<compile_context>
chip_gen: v7x
topology: tpu7x:2x2x1
jax: 0.10.0
libtpu: 0.0.40
codegen_flags: <defaults>
</compile_context>

<pallas_src>
import jax
import jax.numpy as jnp
from jax.experimental import pallas as pl
from jax.experimental.pallas import tpu as pltpu


# ---------------- fused GRU + attention + q/v nets + classifier kernel ----------------
def base_model_kernel(wseq_ref, v_ref,
                      wi_ref, wh_ref, bx_ref, bhn_ref,
                      wv_att_ref, bv_att_ref, wq_att_ref, bq_att_ref, wa_ref,
                      wq_net_ref, bq_net_ref, wv_net_ref, bv_net_ref,
                      wc1_ref, bc1_ref, wc2_ref, bc2_ref,
                      logits_ref, xp_ref, hid_ref):
    # wseq_ref : [TB, T, E] bf16   batch-major word embeddings (this batch tile)
    # v_ref    : [TB, K, D] bf16   object features
    # wi_ref   : [E, 3H] bf16      GRU input weights  (r|z|n concatenated)
    # wh_ref   : [H, 3H] bf16      GRU hidden weights (r|z|n concatenated)
    # bx_ref   : [1, 3H] f32       (bi_r+bh_r | bi_z+bh_z | bi_n)
    # bhn_ref  : [1, H]  f32       bh_n (applied inside r*(...) per the GRU formula)
    # wc2_ref  : [C, ta] bf16      classifier output weight, streamed over grid axis 1
    # logits_ref : [TB, ta] f32
    # xp_ref   : [TB, T, 3H] bf16  scratch: hoisted input-side gate projections
    # hid_ref  : [TB, C] bf16      scratch: classifier hidden, reused across answer tiles
    f32, bf16 = jnp.float32, jnp.bfloat16
    TB, T, E = wseq_ref.shape
    H = wh_ref.shape[0]
    _, K, D = v_ref.shape

    # Everything up to the classifier hidden depends only on the batch tile -> run it once
    # (answer-tile axis j is the innermost, "arbitrary" grid axis; scratch persists over j).
    @pl.when(pl.program_id(1) == 0)
    def _per_batch_tile():
        # ---------------- GRU question encoder ----------------
        # Hoist input-side projections of ALL timesteps into one MXU matmul.
        x_all = wseq_ref[...].reshape(TB * T, E)                        # batch-major rows
        xp = jnp.dot(x_all, wi_ref[...], preferred_element_type=f32) + bx_ref[...]
        xp_ref[...] = xp.reshape(TB, T, 3 * H).astype(bf16)             # bf16 VMEM scratch

        wh = wh_ref[...]        # [H, 3H] stays resident across the unrolled steps
        bhn = bhn_ref[...]      # [1, H]  broadcast hoisted out of the loop
        h = jnp.zeros((TB, H), f32)
        # T is static and small -> full unroll (identical to lax.fori_loop(..., unroll=True));
        # switch to a partially-unrolled fori_loop if the bundle dump shows vreg spills.
        for t in range(T):
            hp = jnp.dot(h.astype(bf16), wh, preferred_element_type=f32)   # [TB, 3H]
            xpt = xp_ref[:, t, :].astype(f32)                              # [TB, 3H]
            r = jax.nn.sigmoid(xpt[:, :H] + hp[:, :H])
            z = jax.nn.sigmoid(xpt[:, H:2 * H] + hp[:, H:2 * H])
            n = jnp.tanh(xpt[:, 2 * H:] + r * (hp[:, 2 * H:] + bhn))
            h = (1.0 - z) * n + z * h
        h_bf = h.astype(bf16)

        # ---------------- attention over objects ----------------
        v_bf = v_ref[...]                                                   # [TB, K, D]
        v_proj = jax.nn.relu(
            jnp.dot(v_bf.reshape(TB * K, D), wv_att_ref[...],
                    preferred_element_type=f32)
            + bv_att_ref[...]).reshape(TB, K, H)                            # [TB, K, H]
        q_proj = jax.nn.relu(
            jnp.dot(h_bf, wq_att_ref[...], preferred_element_type=f32)
            + bq_att_ref[...])                                              # [TB, H]
        # fold the final Linear(H,1) weight into the question side
        # (its bias is dropped: softmax is shift-invariant)
        q_att = q_proj * wa_ref[...]                                        # [TB, H]
        # degenerate unit-M matmul -> VPU multiply + XLU lane-reduce over H
        s = jnp.sum(q_att[:, None, :] * v_proj, axis=-1)                    # [TB, K]
        m = jnp.max(s, axis=-1, keepdims=True)
        e = jnp.exp(s - m)
        att = e * pl.reciprocal(jnp.sum(e, axis=-1, keepdims=True), approx=True)
        # attention-weighted object sum -> VPU multiply + sublane reduce over K
        v_emb = jnp.sum(att[:, :, None] * v_bf.astype(f32), axis=1)         # [TB, D]

        # ---------------- q_net / v_net / classifier hidden ----------------
        q_repr = jax.nn.relu(
            jnp.dot(h_bf, wq_net_ref[...], preferred_element_type=f32)
            + bq_net_ref[...])
        v_repr = jax.nn.relu(
            jnp.dot(v_emb.astype(bf16), wv_net_ref[...],
                    preferred_element_type=f32)
            + bv_net_ref[...])
        joint = (q_repr * v_repr).astype(bf16)                              # [TB, H]
        hid_ref[...] = jax.nn.relu(
            jnp.dot(joint, wc1_ref[...], preferred_element_type=f32)
            + bc1_ref[...]).astype(bf16)                                    # [TB, C]

    # classifier output tile: wc2/bc2 stream over the answer-dim grid axis
    logits_ref[...] = (
        jnp.dot(hid_ref[...], wc2_ref[...], preferred_element_type=f32)
        + bc2_ref[...])


# ----------------------------------- wrapper -----------------------------------
def base_model_forward(v, q, params):
    B, T = q.shape
    K, D = v.shape[1], v.shape[2]
    E = params["w_emb"].shape[-1]
    H = params["wh"].shape[-1]
    C = params["wc1"].shape[-1]
    A = params["wc2"].shape[-1]
    bf16 = jnp.bfloat16

    # ---- GRU parameter prep (cheap JAX glue) ----
    wi_cat = jnp.concatenate([params["wi"][0], params["wi"][1], params["wi"][2]],
                             axis=-1).astype(bf16)                      # [E, 3H]  r|z|n
    wh_cat = jnp.concatenate([params["wh"][0], params["wh"][1], params["wh"][2]],
                             axis=-1).astype(bf16)                      # [H, 3H]
    bi, bh = params["bi"], params["bh"]
    bx = jnp.concatenate([bi[0] + bh[0], bi[1] + bh[1], bi[2]], axis=-1)  # [1, 3H]
    bhn = bh[2]                                                            # [1, H]

    resident_weights = [
        wi_cat, wh_cat, bx, bhn,
        params["wv_att"].astype(bf16), params["bv_att"],
        params["wq_att"].astype(bf16), params["bq_att"],
        params["wa"],
        params["wq_net"].astype(bf16), params["bq_net"],
        params["wv_net"].astype(bf16), params["bv_net"],
        params["wc1"].astype(bf16), params["bc1"],
    ]

    # ---- answer tiling: lane-dense logits, wc2 streamed in ta-wide tiles ----
    A_pad = ((A + 127) // 128) * 128
    ta = min(A_pad, 512)
    A_pad = ((A_pad + ta - 1) // ta) * ta
    wc2 = jnp.pad(params["wc2"], ((0, 0), (0, A_pad - A))).astype(bf16)
    bc2 = jnp.pad(params["bc2"], ((0, 0), (0, A_pad - A)))

    # ---- batch tiling: MXU-filling tile, budgeted against the chip's VMEM ----
    try:
        vmem_cap = int(pltpu.get_tpu_info().vmem_capacity_bytes)
    except Exception:
        vmem_cap = 64 * 1024 * 1024          # conservative: v7x per-TensorCore VMEM

    tb = min(256, max(16, ((B + 15) // 16) * 16))       # multiple of 16 (bf16 sublane pack)
    if B > 16 and pl.cdiv(B, tb) < 2:                   # give the 2nd TensorCore work
        tb = max(16, ((((B + 1) // 2) + 15) // 16) * 16)

    resident_bytes = sum(int(x.size) * x.dtype.itemsize for x in resident_weights)

    def vmem_need(tb_):
        need = resident_bytes                                  # single-buffered weights
        need += 2 * tb_ * (T * E + K * D) * 2                  # dbl-buffered batch inputs (bf16)
        need += 2 * (C * ta * 2 + ta * 4 + tb_ * ta * 4)       # streamed wc2/bc2 + logits blocks
        need += tb_ * (T * 3 * H + C) * 2                      # xp / hid scratch (bf16)
        return need

    while tb > 16 and vmem_need(tb) > int(0.7 * vmem_cap):
        tb = max(16, tb // 2)

    B_pad = pl.cdiv(B, tb) * tb
    grid = (B_pad // tb, A_pad // ta)

    # ---- inputs: zero-pad the batch, gather embeddings batch-major (no transpose) ----
    q_pad = jnp.pad(q, ((0, B_pad - B), (0, 0)))
    v_pad = jnp.pad(v, ((0, B_pad - B), (0, 0), (0, 0))).astype(bf16)
    w_emb = jnp.take(params["w_emb"].astype(bf16), q_pad, axis=0)          # [B_pad, T, E]

    def build_call(weight_pipeline_mode):
        def resident(arr):
            nd = arr.ndim
            kwargs = {}
            if weight_pipeline_mode is not None:
                kwargs["pipeline_mode"] = weight_pipeline_mode
            # constant index_map: fetched once, stays resident across the whole grid
            return pl.BlockSpec(arr.shape, lambda i, j, nd=nd: (0,) * nd, **kwargs)

        in_specs = (
            [pl.BlockSpec((tb, T, E), lambda i, j: (i, 0, 0)),
             pl.BlockSpec((tb, K, D), lambda i, j: (i, 0, 0))]
            + [resident(w) for w in resident_weights]
            + [pl.BlockSpec((C, ta), lambda i, j: (0, j)),       # wc2: streamed over answers
               pl.BlockSpec((1, ta), lambda i, j: (0, j))]       # bc2
        )
        out_spec = pl.BlockSpec((tb, ta), lambda i, j: (i, j))
        return pl.pallas_call(
            base_model_kernel,
            out_shape=jax.ShapeDtypeStruct((B_pad, A_pad), jnp.float32),
            grid_spec=pltpu.PrefetchScalarGridSpec(
                num_scalar_prefetch=0,
                grid=grid,
                in_specs=in_specs,
                out_specs=out_spec,
                scratch_shapes=[pltpu.VMEM((tb, T, 3 * H), bf16),   # xp (bf16: half footprint)
                                pltpu.VMEM((tb, C), bf16)]),        # classifier hidden
            compiler_params=pltpu.CompilerParams(
                dimension_semantics=("parallel", "arbitrary"),      # batch shards across TCs
                vmem_limit_bytes=int(0.9 * vmem_cap)),              # derived from chip capacity
        )

    args = (w_emb, v_pad, *resident_weights, wc2, bc2)
    try:
        logits_pad = build_call(pl.Buffered(1))(*args)   # resident weights single-buffered
    except Exception:
        # TODO(synk): Pallas versions without BlockSpec(pipeline_mode=...) fall back to the
        # default (double-buffered) resident weights.
        logits_pad = build_call(None)(*args)

    return logits_pad[:B, :A]


# --------------------------- pure-JAX f32 reference ---------------------------
def reference_forward(v, q, params):
    w = jnp.take(params["w_emb"], q, axis=0)               # [B, T, E]
    B, T, _ = w.shape
    H = params["wh"].shape[-1]
    wi, wh, bi, bh = params["wi"], params["wh"], params["bi"], params["bh"]
    h = jnp.zeros((B, H), jnp.float32)
    for t in range(T):
        x = w[:, t, :]
        r = jax.nn.sigmoid(x @ wi[0] + bi[0] + h @ wh[0] + bh[0])
        z = jax.nn.sigmoid(x @ wi[1] + bi[1] + h @ wh[1] + bh[1])
        n = jnp.tanh(x @ wi[2] + bi[2] + r * (h @ wh[2] + bh[2]))
        h = (1.0 - z) * n + z * h
    v_proj = jax.nn.relu(v @ params["wv_att"] + params["bv_att"])          # [B, K, H]
    q_proj = jax.nn.relu(h @ params["wq_att"] + params["bq_att"])          # [B, H]
    s = jnp.sum(v_proj * (q_proj * params["wa"])[:, None, :], axis=-1)     # [B, K]
    att = jax.nn.softmax(s, axis=-1)
    v_emb = jnp.sum(att[:, :, None] * v, axis=1)                           # [B, D]
    q_repr = jax.nn.relu(h @ params["wq_net"] + params["bq_net"])
    v_repr = jax.nn.relu(v_emb @ params["wv_net"] + params["bv_net"])
    joint = q_repr * v_repr
    hid = jax.nn.relu(joint @ params["wc1"] + params["bc1"])
    return hid @ params["wc2"] + params["bc2"]


# --------------------------- deterministic parameter init ---------------------------
def init_params(key, vocab, E, H, D, C, A):
    ks = jax.random.split(key, 16)
    s = 0.1
    return {
        "w_emb":  s * jax.random.normal(ks[0],  (vocab, E), jnp.float32),
        "wi":     s * jax.random.normal(ks[1],  (3, E, H), jnp.float32),
        "wh":     s * jax.random.normal(ks[2],  (3, H, H), jnp.float32),
        "bi":     s * jax.random.normal(ks[3],  (3, 1, H), jnp.float32),
        "bh":     s * jax.random.normal(ks[4],  (3, 1, H), jnp.float32),
        "wv_att": s * jax.random.normal(ks[5],  (D, H), jnp.float32),
        "bv_att": s * jax.random.normal(ks[6],  (1, H), jnp.float32),
        "wq_att": s * jax.random.normal(ks[7],  (H, H), jnp.float32),
        "bq_att": s * jax.random.normal(ks[8],  (1, H), jnp.float32),
        "wa":     s * jax.random.normal(ks[9],  (1, H), jnp.float32),
        "wq_net": s * jax.random.normal(ks[10], (H, H), jnp.float32),
        "bq_net": s * jax.random.normal(ks[11], (1, H), jnp.float32),
        "wv_net": s * jax.random.normal(ks[12], (D, H), jnp.float32),
        "bv_net": s * jax.random.normal(ks[13], (1, H), jnp.float32),
        "wc1":    s * jax.random.normal(ks[14], (H, C), jnp.float32),
        "bc1":    jnp.zeros((1, C), jnp.float32),
        "wc2":    s * jax.random.normal(ks[15], (C, A), jnp.float32),
        "bc2":    jnp.zeros((1, A), jnp.float32),
    }


if __name__ == "__main__":
    # small shapes: batch=2, num_objs=8, obj_dim=32, seq=8, emb=32, hidden=32,
    # classifier hidden=64, num_answers=16, vocab=64
    B, K, D, T, E, H, C, A, VOCAB = 2, 8, 32, 8, 32, 32, 64, 16, 64

    key = jax.random.PRNGKey(0)
    kv, kq, kp = jax.random.split(key, 3)
    v = jax.random.normal(kv, (B, K, D), jnp.float32)
    q = jax.random.randint(kq, (B, T), 0, VOCAB, dtype=jnp.int32)
    params = init_params(kp, VOCAB, E, H, D, C, A)

    fwd = jax.jit(base_model_forward)
    logits = jax.block_until_ready(fwd(v, q, params))
    assert logits.shape == (B, A) and logits.dtype == jnp.float32
    assert bool(jnp.all(jnp.isfinite(logits)))

    ref = reference_forward(v, q, params)
    assert bool(jnp.allclose(logits, ref, rtol=2e-2, atol=1e-2))
    print("KERNEL_OK")
</pallas_src>

<mosaic_0001>
module attributes {stable_mosaic.version = 11 : i64} {
  func.func @base_model_kernel(%arg0: i32, %arg1: i32, %arg2: memref<16x8x32xbf16, #tpu.memory_space<vmem>>, %arg3: memref<16x8x32xbf16, #tpu.memory_space<vmem>>, %arg4: memref<32x96xbf16, #tpu.memory_space<vmem>>, %arg5: memref<32x96xbf16, #tpu.memory_space<vmem>>, %arg6: memref<1x96xf32, #tpu.memory_space<vmem>>, %arg7: memref<1x32xf32, #tpu.memory_space<vmem>>, %arg8: memref<32x32xbf16, #tpu.memory_space<vmem>>, %arg9: memref<1x32xf32, #tpu.memory_space<vmem>>, %arg10: memref<32x32xbf16, #tpu.memory_space<vmem>>, %arg11: memref<1x32xf32, #tpu.memory_space<vmem>>, %arg12: memref<1x32xf32, #tpu.memory_space<vmem>>, %arg13: memref<32x32xbf16, #tpu.memory_space<vmem>>, %arg14: memref<1x32xf32, #tpu.memory_space<vmem>>, %arg15: memref<32x32xbf16, #tpu.memory_space<vmem>>, %arg16: memref<1x32xf32, #tpu.memory_space<vmem>>, %arg17: memref<32x64xbf16, #tpu.memory_space<vmem>>, %arg18: memref<1x64xf32, #tpu.memory_space<vmem>>, %arg19: memref<64x128xbf16, #tpu.memory_space<vmem>>, %arg20: memref<1x128xf32, #tpu.memory_space<vmem>>, %arg21: memref<16x128xf32, #tpu.memory_space<vmem>>, %arg22: memref<16x8x96xbf16, #tpu.memory_space<vmem>>, %arg23: memref<16x64xbf16, #tpu.memory_space<vmem>>) attributes {dimension_semantics = [#tpu.dimension_semantics<parallel>, #tpu.dimension_semantics<arbitrary>], iteration_bounds = array<i64: 1, 1>, scalar_prefetch = 0 : i64, scratch_operands = 2 : i64, tpu.core_type = #tpu.core_type<tc>, window_params = [{transform_indices = @transform_0, window_bounds = array<i64: 16, 8, 32>}, {transform_indices = @transform_1, window_bounds = array<i64: 16, 8, 32>}, {pipeline_mode = #tpu.pipeline_mode<synchronous>, transform_indices = @transform_2, window_bounds = array<i64: 32, 96>}, {pipeline_mode = #tpu.pipeline_mode<synchronous>, transform_indices = @transform_3, window_bounds = array<i64: 32, 96>}, {pipeline_mode = #tpu.pipeline_mode<synchronous>, transform_indices = @transform_4, window_bounds = array<i64: 1, 96>}, {pipeline_mode = #tpu.pipeline_mode<synchronous>, transform_indices = @transform_5, window_bounds = array<i64: 1, 32>}, {pipeline_mode = #tpu.pipeline_mode<synchronous>, transform_indices = @transform_6, window_bounds = array<i64: 32, 32>}, {pipeline_mode = #tpu.pipeline_mode<synchronous>, transform_indices = @transform_7, window_bounds = array<i64: 1, 32>}, {pipeline_mode = #tpu.pipeline_mode<synchronous>, transform_indices = @transform_8, window_bounds = array<i64: 32, 32>}, {pipeline_mode = #tpu.pipeline_mode<synchronous>, transform_indices = @transform_9, window_bounds = array<i64: 1, 32>}, {pipeline_mode = #tpu.pipeline_mode<synchronous>, transform_indices = @transform_10, window_bounds = array<i64: 1, 32>}, {pipeline_mode = #tpu.pipeline_mode<synchronous>, transform_indices = @transform_11, window_bounds = array<i64: 32, 32>}, {pipeline_mode = #tpu.pipeline_mode<synchronous>, transform_indices = @transform_12, window_bounds = array<i64: 1, 32>}, {pipeline_mode = #tpu.pipeline_mode<synchronous>, transform_indices = @transform_13, window_bounds = array<i64: 32, 32>}, {pipeline_mode = #tpu.pipeline_mode<synchronous>, transform_indices = @transform_14, window_bounds = array<i64: 1, 32>}, {pipeline_mode = #tpu.pipeline_mode<synchronous>, transform_indices = @transform_15, window_bounds = array<i64: 32, 64>}, {pipeline_mode = #tpu.pipeline_mode<synchronous>, transform_indices = @transform_16, window_bounds = array<i64: 1, 64>}, {transform_indices = @transform_17, window_bounds = array<i64: 64, 128>}, {transform_indices = @transform_18, window_bounds = array<i64: 1, 128>}, {transform_indices = @transform_19, window_bounds = array<i64: 16, 128>}]} {
    %c0_i32 = arith.constant 0 : i32
    %0 = arith.cmpi eq, %arg1, %c0_i32 : i32
    %1 = arith.extui %0 : i1 to i32
    %c0_i32_0 = arith.constant 0 : i32
    %2 = arith.cmpi ne, %1, %c0_i32_0 : i32
    scf.if %2 {
      %c0_8 = arith.constant 0 : index
      %c0_9 = arith.constant 0 : index
      %c0_10 = arith.constant 0 : index
      %10 = vector.load %arg2[%c0_8, %c0_9, %c0_10] : memref<16x8x32xbf16, #tpu.memory_space<vmem>>, vector<16x8x32xbf16>
      %11 = vector.shape_cast %10 : vector<16x8x32xbf16> to vector<128x32xbf16>
      %c0_11 = arith.constant 0 : index
      %c0_12 = arith.constant 0 : index
      %12 = vector.load %arg4[%c0_11, %c0_12] : memref<32x96xbf16, #tpu.memory_space<vmem>>, vector<32x96xbf16>
      %cst_13 = arith.constant dense<0.000000e+00> : vector<128x96xf32>
      %13 = tpu.matmul %11, %12, %cst_13 {dimension_numbers = #tpu.dot_dimension_numbers<[1], [0], [0], [1], [0, 0, 1, 1], [], []>} : vector<128x32xbf16>, vector<32x96xbf16>, vector<128x96xf32> -> vector<128x96xf32>
      %c0_14 = arith.constant 0 : index
      %c0_15 = arith.constant 0 : index
      %14 = vector.load %arg6[%c0_14, %c0_15] : memref<1x96xf32, #tpu.memory_space<vmem>>, vector<1x96xf32>
      %15 = vector.broadcast %14 : vector<1x96xf32> to vector<128x96xf32>
      %16 = arith.addf %13, %15 : vector<128x96xf32>
      %17 = vector.shape_cast %16 : vector<128x96xf32> to vector<16x8x96xf32>
      %18 = arith.truncf %17 : vector<16x8x96xf32> to vector<16x8x96xbf16>
      %c0_16 = arith.constant 0 : index
      %c0_17 = arith.constant 0 : index
      %c0_18 = arith.constant 0 : index
      %19 = vector.load %arg22[%c0_16, %c0_17, %c0_18] : memref<16x8x96xbf16, #tpu.memory_space<vmem>>, vector<16x8x96xbf16>
      tpu.vector_store %arg22[%c0_16, %c0_17, %c0_18], %18 {strides = array<i32>} : memref<16x8x96xbf16, #tpu.memory_space<vmem>>, vector<16x8x96xbf16>,
      %c0_19 = arith.constant 0 : index
      %c0_20 = arith.constant 0 : index
      %20 = vector.load %arg5[%c0_19, %c0_20] : memref<32x96xbf16, #tpu.memory_space<vmem>>, vector<32x96xbf16>
      %c0_21 = arith.constant 0 : index
      %c0_22 = arith.constant 0 : index
      %21 = vector.load %arg7[%c0_21, %c0_22] : memref<1x32xf32, #tpu.memory_space<vmem>>, vector<1x32xf32>
      %cst_23 = arith.constant 0.000000e+00 : f32
      %22 = vector.broadcast %cst_23 : f32 to vector<16x32xf32>
      %23 = arith.truncf %22 : vector<16x32xf32> to vector<16x32xbf16>
      %cst_24 = arith.constant dense<0.000000e+00> : vector<16x96xf32>
      %24 = tpu.matmul %23, %20, %cst_24 {dimension_numbers = #tpu.dot_dimension_numbers<[1], [0], [0], [1], [0, 0, 1, 1], [], []>} : vector<16x32xbf16>, vector<32x96xbf16>, vector<16x96xf32> -> vector<16x96xf32>
      %c0_25 = arith.constant 0 : index
      %c0_26 = arith.constant 0 : index
      %c0_27 = arith.constant 0 : index
      %25 = vector.load %arg22[%c0_25, %c0_26, %c0_27] : memref<16x8x96xbf16, #tpu.memory_space<vmem>>, vector<16x1x96xbf16>
      %26 = vector.shape_cast %25 : vector<16x1x96xbf16> to vector<16x96xbf16>
      %27 = arith.extf %26 : vector<16x96xbf16> to vector<16x96xf32>
      %28 = vector.extract_strided_slice %27 {offsets = [0, 0], sizes = [16, 32], strides = [1, 1]} : vector<16x96xf32> to vector<16x32xf32>
      %29 = vector.extract_strided_slice %24 {offsets = [0, 0], sizes = [16, 32], strides = [1, 1]} : vector<16x96xf32> to vector<16x32xf32>
      %30 = arith.addf %28, %29 : vector<16x32xf32>
      %31 = arith.negf %30 : vector<16x32xf32>
      %32 = math.exp %31 : vector<16x32xf32>
      %cst_28 = arith.constant 1.000000e+00 : f32
      %33 = vector.broadcast %cst_28 : f32 to vector<16x32xf32>
      %34 = arith.addf %33, %32 : vector<16x32xf32>
      %35 = arith.divf %33, %34 : vector<16x32xf32>
      %36 = vector.extract_strided_slice %27 {offsets = [0, 32], sizes = [16, 32], strides = [1, 1]} : vector<16x96xf32> to vector<16x32xf32>
      %37 = vector.extract_strided_slice %24 {offsets = [0, 32], sizes = [16, 32], strides = [1, 1]} : vector<16x96xf32> to vector<16x32xf32>
      %38 = arith.addf %36, %37 : vector<16x32xf32>
      %39 = arith.negf %38 : vector<16x32xf32>
      %40 = math.exp %39 : vector<16x32xf32>
      %cst_29 = arith.constant 1.000000e+00 : f32
      %41 = vector.broadcast %cst_29 : f32 to vector<16x32xf32>
      %42 = arith.addf %41, %40 : vector<16x32xf32>
      %43 = arith.divf %41, %42 : vector<16x32xf32>
      %44 = vector.extract_strided_slice %27 {offsets = [0, 64], sizes = [16, 32], strides = [1, 1]} : vector<16x96xf32> to vector<16x32xf32>
      %45 = vector.extract_strided_slice %24 {offsets = [0, 64], sizes = [16, 32], strides = [1, 1]} : vector<16x96xf32> to vector<16x32xf32>
      %46 = vector.broadcast %21 : vector<1x32xf32> to vector<16x32xf32>
      %47 = arith.addf %45, %46 : vector<16x32xf32>
      %48 = arith.mulf %35, %47 : vector<16x32xf32>
      %49 = arith.addf %44, %48 : vector<16x32xf32>
      %50 = math.tanh %49 : vector<16x32xf32>
      %cst_30 = arith.constant 1.000000e+00 : f32
      %51 = vector.broadcast %cst_30 : f32 to vector<16x32xf32>
      %52 = arith.subf %51, %43 : vector<16x32xf32>
      %53 = arith.mulf %52, %50 : vector<16x32xf32>
      %54 = arith.mulf %43, %22 : vector<16x32xf32>
      %55 = arith.addf %53, %54 : vector<16x32xf32>
      %56 = arith.truncf %55 : vector<16x32xf32> to vector<16x32xbf16>
      %cst_31 = arith.constant dense<0.000000e+00> : vector<16x96xf32>
      %57 = tpu.matmul %56, %20, %cst_31 {dimension_numbers = #tpu.dot_dimension_numbers<[1], [0], [0], [1], [0, 0, 1, 1], [], []>} : vector<16x32xbf16>, vector<32x96xbf16>, vector<16x96xf32> -> vector<16x96xf32>
      %c0_32 = arith.constant 0 : index
      %c1 = arith.constant 1 : index
      %c0_33 = arith.constant 0 : index
      %58 = vector.load %arg22[%c0_32, %c1, %c0_33] : memref<16x8x96xbf16, #tpu.memory_space<vmem>>, vector<16x1x96xbf16>
      %59 = vector.shape_cast %58 : vector<16x1x96xbf16> to vector<16x96xbf16>
      %60 = arith.extf %59 : vector<16x96xbf16> to vector<16x96xf32>
      %61 = vector.extract_strided_slice %60 {offsets = [0, 0], sizes = [16, 32], strides = [1, 1]} : vector<16x96xf32> to vector<16x32xf32>
      %62 = vector.extract_strided_slice %57 {offsets = [0, 0], sizes = [16, 32], strides = [1, 1]} : vector<16x96xf32> to vector<16x32xf32>
      %63 = arith.addf %61, %62 : vector<16x32xf32>
      %64 = arith.negf %63 : vector<16x32xf32>
      %65 = math.exp %64 : vector<16x32xf32>
      %cst_34 = arith.constant 1.000000e+00 : f32
      %66 = vector.broadcast %cst_34 : f32 to vector<16x32xf32>
      %67 = arith.addf %66, %65 : vector<16x32xf32>
      %68 = arith.divf %66, %67 : vector<16x32xf32>
      %69 = vector.extract_strided_slice %60 {offsets = [0, 32], sizes = [16, 32], strides = [1, 1]} : vector<16x96xf32> to vector<16x32xf32>
      %70 = vector.extract_strided_slice %57 {offsets = [0, 32], sizes = [16, 32], strides = [1, 1]} : vector<16x96xf32> to vector<16x32xf32>
      %71 = arith.addf %69, %70 : vector<16x32xf32>
      %72 = arith.negf %71 : vector<16x32xf32>
      %73 = math.exp %72 : vector<16x32xf32>
      %cst_35 = arith.constant 1.000000e+00 : f32
      %74 = vector.broadcast %cst_35 : f32 to vector<16x32xf32>
      %75 = arith.addf %74, %73 : vector<16x32xf32>
      %76 = arith.divf %74, %75 : vector<16x32xf32>
      %77 = vector.extract_strided_slice %60 {offsets = [0, 64], sizes = [16, 32], strides = [1, 1]} : vector<16x96xf32> to vector<16x32xf32>
      %78 = vector.extract_strided_slice %57 {offsets = [0, 64], sizes = [16, 32], strides = [1, 1]} : vector<16x96xf32> to vector<16x32xf32>
      %79 = vector.broadcast %21 : vector<1x32xf32> to vector<16x32xf32>
      %80 = arith.addf %78, %79 : vector<16x32xf32>
      %81 = arith.mulf %68, %80 : vector<16x32xf32>
      %82 = arith.addf %77, %81 : vector<16x32xf32>
      %83 = math.tanh %82 : vector<16x32xf32>
      %cst_36 = arith.constant 1.000000e+00 : f32
      %84 = vector.broadcast %cst_36 : f32 to vector<16x32xf32>
      %85 = arith.subf %84, %76 : vector<16x32xf32>
      %86 = arith.mulf %85, %83 : vector<16x32xf32>
      %87 = arith.mulf %76, %55 : vector<16x32xf32>
      %88 = arith.addf %86, %87 : vector<16x32xf32>
      %89 = arith.truncf %88 : vector<16x32xf32> to vector<16x32xbf16>
      %cst_37 = arith.constant dense<0.000000e+00> : vector<16x96xf32>
      %90 = tpu.matmul %89, %20, %cst_37 {dimension_numbers = #tpu.dot_dimension_numbers<[1], [0], [0], [1], [0, 0, 1, 1], [], []>} : vector<16x32xbf16>, vector<32x96xbf16>, vector<16x96xf32> -> vector<16x96xf32>
      %c0_38 = arith.constant 0 : index
      %c2 = arith.constant 2 : index
      %c0_39 = arith.constant 0 : index
      %91 = vector.load %arg22[%c0_38, %c2, %c0_39] : memref<16x8x96xbf16, #tpu.memory_space<vmem>>, vector<16x1x96xbf16>
      %92 = vector.shape_cast %91 : vector<16x1x96xbf16> to vector<16x96xbf16>
      %93 = arith.extf %92 : vector<16x96xbf16> to vector<16x96xf32>
      %94 = vector.extract_strided_slice %93 {offsets = [0, 0], sizes = [16, 32], strides = [1, 1]} : vector<16x96xf32> to vector<16x32xf32>
      %95 = vector.extract_strided_slice %90 {offsets = [0, 0], sizes = [16, 32], strides = [1, 1]} : vector<16x96xf32> to vector<16x32xf32>
      %96 = arith.addf %94, %95 : vector<16x32xf32>
      %97 = arith.negf %96 : vector<16x32xf32>
      %98 = math.exp %97 : vector<16x32xf32>
      %cst_40 = arith.constant 1.000000e+00 : f32
      %99 = vector.broadcast %cst_40 : f32 to vector<16x32xf32>
      %100 = arith.addf %99, %98 : vector<16x32xf32>
      %101 = arith.divf %99, %100 : vector<16x32xf32>
      %102 = vector.extract_strided_slice %93 {offsets = [0, 32], sizes = [16, 32], strides = [1, 1]} : vector<16x96xf32> to vector<16x32xf32>
      %103 = vector.extract_strided_slice %90 {offsets = [0, 32], sizes = [16, 32], strides = [1, 1]} : vector<16x96xf32> to vector<16x32xf32>
      %104 = arith.addf %102, %103 : vector<16x32xf32>
      %105 = arith.negf %104 : vector<16x32xf32>
      %106 = math.exp %105 : vector<16x32xf32>
      %cst_41 = arith.constant 1.000000e+00 : f32
      %107 = vector.broadcast %cst_41 : f32 to vector<16x32xf32>
      %108 = arith.addf %107, %106 : vector<16x32xf32>
      %109 = arith.divf %107, %108 : vector<16x32xf32>
      %110 = vector.extract_strided_slice %93 {offsets = [0, 64], sizes = [16, 32], strides = [1, 1]} : vector<16x96xf32> to vector<16x32xf32>
      %111 = vector.extract_strided_slice %90 {offsets = [0, 64], sizes = [16, 32], strides = [1, 1]} : vector<16x96xf32> to vector<16x32xf32>
      %112 = vector.broadcast %21 : vector<1x32xf32> to vector<16x32xf32>
      %113 = arith.addf %111, %112 : vector<16x32xf32>
      %114 = arith.mulf %101, %113 : vector<16x32xf32>
      %115 = arith.addf %110, %114 : vector<16x32xf32>
      %116 = math.tanh %115 : vector<16x32xf32>
      %cst_42 = arith.constant 1.000000e+00 : f32
      %117 = vector.broadcast %cst_42 : f32 to vector<16x32xf32>
      %118 = arith.subf %117, %109 : vector<16x32xf32>
      %119 = arith.mulf %118, %116 : vector<16x32xf32>
      %120 = arith.mulf %109, %88 : vector<16x32xf32>
      %121 = arith.addf %119, %120 : vector<16x32xf32>
      %122 = arith.truncf %121 : vector<16x32xf32> to vector<16x32xbf16>
      %cst_43 = arith.constant dense<0.000000e+00> : vector<16x96xf32>
      %123 = tpu.matmul %122, %20, %cst_43 {dimension_numbers = #tpu.dot_dimension_numbers<[1], [0], [0], [1], [0, 0, 1, 1], [], []>} : vector<16x32xbf16>, vector<32x96xbf16>, vector<16x96xf32> -> vector<16x96xf32>
      %c0_44 = arith.constant 0 : index
      %c3 = arith.constant 3 : index
      %c0_45 = arith.constant 0 : index
      %124 = vector.load %arg22[%c0_44, %c3, %c0_45] : memref<16x8x96xbf16, #tpu.memory_space<vmem>>, vector<16x1x96xbf16>
      %125 = vector.shape_cast %124 : vector<16x1x96xbf16> to vector<16x96xbf16>
      %126 = arith.extf %125 : vector<16x96xbf16> to vector<16x96xf32>
      %127 = vector.extract_strided_slice %126 {offsets = [0, 0], sizes = [16, 32], strides = [1, 1]} : vector<16x96xf32> to vector<16x32xf32>
      %128 = vector.extract_strided_slice %123 {offsets = [0, 0], sizes = [16, 32], strides = [1, 1]} : vector<16x96xf32> to vector<16x32xf32>
      %129 = arith.addf %127, %128 : vector<16x32xf32>
      %130 = arith.negf %129 : vector<16x32xf32>
      %131 = math.exp %130 : vector<16x32xf32>
      %cst_46 = arith.constant 1.000000e+00 : f32
      %132 = vector.broadcast %cst_46 : f32 to vector<16x32xf32>
      %133 = arith.addf %132, %131 : vector<16x32xf32>
      %134 = arith.divf %132, %133 : vector<16x32xf32>
      %135 = vector.extract_strided_slice %126 {offsets = [0, 32], sizes = [16, 32], strides = [1, 1]} : vector<16x96xf32> to vector<16x32xf32>
      %136 = vector.extract_strided_slice %123 {offsets = [0, 32], sizes = [16, 32], strides = [1, 1]} : vector<16x96xf32> to vector<16x32xf32>
      %137 = arith.addf %135, %136 : vector<16x32xf32>
      %138 = arith.negf %137 : vector<16x32xf32>
      %139 = math.exp %138 : vector<16x32xf32>
      %cst_47 = arith.constant 1.000000e+00 : f32
      %140 = vector.broadcast %cst_47 : f32 to vector<16x32xf32>
      %141 = arith.addf %140, %139 : vector<16x32xf32>
      %142 = arith.divf %140, %141 : vector<16x32xf32>
      %143 = vector.extract_strided_slice %126 {offsets = [0, 64], sizes = [16, 32], strides = [1, 1]} : vector<16x96xf32> to vector<16x32xf32>
      %144 = vector.extract_strided_slice %123 {offsets = [0, 64], sizes = [16, 32], strides = [1, 1]} : vector<16x96xf32> to vector<16x32xf32>
      %145 = vector.broadcast %21 : vector<1x32xf32> to vector<16x32xf32>
      %146 = arith.addf %144, %145 : vector<16x32xf32>
      %147 = arith.mulf %134, %146 : vector<16x32xf32>
      %148 = arith.addf %143, %147 : vector<16x32xf32>
      %149 = math.tanh %148 : vector<16x32xf32>
      %cst_48 = arith.constant 1.000000e+00 : f32
      %150 = vector.broadcast %cst_48 : f32 to vector<16x32xf32>
      %151 = arith.subf %150, %142 : vector<16x32xf32>
      %152 = arith.mulf %151, %149 : vector<16x32xf32>
      %153 = arith.mulf %142, %121 : vector<16x32xf32>
      %154 = arith.addf %152, %153 : vector<16x32xf32>
      %155 = arith.truncf %154 : vector<16x32xf32> to vector<16x32xbf16>
      %cst_49 = arith.constant dense<0.000000e+00> : vector<16x96xf32>
      %156 = tpu.matmul %155, %20, %cst_49 {dimension_numbers = #tpu.dot_dimension_numbers<[1], [0], [0], [1], [0, 0, 1, 1], [], []>} : vector<16x32xbf16>, vector<32x96xbf16>, vector<16x96xf32> -> vector<16x96xf32>
      %c0_50 = arith.constant 0 : index
      %c4 = arith.constant 4 : index
      %c0_51 = arith.constant 0 : index
      %157 = vector.load %arg22[%c0_50, %c4, %c0_51] : memref<16x8x96xbf16, #tpu.memory_space<vmem>>, vector<16x1x96xbf16>
      %158 = vector.shape_cast %157 : vector<16x1x96xbf16> to vector<16x96xbf16>
      %159 = arith.extf %158 : vector<16x96xbf16> to vector<16x96xf32>
      %160 = vector.extract_strided_slice %159 {offsets = [0, 0], sizes = [16, 32], strides = [1, 1]} : vector<16x96xf32> to vector<16x32xf32>
      %161 = vector.extract_strided_slice %156 {offsets = [0, 0], sizes = [16, 32], strides = [1, 1]} : vector<16x96xf32> to vector<16x32xf32>
      %162 = arith.addf %160, %161 : vector<16x32xf32>
      %163 = arith.negf %162 : vector<16x32xf32>
      %164 = math.exp %163 : vector<16x32xf32>
      %cst_52 = arith.constant 1.000000e+00 : f32
      %165 = vector.broadcast %cst_52 : f32 to vector<16x32xf32>
      %166 = arith.addf %165, %164 : vector<16x32xf32>
      %167 = arith.divf %165, %166 : vector<16x32xf32>
      %168 = vector.extract_strided_slice %159 {offsets = [0, 32], sizes = [16, 32], strides = [1, 1]} : vector<16x96xf32> to vector<16x32xf32>
      %169 = vector.extract_strided_slice %156 {offsets = [0, 32], sizes = [16, 32], strides = [1, 1]} : vector<16x96xf32> to vector<16x32xf32>
      %170 = arith.addf %168, %169 : vector<16x32xf32>
      %171 = arith.negf %170 : vector<16x32xf32>
      %172 = math.exp %171 : vector<16x32xf32>
      %cst_53 = arith.constant 1.000000e+00 : f32
      %173 = vector.broadcast %cst_53 : f32 to vector<16x32xf32>
      %174 = arith.addf %173, %172 : vector<16x32xf32>
      %175 = arith.divf %173, %174 : vector<16x32xf32>
      %176 = vector.extract_strided_slice %159 {offsets = [0, 64], sizes = [16, 32], strides = [1, 1]} : vector<16x96xf32> to vector<16x32xf32>
      %177 = vector.extract_strided_slice %156 {offsets = [0, 64], sizes = [16, 32], strides = [1, 1]} : vector<16x96xf32> to vector<16x32xf32>
      %178 = vector.broadcast %21 : vector<1x32xf32> to vector<16x32xf32>
      %179 = arith.addf %177, %178 : vector<16x32xf32>
      %180 = arith.mulf %167, %179 : vector<16x32xf32>
      %181 = arith.addf %176, %180 : vector<16x32xf32>
      %182 = math.tanh %181 : vector<16x32xf32>
      %cst_54 = arith.constant 1.000000e+00 : f32
      %183 = vector.broadcast %cst_54 : f32 to vector<16x32xf32>
      %184 = arith.subf %183, %175 : vector<16x32xf32>
      %185 = arith.mulf %184, %182 : vector<16x32xf32>
      %186 = arith.mulf %175, %154 : vector<16x32xf32>
      %187 = arith.addf %185, %186 : vector<16x32xf32>
      %188 = arith.truncf %187 : vector<16x32xf32> to vector<16x32xbf16>
      %cst_55 = arith.constant dense<0.000000e+00> : vector<16x96xf32>
      %189 = tpu.matmul %188, %20, %cst_55 {dimension_numbers = #tpu.dot_dimension_numbers<[1], [0], [0], [1], [0, 0, 1, 1], [], []>} : vector<16x32xbf16>, vector<32x96xbf16>, vector<16x96xf32> -> vector<16x96xf32>
      %c0_56 = arith.constant 0 : index
      %c5 = arith.constant 5 : index
      %c0_57 = arith.constant 0 : index
      %190 = vector.load %arg22[%c0_56, %c5, %c0_57] : memref<16x8x96xbf16, #tpu.memory_space<vmem>>, vector<16x1x96xbf16>
      %191 = vector.shape_cast %190 : vector<16x1x96xbf16> to vector<16x96xbf16>
      %192 = arith.extf %191 : vector<16x96xbf16> to vector<16x96xf32>
      %193 = vector.extract_strided_slice %192 {offsets = [0, 0], sizes = [16, 32], strides = [1, 1]} : vector<16x96xf32> to vector<16x32xf32>
      %194 = vector.extract_strided_slice %189 {offsets = [0, 0], sizes = [16, 32], strides = [1, 1]} : vector<16x96xf32> to vector<16x32xf32>
      %195 = arith.addf %193, %194 : vector<16x32xf32>
      %196 = arith.negf %195 : vector<16x32xf32>
      %197 = math.exp %196 : vector<16x32xf32>
      %cst_58 = arith.constant 1.000000e+00 : f32
      %198 = vector.broadcast %cst_58 : f32 to vector<16x32xf32>
      %199 = arith.addf %198, %197 : vector<16x32xf32>
      %200 = arith.divf %198, %199 : vector<16x32xf32>
      %201 = vector.extract_strided_slice %192 {offsets = [0, 32], sizes = [16, 32], strides = [1, 1]} : vector<16x96xf32> to vector<16x32xf32>
      %202 = vector.extract_strided_slice %189 {offsets = [0, 32], sizes = [16, 32], strides = [1, 1]} : vector<16x96xf32> to vector<16x32xf32>
      %203 = arith.addf %201, %202 : vector<16x32xf32>
      %204 = arith.negf %203 : vector<16x32xf32>
      %205 = math.exp %204 : vector<16x32xf32>
      %cst_59 = arith.constant 1.000000e+00 : f32
      %206 = vector.broadcast %cst_59 : f32 to vector<16x32xf32>
      %207 = arith.addf %206, %205 : vector<16x32xf32>
      %208 = arith.divf %206, %207 : vector<16x32xf32>
      %209 = vector.extract_strided_slice %192 {offsets = [0, 64], sizes = [16, 32], strides = [1, 1]} : vector<16x96xf32> to vector<16x32xf32>
      %210 = vector.extract_strided_slice %189 {offsets = [0, 64], sizes = [16, 32], strides = [1, 1]} : vector<16x96xf32> to vector<16x32xf32>
      %211 = vector.broadcast %21 : vector<1x32xf32> to vector<16x32xf32>
      %212 = arith.addf %210, %211 : vector<16x32xf32>
      %213 = arith.mulf %200, %212 : vector<16x32xf32>
      %214 = arith.addf %209, %213 : vector<16x32xf32>
      %215 = math.tanh %214 : vector<16x32xf32>
      %cst_60 = arith.constant 1.000000e+00 : f32
      %216 = vector.broadcast %cst_60 : f32 to vector<16x32xf32>
      %217 = arith.subf %216, %208 : vector<16x32xf32>
      %218 = arith.mulf %217, %215 : vector<16x32xf32>
      %219 = arith.mulf %208, %187 : vector<16x32xf32>
      %220 = arith.addf %218, %219 : vector<16x32xf32>
      %221 = arith.truncf %220 : vector<16x32xf32> to vector<16x32xbf16>
      %cst_61 = arith.constant dense<0.000000e+00> : vector<16x96xf32>
      %222 = tpu.matmul %221, %20, %cst_61 {dimension_numbers = #tpu.dot_dimension_numbers<[1], [0], [0], [1], [0, 0, 1, 1], [], []>} : vector<16x32xbf16>, vector<32x96xbf16>, vector<16x96xf32> -> vector<16x96xf32>
      %c0_62 = arith.constant 0 : index
      %c6 = arith.constant 6 : index
      %c0_63 = arith.constant 0 : index
      %223 = vector.load %arg22[%c0_62, %c6, %c0_63] : memref<16x8x96xbf16, #tpu.memory_space<vmem>>, vector<16x1x96xbf16>
      %224 = vector.shape_cast %223 : vector<16x1x96xbf16> to vector<16x96xbf16>
      %225 = arith.extf %224 : vector<16x96xbf16> to vector<16x96xf32>
      %226 = vector.extract_strided_slice %225 {offsets = [0, 0], sizes = [16, 32], strides = [1, 1]} : vector<16x96xf32> to vector<16x32xf32>
      %227 = vector.extract_strided_slice %222 {offsets = [0, 0], sizes = [16, 32], strides = [1, 1]} : vector<16x96xf32> to vector<16x32xf32>
      %228 = arith.addf %226, %227 : vector<16x32xf32>
      %229 = arith.negf %228 : vector<16x32xf32>
      %230 = math.exp %229 : vector<16x32xf32>
      %cst_64 = arith.constant 1.000000e+00 : f32
      %231 = vector.broadcast %cst_64 : f32 to vector<16x32xf32>
      %232 = arith.addf %231, %230 : vector<16x32xf32>
      %233 = arith.divf %231, %232 : vector<16x32xf32>
      %234 = vector.extract_strided_slice %225 {offsets = [0, 32], sizes = [16, 32], strides = [1, 1]} : vector<16x96xf32> to vector<16x32xf32>
      %235 = vector.extract_strided_slice %222 {offsets = [0, 32], sizes = [16, 32], strides = [1, 1]} : vector<16x96xf32> to vector<16x32xf32>
      %236 = arith.addf %234, %235 : vector<16x32xf32>
      %237 = arith.negf %236 : vector<16x32xf32>
      %238 = math.exp %237 : vector<16x32xf32>
      %cst_65 = arith.constant 1.000000e+00 : f32
      %239 = vector.broadcast %cst_65 : f32 to vector<16x32xf32>
      %240 = arith.addf %239, %238 : vector<16x32xf32>
      %241 = arith.divf %239, %240 : vector<16x32xf32>
      %242 = vector.extract_strided_slice %225 {offsets = [0, 64], sizes = [16, 32], strides = [1, 1]} : vector<16x96xf32> to vector<16x32xf32>
      %243 = vector.extract_strided_slice %222 {offsets = [0, 64], sizes = [16, 32], strides = [1, 1]} : vector<16x96xf32> to vector<16x32xf32>
      %244 = vector.broadcast %21 : vector<1x32xf32> to vector<16x32xf32>
      %245 = arith.addf %243, %244 : vector<16x32xf32>
      %246 = arith.mulf %233, %245 : vector<16x32xf32>
      %247 = arith.addf %242, %246 : vector<16x32xf32>
      %248 = math.tanh %247 : vector<16x32xf32>
      %cst_66 = arith.constant 1.000000e+00 : f32
      %249 = vector.broadcast %cst_66 : f32 to vector<16x32xf32>
      %250 = arith.subf %249, %241 : vector<16x32xf32>
      %251 = arith.mulf %250, %248 : vector<16x32xf32>
      %252 = arith.mulf %241, %220 : vector<16x32xf32>
      %253 = arith.addf %251, %252 : vector<16x32xf32>
      %254 = arith.truncf %253 : vector<16x32xf32> to vector<16x32xbf16>
      %cst_67 = arith.constant dense<0.000000e+00> : vector<16x96xf32>
      %255 = tpu.matmul %254, %20, %cst_67 {dimension_numbers = #tpu.dot_dimension_numbers<[1], [0], [0], [1], [0, 0, 1, 1], [], []>} : vector<16x32xbf16>, vector<32x96xbf16>, vector<16x96xf32> -> vector<16x96xf32>
      %c0_68 = arith.constant 0 : index
      %c7 = arith.constant 7 : index
      %c0_69 = arith.constant 0 : index
      %256 = vector.load %arg22[%c0_68, %c7, %c0_69] : memref<16x8x96xbf16, #tpu.memory_space<vmem>>, vector<16x1x96xbf16>
      %257 = vector.shape_cast %256 : vector<16x1x96xbf16> to vector<16x96xbf16>
      %258 = arith.extf %257 : vector<16x96xbf16> to vector<16x96xf32>
      %259 = vector.extract_strided_slice %258 {offsets = [0, 0], sizes = [16, 32], strides = [1, 1]} : vector<16x96xf32> to vector<16x32xf32>
      %260 = vector.extract_strided_slice %255 {offsets = [0, 0], sizes = [16, 32], strides = [1, 1]} : vector<16x96xf32> to vector<16x32xf32>
      %261 = arith.addf %259, %260 : vector<16x32xf32>
      %262 = arith.negf %261 : vector<16x32xf32>
      %263 = math.exp %262 : vector<16x32xf32>
      %cst_70 = arith.constant 1.000000e+00 : f32
      %264 = vector.broadcast %cst_70 : f32 to vector<16x32xf32>
      %265 = arith.addf %264, %263 : vector<16x32xf32>
      %266 = arith.divf %264, %265 : vector<16x32xf32>
      %267 = vector.extract_strided_slice %258 {offsets = [0, 32], sizes = [16, 32], strides = [1, 1]} : vector<16x96xf32> to vector<16x32xf32>
      %268 = vector.extract_strided_slice %255 {offsets = [0, 32], sizes = [16, 32], strides = [1, 1]} : vector<16x96xf32> to vector<16x32xf32>
      %269 = arith.addf %267, %268 : vector<16x32xf32>
      %270 = arith.negf %269 : vector<16x32xf32>
      %271 = math.exp %270 : vector<16x32xf32>
      %cst_71 = arith.constant 1.000000e+00 : f32
      %272 = vector.broadcast %cst_71 : f32 to vector<16x32xf32>
      %273 = arith.addf %272, %271 : vector<16x32xf32>
      %274 = arith.divf %272, %273 : vector<16x32xf32>
      %275 = vector.extract_strided_slice %258 {offsets = [0, 64], sizes = [16, 32], strides = [1, 1]} : vector<16x96xf32> to vector<16x32xf32>
      %276 = vector.extract_strided_slice %255 {offsets = [0, 64], sizes = [16, 32], strides = [1, 1]} : vector<16x96xf32> to vector<16x32xf32>
      %277 = vector.broadcast %21 : vector<1x32xf32> to vector<16x32xf32>
      %278 = arith.addf %276, %277 : vector<16x32xf32>
      %279 = arith.mulf %266, %278 : vector<16x32xf32>
      %280 = arith.addf %275, %279 : vector<16x32xf32>
      %281 = math.tanh %280 : vector<16x32xf32>
      %cst_72 = arith.constant 1.000000e+00 : f32
      %282 = vector.broadcast %cst_72 : f32 to vector<16x32xf32>
      %283 = arith.subf %282, %274 : vector<16x32xf32>
      %284 = arith.mulf %283, %281 : vector<16x32xf32>
      %285 = arith.mulf %274, %253 : vector<16x32xf32>
      %286 = arith.addf %284, %285 : vector<16x32xf32>
      %287 = arith.truncf %286 : vector<16x32xf32> to vector<16x32xbf16>
      %c0_73 = arith.constant 0 : index
      %c0_74 = arith.constant 0 : index
      %c0_75 = arith.constant 0 : index
      %288 = vector.load %arg3[%c0_73, %c0_74, %c0_75] : memref<16x8x32xbf16, #tpu.memory_space<vmem>>, vector<16x8x32xbf16>
      %289 = vector.shape_cast %288 : vector<16x8x32xbf16> to vector<128x32xbf16>
      %c0_76 = arith.constant 0 : index
      %c0_77 = arith.constant 0 : index
      %290 = vector.load %arg8[%c0_76, %c0_77] : memref<32x32xbf16, #tpu.memory_space<vmem>>, vector<32x32xbf16>
      %cst_78 = arith.constant dense<0.000000e+00> : vector<128x32xf32>
      %291 = tpu.matmul %289, %290, %cst_78 {dimension_numbers = #tpu.dot_dimension_numbers<[1], [0], [0], [1], [0, 0, 1, 1], [], []>} : vector<128x32xbf16>, vector<32x32xbf16>, vector<128x32xf32> -> vector<128x32xf32>
      %c0_79 = arith.constant 0 : index
      %c0_80 = arith.constant 0 : index
      %292 = vector.load %arg9[%c0_79, %c0_80] : memref<1x32xf32, #tpu.memory_space<vmem>>, vector<1x32xf32>
      %293 = vector.broadcast %292 : vector<1x32xf32> to vector<128x32xf32>
      %294 = arith.addf %291, %293 : vector<128x32xf32>
      %cst_81 = arith.constant 0.000000e+00 : f32
      %295 = vector.broadcast %cst_81 : f32 to vector<128x32xf32>
      %296 = arith.maximumf %294, %295 : vector<128x32xf32>
      %297 = vector.shape_cast %296 : vector<128x32xf32> to vector<16x8x32xf32>
      %c0_82 = arith.constant 0 : index
      %c0_83 = arith.constant 0 : index
      %298 = vector.load %arg10[%c0_82, %c0_83] : memref<32x32xbf16, #tpu.memory_space<vmem>>, vector<32x32xbf16>
      %cst_84 = arith.constant dense<0.000000e+00> : vector<16x32xf32>
      %299 = tpu.matmul %287, %298, %cst_84 {dimension_numbers = #tpu.dot_dimension_numbers<[1], [0], [0], [1], [0, 0, 1, 1], [], []>} : vector<16x32xbf16>, vector<32x32xbf16>, vector<16x32xf32> -> vector<16x32xf32>
      %c0_85 = arith.constant 0 : index
      %c0_86 = arith.constant 0 : index
      %300 = vector.load %arg11[%c0_85, %c0_86] : memref<1x32xf32, #tpu.memory_space<vmem>>, vector<1x32xf32>
      %301 = vector.broadcast %300 : vector<1x32xf32> to vector<16x32xf32>
      %302 = arith.addf %299, %301 : vector<16x32xf32>
      %cst_87 = arith.constant 0.000000e+00 : f32
      %303 = vector.broadcast %cst_87 : f32 to vector<16x32xf32>
      %304 = arith.maximumf %302, %303 : vector<16x32xf32>
      %c0_88 = arith.constant 0 : index
      %c0_89 = arith.constant 0 : index
      %305 = vector.load %arg12[%c0_88, %c0_89] : memref<1x32xf32, #tpu.memory_space<vmem>>, vector<1x32xf32>
      %306 = vector.broadcast %305 : vector<1x32xf32> to vector<16x32xf32>
      %307 = arith.mulf %304, %306 : vector<16x32xf32>
      %308 = vector.shape_cast %307 : vector<16x32xf32> to vector<16x1x32xf32>
      %309 = vector.broadcast %308 : vector<16x1x32xf32> to vector<16x8x32xf32>
      %310 = arith.mulf %309, %297 : vector<16x8x32xf32>
      %cst_90 = arith.constant dense<0.000000e+00> : vector<16x8xf32>
      %311 = vector.multi_reduction <add>, %310, %cst_90 [2] : vector<16x8x32xf32> to vector<16x8xf32>
      %cst_91 = arith.constant dense<0xFF800000> : vector<16xf32>
      %312 = vector.multi_reduction <maximumf>, %311, %cst_91 [1] : vector<16x8xf32> to vector<16xf32>
      %313 = vector.shape_cast %312 : vector<16xf32> to vector<16x1xf32>
      %314 = vector.broadcast %313 : vector<16x1xf32> to vector<16x8xf32>
      %315 = arith.subf %311, %314 : vector<16x8xf32>
      %316 = math.exp %315 : vector<16x8xf32>
      %cst_92 = arith.constant dense<0.000000e+00> : vector<16xf32>
      %317 = vector.multi_reduction <add>, %316, %cst_92 [1] : vector<16x8xf32> to vector<16xf32>
      %318 = vector.shape_cast %317 : vector<16xf32> to vector<16x1xf32>
      %319 = tpu.reciprocal %318 {approx = true} : vector<16x1xf32> -> vector<16x1xf32>
      %320 = vector.broadcast %319 : vector<16x1xf32> to vector<16x8xf32>
      %321 = arith.mulf %316, %320 : vector<16x8xf32>
      %322 = vector.shape_cast %321 : vector<16x8xf32> to vector<16x8x1xf32>
      %323 = arith.extf %288 : vector<16x8x32xbf16> to vector<16x8x32xf32>
      %324 = vector.broadcast %322 : vector<16x8x1xf32> to vector<16x8x32xf32>
      %325 = arith.mulf %324, %323 : vector<16x8x32xf32>
      %cst_93 = arith.constant dense<0.000000e+00> : vector<16x32xf32>
      %326 = vector.multi_reduction <add>, %325, %cst_93 [1] : vector<16x8x32xf32> to vector<16x32xf32>
      %c0_94 = arith.constant 0 : index
      %c0_95 = arith.constant 0 : index
      %327 = vector.load %arg13[%c0_94, %c0_95] : memref<32x32xbf16, #tpu.memory_space<vmem>>, vector<32x32xbf16>
      %cst_96 = arith.constant dense<0.000000e+00> : vector<16x32xf32>
      %328 = tpu.matmul %287, %327, %cst_96 {dimension_numbers = #tpu.dot_dimension_numbers<[1], [0], [0], [1], [0, 0, 1, 1], [], []>} : vector<16x32xbf16>, vector<32x32xbf16>, vector<16x32xf32> -> vector<16x32xf32>
      %c0_97 = arith.constant 0 : index
      %c0_98 = arith.constant 0 : index
      %329 = vector.load %arg14[%c0_97, %c0_98] : memref<1x32xf32, #tpu.memory_space<vmem>>, vector<1x32xf32>
      %330 = vector.broadcast %329 : vector<1x32xf32> to vector<16x32xf32>
      %331 = arith.addf %328, %330 : vector<16x32xf32>
      %cst_99 = arith.constant 0.000000e+00 : f32
      %332 = vector.broadcast %cst_99 : f32 to vector<16x32xf32>
      %333 = arith.maximumf %331, %332 : vector<16x32xf32>
      %334 = arith.truncf %326 : vector<16x32xf32> to vector<16x32xbf16>
      %c0_100 = arith.constant 0 : index
      %c0_101 = arith.constant 0 : index
      %335 = vector.load %arg15[%c0_100, %c0_101] : memref<32x32xbf16, #tpu.memory_space<vmem>>, vector<32x32xbf16>
      %cst_102 = arith.constant dense<0.000000e+00> : vector<16x32xf32>
      %336 = tpu.matmul %334, %335, %cst_102 {dimension_numbers = #tpu.dot_dimension_numbers<[1], [0], [0], [1], [0, 0, 1, 1], [], []>} : vector<16x32xbf16>, vector<32x32xbf16>, vector<16x32xf32> -> vector<16x32xf32>
      %c0_103 = arith.constant 0 : index
      %c0_104 = arith.constant 0 : index
      %337 = vector.load %arg16[%c0_103, %c0_104] : memref<1x32xf32, #tpu.memory_space<vmem>>, vector<1x32xf32>
      %338 = vector.broadcast %337 : vector<1x32xf32> to vector<16x32xf32>
      %339 = arith.addf %336, %338 : vector<16x32xf32>
      %cst_105 = arith.constant 0.000000e+00 : f32
      %340 = vector.broadcast %cst_105 : f32 to vector<16x32xf32>
      %341 = arith.maximumf %339, %340 : vector<16x32xf32>
      %342 = arith.mulf %333, %341 : vector<16x32xf32>
      %343 = arith.truncf %342 : vector<16x32xf32> to vector<16x32xbf16>
      %c0_106 = arith.constant 0 : index
      %c0_107 = arith.constant 0 : index
      %344 = vector.load %arg17[%c0_106, %c0_107] : memref<32x64xbf16, #tpu.memory_space<vmem>>, vector<32x64xbf16>
      %cst_108 = arith.constant dense<0.000000e+00> : vector<16x64xf32>
      %345 = tpu.matmul %343, %344, %cst_108 {dimension_numbers = #tpu.dot_dimension_numbers<[1], [0], [0], [1], [0, 0, 1, 1], [], []>} : vector<16x32xbf16>, vector<32x64xbf16>, vector<16x64xf32> -> vector<16x64xf32>
      %c0_109 = arith.constant 0 : index
      %c0_110 = arith.constant 0 : index
      %346 = vector.load %arg18[%c0_109, %c0_110] : memref<1x64xf32, #tpu.memory_space<vmem>>, vector<1x64xf32>
      %347 = vector.broadcast %346 : vector<1x64xf32> to vector<16x64xf32>
      %348 = arith.addf %345, %347 : vector<16x64xf32>
      %cst_111 = arith.constant 0.000000e+00 : f32
      %349 = vector.broadcast %cst_111 : f32 to vector<16x64xf32>
      %350 = arith.maximumf %348, %349 : vector<16x64xf32>
      %351 = arith.truncf %350 : vector<16x64xf32> to vector<16x64xbf16>
      %c0_112 = arith.constant 0 : index
      %c0_113 = arith.constant 0 : index
      %352 = vector.load %arg23[%c0_112, %c0_113] : memref<16x64xbf16, #tpu.memory_space<vmem>>, vector<16x64xbf16>
      tpu.vector_store %arg23[%c0_112, %c0_113], %351 {strides = array<i32>} : memref<16x64xbf16, #tpu.memory_space<vmem>>, vector<16x64xbf16>,
    } else {
    }
    %c0 = arith.constant 0 : index
    %c0_1 = arith.constant 0 : index
    %3 = vector.load %arg23[%c0, %c0_1] : memref<16x64xbf16, #tpu.memory_space<vmem>>, vector<16x64xbf16>
    %c0_2 = arith.constant 0 : index
    %c0_3 = arith.constant 0 : index
    %4 = vector.load %arg19[%c0_2, %c0_3] : memref<64x128xbf16, #tpu.memory_space<vmem>>, vector<64x128xbf16>
    %cst = arith.constant dense<0.000000e+00> : vector<16x128xf32>
    %5 = tpu.matmul %3, %4, %cst {dimension_numbers = #tpu.dot_dimension_numbers<[1], [0], [0], [1], [0, 0, 1, 1], [], []>} : vector<16x64xbf16>, vector<64x128xbf16>, vector<16x128xf32> -> vector<16x128xf32>
    %c0_4 = arith.constant 0 : index
    %c0_5 = arith.constant 0 : index
    %6 = vector.load %arg20[%c0_4, %c0_5] : memref<1x128xf32, #tpu.memory_space<vmem>>, vector<1x128xf32>
    %7 = vector.broadcast %6 : vector<1x128xf32> to vector<16x128xf32>
    %8 = arith.addf %5, %7 : vector<16x128xf32>
    %c0_6 = arith.constant 0 : index
    %c0_7 = arith.constant 0 : index
    %9 = vector.load %arg21[%c0_6, %c0_7] : memref<16x128xf32, #tpu.memory_space<vmem>>, vector<16x128xf32>
    tpu.vector_store %arg21[%c0_6, %c0_7], %8 {strides = array<i32>} : memref<16x128xf32, #tpu.memory_space<vmem>>, vector<16x128xf32>,
    return
  }
  func.func @transform_0(%arg0: i32, %arg1: i32) -> (i32, i32, i32) {
    %c0_i32 = arith.constant 0 : i32
    %c0_i32_0 = arith.constant 0 : i32
    %c0_i32_1 = arith.constant 0 : i32
    return %arg0, %c0_i32, %c0_i32_0 : i32, i32, i32
  }
  func.func @transform_1(%arg0: i32, %arg1: i32) -> (i32, i32, i32) {
    %c0_i32 = arith.constant 0 : i32
    %c0_i32_0 = arith.constant 0 : i32
    %c0_i32_1 = arith.constant 0 : i32
    return %arg0, %c0_i32, %c0_i32_0 : i32, i32, i32
  }
  func.func @transform_2(%arg0: i32, %arg1: i32) -> (i32, i32) {
    %c0_i32 = arith.constant 0 : i32
    %c0_i32_0 = arith.constant 0 : i32
    %c0_i32_1 = arith.constant 0 : i32
    return %c0_i32, %c0_i32_0 : i32, i32
  }
  func.func @transform_3(%arg0: i32, %arg1: i32) -> (i32, i32) {
    %c0_i32 = arith.constant 0 : i32
    %c0_i32_0 = arith.constant 0 : i32
    %c0_i32_1 = arith.constant 0 : i32
    return %c0_i32, %c0_i32_0 : i32, i32
  }
  func.func @transform_4(%arg0: i32, %arg1: i32) -> (i32, i32) {
    %c0_i32 = arith.constant 0 : i32
    %c0_i32_0 = arith.constant 0 : i32
    %c0_i32_1 = arith.constant 0 : i32
    return %c0_i32, %c0_i32_0 : i32, i32
  }
  func.func @transform_5(%arg0: i32, %arg1: i32) -> (i32, i32) {
    %c0_i32 = arith.constant 0 : i32
    %c0_i32_0 = arith.constant 0 : i32
    %c0_i32_1 = arith.constant 0 : i32
    return %c0_i32, %c0_i32_0 : i32, i32
  }
  func.func @transform_6(%arg0: i32, %arg1: i32) -> (i32, i32) {
    %c0_i32 = arith.constant 0 : i32
    %c0_i32_0 = arith.constant 0 : i32
    %c0_i32_1 = arith.constant 0 : i32
    return %c0_i32, %c0_i32_0 : i32, i32
  }
  func.func @transform_7(%arg0: i32, %arg1: i32) -> (i32, i32) {
    %c0_i32 = arith.constant 0 : i32
    %c0_i32_0 = arith.constant 0 : i32
    %c0_i32_1 = arith.constant 0 : i32
    return %c0_i32, %c0_i32_0 : i32, i32
  }
  func.func @transform_8(%arg0: i32, %arg1: i32) -> (i32, i32) {
    %c0_i32 = arith.constant 0 : i32
    %c0_i32_0 = arith.constant 0 : i32
    %c0_i32_1 = arith.constant 0 : i32
    return %c0_i32, %c0_i32_0 : i32, i32
  }
  func.func @transform_9(%arg0: i32, %arg1: i32) -> (i32, i32) {
    %c0_i32 = arith.constant 0 : i32
    %c0_i32_0 = arith.constant 0 : i32
    %c0_i32_1 = arith.constant 0 : i32
    return %c0_i32, %c0_i32_0 : i32, i32
  }
  func.func @transform_10(%arg0: i32, %arg1: i32) -> (i32, i32) {
    %c0_i32 = arith.constant 0 : i32
    %c0_i32_0 = arith.constant 0 : i32
    %c0_i32_1 = arith.constant 0 : i32
    return %c0_i32, %c0_i32_0 : i32, i32
  }
  func.func @transform_11(%arg0: i32, %arg1: i32) -> (i32, i32) {
    %c0_i32 = arith.constant 0 : i32
    %c0_i32_0 = arith.constant 0 : i32
    %c0_i32_1 = arith.constant 0 : i32
    return %c0_i32, %c0_i32_0 : i32, i32
  }
  func.func @transform_12(%arg0: i32, %arg1: i32) -> (i32, i32) {
    %c0_i32 = arith.constant 0 : i32
    %c0_i32_0 = arith.constant 0 : i32
    %c0_i32_1 = arith.constant 0 : i32
    return %c0_i32, %c0_i32_0 : i32, i32
  }
  func.func @transform_13(%arg0: i32, %arg1: i32) -> (i32, i32) {
    %c0_i32 = arith.constant 0 : i32
    %c0_i32_0 = arith.constant 0 : i32
    %c0_i32_1 = arith.constant 0 : i32
    return %c0_i32, %c0_i32_0 : i32, i32
  }
  func.func @transform_14(%arg0: i32, %arg1: i32) -> (i32, i32) {
    %c0_i32 = arith.constant 0 : i32
    %c0_i32_0 = arith.constant 0 : i32
    %c0_i32_1 = arith.constant 0 : i32
    return %c0_i32, %c0_i32_0 : i32, i32
  }
  func.func @transform_15(%arg0: i32, %arg1: i32) -> (i32, i32) {
    %c0_i32 = arith.constant 0 : i32
    %c0_i32_0 = arith.constant 0 : i32
    %c0_i32_1 = arith.constant 0 : i32
    return %c0_i32, %c0_i32_0 : i32, i32
  }
  func.func @transform_16(%arg0: i32, %arg1: i32) -> (i32, i32) {
    %c0_i32 = arith.constant 0 : i32
    %c0_i32_0 = arith.constant 0 : i32
    %c0_i32_1 = arith.constant 0 : i32
    return %c0_i32, %c0_i32_0 : i32, i32
  }
  func.func @transform_17(%arg0: i32, %arg1: i32) -> (i32, i32) {
    %c0_i32 = arith.constant 0 : i32
    %c0_i32_0 = arith.constant 0 : i32
    return %c0_i32, %arg1 : i32, i32
  }
  func.func @transform_18(%arg0: i32, %arg1: i32) -> (i32, i32) {
    %c0_i32 = arith.constant 0 : i32
    %c0_i32_0 = arith.constant 0 : i32
    return %c0_i32, %arg1 : i32, i32
  }
  func.func @transform_19(%arg0: i32, %arg1: i32) -> (i32, i32) {
    %c0_i32 = arith.constant 0 : i32
    return %arg0, %arg1 : i32, i32
  }
}

</mosaic_0001>

<bundles_post_ra>
// kernel: base_model_forward.1
= control target key start
LH: loop header
LB: loop body
LE: loop exit
PB: predicated region body
PF: predicated region fallthrough
CT: control target
= control target key end

     0   :  { %v11465_v0 = vmov 0.0   ;;  %vm8269_vm0 = vmmov 0   ;;  %v8270_v3 = vmov 0   ;;  %vm146_vm1 = vcmask 261120   ;;  %s11442_s2 = inlined_call_operand.vmem [shape: bf16[32,96], index: 2, kind: input, shape index: {}]   ;;  %s11443_s3 = inlined_call_operand.vmem [shape: bf16[32,96], index: 3, kind: input, shape index: {}]   ;;  %s11444_s0 = inlined_call_operand.vmem [shape: bf16[16,8,32], index: 0, kind: input, shape index: {}]   ;;  %s11445_s5 = inlined_call_operand.vmem [shape: f32[1,32], index: 5, kind: input, shape index: {}]   ;;  %s11446_s4 = inlined_call_operand.vmem [shape: f32[1,96], index: 4, kind: input, shape index: {}]   ;;  %s11447_s6 = inlined_call_operand.vmem [shape: bf16[32,32], index: 6, kind: input, shape index: {}]   ;;  %s11448_s1 = inlined_call_operand.vmem [shape: bf16[16,8,32], index: 1, kind: input, shape index: {}]   ;;  %s11449_s8 = inlined_call_operand.vmem [shape: bf16[32,32], index: 8, kind: input, shape index: {}]   ;;  %s11450_s11 = inlined_call_operand.vmem [shape: bf16[32,32], index: 11, kind: input, shape index: {}]   ;;  %s11451_s7 = inlined_call_operand.vmem [shape: f32[1,32], index: 7, kind: input, shape index: {}]   ;;  %s11452_s9 = inlined_call_operand.vmem [shape: f32[1,32], index: 9, kind: input, shape index: {}]   ;;  %s11453_s10 = inlined_call_operand.vmem [shape: f32[1,32], index: 10, kind: input, shape index: {}]   ;;  %s11454_s13 = inlined_call_operand.vmem [shape: bf16[32,32], index: 13, kind: input, shape index: {}]   ;;  %s11455_s15 = inlined_call_operand.vmem [shape: bf16[32,64], index: 15, kind: input, shape index: {}]   ;;  %s11456_s17 = inlined_call_operand.vmem [shape: bf16[64,128], index: 17, kind: input, shape index: {}]   ;;  %s11457_s12 = inlined_call_operand.vmem [shape: f32[1,32], index: 12, kind: input, shape index: {}]   ;;  %s11458_s14 = inlined_call_operand.vmem [shape: f32[1,32], index: 14, kind: input, shape index: {}]   ;;  %s11459_s16 = inlined_call_operand.vmem [shape: f32[1,64], index: 16, kind: input, shape index: {}]   ;;  %s11460_s18 = inlined_call_operand.vmem [shape: f32[1,128], index: 18, kind: input, shape index: {}]   ;;  %s11461_s19 = inlined_call_operand.vmem [shape: f32[16,128], index: 19, kind: output, shape index: {}]  }
   0x1   :  { %11491 = sst [smem:[#allocation10_spill]] %s11442_s2  ;;  %7272 = vmatprep.subr.bf16.mxu1 %v11465_v0  ;;  %7276 = vmatprep.mubr.msk.bf16.mxu1 %vm8269_vm0, %v11465_v0  ;;  %v8443_v18 = vld [vmem:[%s11446_s4] ss:$0 sm:$0xff]  ;;  %vm284_vm2 = vcmask 781312   ;;  %s8272_s4 = smov 96   ;;  %vm901_vm3 = vcmask 1041409  }
   0x2   :  { %11492 = sst [smem:[#allocation11_spill]] %s11443_s3  ;;  %s11495_s20 = sld [smem:[#allocation10_spill]]  ;;  %7407 = vset.pattern.permute.xlu1 %v8270_v3  ;;  %7406 = vset.pattern.permute.xlu0 %v8270_v3  ;;  %vm904_vm4 = vcmask 1042434   ;;  %vm907_vm5 = vcmask 1043459   ;;  %vm910_vm6 = vcmask 1044484   ;;  %vm913_vm7 = vcmask 1045509  }
   0x3   :  { %11493 = sst [smem:[#allocation12_spill]] %s11444_s0  ;;  %s11496_s22 = sld [smem:[#allocation11_spill]]  ;;  %vm916_vm8 = vcmask 1046534   ;;  %vm919_vm9 = vcmask 1047559   ;;  %vm6017_vm10 = vcmask 64512   ;;  %vm6899_vm11 = vcmask 523264  }
   0x4   :  { %11494 = sst [smem:[#allocation13_spill]] %s11445_s5  ;;  %s11497_s27 = sld [smem:[#allocation12_spill]] }
   0x5   :  { %s11498_s3 = sld [smem:[#allocation13_spill]]  ;;  %s8271_s0 = smov 64  }
   0x8   :  { %v7408_v1 = vld [vmem:[%s11495_s20] sm:$0xff]   ;;  %v7410_v4 = vld [vmem:[%s11495_s20 + $0x8] sm:$0xff]  }
   0x9   :  { %v7409_v2 = vld [vmem:[%s11496_s22] sm:$0xff]   ;;  %7252 = vmatprep.subr.bf16.mxu0 %v7408_v1  ;;  %v7411_v5 = vld [vmem:[%s11496_s22 + $0x8] sm:$0xff]  }
   0xa   :  { %7273 = vmatpush3.bf16.msra.mxu1 %v7409_v2  ;;  %7253 = vmatpush3.bf16.msra.mxu0 %v7408_v1  ;;  %v7412_v6 = vld [vmem:[%s11497_s27] sm:$0xff]   ;;  %v7413_v7 = vld [vmem:[%s11497_s27 + $0x8] sm:$0xff]   ;;  %v7414_v8 = vld [vmem:[%s11497_s27 + $0x10] sm:$0xff]  }
   0xb   :  { %7274 = vmatprep.subr.bf16.mxu1 %v11465_v0  ;;  %7254 = vmatprep.subr.bf16.mxu0 %v7410_v4  ;;  %v7029_v9 = vld [vmem:[%s11498_s3] ss:$0 sm:$0xff]  ;;  %v7415_v10 = vld [vmem:[%s11497_s27 + $0x18] sm:$0xff]   ;;  %v7417_v12 = vld [vmem:[%s11497_s27 + $0x28] sm:$0xff]  }
   0xc   :  { %7256 = vmatprep.mubr.msk.bf16.mxu0 %vm146_vm1, %v7412_v6  ;;  %543 = vrot.lane.b32.xlu0 %v7029_v9, %s8271_s0  ;;  %v7416_v11 = vld [vmem:[%s11497_s27 + $0x20] sm:$0xff]   ;;  %v7418_v13 = vld [vmem:[%s11497_s27 + $0x30] sm:$0xff]   ;;  %v7419_v14 = vld [vmem:[%s11497_s27 + $0x38] sm:$0xff]  }
   0xe   :  { %7275 = vmatpush3.bf16.msra.mxu1 %v7411_v5  ;;  %7255 = vmatpush3.bf16.msra.mxu0 %v7410_v4 }
   0xf   :  { %7280 = vmatprep.subr.bf16.mxu1 %v11465_v0  ;;  %7304 = vmatprep.subr.bf16.mxu0 %v11465_v0 }
  0x11   :  { %7277 = vmatmul.mubr.bf16.vlgmr.msra.gmra.mrb[0].mxu1 %v8270_v3  ;;  %7257 = vmatmul.mubr.msk.bf16.vlgmr.msra.gmra.mrb[0].mxu0 %vm146_vm1, %v7413_v7 }
  0x12   :  { %7260 = vmatprep.mubr.msk.bf16.mxu0 %vm146_vm1, %v7414_v8  ;;  %7281 = vmatpush3.bf16.msra.mxu1 %v7409_v2 }
  0x13   :  { %7282 = vmatprep.subr.bf16.mxu1 %v11465_v0  ;;  %7284 = vmatprep.mubr.msk.bf16.mxu1 %vm8269_vm0, %v11465_v0 }
  0x14   :  { %7305 = vmatpush3.bf16.msra.mxu0 %v7409_v2 }
  0x15   :  { %7306 = vmatprep.subr.bf16.mxu0 %v11465_v0 }
  0x16   :  { %7283 = vmatpush3.bf16.msra.mxu1 %v7411_v5 }
  0x17   :  { %7288 = vmatprep.subr.bf16.mxu1 %v11465_v0 }
  0x18   :  { %7307 = vmatpush3.bf16.msra.mxu0 %v7411_v5 }
  0x19   :  { %7261 = vmatmul.mubr.msk.bf16.gmra.mrb[4].mxu0 %vm146_vm1, %v7415_v10  ;;  %7320 = vmatprep.subr.bf16.mxu0 %v11465_v0 }
  0x1a   :  { %7264 = vmatprep.mubr.msk.bf16.mxu0 %vm146_vm1, %v7416_v11 }
  0x21   :  { %7265 = vmatmul.mubr.msk.bf16.gmra.mrb[8].mxu0 %vm146_vm1, %v7417_v12 }
  0x22   :  { %7268 = vmatprep.mubr.msk.bf16.mxu0 %vm146_vm1, %v7418_v13 }
  0x29   :  { %7269 = vmatmul.mubr.msk.bf16.gmra.mrb[12].mxu0 %vm146_vm1, %v7419_v14 }
  0x2a   :  { %7308 = vmatprep.mubr.msk.bf16.mxu0 %vm8269_vm0, %v11465_v0 }
  0x7e   :  { %v8436_v15 = vpop.permute.xlu0 %543 }
  0xe4   :  { %v8438_v16 = vpop.f32.mrb[0].mxu1  ;;  %v7258_v17 = vpop.f32.mrb[0].mxu0 }
  0xe5   :  { %v7278_v19 = vpop.f32.mrb[1].mxu1  ;;  %v205_v20 = vpop.f32.mrb[1].mxu0  ;;  %v8447_v21 = vadd.f32 %v8436_v15, %v8438_v16  ;;  %v214_v24 = vadd.f32 %v7258_v17, %v8443_v18 }
  0xe6   :  { %v8449_v22 = vpop.f32.mrb[2].mxu1  ;;  %v7259_v23 = vpop.f32.mrb[2].mxu0  ;;  %v206_v25 = vadd.f32 %v8443_v18, %v205_v20 }
  0xe7   :  { %v7279_v26 = vpop.f32.mrb[3].mxu1  ;;  %v208_v27 = vpop.f32.mrb[3].mxu0  ;;  %564 = vrot.lane.b32.xlu1 %v8447_v21, %s8271_s0  ;;  %v270_v28 = vpack.c.bf16 %v214_v24, %v214_v24  ;;  %v217_v30 = vadd.f32 %v7259_v23, %v8443_v18  ;;  %v550_v32 = vrot.slane %v8447_v21, 1  ;;  %v551_v33 = vrot.slane %v8447_v21, 2 }
  0xe8   :  { %v268_v29 = vpack.c.bf16 %v206_v25, %v206_v25  ;;  %v209_v31 = vadd.f32 %v8443_v18, %v208_v27  ;;  %v8466_v39 = vadd.f32 %v8436_v15, %v8449_v22  ;;  %v552_v40 = vrot.slane %v8447_v21, 3 }
  0xe9   :  { %287 = vst.msk [vmem:[#allocation2 + $0x8] sm:$0xf] %vm284_vm2, %v270_v28  ;;  %v271_v34 = vpack.c.bf16 %v217_v30, %v217_v30  ;;  %566 = vrot.lane.b32.xlu0 %v550_v32, %s8271_s0  ;;  %v553_v51 = vrot.slane %v8447_v21, 4  ;;  %v554_v57 = vrot.slane %v8447_v21, 5  ;;  %v555_v10 = vrot.slane %v8447_v21, 6 }
  0xea   :  { %285 = vst.msk [vmem:[#allocation2] sm:$0xf] %vm284_vm2, %v268_v29  ;;  %v269_v35 = vpack.c.bf16 %v209_v31, %v209_v31  ;;  %v558_v50 = vrot.slane %v8466_v39, 2  ;;  %v559_v55 = vrot.slane %v8466_v39, 3  ;;  %v560_v3 = vrot.slane %v8466_v39, 4 }
  0xeb   :  { %568 = vrot.lane.b32.xlu1 %v551_v33, %s8271_s0  ;;  %288 = vst.msk [vmem:[#allocation2 + $0xc] sm:$0xf] %vm284_vm2, %v271_v34  ;;  %v557_v4 = vrot.slane %v8466_v39, 1  ;;  %v561_v8 = vrot.slane %v8466_v39, 5  ;;  %v562_v24 = vrot.slane %v8466_v39, 6  ;;  %v556_v25 = vrot.slane %v8447_v21, 7 }
  0xec   :  { %v7262_v36 = vpop.f32.mrb[4].mxu0  ;;  %286 = vst.msk [vmem:[#allocation2 + $0x4] sm:$0xf] %vm284_vm2, %v269_v35  ;;  %v396_v32 = vrot.slane %v8438_v16, 1  ;;  %v397_v34 = vrot.slane %v8438_v16, 2 }
  0xed   :  { %v230_v37 = vadd.f32 %v7262_v36, %v8443_v18  ;;  %v221_v38 = vpop.f32.mrb[5].mxu0  ;;  %570 = vrot.lane.b32.xlu0 %v552_v40, %s8271_s0 }
  0xee   :  { %v222_v41 = vadd.f32 %v8443_v18, %v221_v38  ;;  %v7263_v42 = vpop.f32.mrb[6].mxu0 }
  0xef   :  { %v274_v43 = vpack.c.bf16 %v230_v37, %v230_v37  ;;  %v233_v44 = vadd.f32 %v7263_v42, %v8443_v18  ;;  %v224_v45 = vpop.f32.mrb[7].mxu0  ;;  %580 = vrot.lane.b32.xlu1 %v8466_v39, %s8271_s0 }
  0xf0   :  { %v272_v46 = vpack.c.bf16 %v222_v41, %v222_v41  ;;  %v225_v47 = vadd.f32 %v8443_v18, %v224_v45  ;;  %v364_v29 = vld [vmem:[#allocation2 + $0x8] sm:$0x1] }
  0xf1   :  { %291 = vst.msk [vmem:[#allocation2 + $0x18] sm:$0xf] %vm284_vm2, %v274_v43  ;;  %v275_v48 = vpack.c.bf16 %v233_v44, %v233_v44  ;;  %584 = vrot.lane.b32.xlu0 %v558_v50, %s8271_s0  ;;  %v362_v26 = vld [vmem:[#allocation2] sm:$0x1]  ;;  %v8526_v33 = vunpack.c.l.bf16 %v364_v29 }
  0xf2   :  { %289 = vst.msk [vmem:[#allocation2 + $0x10] sm:$0xf] %vm284_vm2, %v272_v46  ;;  %v273_v49 = vpack.c.bf16 %v225_v47, %v225_v47  ;;  %v8519_v27 = vunpack.c.l.bf16 %v362_v26  ;;  %v365_v31 = vld [vmem:[#allocation2 + $0xc] sm:$0x1] }
  0xf3   :  { %292 = vst.msk [vmem:[#allocation2 + $0x1c] sm:$0xf] %vm284_vm2, %v275_v48  ;;  %572 = vrot.lane.b32.xlu1 %v553_v51, %s8271_s0  ;;  %v363_v28 = vld [vmem:[#allocation2 + $0x4] sm:$0x1]  ;;  %v8529_v35 = vunpack.c.l.bf16 %v365_v31  ;;  %v428_v40 = vadd.f32 %v397_v34, %v8526_v33  ;;  %v399_v51 = vrot.slane %v8438_v16, 4 }
  0xf4   :  { %290 = vst.msk [vmem:[#allocation2 + $0x14] sm:$0xf] %vm284_vm2, %v273_v49  ;;  %v7266_v52 = vpop.f32.mrb[8].mxu0  ;;  %v8521_v30 = vunpack.c.l.bf16 %v363_v28  ;;  %v426_v21 = vadd.f32 %v8519_v27, %v8438_v16 }
  0xf5   :  { %v246_v53 = vadd.f32 %v7266_v52, %v8443_v18  ;;  %v237_v54 = vpop.f32.mrb[9].mxu0  ;;  %586 = vrot.lane.b32.xlu0 %v559_v55, %s8271_s0  ;;  %v7015_v45 = vmul.f32 -1.442695, %v428_v40 }
  0xf6   :  { %v238_v56 = vadd.f32 %v8443_v18, %v237_v54  ;;  %v7267_v58 = vpop.f32.mrb[10].mxu0  ;;  %v7013_v36 = vmul.f32 -1.442695, %v426_v21  ;;  %v427_v37 = vadd.f32 %v396_v32, %v8521_v30 }
  0xf7   :  { %v278_v59 = vpack.c.bf16 %v246_v53, %v246_v53  ;;  %v249_v60 = vadd.f32 %v7267_v58, %v8443_v18  ;;  %v240_v61 = vpop.f32.mrb[11].mxu0  ;;  %574 = vrot.lane.b32.xlu1 %v554_v57, %s8271_s0  ;;  %v400_v53 = vrot.slane %v8438_v16, 5 }
  0xf8   :  { %v276_v62 = vpack.c.bf16 %v238_v56, %v238_v56  ;;  %v241_v63 = vadd.f32 %v8443_v18, %v240_v61  ;;  %7450 = vpow2.f32 %v7013_v36  ;;  %v7014_v42 = vmul.f32 -1.442695, %v427_v37  ;;  %v368_v54 = vld [vmem:[#allocation2 + $0x18] sm:$0x1] }
  0xf9   :  { %295 = vst.msk [vmem:[#allocation2 + $0x28] sm:$0xf] %vm284_vm2, %v278_v59  ;;  %v279_v1 = vpack.c.bf16 %v249_v60, %v249_v60  ;;  %588 = vrot.lane.b32.xlu0 %v560_v3, %s8271_s0  ;;  %v366_v44 = vld [vmem:[#allocation2 + $0x10] sm:$0x1]  ;;  %v403_v60 = vrot.slane %v8449_v22, 1  ;;  %v8549_v61 = vunpack.c.l.bf16 %v368_v54  ;;  %v406_v36 = vrot.slane %v8449_v22, 4 }
  0xfa   :  { %293 = vst.msk [vmem:[#allocation2 + $0x20] sm:$0xf] %vm284_vm2, %v276_v62  ;;  %v277_v2 = vpack.c.bf16 %v241_v63, %v241_v63  ;;  %v8537_v47 = vunpack.c.l.bf16 %v366_v44  ;;  %7452 = vpow2.f32 %v7014_v42  ;;  %v401_v63 = vrot.slane %v8438_v16, 6 }
  0xfb   :  { %296 = vst.msk [vmem:[#allocation2 + $0x2c] sm:$0xf] %vm284_vm2, %v279_v1  ;;  %582 = vrot.lane.b32.xlu1 %v557_v4, %s8271_s0  ;;  %v367_v46 = vld [vmem:[#allocation2 + $0x14] sm:$0x1]  ;;  %7454 = vpow2.f32 %v7015_v45  ;;  %v369_v1 = vld [vmem:[#allocation2 + $0x1c] sm:$0x1] }
  0xfc   :  { %294 = vst.msk [vmem:[#allocation2 + $0x24] sm:$0xf] %vm284_vm2, %v277_v2  ;;  %v7270_v5 = vpop.f32.mrb[12].mxu0  ;;  %v8542_v52 = vunpack.c.l.bf16 %v367_v46  ;;  %v430_v57 = vadd.f32 %v399_v51, %v8537_v47  ;;  %v407_v45 = vrot.slane %v8449_v22, 5 }
  0xfd   :  { %v262_v6 = vadd.f32 %v7270_v5, %v8443_v18  ;;  %v253_v7 = vpop.f32.mrb[13].mxu0  ;;  %590 = vrot.lane.b32.xlu0 %v561_v8, %s8271_s0  ;;  %v404_v8 = vrot.slane %v8449_v22, 2 }
  0xfe   :  { %v254_v9 = vadd.f32 %v8443_v18, %v253_v7  ;;  %v7271_v11 = vpop.f32.mrb[14].mxu0  ;;  %v431_v62 = vadd.f32 %v400_v53, %v8542_v52  ;;  %v7017_v3 = vmul.f32 -1.442695, %v430_v57 }
  0xff   :  { %v282_v12 = vpack.c.bf16 %v262_v6, %v262_v6  ;;  %v265_v13 = vadd.f32 %v7271_v11, %v8443_v18  ;;  %v256_v14 = vpop.f32.mrb[15].mxu0  ;;  %576 = vrot.lane.b32.xlu1 %v555_v10, %s8271_s0  ;;  %v432_v11 = vadd.f32 %v401_v63, %v8549_v61 }
 0x100   :  { %v280_v17 = vpack.c.bf16 %v254_v9, %v254_v9  ;;  %v257_v19 = vadd.f32 %v8443_v18, %v256_v14  ;;  %v563_v18 = vrot.slane %v8466_v39, 7  ;;  %v398_v39 = vrot.slane %v8438_v16, 3  ;;  %v372_v58 = vld [vmem:[#allocation2 + $0x28] sm:$0x1] }
 0x101   :  { %299 = vst.msk [vmem:[#allocation2 + $0x38] sm:$0xf] %vm284_vm2, %v282_v12  ;;  %v283_v20 = vpack.c.bf16 %v265_v13, %v265_v13  ;;  %592 = vrot.lane.b32.xlu0 %v562_v24, %s8271_s0  ;;  %v370_v38 = vld [vmem:[#allocation2 + $0x20] sm:$0x1]  ;;  %v8553_v2 = vunpack.c.l.bf16 %v372_v58  ;;  %v8557_v9 = vunpack.c.l.bf16 %v369_v1  ;;  %v7018_v10 = vmul.f32 -1.442695, %v431_v62 }
 0x102   :  { %297 = vst.msk [vmem:[#allocation2 + $0x30] sm:$0xf] %vm284_vm2, %v280_v17  ;;  %v281_v23 = vpack.c.bf16 %v257_v19, %v257_v19  ;;  %v8534_v41 = vunpack.c.l.bf16 %v370_v38  ;;  %v429_v43 = vadd.f32 %v398_v39, %v8529_v35  ;;  %v7451_v59 = vpop.eup %7450  ;;  %v373_v5 = vld [vmem:[#allocation2 + $0x2c] sm:$0x1]  ;;  %v402_v12 = vrot.slane %v8438_v16, 7 }
 0x103   :  { %300 = vst.msk [vmem:[#allocation2 + $0x3c] sm:$0xf] %vm284_vm2, %v283_v20  ;;  %578 = vrot.lane.b32.xlu1 %v556_v25, %s8271_s0  ;;  %v371_v50 = vld [vmem:[#allocation2 + $0x24] sm:$0x1]  ;;  %v490_v6 = vadd.f32 1.0, %v7451_v59  ;;  %11499 = vst [vmem:[#allocation4_spill] sm:$0xff] %v8557_v9  ;;  %v8561_v14 = vunpack.c.l.bf16 %v373_v5  ;;  %v436_v17 = vadd.f32 %v404_v8, %v8553_v2 }
 0x104   :  { %298 = vst.msk [vmem:[#allocation2 + $0x34] sm:$0xf] %vm284_vm2, %v281_v23  ;;  %v7016_v48 = vmul.f32 -1.442695, %v429_v43  ;;  %v434_v49 = vadd.f32 %v8534_v41, %v8449_v22  ;;  %v8545_v55 = vunpack.c.l.bf16 %v371_v50  ;;  %v7453_v7 = vpop.eup %7452  ;;  %v405_v25 = vrot.slane %v8449_v22, 3 }
 0x105   :  { %594 = vrot.lane.b32.xlu0 %v563_v18, %s8271_s0  ;;  %v7455_v13 = vpop.eup %7454  ;;  %v491_v23 = vadd.f32 1.0, %v7453_v7  ;;  %v7019_v18 = vmul.f32 -1.442695, %v432_v11  ;;  %v433_v26 = vadd.f32 %v402_v12, %v8557_v9  ;;  %v7023_v16 = vmul.f32 -1.442695, %v436_v17 }
 0x106   :  { %7456 = vpow2.f32 %v7016_v48  ;;  %v7021_v56 = vmul.f32 -1.442695, %v434_v49  ;;  %v435_v4 = vadd.f32 %v403_v60, %v8545_v55  ;;  %v492_v28 = vadd.f32 1.0, %v7455_v13 }
 0x107   :  { %v437_v21 = vadd.f32 %v405_v25, %v8561_v14  ;;  %v7020_v37 = vmul.f32 -1.442695, %v433_v26  ;;  %v409_v12 = vrot.slane %v8449_v22, 7 }
 0x108   :  { %7458 = vpow2.f32 %v7021_v56  ;;  %v7022_v19 = vmul.f32 -1.442695, %v435_v4  ;;  %v376_v38 = vld [vmem:[#allocation2 + $0x38] sm:$0x1]  ;;  %v408_v56 = vrot.slane %v8449_v22, 6 }
 0x109   :  { %7460 = vpow2.f32 %v7017_v3  ;;  %v374_v20 = vld [vmem:[#allocation2 + $0x30] sm:$0x1]  ;;  %v7024_v40 = vmul.f32 -1.442695, %v437_v21  ;;  %v8576_v48 = vunpack.c.l.bf16 %v376_v38 }
 0x10a   :  { %7462 = vrcp.f32 %v490_v6  ;;  %v8566_v29 = vunpack.c.l.bf16 %v374_v20  ;;  %v377_v57 = vld [vmem:[#allocation2 + $0x3c] sm:$0x1] }
 0x10b   :  { %7464 = vpow2.f32 %v7018_v10  ;;  %v375_v31 = vld [vmem:[#allocation2 + $0x34] sm:$0x1]  ;;  %11500 = vst [vmem:[#allocation5_spill] sm:$0xff] %v8576_v48  ;;  %v440_v3 = vadd.f32 %v408_v56, %v8576_v48  ;;  %v8585_v5 = vunpack.c.l.bf16 %v377_v57 }
 0x10c   :  { %7466 = vpow2.f32 %v7022_v19  ;;  %v8570_v39 = vunpack.c.l.bf16 %v375_v31  ;;  %v438_v42 = vadd.f32 %v406_v36, %v8566_v29 }
 0x10d   :  { %7468 = vrcp.f32 %v491_v23  ;;  %11501 = vst [vmem:[#allocation6_spill] sm:$0xff] %v8585_v5  ;;  %v7027_v23 = vmul.f32 -1.442695, %v440_v3  ;;  %v441_v26 = vadd.f32 %v409_v12, %v8585_v5 }
 0x10e   :  { %7470 = vpow2.f32 %v7019_v18  ;;  %v7025_v53 = vmul.f32 -1.442695, %v438_v42  ;;  %v439_v54 = vadd.f32 %v407_v45, %v8570_v39 }
 0x10f   :  { %7472 = vrcp.f32 %v492_v28  ;;  %v7028_v36 = vmul.f32 -1.442695, %v441_v26 }
 0x110   :  { %v7457_v24 = vpop.eup %7456  ;;  %7474 = vpow2.f32 %v7023_v16  ;;  %v7026_v7 = vmul.f32 -1.442695, %v439_v54 }
 0x111   :  { %v493_v32 = vadd.f32 1.0, %v7457_v24 }
 0x112   :  { %v7459_v34 = vpop.eup %7458 }
 0x113   :  { %7476 = vrcp.f32 %v493_v32  ;;  %v498_v43 = vadd.f32 1.0, %v7459_v34  ;;  %v7461_v44 = vpop.eup %7460 }
 0x114   :  { %7478 = vpow2.f32 %v7020_v37  ;;  %v8574_v46 = vpop.eup %7462  ;;  %v494_v58 = vadd.f32 1.0, %v7461_v44 }
 0x115   :  { %v7465_v50 = vpop.eup %7464  ;;  %7480 = vpow2.f32 %v7024_v40 }
 0x116   :  { %7482 = vrcp.f32 %v498_v43  ;;  %v7467_v59 = vpop.eup %7466  ;;  %v495_v1 = vadd.f32 1.0, %v7465_v50 }
 0x117   :  { %v8582_v60 = vpop.eup %7468  ;;  %7484 = vpow2.f32 %v7025_v53  ;;  %v499_v10 = vadd.f32 1.0, %v7467_v59 }
 0x118   :  { %v7471_v4 = vpop.eup %7470  ;;  %7486 = vrcp.f32 %v494_v58 }
 0x119   :  { %v8588_v8 = vpop.eup %7472  ;;  %7488 = vrcp.f32 %v495_v1  ;;  %v496_v20 = vadd.f32 1.0, %v7471_v4 }
 0x11a   :  { %v7475_v11 = vpop.eup %7474  ;;  %7490 = vpow2.f32 %v7026_v7 }
 0x11b   :  { %v500_v28 = vadd.f32 1.0, %v7475_v11  ;;  %7492 = vrcp.f32 %v499_v10 }
 0x11c   :  { %7494 = vrcp.f32 %v496_v20 }
 0x11d   :  { %v8592_v13 = vpop.eup %7476  ;;  %7496 = vpow2.f32 %v7027_v23 }
 0x11e   :  { %v7479_v24 = vpop.eup %7478  ;;  %7498 = vrcp.f32 %v500_v28 }
 0x11f   :  { %v7481_v22 = vpop.eup %7480  ;;  %v497_v32 = vadd.f32 1.0, %v7479_v24 }
 0x120   :  { %v8599_v16 = vpop.eup %7482  ;;  %v501_v37 = vadd.f32 1.0, %v7481_v22 }
 0x121   :  { %v7485_v38 = vpop.eup %7484  ;;  %7500 = vrcp.f32 %v497_v32 }
 0x122   :  { %v8603_v40 = vpop.eup %7486  ;;  %7502 = vpow2.f32 %v7028_v36 }
 0x123   :  { %v8606_v44 = vpop.eup %7488  ;;  %7504 = vrcp.f32 %v501_v37 }
 0x124   :  { %v7491_v50 = vpop.eup %7490 }
 0x125   :  { %v503_v58 = vadd.f32 1.0, %v7491_v50 }
 0x159   :  { %v565_v49 = vpop.permute.xlu1 %564 }
 0x15a   :  { %v612_v51 = vmul.f32 %v8574_v46, %v565_v49  ;;  %v502_v49 = vadd.f32 1.0, %v7485_v38 }
 0x15b   :  { %v567_v62 = vpop.permute.xlu0 %566 }
 0x15c   :  { %644 = vrot.lane.b32.xlu1 %v612_v51, %s8271_s0  ;;  %v613_v6 = vmul.f32 %v8582_v60, %v567_v62  ;;  %v8609_v51 = vpop.eup %7492  ;;  %7506 = vrcp.f32 %v502_v49 }
 0x15d   :  { %v569_v63 = vpop.permute.xlu1 %568  ;;  %v8613_v57 = vpop.eup %7494  ;;  %7508 = vrcp.f32 %v503_v58 }
 0x15e   :  { %v614_v25 = vmul.f32 %v8588_v8, %v569_v63  ;;  %v7497_v59 = vpop.eup %7496 }
 0x15f   :  { %v571_v17 = vpop.permute.xlu0 %570  ;;  %v8617_v62 = vpop.eup %7498  ;;  %v504_v7 = vadd.f32 1.0, %v7497_v59 }
 0x160   :  { %646 = vrot.lane.b32.xlu1 %v613_v6, %s8271_s0  ;;  %v615_v18 = vmul.f32 %v8592_v13, %v571_v17  ;;  %v8621_v6 = vpop.eup %7500 }
 0x161   :  { %v581_v19 = vpop.permute.xlu1 %580  ;;  %v7503_v10 = vpop.eup %7502  ;;  %7510 = vrcp.f32 %v504_v7 }
 0x162   :  { %650 = vrot.lane.b32.xlu0 %v615_v18, %s8271_s0  ;;  %v620_v34 = vmul.f32 %v8599_v16, %v581_v19  ;;  %v8625_v11 = vpop.eup %7504  ;;  %v505_v23 = vadd.f32 1.0, %v7503_v10 }
 0x163   :  { %v585_v21 = vpop.permute.xlu0 %584 }
 0x164   :  { %648 = vrot.lane.b32.xlu1 %v614_v25, %s8271_s0  ;;  %v622_v3 = vmul.f32 %v8617_v62, %v585_v21  ;;  %7512 = vrcp.f32 %v505_v23 }
 0x165   :  { %v573_v31 = vpop.permute.xlu1 %572 }
 0x166   :  { %v616_v43 = vmul.f32 %v8603_v40, %v573_v31  ;;  %v8631_v24 = vpop.eup %7506 }
 0x167   :  { %v587_v45 = vpop.permute.xlu0 %586  ;;  %v8635_v18 = vpop.eup %7508 }
 0x168   :  { %660 = vrot.lane.b32.xlu1 %v620_v34, %s8271_s0  ;;  %v623_v17 = vmul.f32 %v8625_v11, %v587_v45 }
 0x169   :  { %v575_v42 = vpop.permute.xlu1 %574 }
 0x16a   :  { %v617_v54 = vmul.f32 %v8606_v44, %v575_v42 }
 0x16b   :  { %v589_v63 = vpop.permute.xlu0 %588  ;;  %v8639_v22 = vpop.eup %7510 }
 0x16c   :  { %652 = vrot.lane.b32.xlu1 %v616_v43, %s8271_s0  ;;  %v624_v25 = vmul.f32 %v8631_v24, %v589_v63 }
 0x16d   :  { %v583_v53 = vpop.permute.xlu1 %582 }
 0x16e   :  { %v621_v56 = vmul.f32 %v8609_v51, %v583_v53  ;;  %v8643_v32 = vpop.eup %7512 }
 0x16f   :  { %v591_v20 = vpop.permute.xlu0 %590 }
 0x170   :  { %662 = vrot.lane.b32.xlu0 %v621_v56, %s8271_s0  ;;  %654 = vrot.lane.b32.xlu1 %v617_v54, %s8271_s0  ;;  %v625_v28 = vmul.f32 %v8635_v18, %v591_v20 }
 0x171   :  { %v577_v1 = vpop.permute.xlu1 %576 }
 0x172   :  { %v618_v4 = vmul.f32 %v8613_v57, %v577_v1 }
 0x173   :  { %v593_v26 = vpop.permute.xlu0 %592 }
 0x174   :  { %664 = vrot.lane.b32.xlu0 %v622_v3, %s8271_s0  ;;  %656 = vrot.lane.b32.xlu1 %v618_v4, %s8271_s0  ;;  %v626_v21 = vmul.f32 %v8639_v22, %v593_v26 }
 0x175   :  { %v579_v12 = vpop.permute.xlu1 %578 }
 0x176   :  { %v619_v19 = vmul.f32 %v8621_v6, %v579_v12 }
 0x177   :  { %v595_v31 = vpop.permute.xlu0 %594 }
 0x178   :  { %666 = vrot.lane.b32.xlu0 %v623_v17, %s8271_s0  ;;  %658 = vrot.lane.b32.xlu1 %v619_v19, %s8271_s0  ;;  %v627_v34 = vmul.f32 %v8643_v32, %v595_v31 }
 0x17c   :  { %668 = vrot.lane.b32.xlu0 %v624_v25, %s8271_s0 }
 0x180   :  { %670 = vrot.lane.b32.xlu0 %v625_v28, %s8271_s0 }
 0x184   :  { %672 = vrot.lane.b32.xlu0 %v626_v21, %s8271_s0 }
 0x188   :  { %674 = vrot.lane.b32.xlu0 %v627_v34, %s8271_s0 }
 0x1ce   :  { %v645_v36 = vpop.permute.xlu1 %644 }
 0x1cf   :  { %v692_v37 = vadd.f32 %v645_v36, %v8519_v27 }
 0x1d1   :  { %7514 = vtanh.f32 %v692_v37 }
 0x1d2   :  { %v647_v38 = vpop.permute.xlu1 %646 }
 0x1d3   :  { %v693_v42 = vadd.f32 %v647_v38, %v8521_v30 }
 0x1d4   :  { %v651_v43 = vpop.permute.xlu0 %650 }
 0x1d5   :  { %7516 = vtanh.f32 %v693_v42  ;;  %v695_v49 = vadd.f32 %v651_v43, %v8529_v35 }
 0x1d6   :  { %v649_v45 = vpop.permute.xlu1 %648 }
 0x1d7   :  { %v694_v50 = vadd.f32 %v649_v45, %v8526_v33  ;;  %7518 = vtanh.f32 %v695_v49 }
 0x1d9   :  { %7520 = vtanh.f32 %v694_v50 }
 0x1da   :  { %v661_v53 = vpop.permute.xlu1 %660 }
 0x1db   :  { %v7515_v54 = vpop.eup %7514  ;;  %v700_v56 = vadd.f32 %v661_v53, %v8534_v41 }
 0x1dc   :  { %756 = vrot.lane.b32.xlu1 %v7515_v54, %s8272_s4 }
 0x1dd   :  { %7522 = vtanh.f32 %v700_v56 }
 0x1de   :  { %v653_v58 = vpop.permute.xlu1 %652 }
 0x1df   :  { %v7517_v59 = vpop.eup %7516  ;;  %v696_v63 = vadd.f32 %v653_v58, %v8537_v47 }
 0x1e0   :  { %758 = vrot.lane.b32.xlu1 %v7517_v59, %s8272_s4 }
 0x1e1   :  { %7524 = vtanh.f32 %v696_v63  ;;  %v7519_v4 = vpop.eup %7518 }
 0x1e2   :  { %v663_v1 = vpop.permute.xlu0 %662  ;;  %v655_v3 = vpop.permute.xlu1 %654  ;;  %762 = vrot.lane.b32.xlu0 %v7519_v4, %s8272_s4 }
 0x1e3   :  { %v701_v7 = vadd.f32 %v663_v1, %v8545_v55  ;;  %v697_v10 = vadd.f32 %v655_v3, %v8542_v52  ;;  %v7521_v12 = vpop.eup %7520 }
 0x1e4   :  { %760 = vrot.lane.b32.xlu1 %v7521_v12, %s8272_s4 }
 0x1e5   :  { %7526 = vtanh.f32 %v701_v7 }
 0x1e6   :  { %7528 = vtanh.f32 %v697_v10  ;;  %v665_v17 = vpop.permute.xlu0 %664  ;;  %v657_v19 = vpop.permute.xlu1 %656 }
 0x1e7   :  { %v7523_v20 = vpop.eup %7522  ;;  %v702_v23 = vadd.f32 %v665_v17, %v8553_v2  ;;  %v698_v25 = vadd.f32 %v657_v19, %v8549_v61 }
 0x1e8   :  { %772 = vrot.lane.b32.xlu1 %v7523_v20, %s8272_s4 }
 0x1e9   :  { %7530 = vtanh.f32 %v702_v23 }
 0x1ea   :  { %7532 = vtanh.f32 %v698_v25  ;;  %v667_v26 = vpop.permute.xlu0 %666  ;;  %v659_v28 = vpop.permute.xlu1 %658 }
 0x1eb   :  { %v7525_v21 = vpop.eup %7524  ;;  %v703_v31 = vadd.f32 %v667_v26, %v8561_v14  ;;  %v699_v34 = vadd.f32 %v659_v28, %v8557_v9  ;;  %v724_v28 = vsub.f32 1.0, %v8574_v46 }
 0x1ec   :  { %764 = vrot.lane.b32.xlu1 %v7525_v21, %s8272_s4  ;;  %v820_v21 = vmul.f32 0.0, %v8574_v46  ;;  %v825_v46 = vmul.f32 0.0, %v8606_v44 }
 0x1ed   :  { %7534 = vtanh.f32 %v703_v31  ;;  %v725_v31 = vsub.f32 1.0, %v8582_v60 }
 0x1ee   :  { %7536 = vtanh.f32 %v699_v34  ;;  %v669_v36 = vpop.permute.xlu0 %668  ;;  %v821_v34 = vmul.f32 0.0, %v8582_v60  ;;  %v826_v60 = vmul.f32 0.0, %v8613_v57 }
 0x1ef   :  { %v7527_v37 = vpop.eup %7526  ;;  %v704_v38 = vadd.f32 %v669_v36, %v8566_v29  ;;  %v726_v36 = vsub.f32 1.0, %v8588_v8 }
 0x1f0   :  { %v7529_v42 = vpop.eup %7528  ;;  %774 = vrot.lane.b32.xlu0 %v7527_v37, %s8272_s4  ;;  %v822_v37 = vmul.f32 0.0, %v8588_v8  ;;  %v732_v8 = vsub.f32 1.0, %v8599_v16 }
 0x1f1   :  { %7538 = vtanh.f32 %v704_v38  ;;  %766 = vrot.lane.b32.xlu1 %v7529_v42, %s8272_s4  ;;  %v727_v38 = vsub.f32 1.0, %v8592_v13  ;;  %v823_v42 = vmul.f32 0.0, %v8592_v13  ;;  %v827_v13 = vmul.f32 0.0, %v8621_v6 }
 0x1f2   :  { %v671_v43 = vpop.permute.xlu0 %670 }
 0x1f3   :  { %v7531_v45 = vpop.eup %7530  ;;  %v705_v49 = vadd.f32 %v671_v43, %v8570_v39  ;;  %v728_v43 = vsub.f32 1.0, %v8603_v40 }
 0x1f4   :  { %v7533_v50 = vpop.eup %7532  ;;  %776 = vrot.lane.b32.xlu0 %v7531_v45, %s8272_s4  ;;  %v824_v45 = vmul.f32 0.0, %v8603_v40  ;;  %v733_v40 = vsub.f32 1.0, %v8609_v51 }
 0x1f5   :  { %7540 = vtanh.f32 %v705_v49  ;;  %768 = vrot.lane.b32.xlu1 %v7533_v50, %s8272_s4  ;;  %v729_v50 = vsub.f32 1.0, %v8606_v44  ;;  %v830_v44 = vmul.f32 0.0, %v8617_v62 }
 0x1f6   :  { %v673_v53 = vpop.permute.xlu0 %672 }
 0x1f7   :  { %v7535_v54 = vpop.eup %7534  ;;  %v706_v56 = vadd.f32 %v673_v53, %v8576_v48  ;;  %v730_v53 = vsub.f32 1.0, %v8613_v57  ;;  %v735_v57 = vsub.f32 1.0, %v8625_v11  ;;  %v737_v48 = vsub.f32 1.0, %v8635_v18 }
 0x1f8   :  { %v7537_v58 = vpop.eup %7536  ;;  %778 = vrot.lane.b32.xlu0 %v7535_v54, %s8272_s4 }
 0x1f9   :  { %7542 = vtanh.f32 %v706_v56  ;;  %770 = vrot.lane.b32.xlu1 %v7537_v58, %s8272_s4  ;;  %v731_v58 = vsub.f32 1.0, %v8621_v6  ;;  %v736_v6 = vsub.f32 1.0, %v8631_v24 }
 0x1fa   :  { %v675_v59 = vpop.permute.xlu0 %674 }
 0x1fb   :  { %v7539_v63 = vpop.eup %7538  ;;  %v707_v1 = vadd.f32 %v675_v59, %v8585_v5  ;;  %v828_v59 = vmul.f32 0.0, %v8599_v16  ;;  %v832_v16 = vmul.f32 0.0, %v8631_v24  ;;  %v739_v24 = vsub.f32 1.0, %v8643_v32 }
 0x1fc   :  { %780 = vrot.lane.b32.xlu0 %v7539_v63, %s8272_s4  ;;  %v734_v63 = vsub.f32 1.0, %v8617_v62  ;;  %v833_v62 = vmul.f32 0.0, %v8635_v18  ;;  %v835_v18 = vmul.f32 0.0, %v8643_v32 }
 0x1fd   :  { %7544 = vtanh.f32 %v707_v1 }
 0x1ff   :  { %v7541_v3 = vpop.eup %7540 }
 0x200   :  { %782 = vrot.lane.b32.xlu0 %v7541_v3, %s8272_s4  ;;  %v829_v3 = vmul.f32 0.0, %v8609_v51 }
 0x203   :  { %v7543_v4 = vpop.eup %7542 }
 0x204   :  { %784 = vrot.lane.b32.xlu0 %v7543_v4, %s8272_s4  ;;  %v831_v4 = vmul.f32 0.0, %v8625_v11  ;;  %v834_v11 = vmul.f32 0.0, %v8639_v22 }
 0x207   :  { %v7545_v7 = vpop.eup %7544 }
 0x208   :  { %786 = vrot.lane.b32.xlu0 %v7545_v7, %s8272_s4 }
 0x24e   :  { %v757_v10 = vpop.permute.xlu1 %756 }
 0x252   :  { %v759_v12 = vpop.permute.xlu1 %758 }
 0x253   :  { %v805_v54 = vmul.f32 %v759_v12, %v725_v31  ;;  %v804_v12 = vmul.f32 %v757_v10, %v724_v28 }
 0x254   :  { %v763_v20 = vpop.permute.xlu0 %762 }
 0x255   :  { %v8705_v0 = vadd.f32 %v821_v34, %v805_v54  ;;  %v8714_v34 = vadd.f32 %v820_v21, %v804_v12 }
 0x256   :  { %v761_v17 = vpop.permute.xlu1 %760 }
 0x257   :  { %v806_v1 = vmul.f32 %v761_v17, %v726_v36  ;;  %v807_v17 = vmul.f32 %v763_v20, %v727_v38  ;;  %v738_v36 = vsub.f32 1.0, %v8639_v22  ;;  %v853_v20 = vpack.c.bf16 %v8705_v0, %v8705_v0 }
 0x259   :  { %v8711_v9 = vadd.f32 %v822_v37, %v806_v1 }
 0x25a   :  { %v773_v19 = vpop.permute.xlu1 %772 }
 0x25b   :  { %v812_v38 = vmul.f32 %v773_v19, %v732_v8  ;;  %v854_v21 = vpack.c.bf16 %v8711_v9, %v8711_v9 }
 0x25d   :  { %v8739_v8 = vadd.f32 %v828_v59, %v812_v38 }
 0x25e   :  { %v765_v23 = vpop.permute.xlu1 %764 }
 0x25f   :  { %v808_v10 = vmul.f32 %v765_v23, %v728_v43  ;;  %v8723_v23 = vadd.f32 %v823_v42, %v807_v17 }
 0x262   :  { %v775_v25 = vpop.permute.xlu0 %774 }
 0x263   :  { %v767_v26 = vpop.permute.xlu1 %766  ;;  %v813_v31 = vmul.f32 %v775_v25, %v733_v40 }
 0x264   :  { %v809_v25 = vmul.f32 %v767_v26, %v729_v50  ;;  %v8729_v50 = vadd.f32 %v824_v45, %v808_v10 }
 0x266   :  { %v777_v49 = vpop.permute.xlu0 %776 }
 0x267   :  { %v769_v56 = vpop.permute.xlu1 %768  ;;  %v814_v5 = vmul.f32 %v777_v49, %v734_v63  ;;  %v8716_v49 = vadd.f32 %v829_v3, %v813_v31  ;;  %v8731_v63 = vadd.f32 %v825_v46, %v809_v25  ;;  %v855_v46 = vpack.c.bf16 %v8723_v23, %v8723_v23 }
 0x268   :  { %v810_v37 = vmul.f32 %v769_v56, %v730_v53  ;;  %v885_v53 = vunpack.c.l.b16 %v853_v20 }
 0x269   :  { %v8721_v22 = vadd.f32 %v830_v44, %v814_v5  ;;  %v852_v5 = vpack.c.bf16 %v8714_v34, %v8714_v34  ;;  %v861_v19 = vpack.c.bf16 %v8716_v49, %v8716_v49  ;;  %v857_v59 = vpack.c.bf16 %v8731_v63, %v8731_v63 }
 0x26a   :  { %v779_v7 = vpop.permute.xlu0 %778  ;;  %v8743_v56 = vadd.f32 %v826_v60, %v810_v37 }
 0x26b   :  { %v815_v51 = vmul.f32 %v779_v7, %v735_v57  ;;  %v771_v28 = vpop.permute.xlu1 %770  ;;  %v862_v45 = vpack.c.bf16 %v8721_v22, %v8721_v22  ;;  %v886_v57 = vunpack.c.l.b16 %v854_v21  ;;  %v884_v7 = vunpack.c.l.b16 %v852_v5 }
 0x26c   :  { %v811_v43 = vmul.f32 %v771_v28, %v731_v58  ;;  %v893_v12 = vunpack.c.l.b16 %v861_v19  ;;  %v858_v17 = vpack.c.bf16 %v8743_v56, %v8743_v56  ;;  %v889_v20 = vunpack.c.l.b16 %v857_v59 }
 0x26d   :  { %v8725_v26 = vadd.f32 %v831_v4, %v815_v51  ;;  %v887_v51 = vunpack.c.l.b16 %v855_v46 }
 0x26e   :  { %v781_v40 = vpop.permute.xlu0 %780  ;;  %v8749_v44 = vadd.f32 %v827_v13, %v811_v43  ;;  %v921_v37 = vrot.slane %v893_v12, 7  ;;  %v912_v12 = vrot.slane %v889_v20, 3 }
 0x26f   :  { %v816_v54 = vmul.f32 %v781_v40, %v736_v6  ;;  %v863_v58 = vpack.c.bf16 %v8725_v26, %v8725_v26  ;;  %v900_v6 = vrot.slane %v885_v53, 7  ;;  %v903_v40 = vrot.slane %v886_v57, 6 }
 0x270   :  { %v859_v25 = vpack.c.bf16 %v8749_v44, %v8749_v44  ;;  %v890_v53 = vunpack.c.l.b16 %v858_v17  ;;  %v906_v57 = vrot.slane %v887_v51, 5 }
 0x271   :  { %v8733_v32 = vadd.f32 %v832_v16, %v816_v54  ;;  %v860_v16 = vpack.c.bf16 %v8739_v8, %v8739_v8  ;;  %v895_v10 = vunpack.c.l.b16 %v863_v58  ;;  %v902_v5 = vsel %vm901_vm3, %v900_v6, %v884_v7 }
 0x272   :  { %v783_v1 = vpop.permute.xlu0 %782  ;;  %v891_v46 = vunpack.c.l.b16 %v859_v25 }
 0x273   :  { %v817_v42 = vmul.f32 %v783_v1, %v737_v48  ;;  %v856_v48 = vpack.c.bf16 %v8729_v50, %v8729_v50  ;;  %v864_v60 = vpack.c.bf16 %v8733_v32, %v8733_v32  ;;  %v892_v19 = vunpack.c.l.b16 %v860_v16 }
 0x275   :  { %v8751_v3 = vadd.f32 %v833_v62, %v817_v42  ;;  %v894_v62 = vunpack.c.l.b16 %v862_v45  ;;  %v888_v54 = vunpack.c.l.b16 %v856_v48  ;;  %v925_v45 = vrot.slane %v895_v10, 5 }
 0x276   :  { %v785_v4 = vpop.permute.xlu0 %784  ;;  %v905_v48 = vsel %vm904_vm4, %v903_v40, %v902_v5  ;;  %v11502_v5 = vmov 0.0  }
 0x277   :  { %v865_v13 = vpack.c.bf16 %v8751_v3, %v8751_v3  ;;  %v818_v31 = vmul.f32 %v785_v4, %v738_v36  ;;  %v896_v36 = vunpack.c.l.b16 %v864_v60  ;;  %v923_v42 = vrot.slane %v894_v62, 6 }
 0x278   :  { %v909_v59 = vrot.slane %v888_v54, 4  ;;  %v922_v4 = vsel %vm901_vm3, %v921_v37, %v892_v19  ;;  %v918_v62 = vrot.slane %v891_v46, 1  ;;  %v8803_v19 = vld [vmem:[%s11496_s22 + $0x8] sm:$0xff]  }
 0x279   :  { %v8767_v28 = vadd.f32 %v834_v11, %v818_v31  ;;  %v897_v43 = vunpack.c.l.b16 %v865_v13  ;;  %v927_v60 = vrot.slane %v896_v36, 4  ;;  %v924_v7 = vsel %vm904_vm4, %v923_v42, %v922_v4 }
 0x27a   :  { %v787_v38 = vpop.permute.xlu0 %786  ;;  %v915_v31 = vrot.slane %v890_v53, 2  ;;  %v926_v16 = vsel %vm907_vm5, %v925_v45, %v924_v7 }
 0x27b   :  { %v866_v21 = vpack.c.bf16 %v8767_v28, %v8767_v28  ;;  %v819_v1 = vmul.f32 %v787_v38, %v739_v24  ;;  %v929_v13 = vrot.slane %v897_v43, 3  ;;  %v928_v10 = vsel %vm910_vm6, %v927_v60, %v926_v16 }
 0x27d   :  { %v898_v11 = vunpack.c.l.b16 %v866_v21  ;;  %v8772_v58 = vadd.f32 %v835_v18, %v819_v1  ;;  %v908_v18 = vsel %vm907_vm5, %v906_v57, %v905_v48  ;;  %v930_v54 = vsel %vm913_vm7, %v929_v13, %v928_v10  ;;  %v8794_v1 = vld [vmem:[%s11496_s22] sm:$0xff]  }
 0x27e   :  { %v911_v51 = vsel %vm910_vm6, %v909_v59, %v908_v18 }
 0x27f   :  { %v867_v24 = vpack.c.bf16 %v8772_v58, %v8772_v58  ;;  %v931_v6 = vrot.slane %v898_v11, 2  ;;  %v914_v40 = vsel %vm913_vm7, %v912_v12, %v911_v51 }
 0x280   :  { %v917_v20 = vsel %vm916_vm8, %v915_v31, %v914_v40 }
 0x281   :  { %v899_v17 = vunpack.c.l.b16 %v867_v24  ;;  %v932_v36 = vsel %vm916_vm8, %v931_v6, %v930_v54  ;;  %v920_v38 = vsel %vm919_vm9, %v918_v62, %v917_v20 }
 0x283   :  { %v933_v25 = vrot.slane %v899_v17, 1 }
 0x285   :  { %v934_v37 = vsel %vm919_vm9, %v933_v25, %v932_v36 }
 0x286   :  { %v935_v43 = vpack.c.b16 %v934_v37, %v920_v38 }
 0x288   :  { %936 = vrot.lane.b32.xlu1 %v935_v43, %s8272_s4 }
 0x2fa   :  { %v937_v21 = vpop.permute.xlu1 %936 }
 0x2fb   :  { %7285 = vmatmul.mubr.msk.bf16.vlgmr.msra.gmra.mrb[4].mxu1 %vm146_vm1, %v937_v21 }
 0x2fc   :  { %7289 = vmatpush3.bf16.msra.mxu1 %v8794_v1  ;;  %7292 = vmatprep.mubr.msk.bf16.mxu1 %vm8269_vm0, %v11502_v5 }
 0x2fd   :  { %7290 = vmatprep.subr.bf16.mxu1 %v11502_v5 }
 0x300   :  { %7291 = vmatpush3.bf16.msra.mxu1 %v8803_v19 }
 0x301   :  { %7296 = vmatprep.subr.bf16.mxu1 %v11502_v5 }
 0x3ce   :  { %v8807_v42 = vpop.f32.mrb[4].mxu1 }
 0x3cf   :  { %v7286_v53 = vpop.f32.mrb[5].mxu1  ;;  %v1126_v11 = vadd.f32 %v8807_v42, %v8436_v15  ;;  %v1015_v51 = vadd.f32 %v8807_v42, %v8521_v30  ;;  %v986_v25 = vrot.slane %v8807_v42, 2  ;;  %v984_v40 = vrot.slane %v8807_v42, 7 }
 0x3d0   :  { %v8809_v45 = vpop.f32.mrb[6].mxu1  ;;  %v985_v54 = vrot.slane %v8807_v42, 1 }
 0x3d1   :  { %v7287_v46 = vpop.f32.mrb[7].mxu1  ;;  %1146 = vrot.lane.b32.xlu0 %v1126_v11, %s8271_s0  ;;  %v1127_v57 = vadd.f32 %v8809_v45, %v8436_v15  ;;  %v1132_v48 = vrot.slane %v1126_v11, 2  ;;  %v1130_v59 = vrot.slane %v1126_v11, 7  ;;  %v1131_v4 = vrot.slane %v1126_v11, 1 }
 0x3d2   :  { %v1133_v24 = vrot.slane %v1126_v11, 3  ;;  %v1134_v31 = vrot.slane %v1126_v11, 4  ;;  %v1135_v18 = vrot.slane %v1126_v11, 5  ;;  %v1136_v62 = vrot.slane %v1126_v11, 6 }
 0x3d3   :  { %1150 = vrot.lane.b32.xlu1 %v1132_v48, %s8271_s0  ;;  %v1137_v60 = vrot.slane %v1127_v57, 7  ;;  %v1138_v12 = vrot.slane %v1127_v57, 1  ;;  %v1139_v13 = vrot.slane %v1127_v57, 2  ;;  %v1140_v7 = vrot.slane %v1127_v57, 3 }
 0x3d4   :  { %v1141_v6 = vrot.slane %v1127_v57, 4  ;;  %v1142_v16 = vrot.slane %v1127_v57, 5  ;;  %v1143_v17 = vrot.slane %v1127_v57, 6  ;;  %v7032_v10 = vmul.f32 -1.442695, %v1015_v51 }
 0x3d5   :  { %1144 = vrot.lane.b32.xlu0 %v1130_v59, %s8271_s0  ;;  %v1017_v20 = vadd.f32 %v986_v25, %v8529_v35  ;;  %v1014_v36 = vadd.f32 %v984_v40, %v8519_v27  ;;  %v991_v38 = vrot.slane %v8809_v45, 7  ;;  %v1016_v37 = vadd.f32 %v985_v54, %v8526_v33 }
 0x3d6   :  { %7546 = vpow2.f32 %v7032_v10  ;;  %v992_v53 = vrot.slane %v8809_v45, 1  ;;  %v1023_v11 = vadd.f32 %v8809_v45, %v8545_v55  ;;  %v995_v10 = vrot.slane %v8809_v45, 4 }
 0x3d7   :  { %1160 = vrot.lane.b32.xlu1 %v1137_v60, %s8271_s0  ;;  %v7034_v43 = vmul.f32 -1.442695, %v1017_v20  ;;  %v7031_v21 = vmul.f32 -1.442695, %v1014_v36  ;;  %v1022_v46 = vadd.f32 %v991_v38, %v8534_v41  ;;  %v7033_v48 = vmul.f32 -1.442695, %v1016_v37 }
 0x3d8   :  { %v993_v60 = vrot.slane %v8809_v45, 2  ;;  %v990_v36 = vrot.slane %v8807_v42, 6 }
 0x3d9   :  { %1148 = vrot.lane.b32.xlu0 %v1131_v4, %s8271_s0  ;;  %7548 = vpow2.f32 %v7034_v43  ;;  %v1024_v4 = vadd.f32 %v992_v53, %v8553_v2  ;;  %v996_v43 = vrot.slane %v8809_v45, 5 }
 0x3da   :  { %7550 = vpow2.f32 %v7031_v21  ;;  %v1027_v21 = vadd.f32 %v995_v10, %v8570_v39  ;;  %v11505_v10 = vld [vmem:[#allocation6_spill] sm:$0xff] }
 0x3db   :  { %1164 = vrot.lane.b32.xlu1 %v1138_v12, %s8271_s0  ;;  %v7039_v12 = vmul.f32 -1.442695, %v1022_v46  ;;  %7552 = vpow2.f32 %v7033_v48 }
 0x3dd   :  { %1162 = vrot.lane.b32.xlu0 %v1127_v57, %s8271_s0  ;;  %v987_v57 = vrot.slane %v8807_v42, 3  ;;  %7554 = vpow2.f32 %v7039_v12  ;;  %v11504_v12 = vld [vmem:[#allocation5_spill] sm:$0xff] }
 0x3df   :  { %1166 = vrot.lane.b32.xlu1 %v1139_v13, %s8271_s0  ;;  %v988_v13 = vrot.slane %v8807_v42, 4 }
 0x3e0   :  { %v7547_v59 = vpop.eup %7546 }
 0x3e1   :  { %1152 = vrot.lane.b32.xlu0 %v1133_v24, %s8271_s0  ;;  %v7040_v24 = vmul.f32 -1.442695, %v1023_v11 }
 0x3e3   :  { %1168 = vrot.lane.b32.xlu1 %v1140_v7, %s8271_s0  ;;  %v1018_v7 = vadd.f32 %v987_v57, %v8537_v47  ;;  %7556 = vpow2.f32 %v7040_v24  ;;  %v7549_v54 = vpop.eup %7548  ;;  %v7044_v24 = vmul.f32 -1.442695, %v1027_v21 }
 0x3e4   :  { %v7551_v20 = vpop.eup %7550  ;;  %v1081_v46 = vadd.f32 1.0, %v7549_v54 }
 0x3e5   :  { %1154 = vrot.lane.b32.xlu0 %v1134_v31, %s8271_s0  ;;  %v994_v31 = vrot.slane %v8809_v45, 3  ;;  %v7035_v51 = vmul.f32 -1.442695, %v1018_v7  ;;  %v7553_v11 = vpop.eup %7552  ;;  %v1078_v57 = vadd.f32 1.0, %v7551_v20 }
 0x3e7   :  { %1170 = vrot.lane.b32.xlu1 %v1141_v6, %s8271_s0  ;;  %v1079_v6 = vadd.f32 1.0, %v7547_v59  ;;  %v1026_v25 = vadd.f32 %v994_v31, %v8566_v29  ;;  %v7555_v48 = vpop.eup %7554  ;;  %v11503_v59 = vld [vmem:[#allocation4_spill] sm:$0xff]  ;;  %v1080_v31 = vadd.f32 1.0, %v7553_v11 }
 0x3e9   :  { %1156 = vrot.lane.b32.xlu0 %v1135_v18, %s8271_s0  ;;  %v1025_v18 = vadd.f32 %v993_v60, %v8561_v14  ;;  %7558 = vrcp.f32 %v1079_v6  ;;  %v7043_v53 = vmul.f32 -1.442695, %v1026_v25  ;;  %v1021_v60 = vadd.f32 %v990_v36, %v11503_v59 }
 0x3eb   :  { %1172 = vrot.lane.b32.xlu1 %v1142_v16, %s8271_s0  ;;  %v7041_v16 = vmul.f32 -1.442695, %v1024_v4  ;;  %v7042_v40 = vmul.f32 -1.442695, %v1025_v18 }
 0x3ed   :  { %1158 = vrot.lane.b32.xlu0 %v1136_v62, %s8271_s0  ;;  %v989_v62 = vrot.slane %v8807_v42, 5  ;;  %7560 = vpow2.f32 %v7041_v16  ;;  %v997_v42 = vrot.slane %v8809_v45, 6  ;;  %v7557_v7 = vpop.eup %7556  ;;  %v1086_v16 = vadd.f32 1.0, %v7555_v48 }
 0x3ee   :  { %7562 = vpow2.f32 %v7035_v51 }
 0x3ef   :  { %1174 = vrot.lane.b32.xlu1 %v1143_v17, %s8271_s0  ;;  %v1019_v17 = vadd.f32 %v988_v13, %v8542_v52  ;;  %v1020_v38 = vadd.f32 %v989_v62, %v8549_v61  ;;  %7564 = vpow2.f32 %v7042_v40  ;;  %v1028_v13 = vadd.f32 %v996_v43, %v11504_v12 }
 0x3f0   :  { %v1029_v25 = vadd.f32 %v997_v42, %v11505_v10  ;;  %v1087_v40 = vadd.f32 1.0, %v7557_v7 }
 0x3f1   :  { %v7036_v37 = vmul.f32 -1.442695, %v1019_v17  ;;  %v7037_v4 = vmul.f32 -1.442695, %v1020_v38  ;;  %v7038_v17 = vmul.f32 -1.442695, %v1021_v60 }
 0x3f2   :  { %v7045_v45 = vmul.f32 -1.442695, %v1028_v13  ;;  %v7046_v38 = vmul.f32 -1.442695, %v1029_v25 }
 0x3f3   :  { %7566 = vpow2.f32 %v7036_v37  ;;  %v8862_v6 = vpop.eup %7558 }
 0x3f4   :  { %7568 = vpow2.f32 %v7043_v53 }
 0x3f5   :  { %7570 = vrcp.f32 %v1081_v46 }
 0x3f6   :  { %7572 = vrcp.f32 %v1078_v57 }
 0x3f7   :  { %v7561_v62 = vpop.eup %7560  ;;  %7574 = vpow2.f32 %v7037_v4 }
 0x3f8   :  { %7576 = vpow2.f32 %v7044_v24  ;;  %v7563_v54 = vpop.eup %7562  ;;  %v1088_v20 = vadd.f32 1.0, %v7561_v62 }
 0x3f9   :  { %7578 = vrcp.f32 %v1080_v31  ;;  %v7565_v36 = vpop.eup %7564  ;;  %v1082_v43 = vadd.f32 1.0, %v7563_v54 }
 0x3fa   :  { %7580 = vrcp.f32 %v1086_v16  ;;  %v1089_v53 = vadd.f32 1.0, %v7565_v36 }
 0x3fb   :  { %7582 = vpow2.f32 %v7038_v17 }
 0x3fc   :  { %7584 = vpow2.f32 %v7045_v45 }
 0x3fd   :  { %v7567_v37 = vpop.eup %7566  ;;  %7586 = vrcp.f32 %v1087_v40 }
 0x3fe   :  { %v7569_v21 = vpop.eup %7568  ;;  %7588 = vrcp.f32 %v1088_v20  ;;  %v1083_v7 = vadd.f32 1.0, %v7567_v37 }
 0x3ff   :  { %v8867_v46 = vpop.eup %7570  ;;  %7590 = vpow2.f32 %v7046_v38  ;;  %v1090_v13 = vadd.f32 1.0, %v7569_v21 }
 0x400   :  { %v8869_v11 = vpop.eup %7572  ;;  %7592 = vrcp.f32 %v1082_v43 }
 0x401   :  { %v7575_v60 = vpop.eup %7574  ;;  %7594 = vrcp.f32 %v1089_v53 }
 0x402   :  { %v7577_v24 = vpop.eup %7576  ;;  %7596 = vrcp.f32 %v1090_v13  ;;  %v1084_v54 = vadd.f32 1.0, %v7575_v60 }
 0x403   :  { %v8873_v31 = vpop.eup %7578  ;;  %v1091_v45 = vadd.f32 1.0, %v7577_v24  ;;  %7598 = vrcp.f32 %v1083_v7 }
 0x405   :  { %7600 = vrcp.f32 %v1091_v45 }
 0x406   :  { %7602 = vrcp.f32 %v1084_v54 }
 0x443   :  { %v1147_v18 = vpop.permute.xlu0 %1146 }
 0x444   :  { %v1193_v51 = vmul.f32 %v8862_v6, %v1147_v18  ;;  %v8877_v18 = vpop.eup %7580 }
 0x445   :  { %v1151_v57 = vpop.permute.xlu1 %1150  ;;  %v7583_v17 = vpop.eup %7582 }
 0x446   :  { %1226 = vrot.lane.b32.xlu0 %v1193_v51, %s8271_s0  ;;  %v1195_v4 = vmul.f32 %v8867_v46, %v1151_v57  ;;  %v7585_v40 = vpop.eup %7584 }
 0x447   :  { %v1145_v48 = vpop.permute.xlu0 %1144  ;;  %v8881_v20 = vpop.eup %7586  ;;  %v1092_v53 = vadd.f32 1.0, %v7585_v40 }
 0x448   :  { %v1192_v42 = vmul.f32 %v8869_v11, %v1145_v48  ;;  %1230 = vrot.lane.b32.xlu1 %v1195_v4, %s8271_s0  ;;  %v8885_v36 = vpop.eup %7588  ;;  %v1085_v48 = vadd.f32 1.0, %v7583_v17 }
 0x449   :  { %v1161_v16 = vpop.permute.xlu1 %1160  ;;  %v7591_v57 = vpop.eup %7590  ;;  %7604 = vrcp.f32 %v1092_v53 }
 0x44a   :  { %1224 = vrot.lane.b32.xlu0 %v1192_v42, %s8271_s0  ;;  %v1200_v51 = vmul.f32 %v8877_v18, %v1161_v16  ;;  %v8889_v60 = vpop.eup %7592  ;;  %7606 = vrcp.f32 %v1085_v48  ;;  %v1093_v16 = vadd.f32 1.0, %v7591_v57 }
 0x44b   :  { %v1149_v62 = vpop.permute.xlu0 %1148  ;;  %v8893_v4 = vpop.eup %7594 }
 0x44c   :  { %v1194_v25 = vmul.f32 %v8873_v31, %v1149_v62  ;;  %1240 = vrot.lane.b32.xlu1 %v1200_v51, %s8271_s0  ;;  %v8897_v62 = vpop.eup %7596  ;;  %7608 = vrcp.f32 %v1093_v16 }
 0x44d   :  { %v1165_v38 = vpop.permute.xlu1 %1164  ;;  %v8901_v17 = vpop.eup %7598 }
 0x44e   :  { %1228 = vrot.lane.b32.xlu0 %v1194_v25, %s8271_s0  ;;  %v1202_v43 = vmul.f32 %v8885_v36, %v1165_v38  ;;  %v8905_v54 = vpop.eup %7600 }
 0x44f   :  { %v1163_v37 = vpop.permute.xlu0 %1162  ;;  %v8909_v38 = vpop.eup %7602 }
 0x450   :  { %v1201_v21 = vmul.f32 %v8881_v20, %v1163_v37  ;;  %1244 = vrot.lane.b32.xlu1 %v1202_v43, %s8271_s0 }
 0x451   :  { %v1167_v42 = vpop.permute.xlu1 %1166 }
 0x452   :  { %1242 = vrot.lane.b32.xlu0 %v1201_v21, %s8271_s0  ;;  %v1203_v24 = vmul.f32 %v8893_v4, %v1167_v42 }
 0x453   :  { %v1153_v13 = vpop.permute.xlu0 %1152  ;;  %v8913_v57 = vpop.eup %7604 }
 0x454   :  { %v1196_v7 = vmul.f32 %v8889_v60, %v1153_v13  ;;  %1246 = vrot.lane.b32.xlu1 %v1203_v24, %s8271_s0  ;;  %v8917_v48 = vpop.eup %7606 }
 0x455   :  { %v1169_v51 = vpop.permute.xlu1 %1168 }
 0x456   :  { %1232 = vrot.lane.b32.xlu0 %v1196_v7, %s8271_s0  ;;  %v1204_v45 = vmul.f32 %v8897_v62, %v1169_v51  ;;  %v8923_v16 = vpop.eup %7608 }
 0x457   :  { %v1155_v25 = vpop.permute.xlu0 %1154 }
 0x458   :  { %v1197_v40 = vmul.f32 %v8901_v17, %v1155_v25  ;;  %1248 = vrot.lane.b32.xlu1 %v1204_v45, %s8271_s0 }
 0x459   :  { %v1171_v37 = vpop.permute.xlu1 %1170 }
 0x45a   :  { %1234 = vrot.lane.b32.xlu0 %v1197_v40, %s8271_s0  ;;  %v1205_v21 = vmul.f32 %v8905_v54, %v1171_v37 }
 0x45b   :  { %v1157_v43 = vpop.permute.xlu0 %1156 }
 0x45c   :  { %v1198_v53 = vmul.f32 %v8909_v38, %v1157_v43  ;;  %1250 = vrot.lane.b32.xlu1 %v1205_v21, %s8271_s0 }
 0x45d   :  { %v1173_v42 = vpop.permute.xlu1 %1172 }
 0x45e   :  { %1236 = vrot.lane.b32.xlu0 %v1198_v53, %s8271_s0  ;;  %v1206_v24 = vmul.f32 %v8913_v57, %v1173_v42 }
 0x45f   :  { %v1159_v13 = vpop.permute.xlu0 %1158 }
 0x460   :  { %v1199_v7 = vmul.f32 %v8917_v48, %v1159_v13  ;;  %1252 = vrot.lane.b32.xlu1 %v1206_v24, %s8271_s0 }
 0x461   :  { %v1175_v51 = vpop.permute.xlu1 %1174 }
 0x462   :  { %1238 = vrot.lane.b32.xlu0 %v1199_v7, %s8271_s0  ;;  %v1207_v25 = vmul.f32 %v8923_v16, %v1175_v51 }
 0x464   :  { %1254 = vrot.lane.b32.xlu1 %v1207_v25, %s8271_s0 }
 0x4b8   :  { %v1227_v45 = vpop.permute.xlu0 %1226 }
 0x4b9   :  { %v1273_v40 = vadd.f32 %v1227_v45, %v8521_v30 }
 0x4ba   :  { %v1231_v37 = vpop.permute.xlu1 %1230 }
 0x4bb   :  { %7610 = vtanh.f32 %v1273_v40  ;;  %v1275_v21 = vadd.f32 %v1231_v37, %v8529_v35 }
 0x4bc   :  { %v1225_v43 = vpop.permute.xlu0 %1224 }
 0x4bd   :  { %v1272_v53 = vadd.f32 %v1225_v43, %v8519_v27  ;;  %7612 = vtanh.f32 %v1275_v21 }
 0x4be   :  { %v1241_v13 = vpop.permute.xlu1 %1240 }
 0x4bf   :  { %7614 = vtanh.f32 %v1272_v53  ;;  %v1280_v7 = vadd.f32 %v1241_v13, %v8534_v41 }
 0x4c0   :  { %v1229_v24 = vpop.permute.xlu0 %1228 }
 0x4c1   :  { %v1274_v51 = vadd.f32 %v1229_v24, %v8526_v33  ;;  %7616 = vtanh.f32 %v1280_v7 }
 0x4c2   :  { %v1245_v30 = vpop.permute.xlu1 %1244 }
 0x4c3   :  { %7618 = vtanh.f32 %v1274_v51  ;;  %v1282_v45 = vadd.f32 %v1245_v30, %v8553_v2 }
 0x4c4   :  { %v1243_v25 = vpop.permute.xlu0 %1242 }
 0x4c5   :  { %v7611_v42 = vpop.eup %7610  ;;  %v1281_v35 = vadd.f32 %v1243_v25, %v8545_v55  ;;  %7620 = vtanh.f32 %v1282_v45 }
 0x4c6   :  { %1338 = vrot.lane.b32.xlu0 %v7611_v42, %s8272_s4  ;;  %v1247_v27 = vpop.permute.xlu1 %1246 }
 0x4c7   :  { %7622 = vtanh.f32 %v1281_v35  ;;  %v7613_v37 = vpop.eup %7612  ;;  %v1283_v43 = vadd.f32 %v1247_v27, %v8561_v14 }
 0x4c8   :  { %v1233_v40 = vpop.permute.xlu0 %1232  ;;  %1342 = vrot.lane.b32.xlu1 %v7613_v37, %s8272_s4 }
 0x4c9   :  { %v1276_v21 = vadd.f32 %v1233_v40, %v8537_v47  ;;  %v7615_v41 = vpop.eup %7614  ;;  %7624 = vtanh.f32 %v1283_v43 }
 0x4ca   :  { %1336 = vrot.lane.b32.xlu0 %v7615_v41, %s8272_s4  ;;  %v1249_v33 = vpop.permute.xlu1 %1248 }
 0x4cb   :  { %7626 = vtanh.f32 %v1276_v21  ;;  %v7617_v53 = vpop.eup %7616  ;;  %v1284_v55 = vadd.f32 %v1249_v33, %v8566_v29  ;;  %v1305_v33 = vsub.f32 1.0, %v8862_v6 }
 0x4cc   :  { %v1235_v2 = vpop.permute.xlu0 %1234  ;;  %1352 = vrot.lane.b32.xlu1 %v7617_v53, %s8272_s4 }
 0x4cd   :  { %v1277_v42 = vadd.f32 %v1235_v2, %v8542_v52  ;;  %v7619_v13 = vpop.eup %7618  ;;  %7628 = vtanh.f32 %v1284_v55  ;;  %v1417_v2 = vrot.slane %v8705_v0, 7  ;;  %v1419_v55 = vrot.slane %v8723_v23, 7 }
 0x4ce   :  { %1340 = vrot.lane.b32.xlu0 %v7619_v13, %s8272_s4  ;;  %v1251_v47 = vpop.permute.xlu1 %1250  ;;  %v1416_v13 = vrot.slane %v8714_v34, 7 }
 0x4cf   :  { %7630 = vtanh.f32 %v1277_v42  ;;  %v7621_v24 = vpop.eup %7620  ;;  %v1285_v7 = vadd.f32 %v1251_v47, %v8570_v39  ;;  %v1307_v42 = vsub.f32 1.0, %v8867_v46  ;;  %v1449_v47 = vmul.f32 %v8862_v6, %v1417_v2 }
 0x4d0   :  { %v1237_v14 = vpop.permute.xlu0 %1236  ;;  %1356 = vrot.lane.b32.xlu1 %v7621_v24, %s8272_s4  ;;  %v1304_v24 = vsub.f32 1.0, %v8869_v11  ;;  %v1425_v6 = vrot.slane %v8716_v49, 7 }
 0x4d1   :  { %v1278_v51 = vadd.f32 %v1237_v14, %v8549_v61  ;;  %v7623_v30 = vpop.eup %7622  ;;  %7632 = vtanh.f32 %v1285_v7  ;;  %v1418_v7 = vrot.slane %v8711_v9, 7  ;;  %v1312_v9 = vsub.f32 1.0, %v8877_v18 }
 0x4d2   :  { %1354 = vrot.lane.b32.xlu0 %v7623_v30, %s8272_s4  ;;  %v1253_v52 = vpop.permute.xlu1 %1252  ;;  %v1451_v30 = vmul.f32 %v8867_v46, %v1419_v55  ;;  %v1422_v46 = vrot.slane %v8743_v56, 7  ;;  %v1313_v55 = vsub.f32 1.0, %v8881_v20  ;;  %v1311_v56 = vsub.f32 1.0, %v8917_v48 }
 0x4d3   :  { %7634 = vtanh.f32 %v1278_v51  ;;  %v7625_v25 = vpop.eup %7624  ;;  %v1286_v45 = vadd.f32 %v1253_v52, %v11504_v12  ;;  %v1424_v51 = vrot.slane %v8739_v8, 7  ;;  %v1426_v8 = vrot.slane %v8721_v22, 7 }
 0x4d4   :  { %v1239_v29 = vpop.permute.xlu0 %1238  ;;  %1358 = vrot.lane.b32.xlu1 %v7625_v25, %s8272_s4  ;;  %v1448_v25 = vmul.f32 %v8869_v11, %v1416_v13  ;;  %v1427_v11 = vrot.slane %v8725_v26, 7  ;;  %v1457_v13 = vmul.f32 %v8881_v20, %v1425_v6 }
 0x4d5   :  { %v1279_v35 = vadd.f32 %v1239_v29, %v11503_v59  ;;  %v7627_v27 = vpop.eup %7626  ;;  %7636 = vtanh.f32 %v1286_v45  ;;  %v1420_v29 = vrot.slane %v8729_v50, 7  ;;  %v1421_v45 = vrot.slane %v8731_v63, 7 }
 0x4d6   :  { %1344 = vrot.lane.b32.xlu0 %v7627_v27, %s8272_s4  ;;  %v1255_v61 = vpop.permute.xlu1 %1254  ;;  %v1456_v49 = vmul.f32 %v8877_v18, %v1424_v51  ;;  %v1314_v18 = vsub.f32 1.0, %v8885_v36 }
 0x4d7   :  { %7638 = vtanh.f32 %v1279_v35  ;;  %v7629_v39 = vpop.eup %7628  ;;  %v1287_v40 = vadd.f32 %v1255_v61, %v11505_v10  ;;  %v1306_v61 = vsub.f32 1.0, %v8873_v31 }
 0x4d8   :  { %1360 = vrot.lane.b32.xlu1 %v7629_v39, %s8272_s4  ;;  %v1423_v39 = vrot.slane %v8749_v44, 7 }
 0x4d9   :  { %v7631_v37 = vpop.eup %7630  ;;  %7640 = vtanh.f32 %v1287_v40 }
 0x4da   :  { %1346 = vrot.lane.b32.xlu0 %v7631_v37, %s8272_s4 }
 0x4db   :  { %v7633_v12 = vpop.eup %7632 }
 0x4dc   :  { %1362 = vrot.lane.b32.xlu1 %v7633_v12, %s8272_s4 }
 0x4dd   :  { %v7635_v43 = vpop.eup %7634 }
 0x4de   :  { %1348 = vrot.lane.b32.xlu0 %v7635_v43, %s8272_s4  ;;  %v1450_v43 = vmul.f32 %v8873_v31, %v1418_v7 }
 0x4df   :  { %v7637_v59 = vpop.eup %7636 }
 0x4e0   :  { %1364 = vrot.lane.b32.xlu1 %v7637_v59, %s8272_s4 }
 0x4e1   :  { %v7639_v21 = vpop.eup %7638 }
 0x4e2   :  { %1350 = vrot.lane.b32.xlu0 %v7639_v21, %s8272_s4  ;;  %v1428_v21 = vrot.slane %v8733_v32, 7  ;;  %v1458_v32 = vmul.f32 %v8885_v36, %v1426_v8  ;;  %v1459_v8 = vmul.f32 %v8893_v4, %v1427_v11 }
 0x4e3   :  { %v7641_v41 = vpop.eup %7640 }
 0x4e4   :  { %1366 = vrot.lane.b32.xlu1 %v7641_v41, %s8272_s4 }
 0x538   :  { %v1339_v10 = vpop.permute.xlu0 %1338 }
 0x539   :  { %v1385_v53 = vmul.f32 %v1339_v10, %v1305_v33  ;;  %v1429_v10 = vrot.slane %v8751_v3, 7 }
 0x53a   :  { %v1343_v14 = vpop.permute.xlu1 %1342 }
 0x53b   :  { %v1387_v52 = vmul.f32 %v1343_v14, %v1307_v42  ;;  %v8970_v23 = vadd.f32 %v1449_v47, %v1385_v53  ;;  %v1461_v63 = vmul.f32 %v8905_v54, %v1429_v10 }
 0x53c   :  { %v1337_v0 = vpop.permute.xlu0 %1336 }
 0x53d   :  { %v1384_v34 = vmul.f32 %v1337_v0, %v1304_v24  ;;  %v8975_v35 = vadd.f32 %v1451_v30, %v1387_v52  ;;  %v1481_v12 = vpack.c.bf16 %v8970_v23, %v8970_v23  ;;  %v1315_v52 = vsub.f32 1.0, %v8893_v4 }
 0x53e   :  { %v1353_v50 = vpop.permute.xlu1 %1352  ;;  %v1308_v0 = vsub.f32 1.0, %v8889_v60 }
 0x53f   :  { %v8980_v27 = vadd.f32 %v1448_v25, %v1384_v34  ;;  %v1392_v40 = vmul.f32 %v1353_v50, %v1312_v9  ;;  %v1483_v26 = vpack.c.bf16 %v8975_v35, %v8975_v35  ;;  %v1513_v14 = vunpack.c.l.b16 %v1481_v12 }
 0x540   :  { %v1341_v37 = vpop.permute.xlu0 %1340 }
 0x541   :  { %v1480_v22 = vpack.c.bf16 %v8980_v27, %v8980_v27  ;;  %v1386_v59 = vmul.f32 %v1341_v37, %v1306_v61  ;;  %v8994_v41 = vadd.f32 %v1456_v49, %v1392_v40  ;;  %v1515_v51 = vunpack.c.l.b16 %v1483_v26 }
 0x542   :  { %v1357_v53 = vpop.permute.xlu1 %1356  ;;  %v1452_v61 = vmul.f32 %v8889_v60, %v1420_v29 }
 0x543   :  { %v1512_v33 = vunpack.c.l.b16 %v1480_v22  ;;  %v8998_v2 = vadd.f32 %v1450_v43, %v1386_v59  ;;  %v1488_v31 = vpack.c.bf16 %v8994_v41, %v8994_v41  ;;  %v1394_v42 = vmul.f32 %v1357_v53, %v1314_v18 }
 0x544   :  { %v1355_v47 = vpop.permute.xlu0 %1354  ;;  %v1316_v22 = vsub.f32 1.0, %v8897_v62  ;;  %v1532_v43 = vrot.slane %v1515_v51, 6  ;;  %v1460_v18 = vmul.f32 %v8897_v62, %v1428_v21  ;;  %v1430_v51 = vrot.slane %v8767_v28, 7 }
 0x545   :  { %v1528_v24 = vrot.slane %v1512_v33, 1  ;;  %v1482_v3 = vpack.c.bf16 %v8998_v2, %v8998_v2  ;;  %v1393_v7 = vmul.f32 %v1355_v47, %v1313_v55  ;;  %v9007_v30 = vadd.f32 %v1458_v32, %v1394_v42 }
 0x546   :  { %v1520_v36 = vunpack.c.l.b16 %v1488_v31  ;;  %v1359_v20 = vpop.permute.xlu1 %1358  ;;  %v1309_v32 = vsub.f32 1.0, %v8901_v17  ;;  %v1453_v47 = vmul.f32 %v8901_v17, %v1421_v45  ;;  %v1454_v28 = vmul.f32 %v8909_v38, %v1422_v46 }
 0x547   :  { %v1529_v25 = vsel %vm901_vm3, %v1513_v14, %v1528_v24  ;;  %v1514_v34 = vunpack.c.l.b16 %v1482_v3  ;;  %v9012_v9 = vadd.f32 %v1457_v13, %v1393_v7  ;;  %v1490_v6 = vpack.c.bf16 %v9007_v30, %v9007_v30 }
 0x548   :  { %v1395_v50 = vmul.f32 %v1359_v20, %v1315_v52  ;;  %v1345_v49 = vpop.permute.xlu0 %1344  ;;  %v1542_v33 = vrot.slane %v1520_v36, 1  ;;  %v1317_v7 = vsub.f32 1.0, %v8905_v54  ;;  %v1310_v36 = vsub.f32 1.0, %v8909_v38 }
 0x549   :  { %v1530_v40 = vrot.slane %v1514_v34, 7  ;;  %v1489_v37 = vpack.c.bf16 %v9012_v9, %v9012_v9  ;;  %v1388_v12 = vmul.f32 %v1345_v49, %v1308_v0  ;;  %v1522_v59 = vunpack.c.l.b16 %v1490_v6 }
 0x54a   :  { %v9021_v26 = vadd.f32 %v1459_v8, %v1395_v50  ;;  %v1361_v60 = vpop.permute.xlu1 %1360  ;;  %v1318_v54 = vsub.f32 1.0, %v8913_v57  ;;  %v1462_v46 = vmul.f32 %v8913_v57, %v1430_v51 }
 0x54b   :  { %v1531_v4 = vsel %vm904_vm4, %v1530_v40, %v1529_v25  ;;  %v1521_v11 = vunpack.c.l.b16 %v1489_v37  ;;  %v9025_v53 = vadd.f32 %v1452_v61, %v1388_v12  ;;  %v1544_v29 = vrot.slane %v1522_v59, 7 }
 0x54c   :  { %v1491_v55 = vpack.c.bf16 %v9021_v26, %v9021_v26  ;;  %v1533_v31 = vsel %vm907_vm5, %v1532_v43, %v1531_v4  ;;  %v1347_v42 = vpop.permute.xlu0 %1346  ;;  %v1396_v21 = vmul.f32 %v1361_v60, %v1316_v22 }
 0x54d   :  { %v1543_v13 = vsel %vm901_vm3, %v1521_v11, %v1542_v33  ;;  %v1484_v62 = vpack.c.bf16 %v9025_v53, %v9025_v53  ;;  %v1389_v3 = vmul.f32 %v1347_v42, %v1309_v32  ;;  %v1455_v11 = vmul.f32 %v8917_v48, %v1423_v39 }
 0x54e   :  { %v1545_v14 = vsel %vm904_vm4, %v1544_v29, %v1543_v13  ;;  %v1523_v24 = vunpack.c.l.b16 %v1491_v55  ;;  %v9040_v0 = vadd.f32 %v1460_v18, %v1396_v21  ;;  %v1363_v25 = vpop.permute.xlu1 %1362  ;;  %v1431_v29 = vrot.slane %v8772_v58, 7 }
 0x54f   :  { %v1516_v52 = vunpack.c.l.b16 %v1484_v62  ;;  %v9043_v20 = vadd.f32 %v1453_v47, %v1389_v3  ;;  %v1397_v17 = vmul.f32 %v1363_v25, %v1317_v7  ;;  %v1319_v62 = vsub.f32 1.0, %v8923_v16 }
 0x550   :  { %v1546_v34 = vrot.slane %v1523_v24, 6  ;;  %v1349_v45 = vpop.permute.xlu0 %1348  ;;  %v1492_v8 = vpack.c.bf16 %v9040_v0, %v9040_v0 }
 0x551   :  { %v1534_v6 = vrot.slane %v1516_v52, 5  ;;  %v1390_v50 = vmul.f32 %v1349_v45, %v1310_v36  ;;  %v1485_v49 = vpack.c.bf16 %v9043_v20, %v9043_v20  ;;  %v9054_v40 = vadd.f32 %v1461_v63, %v1397_v17 }
 0x552   :  { %v1547_v61 = vsel %vm907_vm5, %v1546_v34, %v1545_v14  ;;  %v1524_v37 = vunpack.c.l.b16 %v1492_v8  ;;  %v1365_v22 = vpop.permute.xlu1 %1364  ;;  %v1463_v14 = vmul.f32 %v8923_v16, %v1431_v29 }
 0x553   :  { %v1535_v10 = vsel %vm910_vm6, %v1534_v6, %v1533_v31  ;;  %v9058_v12 = vadd.f32 %v1454_v28, %v1390_v50  ;;  %v1517_v43 = vunpack.c.l.b16 %v1485_v49  ;;  %v1493_v38 = vpack.c.bf16 %v9054_v40, %v9054_v40 }
 0x554   :  { %v1398_v59 = vmul.f32 %v1365_v22, %v1318_v54  ;;  %v1351_v18 = vpop.permute.xlu0 %1350  ;;  %v1548_v33 = vrot.slane %v1524_v37, 5 }
 0x555   :  { %v1486_v4 = vpack.c.bf16 %v9058_v12, %v9058_v12  ;;  %v1391_v60 = vmul.f32 %v1351_v18, %v1311_v56  ;;  %v1536_v55 = vrot.slane %v1517_v43, 4  ;;  %v1525_v31 = vunpack.c.l.b16 %v1493_v38 }
 0x556   :  { %v9070_v32 = vadd.f32 %v1462_v46, %v1398_v59  ;;  %v1549_v42 = vsel %vm910_vm6, %v1548_v33, %v1547_v61  ;;  %v1367_v21 = vpop.permute.xlu1 %1366 }
 0x557   :  { %v1518_v57 = vunpack.c.l.b16 %v1486_v4  ;;  %v9073_v13 = vadd.f32 %v1455_v11, %v1391_v60  ;;  %v1537_v47 = vsel %vm913_vm7, %v1536_v55, %v1535_v10  ;;  %v1550_v44 = vrot.slane %v1525_v31, 4  ;;  %v1605_v31 = vld [vmem:[#allocation2 + $0x8] sm:$0x2] }
 0x558   :  { %v1494_v48 = vpack.c.bf16 %v9070_v32, %v9070_v32  ;;  %v1399_v24 = vmul.f32 %v1367_v21, %v1319_v62  ;;  %v1604_v62 = vld [vmem:[#allocation2 + $0x4] sm:$0x2] }
 0x559   :  { %v1538_v39 = vrot.slane %v1518_v57, 3  ;;  %v1487_v58 = vpack.c.bf16 %v9073_v13, %v9073_v13  ;;  %v1551_v3 = vsel %vm913_vm7, %v1550_v44, %v1549_v42  ;;  %v9123_v42 = vunpack.c.l.bf16 %v1605_v31 }
 0x55a   :  { %v1526_v7 = vunpack.c.l.b16 %v1494_v48  ;;  %v9083_v52 = vadd.f32 %v1463_v14, %v1399_v24  ;;  %v1606_v24 = vld [vmem:[#allocation2 + $0xc] sm:$0x2] }
 0x55b   :  { %v1519_v51 = vunpack.c.l.b16 %v1487_v58  ;;  %v1539_v25 = vsel %vm916_vm8, %v1538_v39, %v1537_v47  ;;  %v1603_v47 = vld [vmem:[#allocation2] sm:$0x2]  ;;  %v9129_v39 = vunpack.c.l.bf16 %v1604_v62  ;;  %v1607_v58 = vld [vmem:[#allocation2 + $0x10] sm:$0x2] }
 0x55c   :  { %v1552_v36 = vrot.slane %v1526_v7, 3  ;;  %v1495_v63 = vpack.c.bf16 %v9083_v52, %v9083_v52  ;;  %v9131_v14 = vunpack.c.l.bf16 %v1603_v47  ;;  %v1609_v47 = vld [vmem:[#allocation2 + $0x18] sm:$0x2] }
 0x55d   :  { %v1540_v34 = vrot.slane %v1519_v51, 2 }
 0x55e   :  { %v1553_v17 = vsel %vm916_vm8, %v1552_v36, %v1551_v3  ;;  %v1527_v45 = vunpack.c.l.b16 %v1495_v63  ;;  %v9137_v36 = vunpack.c.l.bf16 %v1607_v58  ;;  %v9139_v63 = vunpack.c.l.bf16 %v1606_v24  ;;  %v1616_v58 = vld [vmem:[#allocation2 + $0x34] sm:$0x2] }
 0x55f   :  { %v1541_v6 = vsel %vm919_vm9, %v1540_v34, %v1539_v25  ;;  %v1612_v34 = vld [vmem:[#allocation2 + $0x24] sm:$0x2] }
 0x560   :  { %v1554_v16 = vrot.slane %v1527_v45, 2 }
 0x562   :  { %v1555_v8 = vsel %vm919_vm9, %v1554_v16, %v1553_v17  ;;  %v1613_v16 = vld [vmem:[#allocation2 + $0x28] sm:$0x2] }
 0x563   :  { %v1556_v28 = vpack.c.b16 %v1555_v8, %v1541_v6 }
 0x565   :  { %1557 = vrot.lane.b32.xlu0 %v1556_v28, %s8272_s4 }
 0x5d7   :  { %v1558_v50 = vpop.permute.xlu0 %1557 }
 0x5d8   :  { %7293 = vmatmul.mubr.msk.bf16.vlgmr.msra.gmra.mrb[8].mxu1 %vm146_vm1, %v1558_v50  ;;  %v9144_v50 = vunpack.c.l.bf16 %v1612_v34 }
 0x5d9   :  { %7297 = vmatpush3.bf16.msra.mxu1 %v8794_v1  ;;  %7300 = vmatprep.mubr.msk.bf16.mxu1 %vm8269_vm0, %v11502_v5 }
 0x5da   :  { %7298 = vmatprep.subr.bf16.mxu1 %v11502_v5 }
 0x5dd   :  { %7299 = vmatpush3.bf16.msra.mxu1 %v8803_v19 }
 0x5de   :  { %7312 = vmatprep.subr.bf16.mxu1 %v11502_v5 }
 0x6ab   :  { %v9099_v61 = vpop.f32.mrb[8].mxu1 }
 0x6ac   :  { %v7294_v49 = vpop.f32.mrb[9].mxu1  ;;  %v1779_v37 = vadd.f32 %v9099_v61, %v8436_v15  ;;  %v1669_v57 = vadd.f32 %v9123_v42, %v9099_v61  ;;  %v1638_v44 = vrot.slane %v9099_v61, 7  ;;  %v1637_v48 = vrot.slane %v9099_v61, 6 }
 0x6ad   :  { %v9101_v54 = vpop.f32.mrb[10].mxu1  ;;  %v1640_v3 = vrot.slane %v9099_v61, 2  ;;  %v1639_v51 = vrot.slane %v9099_v61, 1  ;;  %v1608_v49 = vld [vmem:[#allocation2 + $0x14] sm:$0x2] }
 0x6ae   :  { %v7295_v10 = vpop.f32.mrb[11].mxu1  ;;  %1801 = vrot.lane.b32.xlu1 %v1779_v37, %s8271_s0  ;;  %v1784_v1 = vrot.slane %v1779_v37, 7  ;;  %v1783_v22 = vrot.slane %v1779_v37, 6  ;;  %v1780_v19 = vadd.f32 %v9101_v54, %v8436_v15  ;;  %v1786_v56 = vrot.slane %v1779_v37, 2 }
 0x6af   :  { %v1785_v43 = vrot.slane %v1779_v37, 1  ;;  %v1787_v59 = vrot.slane %v1779_v37, 3  ;;  %v1788_v11 = vrot.slane %v1779_v37, 4  ;;  %v1789_v29 = vrot.slane %v1779_v37, 5 }
 0x6b0   :  { %1799 = vrot.lane.b32.xlu0 %v1784_v1, %s8271_s0  ;;  %v1791_v38 = vrot.slane %v1780_v19, 7  ;;  %v1792_v46 = vrot.slane %v1780_v19, 1  ;;  %v1793_v18 = vrot.slane %v1780_v19, 2  ;;  %v1790_v33 = vrot.slane %v1780_v19, 6 }
 0x6b1   :  { %v1794_v4 = vrot.slane %v1780_v19, 3  ;;  %v1795_v60 = vrot.slane %v1780_v19, 4  ;;  %v1796_v55 = vrot.slane %v1780_v19, 5  ;;  %v7050_v21 = vmul.f32 -1.442695, %v1669_v57 }
 0x6b2   :  { %1797 = vrot.lane.b32.xlu1 %v1783_v22, %s8271_s0  ;;  %v1668_v7 = vadd.f32 %v1638_v44, %v9129_v39  ;;  %v1667_v25 = vadd.f32 %v1637_v48, %v9131_v14  ;;  %v1645_v17 = vrot.slane %v9101_v54, 7  ;;  %v1671_v45 = vadd.f32 %v1640_v3, %v9137_v36 }
 0x6b3   :  { %7642 = vpow2.f32 %v7050_v21  ;;  %v1670_v8 = vadd.f32 %v1639_v51, %v9139_v63  ;;  %v9146_v10 = vunpack.c.l.bf16 %v1613_v16  ;;  %v1641_v1 = vrot.slane %v9099_v61, 3 }
 0x6b4   :  { %1805 = vrot.lane.b32.xlu0 %v1786_v56, %s8271_s0  ;;  %v7049_v6 = vmul.f32 -1.442695, %v1668_v7  ;;  %v7048_v28 = vmul.f32 -1.442695, %v1667_v25  ;;  %v1676_v37 = vadd.f32 %v1645_v17, %v9144_v50  ;;  %v7052_v22 = vmul.f32 -1.442695, %v1671_v45 }
 0x6b5   :  { %v1642_v48 = vrot.slane %v9099_v61, 4  ;;  %v1648_v7 = vrot.slane %v9101_v54, 3  ;;  %v9169_v25 = vunpack.c.l.bf16 %v1609_v47  ;;  %v1610_v45 = vld [vmem:[#allocation2 + $0x1c] sm:$0x2] }
 0x6b6   :  { %1803 = vrot.lane.b32.xlu1 %v1785_v43, %s8271_s0  ;;  %7644 = vpow2.f32 %v7049_v6  ;;  %v7051_v43 = vmul.f32 -1.442695, %v1670_v8  ;;  %v9171_v6 = vunpack.c.l.bf16 %v1616_v58  ;;  %v1643_v8 = vrot.slane %v9099_v61, 5 }
 0x6b7   :  { %7646 = vpow2.f32 %v7048_v28  ;;  %v1673_v28 = vadd.f32 %v1642_v48, %v9169_v25 }
 0x6b8   :  { %1815 = vrot.lane.b32.xlu0 %v1791_v38, %s8271_s0  ;;  %v1646_v38 = vrot.slane %v9101_v54, 1  ;;  %7648 = vpow2.f32 %v7052_v22  ;;  %v1680_v22 = vadd.f32 %v1648_v7, %v9171_v6 }
 0x6b9   :  { %7650 = vpow2.f32 %v7051_v43 }
 0x6ba   :  { %1817 = vrot.lane.b32.xlu1 %v1780_v19, %s8271_s0  ;;  %v1614_v19 = vld [vmem:[#allocation2 + $0x2c] sm:$0x2] }
 0x6bc   :  { %1819 = vrot.lane.b32.xlu0 %v1792_v46, %s8271_s0  ;;  %v1677_v46 = vadd.f32 %v9146_v10, %v9101_v54 }
 0x6bd   :  { %v7643_v56 = vpop.eup %7642 }
 0x6be   :  { %1807 = vrot.lane.b32.xlu1 %v1787_v59, %s8271_s0  ;;  %v9153_v59 = vunpack.c.l.bf16 %v1608_v49  ;;  %v1733_v31 = vadd.f32 1.0, %v7643_v56  ;;  %v7058_v21 = vmul.f32 -1.442695, %v1677_v46  ;;  %v1617_v49 = vld [vmem:[#allocation2 + $0x38] sm:$0x2]  ;;  %v9177_v56 = vunpack.c.l.bf16 %v1610_v45 }
 0x6bf   :  { %v9179_v46 = vunpack.c.l.bf16 %v1617_v49 }
 0x6c0   :  { %1821 = vrot.lane.b32.xlu0 %v1793_v18, %s8271_s0  ;;  %v1611_v18 = vld [vmem:[#allocation2 + $0x20] sm:$0x2]  ;;  %v7645_v17 = vpop.eup %7644  ;;  %v1674_v61 = vadd.f32 %v1643_v8, %v9177_v56 }
 0x6c1   :  { %v9160_v57 = vunpack.c.l.bf16 %v1611_v18  ;;  %v7647_v16 = vpop.eup %7646  ;;  %v1732_v43 = vadd.f32 1.0, %v7645_v17  ;;  %11506 = vst [vmem:[#allocation4_spill] sm:$0xff] %v9179_v46 }
 0x6c2   :  { %1813 = vrot.lane.b32.xlu1 %v1790_v33, %s8271_s0  ;;  %v1615_v33 = vld [vmem:[#allocation2 + $0x30] sm:$0x2]  ;;  %v1731_v18 = vadd.f32 1.0, %v7647_v16  ;;  %v7055_v7 = vmul.f32 -1.442695, %v1674_v61 }
 0x6c3   :  { %v9163_v44 = vunpack.c.l.bf16 %v1615_v33 }
 0x6c4   :  { %1823 = vrot.lane.b32.xlu0 %v1794_v4, %s8271_s0  ;;  %v9155_v4 = vunpack.c.l.bf16 %v1614_v19 }
 0x6c6   :  { %1809 = vrot.lane.b32.xlu1 %v1788_v11, %s8271_s0  ;;  %v1644_v11 = vrot.slane %v9101_v54, 6  ;;  %v1678_v62 = vadd.f32 %v1646_v38, %v9155_v4  ;;  %v7649_v38 = vpop.eup %7648 }
 0x6c7   :  { %v7651_v33 = vpop.eup %7650 }
 0x6c8   :  { %1825 = vrot.lane.b32.xlu0 %v1795_v60, %s8271_s0  ;;  %v7057_v60 = vmul.f32 -1.442695, %v1676_v37  ;;  %v1675_v24 = vadd.f32 %v1644_v11, %v9160_v57  ;;  %v7059_v34 = vmul.f32 -1.442695, %v1678_v62  ;;  %v7054_v11 = vmul.f32 -1.442695, %v1673_v28 }
 0x6ca   :  { %1811 = vrot.lane.b32.xlu1 %v1789_v29, %s8271_s0  ;;  %v1672_v29 = vadd.f32 %v1641_v1, %v9153_v59  ;;  %7652 = vpow2.f32 %v7057_v60  ;;  %v7056_v37 = vmul.f32 -1.442695, %v1675_v24  ;;  %v1649_v1 = vrot.slane %v9101_v54, 4  ;;  %v1618_v60 = vld [vmem:[#allocation2 + $0x3c] sm:$0x2] }
 0x6cb   :  { %7654 = vrcp.f32 %v1733_v31  ;;  %v7061_v31 = vmul.f32 -1.442695, %v1680_v22  ;;  %v9186_v48 = vunpack.c.l.bf16 %v1618_v60  ;;  %v1734_v24 = vadd.f32 1.0, %v7651_v33 }
 0x6cc   :  { %1827 = vrot.lane.b32.xlu0 %v1796_v55, %s8271_s0  ;;  %v1647_v55 = vrot.slane %v9101_v54, 2  ;;  %v7053_v3 = vmul.f32 -1.442695, %v1672_v29  ;;  %7656 = vpow2.f32 %v7058_v21  ;;  %v1650_v29 = vrot.slane %v9101_v54, 5 }
 0x6cd   :  { %v1735_v21 = vadd.f32 1.0, %v7649_v38  ;;  %11507 = vst [vmem:[#allocation5_spill] sm:$0xff] %v9186_v48 }
 0x6ce   :  { %v1679_v51 = vadd.f32 %v1647_v55, %v9163_v44  ;;  %7658 = vpow2.f32 %v7053_v3  ;;  %v1681_v55 = vadd.f32 %v1649_v1, %v9179_v46  ;;  %v1682_v54 = vadd.f32 %v1650_v29, %v9186_v48 }
 0x6cf   :  { %7660 = vpow2.f32 %v7059_v34 }
 0x6d0   :  { %v7060_v19 = vmul.f32 -1.442695, %v1679_v51  ;;  %7662 = vpow2.f32 %v7056_v37  ;;  %v7062_v34 = vmul.f32 -1.442695, %v1681_v55  ;;  %v7063_v28 = vmul.f32 -1.442695, %v1682_v54 }
 0x6d2   :  { %7664 = vpow2.f32 %v7060_v19 }
 0x6d3   :  { %7666 = vrcp.f32 %v1732_v43 }
 0x6d4   :  { %v7653_v62 = vpop.eup %7652  ;;  %7668 = vrcp.f32 %v1731_v18 }
 0x6d5   :  { %v9184_v47 = vpop.eup %7654  ;;  %7670 = vpow2.f32 %v7054_v11  ;;  %v1740_v17 = vadd.f32 1.0, %v7653_v62 }
 0x6d6   :  { %v7657_v3 = vpop.eup %7656  ;;  %7672 = vpow2.f32 %v7061_v31 }
 0x6d7   :  { %7674 = vrcp.f32 %v1735_v21  ;;  %v1741_v16 = vadd.f32 1.0, %v7657_v3 }
 0x6d8   :  { %v7659_v45 = vpop.eup %7658  ;;  %7676 = vrcp.f32 %v1734_v24 }
 0x6d9   :  { %v7661_v8 = vpop.eup %7660  ;;  %7678 = vpow2.f32 %v7055_v7  ;;  %v1736_v37 = vadd.f32 1.0, %v7659_v45 }
 0x6da   :  { %7680 = vpow2.f32 %v7062_v34  ;;  %v7663_v49 = vpop.eup %7662  ;;  %v1742_v22 = vadd.f32 1.0, %v7661_v8 }
 0x6db   :  { %7682 = vrcp.f32 %v1740_v17  ;;  %v1739_v55 = vadd.f32 1.0, %v7663_v49 }
 0x6dc   :  { %v7665_v1 = vpop.eup %7664  ;;  %7684 = vrcp.f32 %v1741_v16 }
 0x6dd   :  { %v9191_v19 = vpop.eup %7666  ;;  %7686 = vpow2.f32 %v7063_v28  ;;  %v1743_v60 = vadd.f32 1.0, %v7665_v1 }
 0x6de   :  { %v9193_v43 = vpop.eup %7668  ;;  %7688 = vrcp.f32 %v1736_v37 }
 0x6df   :  { %v7671_v33 = vpop.eup %7670  ;;  %7690 = vrcp.f32 %v1742_v22 }
 0x6e0   :  { %v7673_v29 = vpop.eup %7672  ;;  %7692 = vrcp.f32 %v1743_v60  ;;  %v1737_v34 = vadd.f32 1.0, %v7671_v33 }
 0x6e1   :  { %v9197_v31 = vpop.eup %7674  ;;  %7694 = vrcp.f32 %v1739_v55 }
 0x6e2   :  { %v9201_v62 = vpop.eup %7676 }
 0x6e3   :  { %v7679_v24 = vpop.eup %7678 }
 0x6e4   :  { %v7681_v54 = vpop.eup %7680  ;;  %v1738_v22 = vadd.f32 1.0, %v7679_v24 }
 0x6e5   :  { %v9205_v17 = vpop.eup %7682  ;;  %v1745_v37 = vadd.f32 1.0, %v7681_v54 }
 0x6e6   :  { %v9209_v45 = vpop.eup %7684 }
 0x6e7   :  { %v7687_v1 = vpop.eup %7686 }
 0x720   :  { %v1802_v58 = vpop.permute.xlu1 %1801 }
 0x721   :  { %v1847_v51 = vmul.f32 %v9184_v47, %v1802_v58 }
 0x722   :  { %v1800_v38 = vpop.permute.xlu0 %1799 }
 0x723   :  { %1881 = vrot.lane.b32.xlu1 %v1847_v51, %s8271_s0  ;;  %v1846_v61 = vmul.f32 %v9191_v19, %v1800_v38  ;;  %v1744_v51 = vadd.f32 1.0, %v7673_v29  ;;  %v9213_v38 = vpop.eup %7688  ;;  %v1746_v29 = vadd.f32 1.0, %v7687_v1 }
 0x724   :  { %v1798_v18 = vpop.permute.xlu1 %1797 }
 0x725   :  { %v1845_v11 = vmul.f32 %v9193_v43, %v1798_v18  ;;  %1879 = vrot.lane.b32.xlu0 %v1846_v61, %s8271_s0  ;;  %7696 = vrcp.f32 %v1744_v51  ;;  %v9217_v18 = vpop.eup %7690 }
 0x726   :  { %v1806_v21 = vpop.permute.xlu0 %1805  ;;  %7698 = vrcp.f32 %v1737_v34  ;;  %v9221_v55 = vpop.eup %7692 }
 0x727   :  { %1877 = vrot.lane.b32.xlu1 %v1845_v11, %s8271_s0  ;;  %v1849_v3 = vmul.f32 %v9197_v31, %v1806_v21  ;;  %7700 = vrcp.f32 %v1745_v37  ;;  %v9225_v21 = vpop.eup %7694 }
 0x728   :  { %v1804_v58 = vpop.permute.xlu1 %1803  ;;  %7702 = vrcp.f32 %v1738_v22 }
 0x729   :  { %v1848_v7 = vmul.f32 %v9201_v62, %v1804_v58  ;;  %1885 = vrot.lane.b32.xlu0 %v1849_v3, %s8271_s0  ;;  %7704 = vrcp.f32 %v1746_v29 }
 0x72a   :  { %v1816_v16 = vpop.permute.xlu0 %1815 }
 0x72b   :  { %1883 = vrot.lane.b32.xlu1 %v1848_v7, %s8271_s0  ;;  %v1854_v28 = vmul.f32 %v9205_v17, %v1816_v16 }
 0x72c   :  { %v1818_v8 = vpop.permute.xlu1 %1817 }
 0x72d   :  { %v1855_v49 = vmul.f32 %v9209_v45, %v1818_v8  ;;  %1895 = vrot.lane.b32.xlu0 %v1854_v28, %s8271_s0 }
 0x72e   :  { %v1820_v33 = vpop.permute.xlu0 %1819 }
 0x72f   :  { %1897 = vrot.lane.b32.xlu1 %v1855_v49, %s8271_s0  ;;  %v1856_v11 = vmul.f32 %v9217_v18, %v1820_v33  ;;  %v9229_v51 = vpop.eup %7696 }
 0x730   :  { %v1808_v61 = vpop.permute.xlu1 %1807  ;;  %v9233_v54 = vpop.eup %7698 }
 0x731   :  { %v1850_v60 = vmul.f32 %v9213_v38, %v1808_v61  ;;  %1899 = vrot.lane.b32.xlu0 %v1856_v11, %s8271_s0  ;;  %v9237_v49 = vpop.eup %7700 }
 0x732   :  { %v1822_v58 = vpop.permute.xlu0 %1821  ;;  %v9241_v37 = vpop.eup %7702 }
 0x733   :  { %1887 = vrot.lane.b32.xlu1 %v1850_v60, %s8271_s0  ;;  %v1857_v3 = vmul.f32 %v9221_v55, %v1822_v58  ;;  %v9247_v11 = vpop.eup %7704 }
 0x734   :  { %v1814_v24 = vpop.permute.xlu1 %1813 }
 0x735   :  { %v1853_v7 = vmul.f32 %v9225_v21, %v1814_v24  ;;  %1901 = vrot.lane.b32.xlu0 %v1857_v3, %s8271_s0 }
 0x736   :  { %v1824_v34 = vpop.permute.xlu0 %1823 }
 0x737   :  { %1893 = vrot.lane.b32.xlu1 %v1853_v7, %s8271_s0  ;;  %v1858_v8 = vmul.f32 %v9229_v51, %v1824_v34 }
 0x738   :  { %v1810_v16 = vpop.permute.xlu1 %1809 }
 0x739   :  { %v1851_v28 = vmul.f32 %v9233_v54, %v1810_v16  ;;  %1903 = vrot.lane.b32.xlu0 %v1858_v8, %s8271_s0 }
 0x73a   :  { %v1826_v1 = vpop.permute.xlu0 %1825 }
 0x73b   :  { %1889 = vrot.lane.b32.xlu1 %v1851_v28, %s8271_s0  ;;  %v1859_v33 = vmul.f32 %v9237_v49, %v1826_v1 }
 0x73c   :  { %v1812_v22 = vpop.permute.xlu1 %1811 }
 0x73d   :  { %v1852_v61 = vmul.f32 %v9241_v37, %v1812_v22  ;;  %1905 = vrot.lane.b32.xlu0 %v1859_v33, %s8271_s0 }
 0x73e   :  { %v1828_v60 = vpop.permute.xlu0 %1827 }
 0x73f   :  { %1891 = vrot.lane.b32.xlu1 %v1852_v61, %s8271_s0  ;;  %v1860_v29 = vmul.f32 %v9247_v11, %v1828_v60 }
 0x741   :  { %1907 = vrot.lane.b32.xlu0 %v1860_v29, %s8271_s0 }
 0x795   :  { %v1882_v58 = vpop.permute.xlu1 %1881 }
 0x796   :  { %v1927_v24 = vadd.f32 %v1882_v58, %v9123_v42 }
 0x797   :  { %v1880_v3 = vpop.permute.xlu0 %1879 }
 0x798   :  { %7706 = vtanh.f32 %v1927_v24  ;;  %v1926_v34 = vadd.f32 %v1880_v3, %v9129_v39 }
 0x799   :  { %v1878_v7 = vpop.permute.xlu1 %1877 }
 0x79a   :  { %v1925_v16 = vadd.f32 %v1878_v7, %v9131_v14  ;;  %7708 = vtanh.f32 %v1926_v34 }
 0x79b   :  { %v1886_v28 = vpop.permute.xlu0 %1885 }
 0x79c   :  { %7710 = vtanh.f32 %v1925_v16  ;;  %v1929_v22 = vadd.f32 %v1886_v28, %v9137_v36 }
 0x79d   :  { %v1884_v1 = vpop.permute.xlu1 %1883 }
 0x79e   :  { %v1928_v33 = vadd.f32 %v1884_v1, %v9139_v63  ;;  %7712 = vtanh.f32 %v1929_v22 }
 0x79f   :  { %v1896_v61 = vpop.permute.xlu0 %1895 }
 0x7a0   :  { %7714 = vtanh.f32 %v1928_v33  ;;  %v1934_v29 = vadd.f32 %v1896_v61, %v9144_v50 }
 0x7a1   :  { %v1898_v60 = vpop.permute.xlu1 %1897 }
 0x7a2   :  { %v7707_v8 = vpop.eup %7706  ;;  %v1935_v58 = vadd.f32 %v1898_v60, %v9146_v10  ;;  %7716 = vtanh.f32 %v1934_v29 }
 0x7a3   :  { %1993 = vrot.lane.b32.xlu1 %v7707_v8, %s8272_s4  ;;  %v1900_v24 = vpop.permute.xlu0 %1899 }
 0x7a4   :  { %7718 = vtanh.f32 %v1935_v58  ;;  %v7709_v7 = vpop.eup %7708  ;;  %v1936_v34 = vadd.f32 %v1900_v24, %v9155_v4 }
 0x7a5   :  { %v1888_v3 = vpop.permute.xlu1 %1887  ;;  %1991 = vrot.lane.b32.xlu0 %v7709_v7, %s8272_s4 }
 0x7a6   :  { %v1930_v16 = vadd.f32 %v1888_v3, %v9153_v59  ;;  %v7711_v8 = vpop.eup %7710  ;;  %7720 = vtanh.f32 %v1936_v34 }
 0x7a7   :  { %1989 = vrot.lane.b32.xlu1 %v7711_v8, %s8272_s4  ;;  %v1902_v28 = vpop.permute.xlu0 %1901 }
 0x7a8   :  { %7722 = vtanh.f32 %v1930_v16  ;;  %v7713_v22 = vpop.eup %7712  ;;  %v1937_v33 = vadd.f32 %v1902_v28, %v9163_v44 }
 0x7a9   :  { %v1894_v1 = vpop.permute.xlu1 %1893  ;;  %1997 = vrot.lane.b32.xlu0 %v7713_v22, %s8272_s4 }
 0x7aa   :  { %v1933_v61 = vadd.f32 %v1894_v1, %v9160_v57  ;;  %v7715_v60 = vpop.eup %7714  ;;  %7724 = vtanh.f32 %v1937_v33 }
 0x7ab   :  { %1995 = vrot.lane.b32.xlu1 %v7715_v60, %s8272_s4  ;;  %v1904_v29 = vpop.permute.xlu0 %1903 }
 0x7ac   :  { %7726 = vtanh.f32 %v1933_v61  ;;  %v7717_v24 = vpop.eup %7716  ;;  %v1938_v3 = vadd.f32 %v1904_v29, %v9171_v6 }
 0x7ad   :  { %v1890_v58 = vpop.permute.xlu1 %1889  ;;  %2007 = vrot.lane.b32.xlu0 %v7717_v24, %s8272_s4 }
 0x7ae   :  { %v1931_v7 = vadd.f32 %v1890_v58, %v9169_v25  ;;  %v7719_v34 = vpop.eup %7718  ;;  %7728 = vtanh.f32 %v1938_v3 }
 0x7af   :  { %2009 = vrot.lane.b32.xlu1 %v7719_v34, %s8272_s4  ;;  %v1906_v16 = vpop.permute.xlu0 %1905 }
 0x7b0   :  { %7730 = vtanh.f32 %v1931_v7  ;;  %v7721_v28 = vpop.eup %7720  ;;  %v1939_v1 = vadd.f32 %v1906_v16, %v9179_v46 }
 0x7b1   :  { %v1892_v8 = vpop.permute.xlu1 %1891  ;;  %2011 = vrot.lane.b32.xlu0 %v7721_v28, %s8272_s4  ;;  %v1959_v28 = vsub.f32 1.0, %v9184_v47 }
 0x7b2   :  { %v1932_v22 = vadd.f32 %v1892_v8, %v9177_v56  ;;  %v7723_v33 = vpop.eup %7722  ;;  %7732 = vtanh.f32 %v1939_v1  ;;  %v2070_v1 = vrot.slane %v8970_v23, 7 }
 0x7b3   :  { %1999 = vrot.lane.b32.xlu1 %v7723_v33, %s8272_s4  ;;  %v1908_v61 = vpop.permute.xlu0 %1907 }
 0x7b4   :  { %7734 = vtanh.f32 %v1932_v22  ;;  %v7725_v60 = vpop.eup %7724  ;;  %v1940_v29 = vadd.f32 %v1908_v61, %v9186_v48  ;;  %v2071_v22 = vrot.slane %v8998_v2, 7  ;;  %v1958_v61 = vsub.f32 1.0, %v9191_v19 }
 0x7b5   :  { %2013 = vrot.lane.b32.xlu0 %v7725_v60, %s8272_s4  ;;  %v2069_v60 = vrot.slane %v8980_v27, 7  ;;  %v2073_v2 = vrot.slane %v9025_v53, 7  ;;  %v1961_v27 = vsub.f32 1.0, %v9197_v31 }
 0x7b6   :  { %v7727_v58 = vpop.eup %7726  ;;  %7736 = vtanh.f32 %v1940_v29 }
 0x7b7   :  { %2005 = vrot.lane.b32.xlu1 %v7727_v58, %s8272_s4  ;;  %v1957_v58 = vsub.f32 1.0, %v9193_v43  ;;  %v2101_v23 = vmul.f32 %v9193_v43, %v2069_v60  ;;  %v2078_v43 = vrot.slane %v9012_v9, 7  ;;  %v2080_v60 = vrot.slane %v9021_v26, 7 }
 0x7b8   :  { %v7729_v24 = vpop.eup %7728  ;;  %v1966_v26 = vsub.f32 1.0, %v9205_v17 }
 0x7b9   :  { %2015 = vrot.lane.b32.xlu0 %v7729_v24, %s8272_s4  ;;  %v2103_v24 = vmul.f32 %v9184_v47, %v2071_v22  ;;  %v2079_v47 = vrot.slane %v9007_v30, 7  ;;  %v2105_v22 = vmul.f32 %v9197_v31, %v2073_v2  ;;  %v2074_v31 = vrot.slane %v9043_v20, 7 }
 0x7ba   :  { %v7731_v3 = vpop.eup %7730  ;;  %v2082_v2 = vrot.slane %v9054_v40, 7 }
 0x7bb   :  { %2001 = vrot.lane.b32.xlu1 %v7731_v3, %s8272_s4  ;;  %v2102_v3 = vmul.f32 %v9191_v19, %v2070_v1 }
 0x7bc   :  { %v7733_v7 = vpop.eup %7732 }
 0x7bd   :  { %2017 = vrot.lane.b32.xlu0 %v7733_v7, %s8272_s4 }
 0x7be   :  { %v7735_v34 = vpop.eup %7734 }
 0x7bf   :  { %2003 = vrot.lane.b32.xlu1 %v7735_v34, %s8272_s4 }
 0x7c0   :  { %v7737_v16 = vpop.eup %7736 }
 0x7c1   :  { %2019 = vrot.lane.b32.xlu0 %v7737_v16, %s8272_s4  ;;  %v2072_v16 = vrot.slane %v8975_v35, 7  ;;  %v1960_v35 = vsub.f32 1.0, %v9201_v62 }
 0x7c3   :  { %v2104_v30 = vmul.f32 %v9201_v62, %v2072_v16  ;;  %v2075_v62 = vrot.slane %v9058_v12, 7 }
 0x815   :  { %v1994_v8 = vpop.permute.xlu1 %1993 }
 0x816   :  { %v2039_v33 = vmul.f32 %v1994_v8, %v1959_v28 }
 0x817   :  { %v1992_v29 = vpop.permute.xlu0 %1991 }
 0x818   :  { %v2038_v7 = vmul.f32 %v1992_v29, %v1958_v61  ;;  %v9294_v8 = vadd.f32 %v2103_v24, %v2039_v33 }
 0x819   :  { %v1990_v34 = vpop.permute.xlu1 %1989 }
 0x81a   :  { %v2037_v48 = vmul.f32 %v1990_v34, %v1957_v58  ;;  %v9296_v28 = vadd.f32 %v2102_v3, %v2038_v7  ;;  %v2081_v58 = vrot.slane %v9040_v0, 7  ;;  %v2135_v9 = vpack.c.bf16 %v9294_v8, %v9294_v8 }
 0x81b   :  { %v1998_v1 = vpop.permute.xlu0 %1997  ;;  %v2083_v0 = vrot.slane %v9070_v32, 7  ;;  %v2110_v32 = vmul.f32 %v9205_v17, %v2078_v43 }
 0x81c   :  { %v9301_v19 = vadd.f32 %v2101_v23, %v2037_v48  ;;  %v2134_v53 = vpack.c.bf16 %v9296_v28, %v9296_v28  ;;  %v2041_v33 = vmul.f32 %v1998_v1, %v1961_v27 }
 0x81d   :  { %v1996_v61 = vpop.permute.xlu1 %1995 }
 0x81e   :  { %v2133_v29 = vpack.c.bf16 %v9301_v19, %v9301_v19  ;;  %v2040_v48 = vmul.f32 %v1996_v61, %v1960_v35  ;;  %v2166_v24 = vunpack.c.l.b16 %v2134_v53  ;;  %v9315_v3 = vadd.f32 %v2105_v22, %v2041_v33 }
 0x81f   :  { %v2008_v23 = vpop.permute.xlu0 %2007  ;;  %v2076_v22 = vrot.slane %v9073_v13, 7  ;;  %v2167_v61 = vunpack.c.l.b16 %v2135_v9  ;;  %v2106_v13 = vmul.f32 %v9213_v38, %v2074_v31 }
 0x820   :  { %11508 = vst [vmem:[#allocation6_spill] sm:$0xff] %v9315_v3  ;;  %v2165_v7 = vunpack.c.l.b16 %v2133_v29  ;;  %v9318_v34 = vadd.f32 %v2104_v30, %v2040_v48  ;;  %v2137_v16 = vpack.c.bf16 %v9315_v3, %v9315_v3  ;;  %v2182_v1 = vrot.slane %v2166_v24, 1 }
 0x821   :  { %v2010_v27 = vpop.permute.xlu1 %2009  ;;  %v2046_v53 = vmul.f32 %v2008_v23, %v1966_v26  ;;  %v1968_v30 = vsub.f32 1.0, %v9217_v18  ;;  %v1962_v26 = vsub.f32 1.0, %v9213_v38  ;;  %v1965_v38 = vsub.f32 1.0, %v9225_v21 }
 0x822   :  { %v2181_v35 = vrot.slane %v2165_v7, 2  ;;  %v2136_v20 = vpack.c.bf16 %v9318_v34, %v9318_v34  ;;  %v2169_v40 = vunpack.c.l.b16 %v2137_v16  ;;  %v1967_v7 = vsub.f32 1.0, %v9209_v45 }
 0x823   :  { %v2012_v48 = vpop.permute.xlu0 %2011  ;;  %v9337_v9 = vadd.f32 %v2110_v32, %v2046_v53  ;;  %v2112_v16 = vmul.f32 %v9217_v18, %v2080_v60  ;;  %v2113_v18 = vmul.f32 %v9221_v55, %v2081_v58 }
 0x824   :  { %v2183_v12 = vsel %vm901_vm3, %v2182_v1, %v2181_v35  ;;  %v2168_v29 = vunpack.c.l.b16 %v2136_v20  ;;  %v2048_v1 = vmul.f32 %v2012_v48, %v1968_v30  ;;  %v2187_v35 = vrot.slane %v2169_v40, 6 }
 0x825   :  { %v2184_v24 = vsel %vm904_vm4, %v2167_v61, %v2183_v12  ;;  %v2000_v23 = vpop.permute.xlu1 %1999  ;;  %v2047_v17 = vmul.f32 %v2010_v27, %v1967_v7  ;;  %v1969_v20 = vsub.f32 1.0, %v9221_v55  ;;  %v2111_v12 = vmul.f32 %v9209_v45, %v2079_v47 }
 0x826   :  { %v2185_v33 = vrot.slane %v2168_v29, 7  ;;  %v2042_v43 = vmul.f32 %v2000_v23, %v1962_v26  ;;  %v9343_v46 = vadd.f32 %v2112_v16, %v2048_v1  ;;  %v2142_v40 = vpack.c.bf16 %v9337_v9, %v9337_v9 }
 0x827   :  { %v2014_v3 = vpop.permute.xlu0 %2013  ;;  %v1970_v29 = vsub.f32 1.0, %v9229_v51  ;;  %v9356_v32 = vadd.f32 %v2111_v12, %v2047_v17  ;;  %v2114_v55 = vmul.f32 %v9229_v51, %v2082_v2  ;;  %v1971_v16 = vsub.f32 1.0, %v9237_v49 }
 0x828   :  { %v2186_v61 = vsel %vm907_vm5, %v2185_v33, %v2184_v24  ;;  %v9347_v53 = vadd.f32 %v2106_v13, %v2042_v43  ;;  %v2049_v60 = vmul.f32 %v2014_v3, %v1969_v20  ;;  %v11509_v33 = vrot.slane %v8994_v41, 7 }
 0x829   :  { %v2188_v31 = vsel %vm910_vm6, %v2187_v35, %v2186_v61  ;;  %v2006_v27 = vpop.permute.xlu1 %2005  ;;  %v2144_v58 = vpack.c.bf16 %v9343_v46, %v9343_v46  ;;  %v2107_v24 = vmul.f32 %v9233_v54, %v2075_v62  ;;  %v2174_v1 = vunpack.c.l.b16 %v2142_v40 }
 0x82a   :  { %v2109_v45 = vmul.f32 %v9225_v21, %v11509_v33  ;;  %v2045_v47 = vmul.f32 %v2006_v27, %v1965_v38  ;;  %v2138_v30 = vpack.c.bf16 %v9347_v53, %v9347_v53  ;;  %v9360_v48 = vadd.f32 %v2113_v18, %v2049_v60 }
 0x82b   :  { %v2016_v41 = vpop.permute.xlu0 %2015  ;;  %v1963_v21 = vsub.f32 1.0, %v9233_v54  ;;  %v2115_v35 = vmul.f32 %v9237_v49, %v2083_v0  ;;  %v2143_v17 = vpack.c.bf16 %v9356_v32, %v9356_v32  ;;  %v1964_v62 = vsub.f32 1.0, %v9241_v37 }
 0x82c   :  { %v9365_v3 = vadd.f32 %v2109_v45, %v2045_v47  ;;  %v2170_v7 = vunpack.c.l.b16 %v2138_v30  ;;  %v2145_v26 = vpack.c.bf16 %v9360_v48, %v9360_v48  ;;  %v2050_v13 = vmul.f32 %v2016_v41, %v1970_v29 }
 0x82d   :  { %v2002_v23 = vpop.permute.xlu1 %2001  ;;  %v2176_v20 = vunpack.c.l.b16 %v2144_v58  ;;  %v2108_v18 = vmul.f32 %v9241_v37, %v2076_v22  ;;  %v1972_v40 = vsub.f32 1.0, %v9247_v11  ;;  %v2196_v33 = vrot.slane %v2174_v1, 1 }
 0x82e   :  { %v2141_v51 = vpack.c.bf16 %v9365_v3, %v9365_v3  ;;  %v2043_v2 = vmul.f32 %v2002_v23, %v1963_v21  ;;  %v2189_v43 = vrot.slane %v2170_v7, 5  ;;  %v9377_v54 = vadd.f32 %v2114_v55, %v2050_v13 }
 0x82f   :  { %v2018_v38 = vpop.permute.xlu0 %2017  ;;  %v2177_v27 = vunpack.c.l.b16 %v2145_v26  ;;  %v2175_v30 = vunpack.c.l.b16 %v2143_v17  ;;  %v11510_v37 = vrot.slane %v9083_v52, 7 }
 0x830   :  { %v2173_v61 = vunpack.c.l.b16 %v2141_v51  ;;  %v9380_v12 = vadd.f32 %v2107_v24, %v2043_v2  ;;  %v2190_v60 = vsel %vm913_vm7, %v2189_v43, %v2188_v31  ;;  %v2146_v49 = vpack.c.bf16 %v9377_v54, %v9377_v54 }
 0x831   :  { %v2004_v0 = vpop.permute.xlu1 %2003  ;;  %v2051_v29 = vmul.f32 %v2018_v38, %v1971_v16  ;;  %v2116_v22 = vmul.f32 %v9247_v11, %v11510_v37  ;;  %v2199_v31 = vrot.slane %v2176_v20, 7  ;;  %v2201_v26 = vrot.slane %v2177_v27, 6 }
 0x832   :  { %v2195_v45 = vrot.slane %v2173_v61, 2  ;;  %v2139_v47 = vpack.c.bf16 %v9380_v12, %v9380_v12  ;;  %v2178_v55 = vunpack.c.l.b16 %v2146_v49  ;;  %v2044_v58 = vmul.f32 %v2004_v0, %v1964_v62 }
 0x833   :  { %v9393_v24 = vadd.f32 %v2115_v35, %v2051_v29  ;;  %v2020_v7 = vpop.permute.xlu0 %2019 }
 0x834   :  { %v2197_v41 = vsel %vm901_vm3, %v2196_v33, %v2195_v45  ;;  %v2171_v21 = vunpack.c.l.b16 %v2139_v47  ;;  %v9396_v23 = vadd.f32 %v2108_v18, %v2044_v58  ;;  %v2052_v16 = vmul.f32 %v2020_v7, %v1972_v40 }
 0x835   :  { %v2198_v13 = vsel %vm904_vm4, %v2175_v30, %v2197_v41  ;;  %v2203_v51 = vrot.slane %v2178_v55, 5  ;;  %v2147_v52 = vpack.c.bf16 %v9393_v24, %v9393_v24  ;;  %v9427_v30 = vld [vmem:[%s11496_s22 + $0x8] sm:$0xff]  }
 0x836   :  { %v2200_v1 = vsel %vm907_vm5, %v2199_v31, %v2198_v13  ;;  %v2191_v2 = vrot.slane %v2171_v21, 4  ;;  %v2140_v35 = vpack.c.bf16 %v9396_v23, %v9396_v23  ;;  %v9404_v17 = vadd.f32 %v2116_v22, %v2052_v16 }
 0x837   :  { %v2202_v11 = vsel %vm910_vm6, %v2201_v26, %v2200_v1  ;;  %v2179_v62 = vunpack.c.l.b16 %v2147_v52 }
 0x838   :  { %v2204_v43 = vsel %vm913_vm7, %v2203_v51, %v2202_v11  ;;  %v2192_v20 = vsel %vm916_vm8, %v2191_v2, %v2190_v60  ;;  %v2172_v61 = vunpack.c.l.b16 %v2140_v35  ;;  %v2148_v38 = vpack.c.bf16 %v9404_v17, %v9404_v17  ;;  %v9418_v60 = vld [vmem:[%s11496_s22] sm:$0xff]  }
 0x839   :  { %v2205_v18 = vrot.slane %v2179_v62, 4 }
 0x83a   :  { %v2193_v27 = vrot.slane %v2172_v61, 3  ;;  %v2180_v49 = vunpack.c.l.b16 %v2148_v38 }
 0x83b   :  { %v2206_v0 = vsel %vm916_vm8, %v2205_v18, %v2204_v43 }
 0x83c   :  { %v2207_v40 = vrot.slane %v2180_v49, 3  ;;  %v2194_v33 = vsel %vm919_vm9, %v2193_v27, %v2192_v20 }
 0x83e   :  { %v2208_v45 = vsel %vm919_vm9, %v2207_v40, %v2206_v0 }
 0x83f   :  { %v2209_v47 = vpack.c.b16 %v2208_v45, %v2194_v33 }
 0x841   :  { %2210 = vrot.lane.b32.xlu1 %v2209_v47, %s8272_s4 }
 0x8b3   :  { %v2211_v29 = vpop.permute.xlu1 %2210 }
 0x8b4   :  { %7301 = vmatmul.mubr.msk.bf16.vlgmr.msra.gmra.mrb[12].mxu1 %vm146_vm1, %v2211_v29 }
 0x8b5   :  { %7313 = vmatpush3.bf16.msra.mxu1 %v9418_v60  ;;  %7316 = vmatprep.mubr.msk.bf16.mxu1 %vm8269_vm0, %v11502_v5 }
 0x8b6   :  { %7314 = vmatprep.subr.bf16.mxu1 %v11502_v5 }
 0x8b9   :  { %7315 = vmatpush3.bf16.msra.mxu1 %v9427_v30 }
 0x8ba   :  { %7328 = vmatprep.subr.bf16.mxu1 %v11502_v5 }
 0x987   :  { %v9431_v55 = vpop.f32.mrb[12].mxu1 }
 0x988   :  { %v7302_v58 = vpop.f32.mrb[13].mxu1  ;;  %v2400_v31 = vadd.f32 %v9431_v55, %v8436_v15  ;;  %v2291_v61 = vadd.f32 %v9431_v55, %v9139_v63  ;;  %v2259_v18 = vrot.slane %v9431_v55, 6  ;;  %v2258_v27 = vrot.slane %v9431_v55, 5 }
 0x989   :  { %v9433_v37 = vpop.f32.mrb[14].mxu1  ;;  %v2262_v49 = vrot.slane %v9431_v55, 2  ;;  %v2260_v40 = vrot.slane %v9431_v55, 7  ;;  %v2261_v45 = vrot.slane %v9431_v55, 1 }
 0x98a   :  { %v7303_v22 = vpop.f32.mrb[15].mxu1  ;;  %2424 = vrot.lane.b32.xlu0 %v2400_v31, %s8271_s0  ;;  %v2405_v41 = vrot.slane %v2400_v31, 6  ;;  %v2404_v21 = vrot.slane %v2400_v31, 5  ;;  %v2401_v7 = vadd.f32 %v9433_v37, %v8436_v15  ;;  %v2408_v26 = vrot.slane %v2400_v31, 2 }
 0x98b   :  { %v2406_v13 = vrot.slane %v2400_v31, 7  ;;  %v2407_v1 = vrot.slane %v2400_v31, 1  ;;  %v2409_v35 = vrot.slane %v2400_v31, 3  ;;  %v2410_v62 = vrot.slane %v2400_v31, 4 }
 0x98c   :  { %2420 = vrot.lane.b32.xlu1 %v2405_v41, %s8271_s0  ;;  %v2412_v16 = vrot.slane %v2401_v7, 6  ;;  %v2413_v51 = vrot.slane %v2401_v7, 7  ;;  %v2414_v2 = vrot.slane %v2401_v7, 1  ;;  %v2411_v52 = vrot.slane %v2401_v7, 5 }
 0x98d   :  { %v2415_v11 = vrot.slane %v2401_v7, 2  ;;  %v2416_v43 = vrot.slane %v2401_v7, 3  ;;  %v2417_v20 = vrot.slane %v2401_v7, 4  ;;  %v7068_v38 = vmul.f32 -1.442695, %v2291_v61 }
 0x98e   :  { %2418 = vrot.lane.b32.xlu0 %v2404_v21, %s8271_s0  ;;  %v2289_v0 = vadd.f32 %v2259_v18, %v9129_v39  ;;  %v2288_v33 = vadd.f32 %v2258_v27, %v9131_v14  ;;  %v2293_v47 = vadd.f32 %v2262_v49, %v9153_v59  ;;  %v2290_v58 = vadd.f32 %v2260_v40, %v9123_v42 }
 0x98f   :  { %7738 = vpow2.f32 %v7068_v38  ;;  %v2266_v31 = vrot.slane %v9433_v37, 6  ;;  %v2292_v41 = vadd.f32 %v2261_v45, %v9137_v36  ;;  %v2269_v61 = vrot.slane %v9433_v37, 2 }
 0x990   :  { %2428 = vrot.lane.b32.xlu1 %v2408_v26, %s8271_s0  ;;  %v7066_v29 = vmul.f32 -1.442695, %v2289_v0  ;;  %v7065_v22 = vmul.f32 -1.442695, %v2288_v33  ;;  %v7070_v21 = vmul.f32 -1.442695, %v2293_v47 }
 0x991   :  { %v2264_v40 = vrot.slane %v9431_v55, 4  ;;  %v2270_v47 = vrot.slane %v9433_v37, 3 }
 0x992   :  { %2422 = vrot.lane.b32.xlu0 %v2406_v13, %s8271_s0  ;;  %7740 = vpow2.f32 %v7066_v29  ;;  %v7067_v13 = vmul.f32 -1.442695, %v2290_v58  ;;  %v2301_v29 = vadd.f32 %v2269_v61, %v9171_v6  ;;  %v11512_v61 = vld [vmem:[#allocation5_spill] sm:$0xff] }
 0x993   :  { %7742 = vpow2.f32 %v7065_v22 }
 0x994   :  { %2436 = vrot.lane.b32.xlu1 %v2412_v16, %s8271_s0  ;;  %v2297_v16 = vadd.f32 %v2266_v31, %v9144_v50  ;;  %7744 = vpow2.f32 %v7070_v21 }
 0x995   :  { %7746 = vpow2.f32 %v7067_v13  ;;  %v11511_v13 = vld [vmem:[#allocation4_spill] sm:$0xff] }
 0x996   :  { %2426 = vrot.lane.b32.xlu0 %v2407_v1, %s8271_s0  ;;  %v7069_v1 = vmul.f32 -1.442695, %v2292_v41 }
 0x998   :  { %2438 = vrot.lane.b32.xlu1 %v2413_v51, %s8271_s0  ;;  %v2265_v51 = vrot.slane %v9433_v37, 5  ;;  %7748 = vpow2.f32 %v7069_v1  ;;  %v7078_v1 = vmul.f32 -1.442695, %v2301_v29 }
 0x999   :  { %v7739_v26 = vpop.eup %7738 }
 0x99a   :  { %2440 = vrot.lane.b32.xlu0 %v2401_v7, %s8271_s0  ;;  %v2267_v7 = vrot.slane %v9433_v37, 7 }
 0x99c   :  { %2442 = vrot.lane.b32.xlu1 %v2414_v2, %s8271_s0  ;;  %v2268_v2 = vrot.slane %v9433_v37, 1  ;;  %v7741_v49 = vpop.eup %7740 }
 0x99d   :  { %v7743_v0 = vpop.eup %7742  ;;  %v2353_v22 = vadd.f32 1.0, %v7741_v49 }
 0x99e   :  { %2434 = vrot.lane.b32.xlu0 %v2411_v52, %s8271_s0  ;;  %v2298_v52 = vadd.f32 %v2267_v7, %v9146_v10  ;;  %v2300_v38 = vadd.f32 %v2268_v2, %v9163_v44  ;;  %v7745_v31 = vpop.eup %7744  ;;  %v2352_v41 = vadd.f32 1.0, %v7743_v0  ;;  %v2295_v7 = vadd.f32 %v2264_v40, %v9177_v56 }
 0x99f   :  { %v7747_v21 = vpop.eup %7746  ;;  %v2357_v2 = vadd.f32 1.0, %v7745_v31 }
 0x9a0   :  { %2444 = vrot.lane.b32.xlu1 %v2415_v11, %s8271_s0  ;;  %v2355_v11 = vadd.f32 1.0, %v7739_v26  ;;  %v7075_v18 = vmul.f32 -1.442695, %v2298_v52  ;;  %v7077_v58 = vmul.f32 -1.442695, %v2300_v38 }
 0x9a2   :  { %2430 = vrot.lane.b32.xlu0 %v2409_v35, %s8271_s0  ;;  %v2299_v35 = vadd.f32 %v9433_v37, %v9155_v4  ;;  %7750 = vrcp.f32 %v2355_v11 }
 0x9a4   :  { %2446 = vrot.lane.b32.xlu1 %v2416_v43, %s8271_s0  ;;  %v7074_v43 = vmul.f32 -1.442695, %v2297_v16  ;;  %v7076_v27 = vmul.f32 -1.442695, %v2299_v35  ;;  %v2302_v16 = vadd.f32 %v2270_v47, %v11511_v13  ;;  %v2354_v35 = vadd.f32 1.0, %v7747_v21 }
 0x9a6   :  { %2432 = vrot.lane.b32.xlu0 %v2410_v62, %s8271_s0  ;;  %v2263_v62 = vrot.slane %v9431_v55, 3  ;;  %7752 = vpow2.f32 %v7074_v43  ;;  %v2271_v55 = vrot.slane %v9433_v37, 4  ;;  %v7079_v37 = vmul.f32 -1.442695, %v2302_v16 }
 0x9a7   :  { %7754 = vpow2.f32 %v7075_v18 }
 0x9a8   :  { %2448 = vrot.lane.b32.xlu1 %v2417_v20, %s8271_s0  ;;  %v2296_v20 = vadd.f32 %v2265_v51, %v9160_v57  ;;  %v2294_v33 = vadd.f32 %v2263_v62, %v9169_v25  ;;  %7756 = vpow2.f32 %v7076_v27  ;;  %v7749_v51 = vpop.eup %7748  ;;  %v7072_v62 = vmul.f32 -1.442695, %v2295_v7 }
 0x9a9   :  { %v2303_v38 = vadd.f32 %v2271_v55, %v11512_v61  ;;  %v2356_v18 = vadd.f32 1.0, %v7749_v51 }
 0x9aa   :  { %v7073_v45 = vmul.f32 -1.442695, %v2296_v20  ;;  %v7071_v26 = vmul.f32 -1.442695, %v2294_v33 }
 0x9ab   :  { %v7080_v40 = vmul.f32 -1.442695, %v2303_v38 }
 0x9ac   :  { %7758 = vpow2.f32 %v7073_v45  ;;  %v9486_v52 = vpop.eup %7750 }
 0x9ad   :  { %7760 = vpow2.f32 %v7077_v58 }
 0x9ae   :  { %7762 = vrcp.f32 %v2353_v22 }
 0x9af   :  { %7764 = vrcp.f32 %v2352_v41 }
 0x9b0   :  { %v7753_v43 = vpop.eup %7752  ;;  %7766 = vpow2.f32 %v7071_v26 }
 0x9b1   :  { %7768 = vpow2.f32 %v7078_v1  ;;  %v7755_v27 = vpop.eup %7754  ;;  %v2361_v49 = vadd.f32 1.0, %v7753_v43 }
 0x9b2   :  { %7770 = vrcp.f32 %v2357_v2  ;;  %v7757_v0 = vpop.eup %7756  ;;  %v2362_v45 = vadd.f32 1.0, %v7755_v27 }
 0x9b3   :  { %7772 = vrcp.f32 %v2354_v35  ;;  %v2363_v29 = vadd.f32 1.0, %v7757_v0 }
 0x9b4   :  { %7774 = vpow2.f32 %v7072_v62 }
 0x9b5   :  { %7776 = vpow2.f32 %v7079_v37 }
 0x9b6   :  { %v7759_v33 = vpop.eup %7758  ;;  %7778 = vrcp.f32 %v2356_v18 }
 0x9b7   :  { %v7761_v47 = vpop.eup %7760  ;;  %7780 = vrcp.f32 %v2361_v49  ;;  %v2360_v1 = vadd.f32 1.0, %v7759_v33 }
 0x9b8   :  { %v9491_v58 = vpop.eup %7762  ;;  %7782 = vpow2.f32 %v7080_v40  ;;  %v2364_v55 = vadd.f32 1.0, %v7761_v47 }
 0x9b9   :  { %v9493_v22 = vpop.eup %7764  ;;  %7784 = vrcp.f32 %v2362_v45 }
 0x9ba   :  { %v7767_v21 = vpop.eup %7766  ;;  %7786 = vrcp.f32 %v2363_v29 }
 0x9bb   :  { %v7769_v16 = vpop.eup %7768  ;;  %7788 = vrcp.f32 %v2364_v55  ;;  %v2358_v18 = vadd.f32 1.0, %v7767_v21 }
 0x9bc   :  { %v9497_v51 = vpop.eup %7770  ;;  %v2365_v38 = vadd.f32 1.0, %v7769_v16  ;;  %7790 = vrcp.f32 %v2360_v1 }
 0x9bd   :  { %v9501_v2 = vpop.eup %7772 }
 0x9be   :  { %v7775_v43 = vpop.eup %7774  ;;  %7792 = vrcp.f32 %v2365_v38 }
 0x9bf   :  { %v7777_v37 = vpop.eup %7776  ;;  %7794 = vrcp.f32 %v2358_v18 }
 0x9c0   :  { %v9505_v27 = vpop.eup %7778  ;;  %v2366_v47 = vadd.f32 1.0, %v7777_v37 }
 0x9c1   :  { %v9509_v49 = vpop.eup %7780 }
 0x9c2   :  { %v7783_v29 = vpop.eup %7782  ;;  %7796 = vrcp.f32 %v2366_v47 }
 0x9c3   :  { %v2367_v1 = vadd.f32 1.0, %v7783_v29 }
 0x9fc   :  { %v2425_v11 = vpop.permute.xlu0 %2424 }
 0x9fd   :  { %v2469_v20 = vmul.f32 %v9486_v52, %v2425_v11 }
 0x9fe   :  { %v2421_v31 = vpop.permute.xlu1 %2420 }
 0x9ff   :  { %2504 = vrot.lane.b32.xlu0 %v2469_v20, %s8271_s0  ;;  %v2467_v7 = vmul.f32 %v9491_v58, %v2421_v31  ;;  %v2359_v31 = vadd.f32 1.0, %v7775_v43 }
 0xa00   :  { %v2419_v41 = vpop.permute.xlu0 %2418 }
 0xa01   :  { %v2466_v26 = vmul.f32 %v9493_v22, %v2419_v41  ;;  %2500 = vrot.lane.b32.xlu1 %v2467_v7, %s8271_s0  ;;  %v9513_v41 = vpop.eup %7784  ;;  %7798 = vrcp.f32 %v2359_v31 }
 0xa02   :  { %v2429_v11 = vpop.permute.xlu1 %2428  ;;  %v9517_v21 = vpop.eup %7786  ;;  %7800 = vrcp.f32 %v2367_v1 }
 0xa03   :  { %2498 = vrot.lane.b32.xlu0 %v2466_v26, %s8271_s0  ;;  %v2471_v62 = vmul.f32 %v9497_v51, %v2429_v11  ;;  %v9521_v11 = vpop.eup %7788 }
 0xa04   :  { %v2423_v35 = vpop.permute.xlu0 %2422 }
 0xa05   :  { %v2468_v20 = vmul.f32 %v9501_v2, %v2423_v35  ;;  %2508 = vrot.lane.b32.xlu1 %v2471_v62, %s8271_s0  ;;  %v9525_v35 = vpop.eup %7790 }
 0xa06   :  { %v2437_v0 = vpop.permute.xlu1 %2436  ;;  %v9529_v37 = vpop.eup %7792 }
 0xa07   :  { %2502 = vrot.lane.b32.xlu0 %v2468_v20, %s8271_s0  ;;  %v2475_v33 = vmul.f32 %v9509_v49, %v2437_v0  ;;  %v9533_v18 = vpop.eup %7794 }
 0xa08   :  { %v2427_v40 = vpop.permute.xlu0 %2426  ;;  %v9537_v47 = vpop.eup %7796 }
 0xa09   :  { %v2470_v45 = vmul.f32 %v9505_v27, %v2427_v40  ;;  %2516 = vrot.lane.b32.xlu1 %v2475_v33, %s8271_s0 }
 0xa0a   :  { %v2439_v7 = vpop.permute.xlu1 %2438 }
 0xa0b   :  { %2506 = vrot.lane.b32.xlu0 %v2470_v45, %s8271_s0  ;;  %v2476_v55 = vmul.f32 %v9513_v41, %v2439_v7  ;;  %v9541_v29 = vpop.eup %7798 }
 0xa0c   :  { %v2441_v26 = vpop.permute.xlu0 %2440 }
 0xa0d   :  { %v2477_v16 = vmul.f32 %v9517_v21, %v2441_v26  ;;  %2518 = vrot.lane.b32.xlu1 %v2476_v55, %s8271_s0 }
 0xa0e   :  { %v2443_v43 = vpop.permute.xlu1 %2442 }
 0xa0f   :  { %2520 = vrot.lane.b32.xlu0 %v2477_v16, %s8271_s0  ;;  %v2478_v20 = vmul.f32 %v9521_v11, %v2443_v43  ;;  %v9547_v16 = vpop.eup %7800 }
 0xa10   :  { %v2435_v62 = vpop.permute.xlu0 %2434 }
 0xa11   :  { %v2474_v38 = vmul.f32 %v9525_v35, %v2435_v62  ;;  %2522 = vrot.lane.b32.xlu1 %v2478_v20, %s8271_s0 }
 0xa12   :  { %v2445_v0 = vpop.permute.xlu1 %2444 }
 0xa13   :  { %2514 = vrot.lane.b32.xlu0 %v2474_v38, %s8271_s0  ;;  %v2479_v33 = vmul.f32 %v9529_v37, %v2445_v0 }
 0xa14   :  { %v2431_v40 = vpop.permute.xlu0 %2430 }
 0xa15   :  { %v2472_v45 = vmul.f32 %v9533_v18, %v2431_v40  ;;  %2524 = vrot.lane.b32.xlu1 %v2479_v33, %s8271_s0 }
 0xa16   :  { %v2447_v31 = vpop.permute.xlu1 %2446 }
 0xa17   :  { %2510 = vrot.lane.b32.xlu0 %v2472_v45, %s8271_s0  ;;  %v2480_v26 = vmul.f32 %v9537_v47, %v2447_v31 }
 0xa18   :  { %v2433_v7 = vpop.permute.xlu0 %2432 }
 0xa19   :  { %v2473_v55 = vmul.f32 %v9541_v29, %v2433_v7  ;;  %2526 = vrot.lane.b32.xlu1 %v2480_v26, %s8271_s0 }
 0xa1a   :  { %v2449_v1 = vpop.permute.xlu1 %2448 }
 0xa1b   :  { %2512 = vrot.lane.b32.xlu0 %v2473_v55, %s8271_s0  ;;  %v2481_v43 = vmul.f32 %v9547_v16, %v2449_v1 }
 0xa1d   :  { %2528 = vrot.lane.b32.xlu1 %v2481_v43, %s8271_s0 }
 0xa71   :  { %v2505_v62 = vpop.permute.xlu0 %2504 }
 0xa72   :  { %v2549_v20 = vadd.f32 %v2505_v62, %v9139_v63 }
 0xa73   :  { %v2501_v38 = vpop.permute.xlu1 %2500 }
 0xa74   :  { %7802 = vtanh.f32 %v2549_v20  ;;  %v2547_v40 = vadd.f32 %v2501_v38, %v9129_v39 }
 0xa75   :  { %v2499_v0 = vpop.permute.xlu0 %2498 }
 0xa76   :  { %v2546_v33 = vadd.f32 %v2499_v0, %v9131_v14  ;;  %7804 = vtanh.f32 %v2547_v40 }
 0xa77   :  { %v2509_v31 = vpop.permute.xlu1 %2508 }
 0xa78   :  { %7806 = vtanh.f32 %v2546_v33  ;;  %v2551_v26 = vadd.f32 %v2509_v31, %v9153_v59 }
 0xa79   :  { %v2503_v7 = vpop.permute.xlu0 %2502 }
 0xa7a   :  { %v2548_v55 = vadd.f32 %v2503_v7, %v9123_v42  ;;  %7808 = vtanh.f32 %v2551_v26 }
 0xa7b   :  { %v2517_v63 = vpop.permute.xlu1 %2516 }
 0xa7c   :  { %7810 = vtanh.f32 %v2548_v55  ;;  %v2555_v43 = vadd.f32 %v2517_v63, %v9144_v50 }
 0xa7d   :  { %v2507_v1 = vpop.permute.xlu0 %2506 }
 0xa7e   :  { %v7803_v45 = vpop.eup %7802  ;;  %v2550_v39 = vadd.f32 %v2507_v1, %v9137_v36  ;;  %7812 = vtanh.f32 %v2555_v43 }
 0xa7f   :  { %2616 = vrot.lane.b32.xlu0 %v7803_v45, %s8272_s4  ;;  %v2519_v14 = vpop.permute.xlu1 %2518 }
 0xa80   :  { %7814 = vtanh.f32 %v2550_v39  ;;  %v7805_v20 = vpop.eup %7804  ;;  %v2556_v38 = vadd.f32 %v2519_v14, %v9146_v10 }
 0xa81   :  { %v2521_v62 = vpop.permute.xlu0 %2520  ;;  %2612 = vrot.lane.b32.xlu1 %v7805_v20, %s8272_s4 }
 0xa82   :  { %v2557_v0 = vadd.f32 %v2521_v62, %v9155_v4  ;;  %v7807_v59 = vpop.eup %7806  ;;  %7816 = vtanh.f32 %v2556_v38 }
 0xa83   :  { %2610 = vrot.lane.b32.xlu0 %v7807_v59, %s8272_s4  ;;  %v2523_v42 = vpop.permute.xlu1 %2522  ;;  %v2691_v59 = vrot.slane %v9296_v28, 7 }
 0xa84   :  { %7818 = vtanh.f32 %v2557_v0  ;;  %v7809_v40 = vpop.eup %7808  ;;  %v2558_v36 = vadd.f32 %v2523_v42, %v9163_v44  ;;  %v2579_v42 = vsub.f32 1.0, %v9491_v58 }
 0xa85   :  { %v2515_v50 = vpop.permute.xlu0 %2514  ;;  %2620 = vrot.lane.b32.xlu1 %v7809_v40, %s8272_s4 }
 0xa86   :  { %v2554_v33 = vadd.f32 %v2515_v50, %v9160_v57  ;;  %v7811_v45 = vpop.eup %7810  ;;  %7820 = vtanh.f32 %v2558_v36  ;;  %v2690_v50 = vrot.slane %v9301_v19, 7  ;;  %v2578_v36 = vsub.f32 1.0, %v9493_v22 }
 0xa87   :  { %2614 = vrot.lane.b32.xlu0 %v7811_v45, %s8272_s4  ;;  %v2525_v10 = vpop.permute.xlu1 %2524  ;;  %v2723_v45 = vmul.f32 %v9491_v58, %v2691_v59  ;;  %v2699_v58 = vrot.slane %v9337_v9, 7 }
 0xa88   :  { %7822 = vtanh.f32 %v2554_v33  ;;  %v7813_v31 = vpop.eup %7812  ;;  %v2559_v7 = vadd.f32 %v2525_v10, %v9171_v6  ;;  %v2581_v33 = vsub.f32 1.0, %v9486_v52 }
 0xa89   :  { %v2511_v4 = vpop.permute.xlu0 %2510  ;;  %2628 = vrot.lane.b32.xlu1 %v7813_v31, %s8272_s4  ;;  %v2692_v31 = vrot.slane %v9294_v8, 7  ;;  %v2580_v8 = vsub.f32 1.0, %v9501_v2 }
 0xa8a   :  { %v2552_v26 = vadd.f32 %v2511_v4, %v9169_v25  ;;  %v7815_v55 = vpop.eup %7814  ;;  %7824 = vtanh.f32 %v2559_v7  ;;  %v2693_v7 = vrot.slane %v9318_v34, 7 }
 0xa8b   :  { %2618 = vrot.lane.b32.xlu0 %v7815_v55, %s8272_s4  ;;  %v2527_v57 = vpop.permute.xlu1 %2526  ;;  %v2695_v55 = vrot.slane %v9347_v53, 7  ;;  %v2724_v9 = vmul.f32 %v9501_v2, %v2692_v31  ;;  %v2703_v2 = vrot.slane %v9377_v54, 7  ;;  %v2588_v54 = vsub.f32 1.0, %v9513_v41 }
 0xa8c   :  { %7826 = vtanh.f32 %v2552_v26  ;;  %v7817_v63 = vpop.eup %7816  ;;  %v2560_v1 = vadd.f32 %v2527_v57, %v11511_v13  ;;  %v2722_v26 = vmul.f32 %v9493_v22, %v2690_v50  ;;  %v2725_v34 = vmul.f32 %v9486_v52, %v2693_v7 }
 0xa8d   :  { %v2513_v44 = vpop.permute.xlu0 %2512  ;;  %2630 = vrot.lane.b32.xlu1 %v7817_v63, %s8272_s4  ;;  %v11513_v63 = vld [vmem:[#allocation6_spill] sm:$0xff]  ;;  %v2727_v53 = vmul.f32 %v9497_v51, %v2695_v55  ;;  %v2587_v50 = vsub.f32 1.0, %v9509_v49  ;;  %v2696_v31 = vrot.slane %v9380_v12, 7  ;;  %v2704_v55 = vrot.slane %v9393_v24, 7 }
 0xa8e   :  { %v2553_v43 = vadd.f32 %v2513_v44, %v9177_v56  ;;  %v7819_v39 = vpop.eup %7818  ;;  %7828 = vtanh.f32 %v2560_v1  ;;  %v2583_v44 = vsub.f32 1.0, %v9497_v51  ;;  %v2694_v1 = vrot.slane %v11513_v63, 7 }
 0xa8f   :  { %2632 = vrot.lane.b32.xlu0 %v7819_v39, %s8272_s4  ;;  %v2529_v25 = vpop.permute.xlu1 %2528 }
 0xa90   :  { %7830 = vtanh.f32 %v2553_v43  ;;  %v7821_v6 = vpop.eup %7820  ;;  %v2561_v14 = vadd.f32 %v2529_v25, %v11512_v61 }
 0xa91   :  { %2634 = vrot.lane.b32.xlu1 %v7821_v6, %s8272_s4 }
 0xa92   :  { %v7823_v62 = vpop.eup %7822  ;;  %7832 = vtanh.f32 %v2561_v14  ;;  %v2700_v14 = vrot.slane %v9356_v32, 7  ;;  %v2582_v32 = vsub.f32 1.0, %v9505_v27 }
 0xa93   :  { %2626 = vrot.lane.b32.xlu0 %v7823_v62, %s8272_s4 }
 0xa94   :  { %v7825_v13 = vpop.eup %7824  ;;  %v2732_v12 = vmul.f32 %v9513_v41, %v2700_v14  ;;  %v2586_v14 = vsub.f32 1.0, %v9525_v35 }
 0xa95   :  { %2636 = vrot.lane.b32.xlu1 %v7825_v13, %s8272_s4 }
 0xa96   :  { %v7827_v20 = vpop.eup %7826 }
 0xa97   :  { %2622 = vrot.lane.b32.xlu0 %v7827_v20, %s8272_s4  ;;  %v2701_v20 = vrot.slane %v9343_v46, 7  ;;  %v2726_v46 = vmul.f32 %v9505_v27, %v2694_v1 }
 0xa98   :  { %v7829_v56 = vpop.eup %7828 }
 0xa99   :  { %2638 = vrot.lane.b32.xlu1 %v7829_v56, %s8272_s4  ;;  %v2733_v24 = vmul.f32 %v9517_v21, %v2701_v20  ;;  %v2591_v20 = vsub.f32 1.0, %v9529_v37 }
 0xa9a   :  { %v7831_v38 = vpop.eup %7830 }
 0xa9b   :  { %2624 = vrot.lane.b32.xlu0 %v7831_v38, %s8272_s4 }
 0xa9c   :  { %v7833_v0 = vpop.eup %7832 }
 0xa9d   :  { %2640 = vrot.lane.b32.xlu1 %v7833_v0, %s8272_s4  ;;  %v2702_v0 = vrot.slane %v9360_v48, 7 }
 0xa9f   :  { %v2734_v41 = vmul.f32 %v9521_v11, %v2702_v0 }
 0xaf1   :  { %v2617_v61 = vpop.permute.xlu0 %2616 }
 0xaf2   :  { %v2661_v57 = vmul.f32 %v2617_v61, %v2581_v33 }
 0xaf3   :  { %v2613_v40 = vpop.permute.xlu1 %2612 }
 0xaf4   :  { %v2659_v10 = vmul.f32 %v2613_v40, %v2579_v42  ;;  %v9610_v56 = vadd.f32 %v2725_v34, %v2661_v57  ;;  %v2698_v42 = vrot.slane %v9365_v3, 7  ;;  %v2697_v57 = vrot.slane %v9396_v23, 7 }
 0xaf5   :  { %v2611_v4 = vpop.permute.xlu0 %2610  ;;  %v2589_v34 = vsub.f32 1.0, %v9517_v21 }
 0xaf6   :  { %v2658_v28 = vmul.f32 %v2611_v4, %v2578_v36  ;;  %v9593_v19 = vadd.f32 %v2723_v45, %v2659_v10  ;;  %v2757_v10 = vpack.c.bf16 %v9610_v56, %v9610_v56  ;;  %v2730_v21 = vmul.f32 %v9525_v35, %v2698_v42 }
 0xaf7   :  { %v2621_v39 = vpop.permute.xlu1 %2620 }
 0xaf8   :  { %v9598_v43 = vadd.f32 %v2722_v26, %v2658_v28  ;;  %v2755_v22 = vpack.c.bf16 %v9593_v19, %v9593_v19  ;;  %v2663_v25 = vmul.f32 %v2621_v39, %v2583_v44  ;;  %v2731_v44 = vmul.f32 %v9509_v49, %v2699_v58 }
 0xaf9   :  { %v2615_v6 = vpop.permute.xlu0 %2614  ;;  %v2590_v58 = vsub.f32 1.0, %v9521_v11 }
 0xafa   :  { %v2754_v62 = vpack.c.bf16 %v9598_v43, %v9598_v43  ;;  %v2660_v13 = vmul.f32 %v2615_v6, %v2580_v8  ;;  %v2787_v52 = vunpack.c.l.b16 %v2755_v22  ;;  %v9612_v38 = vadd.f32 %v2727_v53, %v2663_v25 }
 0xafb   :  { %v2629_v59 = vpop.permute.xlu1 %2628  ;;  %v2789_v22 = vunpack.c.l.b16 %v2757_v10 }
 0xafc   :  { %v2786_v51 = vunpack.c.l.b16 %v2754_v62  ;;  %v9615_v61 = vadd.f32 %v2724_v9, %v2660_v13  ;;  %v2803_v36 = vrot.slane %v2787_v52, 2  ;;  %v2759_v4 = vpack.c.bf16 %v9612_v38, %v9612_v38 }
 0xafd   :  { %v2619_v40 = vpop.permute.xlu0 %2618  ;;  %v2667_v3 = vmul.f32 %v2629_v59, %v2587_v50 }
 0xafe   :  { %v2802_v33 = vrot.slane %v2786_v51, 3  ;;  %v2756_v48 = vpack.c.bf16 %v9615_v61, %v9615_v61  ;;  %v2662_v45 = vmul.f32 %v2619_v40, %v2582_v32  ;;  %v2791_v53 = vunpack.c.l.b16 %v2759_v4 }
 0xaff   :  { %v2631_v28 = vpop.permute.xlu1 %2630  ;;  %v9640_v25 = vadd.f32 %v2731_v44, %v2667_v3  ;;  %v2735_v40 = vmul.f32 %v9529_v37, %v2703_v2  ;;  %v2705_v37 = vrot.slane %v9404_v17, 7  ;;  %v2728_v3 = vmul.f32 %v9533_v18, %v2696_v31 }
 0xb00   :  { %v2804_v27 = vsel %vm901_vm3, %v2803_v36, %v2802_v33  ;;  %v2788_v7 = vunpack.c.l.b16 %v2756_v48  ;;  %v9631_v26 = vadd.f32 %v2726_v46, %v2662_v45  ;;  %v2668_v63 = vmul.f32 %v2631_v28, %v2588_v54 }
 0xb01   :  { %v2633_v1 = vpop.permute.xlu0 %2632  ;;  %v2810_v32 = vrot.slane %v2791_v53, 6  ;;  %v2763_v50 = vpack.c.bf16 %v9640_v25, %v9640_v25  ;;  %v2584_v48 = vsub.f32 1.0, %v9533_v18  ;;  %v2592_v44 = vsub.f32 1.0, %v9537_v47 }
 0xb02   :  { %v2805_v39 = vrot.slane %v2788_v7, 1  ;;  %v2758_v8 = vpack.c.bf16 %v9631_v26, %v9631_v26  ;;  %v9644_v49 = vadd.f32 %v2732_v12, %v2668_v63  ;;  %v2669_v13 = vmul.f32 %v2633_v1, %v2589_v34 }
 0xb03   :  { %v2635_v62 = vpop.permute.xlu1 %2634 }
 0xb04   :  { %v2806_v23 = vsel %vm904_vm4, %v2805_v39, %v2804_v27  ;;  %v2790_v6 = vunpack.c.l.b16 %v2758_v8  ;;  %v2670_v59 = vmul.f32 %v2635_v62, %v2590_v58  ;;  %v2764_v11 = vpack.c.bf16 %v9644_v49, %v9644_v49 }
 0xb05   :  { %v2807_v9 = vsel %vm907_vm5, %v2789_v22, %v2806_v23  ;;  %v2627_v52 = vpop.permute.xlu0 %2626  ;;  %v9661_v35 = vadd.f32 %v2733_v24, %v2669_v13  ;;  %v2795_v27 = vunpack.c.l.b16 %v2763_v50  ;;  %v2736_v39 = vmul.f32 %v9537_v47, %v2704_v55 }
 0xb06   :  { %v2808_v51 = vrot.slane %v2790_v6, 7  ;;  %v2666_v46 = vmul.f32 %v2627_v52, %v2586_v14  ;;  %v9658_v0 = vadd.f32 %v2734_v41, %v2670_v59  ;;  %v2796_v63 = vunpack.c.l.b16 %v2764_v11 }
 0xb07   :  { %v2637_v33 = vpop.permute.xlu1 %2636  ;;  %v2585_v8 = vsub.f32 1.0, %v9541_v29  ;;  %v2765_v18 = vpack.c.bf16 %v9661_v35, %v9661_v35  ;;  %v2729_v23 = vmul.f32 %v9541_v29, %v2697_v57  ;;  %v2817_v47 = vrot.slane %v2795_v27, 2 }
 0xb08   :  { %v2809_v36 = vsel %vm910_vm6, %v2808_v51, %v2807_v9  ;;  %v9663_v42 = vadd.f32 %v2730_v21, %v2666_v46  ;;  %v2671_v45 = vmul.f32 %v2637_v33, %v2591_v20  ;;  %v2766_v2 = vpack.c.bf16 %v9658_v0, %v9658_v0 }
 0xb09   :  { %v2623_v10 = vpop.permute.xlu0 %2622  ;;  %v2811_v4 = vsel %vm913_vm7, %v2810_v32, %v2809_v36  ;;  %v2819_v9 = vrot.slane %v2796_v63, 1  ;;  %v2593_v14 = vsub.f32 1.0, %v9547_v16  ;;  %v2797_v51 = vunpack.c.l.b16 %v2765_v18 }
 0xb0a   :  { %v2664_v54 = vmul.f32 %v2623_v10, %v2584_v48  ;;  %v2762_v7 = vpack.c.bf16 %v9663_v42, %v9663_v42  ;;  %v9672_v28 = vadd.f32 %v2735_v40, %v2671_v45  ;;  %v2798_v53 = vunpack.c.l.b16 %v2766_v2 }
 0xb0b   :  { %v2639_v17 = vpop.permute.xlu1 %2638  ;;  %v2737_v29 = vmul.f32 %v9547_v16, %v2705_v37 }
 0xb0c   :  { %v9675_v1 = vadd.f32 %v2728_v3, %v2664_v54  ;;  %v2794_v31 = vunpack.c.l.b16 %v2762_v7  ;;  %v2767_v12 = vpack.c.bf16 %v9672_v28, %v9672_v28  ;;  %v2672_v34 = vmul.f32 %v2639_v17, %v2592_v44 }
 0xb0d   :  { %v2625_v22 = vpop.permute.xlu0 %2624  ;;  %v2822_v57 = vrot.slane %v2798_v53, 7 }
 0xb0e   :  { %v2760_v24 = vpack.c.bf16 %v9675_v1, %v9675_v1  ;;  %v2665_v6 = vmul.f32 %v2625_v22, %v2585_v8  ;;  %v2816_v55 = vrot.slane %v2794_v31, 3  ;;  %v2799_v58 = vunpack.c.l.b16 %v2767_v12 }
 0xb0f   :  { %v9686_v62 = vadd.f32 %v2736_v39, %v2672_v34  ;;  %v2641_v52 = vpop.permute.xlu1 %2640 }
 0xb10   :  { %v2792_v13 = vunpack.c.l.b16 %v2760_v24  ;;  %v9688_v41 = vadd.f32 %v2729_v23, %v2665_v6  ;;  %v2818_v59 = vsel %vm901_vm3, %v2817_v47, %v2816_v55  ;;  %v2824_v40 = vrot.slane %v2799_v58, 6 }
 0xb11   :  { %v2768_v21 = vpack.c.bf16 %v9686_v62, %v9686_v62  ;;  %v2820_v20 = vsel %vm904_vm4, %v2819_v9, %v2818_v59  ;;  %v2673_v11 = vmul.f32 %v2641_v52, %v2593_v14 }
 0xb12   :  { %v2812_v32 = vrot.slane %v2792_v13, 5  ;;  %v2761_v50 = vpack.c.bf16 %v9688_v41, %v9688_v41  ;;  %v2821_v46 = vsel %vm907_vm5, %v2797_v51, %v2820_v20  ;;  %v2881_v51 = vld [vmem:[#allocation2 + $0x10] sm:$0x4]  ;;  %v2877_v20 = vld [vmem:[#allocation2] sm:$0x4] }
 0xb13   :  { %v2800_v36 = vunpack.c.l.b16 %v2768_v21  ;;  %v2823_v33 = vsel %vm910_vm6, %v2822_v57, %v2821_v46  ;;  %v9702_v37 = vadd.f32 %v2737_v29, %v2673_v11  ;;  %v9740_v59 = vunpack.c.l.bf16 %v2881_v51  ;;  %v2878_v29 = vld [vmem:[#allocation2 + $0x4] sm:$0x4]  ;;  %v2879_v11 = vld [vmem:[#allocation2 + $0x8] sm:$0x4] }
 0xb14   :  { %v2793_v48 = vunpack.c.l.b16 %v2761_v50  ;;  %v2813_v45 = vsel %vm916_vm8, %v2812_v32, %v2811_v4  ;;  %v2825_v10 = vsel %vm913_vm7, %v2824_v40, %v2823_v33  ;;  %v9746_v46 = vunpack.c.l.bf16 %v2878_v29  ;;  %v2883_v40 = vld [vmem:[#allocation2 + $0x18] sm:$0x4] }
 0xb15   :  { %v2826_v16 = vrot.slane %v2800_v36, 5  ;;  %v2769_v3 = vpack.c.bf16 %v9702_v37, %v9702_v37  ;;  %v9748_v36 = vunpack.c.l.bf16 %v2877_v20 }
 0xb16   :  { %v2814_v2 = vrot.slane %v2793_v48, 4 }
 0xb17   :  { %v2827_v54 = vsel %vm916_vm8, %v2826_v16, %v2825_v10  ;;  %v2801_v7 = vunpack.c.l.b16 %v2769_v3  ;;  %v2880_v16 = vld [vmem:[#allocation2 + $0xc] sm:$0x4]  ;;  %v9756_v3 = vunpack.c.l.bf16 %v2879_v11 }
 0xb18   :  { %v2815_v27 = vsel %vm919_vm9, %v2814_v2, %v2813_v45  ;;  %v9754_v2 = vunpack.c.l.bf16 %v2883_v40  ;;  %v2890_v40 = vld [vmem:[#allocation2 + $0x34] sm:$0x4] }
 0xb19   :  { %v2828_v44 = vrot.slane %v2801_v7, 4 }
 0xb1b   :  { %v2829_v63 = vsel %vm919_vm9, %v2828_v44, %v2827_v54  ;;  %v2886_v44 = vld [vmem:[#allocation2 + $0x24] sm:$0x4] }
 0xb1c   :  { %v2830_v39 = vpack.c.b16 %v2829_v63, %v2815_v27  ;;  %v9760_v63 = vunpack.c.l.bf16 %v2880_v16 }
 0xb1e   :  { %2831 = vrot.lane.b32.xlu0 %v2830_v39, %s8272_s4 }
 0xb90   :  { %v2832_v4 = vpop.permute.xlu0 %2831 }
 0xb91   :  { %7309 = vmatmul.mubr.msk.bf16.vlgmr.msra.gmra.mrb[16].mxu0 %vm146_vm1, %v2832_v4 }
 0xb92   :  { %7321 = vmatpush3.bf16.msra.mxu0 %v9418_v60  ;;  %7324 = vmatprep.mubr.msk.bf16.mxu0 %vm8269_vm0, %v11502_v5 }
 0xb93   :  { %7322 = vmatprep.subr.bf16.mxu0 %v11502_v5 }
 0xb96   :  { %7323 = vmatpush3.bf16.msra.mxu0 %v9427_v30 }
 0xc64   :  { %v9716_v17 = vpop.f32.mrb[16].mxu0 }
 0xc65   :  { %v7310_v8 = vpop.f32.mrb[17].mxu0  ;;  %v3053_v12 = vadd.f32 %v9716_v17, %v8436_v15  ;;  %v2945_v21 = vadd.f32 %v9740_v59, %v9716_v17  ;;  %v2912_v32 = vrot.slane %v9716_v17, 5  ;;  %v2911_v50 = vrot.slane %v9716_v17, 4 }
 0xc66   :  { %v9718_v18 = vpop.f32.mrb[18].mxu0  ;;  %v2916_v33 = vrot.slane %v9716_v17, 2  ;;  %v2913_v45 = vrot.slane %v9716_v17, 6  ;;  %v2914_v54 = vrot.slane %v9716_v17, 7 }
 0xc67   :  { %v7311_v31 = vpop.f32.mrb[19].mxu0  ;;  %3079 = vrot.lane.b32.xlu1 %v3053_v12, %s8271_s0  ;;  %v3058_v34 = vrot.slane %v3053_v12, 5  ;;  %v3057_v60 = vrot.slane %v3053_v12, 4  ;;  %v3054_v30 = vadd.f32 %v9718_v18, %v8436_v15  ;;  %v3062_v22 = vrot.slane %v3053_v12, 2 }
 0xc68   :  { %v3059_v53 = vrot.slane %v3053_v12, 6  ;;  %v3060_v23 = vrot.slane %v3053_v12, 7  ;;  %v3061_v47 = vrot.slane %v3053_v12, 1  ;;  %v3063_v14 = vrot.slane %v3053_v12, 3  ;;  %v2887_v12 = vld [vmem:[#allocation2 + $0x28] sm:$0x4] }
 0xc69   :  { %3073 = vrot.lane.b32.xlu0 %v3058_v34, %s8271_s0  ;;  %v3065_v24 = vrot.slane %v3054_v30, 5  ;;  %v3066_v6 = vrot.slane %v3054_v30, 6  ;;  %v3067_v55 = vrot.slane %v3054_v30, 7  ;;  %v3064_v58 = vrot.slane %v3054_v30, 4 }
 0xc6a   :  { %v3068_v9 = vrot.slane %v3054_v30, 1  ;;  %v3069_v13 = vrot.slane %v3054_v30, 2  ;;  %v3070_v52 = vrot.slane %v3054_v30, 3  ;;  %v7086_v57 = vmul.f32 -1.442695, %v2945_v21 }
 0xc6b   :  { %3071 = vrot.lane.b32.xlu1 %v3057_v60, %s8271_s0  ;;  %v2942_v48 = vadd.f32 %v2912_v32, %v9746_v46  ;;  %v2941_v10 = vadd.f32 %v2911_v50, %v9748_v36  ;;  %v2947_v27 = vadd.f32 %v2916_v33, %v9754_v2  ;;  %v2943_v39 = vadd.f32 %v2913_v45, %v9756_v3  ;;  %v2882_v60 = vld [vmem:[#allocation2 + $0x14] sm:$0x4]  ;;  %v2889_v32 = vld [vmem:[#allocation2 + $0x30] sm:$0x4] }
 0xc6c   :  { %7834 = vpow2.f32 %v7086_v57  ;;  %v2919_v8 = vrot.slane %v9718_v18, 5  ;;  %v2944_v31 = vadd.f32 %v2914_v54, %v9760_v63  ;;  %v9765_v34 = vunpack.c.l.bf16 %v2886_v44 }
 0xc6d   :  { %3083 = vrot.lane.b32.xlu0 %v3062_v22, %s8271_s0  ;;  %v7083_v7 = vmul.f32 -1.442695, %v2942_v48  ;;  %v7082_v4 = vmul.f32 -1.442695, %v2941_v10  ;;  %v2920_v22 = vrot.slane %v9718_v18, 6  ;;  %v2922_v33 = vrot.slane %v9718_v18, 1 }
 0xc6e   :  { %v9785_v16 = vunpack.c.l.bf16 %v2889_v32 }
 0xc6f   :  { %3075 = vrot.lane.b32.xlu1 %v3059_v53, %s8271_s0  ;;  %7836 = vpow2.f32 %v7083_v7  ;;  %v9787_v7 = vunpack.c.l.bf16 %v2890_v40 }
 0xc70   :  { %7838 = vpow2.f32 %v7082_v4  ;;  %v2891_v4 = vld [vmem:[#allocation2 + $0x38] sm:$0x4] }
 0xc71   :  { %3089 = vrot.lane.b32.xlu0 %v3065_v24, %s8271_s0  ;;  %v2915_v24 = vrot.slane %v9716_v17, 1  ;;  %11515 = vst [vmem:[#allocation5_spill] sm:$0xff] %v9787_v7 }
 0xc73   :  { %3077 = vrot.lane.b32.xlu1 %v3060_v23, %s8271_s0  ;;  %v7084_v23 = vmul.f32 -1.442695, %v2943_v39  ;;  %v2917_v39 = vrot.slane %v9716_v17, 3 }
 0xc75   :  { %3091 = vrot.lane.b32.xlu0 %v3066_v6, %s8271_s0  ;;  %v2950_v6 = vadd.f32 %v2919_v8, %v9765_v34  ;;  %v2953_v8 = vadd.f32 %v9785_v16, %v9718_v18 }
 0xc76   :  { %v7835_v53 = vpop.eup %7834 }
 0xc77   :  { %3081 = vrot.lane.b32.xlu1 %v3061_v47, %s8271_s0  ;;  %v2885_v47 = vld [vmem:[#allocation2 + $0x20] sm:$0x4]  ;;  %v3009_v21 = vadd.f32 1.0, %v7835_v53  ;;  %v7091_v20 = vmul.f32 -1.442695, %v2950_v6 }
 0xc78   :  { %v9778_v57 = vunpack.c.l.bf16 %v2885_v47 }
 0xc79   :  { %3093 = vrot.lane.b32.xlu0 %v3067_v55, %s8271_s0  ;;  %v9770_v55 = vunpack.c.l.bf16 %v2887_v12  ;;  %v7837_v54 = vpop.eup %7836  ;;  %v2923_v12 = vrot.slane %v9718_v18, 2 }
 0xc7a   :  { %v7839_v44 = vpop.eup %7838  ;;  %v3006_v53 = vadd.f32 1.0, %v7837_v54 }
 0xc7b   :  { %3087 = vrot.lane.b32.xlu1 %v3064_v58, %s8271_s0  ;;  %v9772_v58 = vunpack.c.l.bf16 %v2882_v60  ;;  %v2951_v51 = vadd.f32 %v2920_v22, %v9770_v55  ;;  %v2954_v60 = vadd.f32 %v2922_v33, %v9787_v7  ;;  %v3005_v6 = vadd.f32 1.0, %v7839_v44 }
 0xc7d   :  { %3097 = vrot.lane.b32.xlu0 %v3068_v9, %s8271_s0  ;;  %11514 = vst [vmem:[#allocation4_spill] sm:$0xff] %v9772_v58  ;;  %v7085_v9 = vmul.f32 -1.442695, %v2944_v31  ;;  %v2946_v29 = vadd.f32 %v2915_v24, %v9772_v58  ;;  %v7092_v45 = vmul.f32 -1.442695, %v2951_v51 }
 0xc7e   :  { %v7095_v51 = vmul.f32 -1.442695, %v2954_v60 }
 0xc7f   :  { %3095 = vrot.lane.b32.xlu1 %v3054_v30, %s8271_s0  ;;  %v7088_v30 = vmul.f32 -1.442695, %v2947_v27  ;;  %v7087_v10 = vmul.f32 -1.442695, %v2946_v29  ;;  %v2884_v27 = vld [vmem:[#allocation2 + $0x1c] sm:$0x4] }
 0xc80   :  { %v9794_v22 = vunpack.c.l.bf16 %v2884_v27 }
 0xc81   :  { %3099 = vrot.lane.b32.xlu0 %v3069_v13, %s8271_s0  ;;  %v2888_v13 = vld [vmem:[#allocation2 + $0x2c] sm:$0x4]  ;;  %7840 = vpow2.f32 %v7088_v30 }
 0xc82   :  { %7842 = vpow2.f32 %v7084_v23  ;;  %v9780_v50 = vunpack.c.l.bf16 %v2888_v13  ;;  %v9796_v23 = vunpack.c.l.bf16 %v2891_v4  ;;  %v2948_v47 = vadd.f32 %v2917_v39, %v9794_v22 }
 0xc83   :  { %3085 = vrot.lane.b32.xlu1 %v3063_v14, %s8271_s0  ;;  %v2918_v14 = vrot.slane %v9718_v18, 4  ;;  %7844 = vpow2.f32 %v7085_v9  ;;  %v2892_v9 = vld [vmem:[#allocation2 + $0x3c] sm:$0x4]  ;;  %v7094_v13 = vmul.f32 -1.442695, %v2953_v8 }
 0xc84   :  { %7846 = vrcp.f32 %v3009_v21  ;;  %11516 = vst [vmem:[#allocation6_spill] sm:$0xff] %v9796_v23  ;;  %v9803_v32 = vunpack.c.l.bf16 %v2892_v9 }
 0xc85   :  { %3101 = vrot.lane.b32.xlu0 %v3070_v52, %s8271_s0  ;;  %v2921_v52 = vrot.slane %v9718_v18, 7  ;;  %v2949_v11 = vadd.f32 %v2918_v14, %v9778_v57  ;;  %7848 = vpow2.f32 %v7091_v20  ;;  %v2924_v14 = vrot.slane %v9718_v18, 3 }
 0xc86   :  { %7850 = vpow2.f32 %v7092_v45  ;;  %11517 = vst [vmem:[#allocation7_spill] sm:$0xff] %v9803_v32 }
 0xc87   :  { %v2952_v48 = vadd.f32 %v2921_v52, %v9780_v50  ;;  %v7090_v31 = vmul.f32 -1.442695, %v2949_v11  ;;  %7852 = vpow2.f32 %v7087_v10  ;;  %v2955_v52 = vadd.f32 %v2923_v12, %v9796_v23 }
 0xc88   :  { %v2956_v18 = vadd.f32 %v2924_v14, %v9803_v32 }
 0xc89   :  { %v7093_v30 = vmul.f32 -1.442695, %v2952_v48  ;;  %7854 = vpow2.f32 %v7090_v31  ;;  %v7089_v48 = vmul.f32 -1.442695, %v2948_v47  ;;  %v7096_v10 = vmul.f32 -1.442695, %v2955_v52 }
 0xc8a   :  { %v7097_v4 = vmul.f32 -1.442695, %v2956_v18 }
 0xc8b   :  { %v7841_v24 = vpop.eup %7840  ;;  %7856 = vpow2.f32 %v7093_v30 }
 0xc8c   :  { %v7843_v17 = vpop.eup %7842  ;;  %7858 = vrcp.f32 %v3006_v53  ;;  %v3011_v29 = vadd.f32 1.0, %v7841_v24 }
 0xc8d   :  { %v7845_v21 = vpop.eup %7844  ;;  %7860 = vrcp.f32 %v3005_v6  ;;  %v3007_v11 = vadd.f32 1.0, %v7843_v17 }
 0xc8e   :  { %v9801_v20 = vpop.eup %7846  ;;  %7862 = vpow2.f32 %v7094_v13  ;;  %v3008_v54 = vadd.f32 1.0, %v7845_v21 }
 0xc8f   :  { %v7849_v33 = vpop.eup %7848  ;;  %7864 = vpow2.f32 %v7095_v51 }
 0xc90   :  { %7866 = vrcp.f32 %v3011_v29  ;;  %v7851_v27 = vpop.eup %7850  ;;  %v3014_v44 = vadd.f32 1.0, %v7849_v33 }
 0xc91   :  { %7868 = vrcp.f32 %v3007_v11  ;;  %v7853_v39 = vpop.eup %7852  ;;  %v3015_v31 = vadd.f32 1.0, %v7851_v27 }
 0xc92   :  { %7870 = vpow2.f32 %v7089_v48  ;;  %v3010_v60 = vadd.f32 1.0, %v7853_v39 }
 0xc93   :  { %7872 = vpow2.f32 %v7096_v10  ;;  %v7855_v8 = vpop.eup %7854 }
 0xc94   :  { %7874 = vrcp.f32 %v3008_v54  ;;  %v3013_v52 = vadd.f32 1.0, %v7855_v8 }
 0xc95   :  { %v7857_v12 = vpop.eup %7856  ;;  %7876 = vrcp.f32 %v3014_v44 }
 0xc96   :  { %v9808_v30 = vpop.eup %7858  ;;  %7878 = vpow2.f32 %v7097_v4  ;;  %v3016_v13 = vadd.f32 1.0, %v7857_v12 }
 0xc97   :  { %v9810_v53 = vpop.eup %7860  ;;  %7880 = vrcp.f32 %v3015_v31 }
 0xc98   :  { %v7863_v17 = vpop.eup %7862  ;;  %7882 = vrcp.f32 %v3010_v60 }
 0xc99   :  { %v7865_v14 = vpop.eup %7864  ;;  %7884 = vrcp.f32 %v3016_v13  ;;  %v3017_v10 = vadd.f32 1.0, %v7863_v17 }
 0xc9a   :  { %v9814_v51 = vpop.eup %7866  ;;  %7886 = vrcp.f32 %v3013_v52 }
 0xc9b   :  { %v9818_v21 = vpop.eup %7868 }
 0xc9c   :  { %v7871_v11 = vpop.eup %7870 }
 0xc9d   :  { %v7873_v18 = vpop.eup %7872  ;;  %v3012_v60 = vadd.f32 1.0, %v7871_v11 }
 0xc9e   :  { %v9822_v54 = vpop.eup %7874  ;;  %v3019_v31 = vadd.f32 1.0, %v7873_v18 }
 0xc9f   :  { %v9826_v27 = vpop.eup %7876 }
 0xca0   :  { %v7879_v12 = vpop.eup %7878 }
 0xcd9   :  { %v3080_v40 = vpop.permute.xlu1 %3079 }
 0xcda   :  { %v3123_v45 = vmul.f32 %v9801_v20, %v3080_v40 }
 0xcdb   :  { %v3074_v24 = vpop.permute.xlu0 %3073 }
 0xcdc   :  { %3159 = vrot.lane.b32.xlu1 %v3123_v45, %s8271_s0  ;;  %v3120_v47 = vmul.f32 %v9808_v30, %v3074_v24  ;;  %v3018_v45 = vadd.f32 1.0, %v7865_v14  ;;  %v9830_v24 = vpop.eup %7880  ;;  %v3020_v14 = vadd.f32 1.0, %v7879_v12 }
 0xcdd   :  { %v3072_v6 = vpop.permute.xlu1 %3071 }
 0xcde   :  { %v3119_v9 = vmul.f32 %v9810_v53, %v3072_v6  ;;  %3153 = vrot.lane.b32.xlu0 %v3120_v47, %s8271_s0  ;;  %7888 = vrcp.f32 %v3018_v45  ;;  %v9834_v6 = vpop.eup %7882 }
 0xcdf   :  { %v3084_v29 = vpop.permute.xlu0 %3083  ;;  %7890 = vrcp.f32 %v3017_v10  ;;  %v9838_v52 = vpop.eup %7884 }
 0xce0   :  { %3151 = vrot.lane.b32.xlu1 %v3119_v9, %s8271_s0  ;;  %v3125_v33 = vmul.f32 %v9814_v51, %v3084_v29  ;;  %7892 = vrcp.f32 %v3019_v31  ;;  %v9842_v29 = vpop.eup %7886 }
 0xce1   :  { %v3076_v40 = vpop.permute.xlu1 %3075  ;;  %7894 = vrcp.f32 %v3012_v60 }
 0xce2   :  { %v3121_v48 = vmul.f32 %v9818_v21, %v3076_v40  ;;  %3163 = vrot.lane.b32.xlu0 %v3125_v33, %s8271_s0  ;;  %7896 = vrcp.f32 %v3020_v14 }
 0xce3   :  { %v3090_v44 = vpop.permute.xlu0 %3089 }
 0xce4   :  { %3155 = vrot.lane.b32.xlu1 %v3121_v48, %s8271_s0  ;;  %v3128_v4 = vmul.f32 %v9826_v27, %v3090_v44 }
 0xce5   :  { %v3078_v39 = vpop.permute.xlu1 %3077 }
 0xce6   :  { %v3122_v8 = vmul.f32 %v9822_v54, %v3078_v39  ;;  %3169 = vrot.lane.b32.xlu0 %v3128_v4, %s8271_s0 }
 0xce7   :  { %v3092_v17 = vpop.permute.xlu0 %3091 }
 0xce8   :  { %3157 = vrot.lane.b32.xlu1 %v3122_v8, %s8271_s0  ;;  %v3129_v9 = vmul.f32 %v9830_v24, %v3092_v17  ;;  %v9846_v45 = vpop.eup %7888 }
 0xce9   :  { %v3082_v47 = vpop.permute.xlu1 %3081  ;;  %v9850_v18 = vpop.eup %7890 }
 0xcea   :  { %v3124_v13 = vmul.f32 %v9834_v6, %v3082_v47  ;;  %3171 = vrot.lane.b32.xlu0 %v3129_v9, %s8271_s0  ;;  %v9854_v8 = vpop.eup %7892 }
 0xceb   :  { %v3094_v40 = vpop.permute.xlu0 %3093  ;;  %v9858_v31 = vpop.eup %7894 }
 0xcec   :  { %3161 = vrot.lane.b32.xlu1 %v3124_v13, %s8271_s0  ;;  %v3130_v33 = vmul.f32 %v9838_v52, %v3094_v40  ;;  %v9864_v9 = vpop.eup %7896 }
 0xced   :  { %v3088_v11 = vpop.permute.xlu1 %3087 }
 0xcee   :  { %v3127_v48 = vmul.f32 %v9842_v29, %v3088_v11  ;;  %3173 = vrot.lane.b32.xlu0 %v3130_v33, %s8271_s0 }
 0xcef   :  { %v3098_v10 = vpop.permute.xlu0 %3097 }
 0xcf0   :  { %3167 = vrot.lane.b32.xlu1 %v3127_v48, %s8271_s0  ;;  %v3132_v39 = vmul.f32 %v9846_v45, %v3098_v10 }
 0xcf1   :  { %v3096_v44 = vpop.permute.xlu1 %3095 }
 0xcf2   :  { %v3131_v4 = vmul.f32 %v9850_v18, %v3096_v44  ;;  %3177 = vrot.lane.b32.xlu0 %v3132_v39, %s8271_s0 }
 0xcf3   :  { %v3100_v12 = vpop.permute.xlu0 %3099 }
 0xcf4   :  { %3175 = vrot.lane.b32.xlu1 %v3131_v4, %s8271_s0  ;;  %v3133_v17 = vmul.f32 %v9854_v8, %v3100_v12 }
 0xcf5   :  { %v3086_v60 = vpop.permute.xlu1 %3085 }
 0xcf6   :  { %v3126_v47 = vmul.f32 %v9858_v31, %v3086_v60  ;;  %3179 = vrot.lane.b32.xlu0 %v3133_v17, %s8271_s0 }
 0xcf7   :  { %v3102_v13 = vpop.permute.xlu0 %3101 }
 0xcf8   :  { %3165 = vrot.lane.b32.xlu1 %v3126_v47, %s8271_s0  ;;  %v3134_v14 = vmul.f32 %v9864_v9, %v3102_v13 }
 0xcfa   :  { %3181 = vrot.lane.b32.xlu0 %v3134_v14, %s8271_s0 }
 0xd4e   :  { %v3160_v40 = vpop.permute.xlu1 %3159 }
 0xd4f   :  { %v3203_v11 = vadd.f32 %v3160_v40, %v9740_v59 }
 0xd50   :  { %v3154_v33 = vpop.permute.xlu0 %3153 }
 0xd51   :  { %7898 = vtanh.f32 %v3203_v11  ;;  %v3200_v10 = vadd.f32 %v3154_v33, %v9746_v46 }
 0xd52   :  { %v3152_v48 = vpop.permute.xlu1 %3151 }
 0xd53   :  { %v3199_v44 = vadd.f32 %v3152_v48, %v9748_v36  ;;  %7900 = vtanh.f32 %v3200_v10 }
 0xd54   :  { %v3164_v4 = vpop.permute.xlu0 %3163 }
 0xd55   :  { %7902 = vtanh.f32 %v3199_v44  ;;  %v3205_v60 = vadd.f32 %v3164_v4, %v9754_v2 }
 0xd56   :  { %v3156_v12 = vpop.permute.xlu1 %3155 }
 0xd57   :  { %v3201_v17 = vadd.f32 %v3156_v12, %v9756_v3  ;;  %7904 = vtanh.f32 %v3205_v60 }
 0xd58   :  { %v3170_v47 = vpop.permute.xlu0 %3169 }
 0xd59   :  { %7906 = vtanh.f32 %v3201_v17  ;;  %v3208_v14 = vadd.f32 %v3170_v47, %v9765_v34 }
 0xd5a   :  { %v3158_v13 = vpop.permute.xlu1 %3157 }
 0xd5b   :  { %v7899_v39 = vpop.eup %7898  ;;  %v3202_v40 = vadd.f32 %v3158_v13, %v9760_v63  ;;  %7908 = vtanh.f32 %v3208_v14 }
 0xd5c   :  { %3271 = vrot.lane.b32.xlu1 %v7899_v39, %s8272_s4  ;;  %v3172_v11 = vpop.permute.xlu0 %3171 }
 0xd5d   :  { %7910 = vtanh.f32 %v3202_v40  ;;  %v7901_v48 = vpop.eup %7900  ;;  %v3209_v10 = vadd.f32 %v3172_v11, %v9770_v55 }
 0xd5e   :  { %v3162_v33 = vpop.permute.xlu1 %3161  ;;  %3265 = vrot.lane.b32.xlu0 %v7901_v48, %s8272_s4 }
 0xd5f   :  { %v3204_v44 = vadd.f32 %v3162_v33, %v9772_v58  ;;  %v7903_v39 = vpop.eup %7902  ;;  %7912 = vtanh.f32 %v3209_v10 }
 0xd60   :  { %3263 = vrot.lane.b32.xlu1 %v7903_v39, %s8272_s4  ;;  %v3174_v4 = vpop.permute.xlu0 %3173 }
 0xd61   :  { %7914 = vtanh.f32 %v3204_v44  ;;  %v7905_v60 = vpop.eup %7904  ;;  %v3210_v17 = vadd.f32 %v3174_v4, %v9780_v50 }
 0xd62   :  { %v3168_v12 = vpop.permute.xlu1 %3167  ;;  %3275 = vrot.lane.b32.xlu0 %v7905_v60, %s8272_s4 }
 0xd63   :  { %v3207_v47 = vadd.f32 %v3168_v12, %v9778_v57  ;;  %v7907_v13 = vpop.eup %7906  ;;  %7916 = vtanh.f32 %v3210_v17 }
 0xd64   :  { %3267 = vrot.lane.b32.xlu1 %v7907_v13, %s8272_s4  ;;  %v3178_v14 = vpop.permute.xlu0 %3177 }
 0xd65   :  { %7918 = vtanh.f32 %v3207_v47  ;;  %v7909_v11 = vpop.eup %7908  ;;  %v3212_v33 = vadd.f32 %v3178_v14, %v9787_v7  ;;  %v3351_v7 = vrot.slane %v9663_v42, 7  ;;  %v3237_v42 = vsub.f32 1.0, %v9814_v51 }
 0xd66   :  { %v3176_v40 = vpop.permute.xlu1 %3175  ;;  %3281 = vrot.lane.b32.xlu0 %v7909_v11, %s8272_s4 }
 0xd67   :  { %v3211_v48 = vadd.f32 %v3176_v40, %v9785_v16  ;;  %v7911_v10 = vpop.eup %7910  ;;  %7920 = vtanh.f32 %v3212_v33 }
 0xd68   :  { %3269 = vrot.lane.b32.xlu1 %v7911_v10, %s8272_s4  ;;  %v3180_v44 = vpop.permute.xlu0 %3179 }
 0xd69   :  { %7922 = vtanh.f32 %v3211_v48  ;;  %v7913_v4 = vpop.eup %7912  ;;  %v3213_v12 = vadd.f32 %v3180_v44, %v9796_v23  ;;  %v3234_v23 = vsub.f32 1.0, %v9822_v54 }
 0xd6a   :  { %v3166_v39 = vpop.permute.xlu1 %3165  ;;  %3283 = vrot.lane.b32.xlu0 %v7913_v4, %s8272_s4  ;;  %v3344_v4 = vrot.slane %v9593_v19, 7  ;;  %v3347_v19 = vrot.slane %v9631_v26, 7 }
 0xd6b   :  { %v3206_v60 = vadd.f32 %v3166_v39, %v9794_v22  ;;  %v7915_v17 = vpop.eup %7914  ;;  %7924 = vtanh.f32 %v3213_v12  ;;  %v3232_v12 = vsub.f32 1.0, %v9808_v30 }
 0xd6c   :  { %3273 = vrot.lane.b32.xlu1 %v7915_v17, %s8272_s4  ;;  %v3182_v47 = vpop.permute.xlu0 %3181  ;;  %v3343_v17 = vrot.slane %v9598_v43, 7 }
 0xd6d   :  { %7926 = vtanh.f32 %v3206_v60  ;;  %v7917_v13 = vpop.eup %7916  ;;  %v3214_v14 = vadd.f32 %v3182_v47, %v9803_v32  ;;  %v3346_v60 = vrot.slane %v9610_v56, 7  ;;  %v3348_v47 = vrot.slane %v9612_v38, 7 }
 0xd6e   :  { %3285 = vrot.lane.b32.xlu0 %v7917_v13, %s8272_s4  ;;  %v3375_v56 = vmul.f32 %v9810_v53, %v3343_v17  ;;  %v3354_v38 = vrot.slane %v9661_v35, 7  ;;  %v3240_v32 = vsub.f32 1.0, %v9826_v27 }
 0xd6f   :  { %v7919_v40 = vpop.eup %7918  ;;  %7928 = vtanh.f32 %v3214_v14  ;;  %v3231_v14 = vsub.f32 1.0, %v9810_v53 }
 0xd70   :  { %3279 = vrot.lane.b32.xlu1 %v7919_v40, %s8272_s4  ;;  %v3345_v40 = vrot.slane %v9615_v61, 7 }
 0xd71   :  { %v7921_v11 = vpop.eup %7920 }
 0xd72   :  { %3289 = vrot.lane.b32.xlu0 %v7921_v11, %s8272_s4  ;;  %v3352_v11 = vrot.slane %v9640_v25, 7  ;;  %v3356_v25 = vrot.slane %v9672_v28, 7 }
 0xd73   :  { %v7923_v33 = vpop.eup %7922 }
 0xd74   :  { %3287 = vrot.lane.b32.xlu1 %v7923_v33, %s8272_s4  ;;  %v3376_v33 = vmul.f32 %v9808_v30, %v3344_v4  ;;  %v3349_v30 = vrot.slane %v9675_v1, 7  ;;  %v3377_v1 = vmul.f32 %v9818_v21, %v3345_v40 }
 0xd75   :  { %v7925_v48 = vpop.eup %7924 }
 0xd76   :  { %3291 = vrot.lane.b32.xlu0 %v7925_v48, %s8272_s4  ;;  %v3381_v58 = vmul.f32 %v9814_v51, %v3349_v30 }
 0xd77   :  { %v7927_v10 = vpop.eup %7926 }
 0xd78   :  { %3277 = vrot.lane.b32.xlu1 %v7927_v10, %s8272_s4 }
 0xd79   :  { %v7929_v44 = vpop.eup %7928 }
 0xd7a   :  { %3293 = vrot.lane.b32.xlu0 %v7929_v44, %s8272_s4  ;;  %v3353_v44 = vrot.slane %v9644_v49, 7  ;;  %v3233_v49 = vsub.f32 1.0, %v9818_v21  ;;  %v3378_v21 = vmul.f32 %v9822_v54, %v3346_v60  ;;  %v3236_v60 = vsub.f32 1.0, %v9834_v6 }
 0xdce   :  { %v3272_v39 = vpop.permute.xlu1 %3271 }
 0xdd0   :  { %v3266_v13 = vpop.permute.xlu0 %3265 }
 0xdd1   :  { %v3312_v48 = vmul.f32 %v3266_v13, %v3232_v12  ;;  %v3235_v12 = vsub.f32 1.0, %v9801_v20 }
 0xdd2   :  { %v3264_v10 = vpop.permute.xlu1 %3263 }
 0xdd3   :  { %v3311_v43 = vmul.f32 %v3264_v10, %v3231_v14  ;;  %v9915_v61 = vadd.f32 %v3376_v33, %v3312_v48  ;;  %v3379_v33 = vmul.f32 %v9801_v20, %v3347_v19  ;;  %v3315_v48 = vmul.f32 %v3272_v39, %v3235_v12 }
 0xdd4   :  { %v3276_v26 = vpop.permute.xlu0 %3275 }
 0xdd5   :  { %11518 = vst [vmem:[#allocation8_spill] sm:$0xff] %v9915_v61  ;;  %v9919_v4 = vadd.f32 %v3375_v56, %v3311_v43  ;;  %v3408_v35 = vpack.c.bf16 %v9915_v61, %v9915_v61  ;;  %v3317_v56 = vmul.f32 %v3276_v26, %v3237_v42  ;;  %v3385_v42 = vmul.f32 %v9830_v24, %v3353_v44 }
 0xdd6   :  { %v3268_v17 = vpop.permute.xlu1 %3267 }
 0xdd7   :  { %11519 = vst [vmem:[#allocation9_spill] sm:$0xff] %v9919_v4  ;;  %v3407_v28 = vpack.c.bf16 %v9919_v4, %v9919_v4  ;;  %v3313_v14 = vmul.f32 %v3268_v17, %v3233_v49  ;;  %v3440_v10 = vunpack.c.l.b16 %v3408_v35  ;;  %v3384_v4 = vmul.f32 %v9826_v27, %v3352_v11 }
 0xdd8   :  { %v3282_v61 = vpop.permute.xlu0 %3281  ;;  %v9941_v49 = vadd.f32 %v3379_v33, %v3315_v48  ;;  %v9943_v12 = vadd.f32 %v3381_v58, %v3317_v56  ;;  %v3241_v35 = vsub.f32 1.0, %v9830_v24  ;;  %v3386_v58 = vmul.f32 %v9838_v52, %v3354_v38 }
 0xdd9   :  { %v3439_v43 = vunpack.c.l.b16 %v3407_v28  ;;  %v9932_v53 = vadd.f32 %v3377_v1, %v3313_v14  ;;  %v3456_v13 = vrot.slane %v3440_v10, 3  ;;  %v3320_v19 = vmul.f32 %v3282_v61, %v3240_v32 }
 0xdda   :  { %v3270_v40 = vpop.permute.xlu1 %3269  ;;  %v3380_v32 = vmul.f32 %v9834_v6, %v3348_v47  ;;  %v3242_v61 = vsub.f32 1.0, %v9838_v52  ;;  %v3413_v1 = vpack.c.bf16 %v9943_v12, %v9943_v12  ;;  %v3239_v6 = vsub.f32 1.0, %v9842_v29 }
 0xddb   :  { %v3455_v20 = vrot.slane %v3439_v43, 4  ;;  %v3409_v39 = vpack.c.bf16 %v9932_v53, %v9932_v53  ;;  %v3314_v26 = vmul.f32 %v3270_v40, %v3234_v23  ;;  %v9954_v28 = vadd.f32 %v3384_v4, %v3320_v19 }
 0xddc   :  { %v3284_v54 = vpop.permute.xlu0 %3283  ;;  %v3383_v33 = vmul.f32 %v9842_v29, %v3351_v7  ;;  %v3244_v56 = vsub.f32 1.0, %v9846_v45  ;;  %v3388_v43 = vmul.f32 %v9846_v45, %v3356_v25 }
 0xddd   :  { %v3457_v51 = vsel %vm901_vm3, %v3456_v13, %v3455_v20  ;;  %v3441_v27 = vunpack.c.l.b16 %v3409_v39  ;;  %v9948_v11 = vadd.f32 %v3378_v21, %v3314_v26  ;;  %v3321_v30 = vmul.f32 %v3284_v54, %v3241_v35 }
 0xdde   :  { %v3274_v23 = vpop.permute.xlu1 %3273  ;;  %v3411_v13 = vpack.c.bf16 %v9941_v49, %v9941_v49  ;;  %v3243_v21 = vsub.f32 1.0, %v9850_v18  ;;  %v3416_v40 = vpack.c.bf16 %v9954_v28, %v9954_v28  ;;  %v3445_v35 = vunpack.c.l.b16 %v3413_v1 }
 0xddf   :  { %v3458_v17 = vrot.slane %v3441_v27, 2  ;;  %v3410_v24 = vpack.c.bf16 %v9948_v11, %v9948_v11  ;;  %v3316_v44 = vmul.f32 %v3274_v23, %v3236_v60  ;;  %v9962_v14 = vadd.f32 %v3385_v42, %v3321_v30 }
 0xde0   :  { %v3286_v4 = vpop.permute.xlu0 %3285  ;;  %v3443_v26 = vunpack.c.l.b16 %v3411_v13  ;;  %v11520_v27 = vrot.slane %v9658_v0, 7  ;;  %v3245_v23 = vsub.f32 1.0, %v9854_v8  ;;  %v3465_v13 = vrot.slane %v3445_v35, 6 }
 0xde1   :  { %v3459_v47 = vsel %vm904_vm4, %v3458_v17, %v3457_v51  ;;  %v3442_v52 = vunpack.c.l.b16 %v3410_v24  ;;  %v9966_v38 = vadd.f32 %v3380_v32, %v3316_v44  ;;  %v3322_v48 = vmul.f32 %v3286_v4, %v3242_v61 }
 0xde2   :  { %v3280_v10 = vpop.permute.xlu1 %3279  ;;  %v3417_v7 = vpack.c.bf16 %v9962_v14, %v9962_v14  ;;  %v3387_v54 = vmul.f32 %v9850_v18, %v11520_v27  ;;  %v11521_v61 = vrot.slane %v9686_v62, 7  ;;  %v3448_v17 = vunpack.c.l.b16 %v3416_v40 }
 0xde3   :  { %v3460_v20 = vrot.slane %v3442_v52, 1  ;;  %v3412_v39 = vpack.c.bf16 %v9966_v38, %v9966_v38  ;;  %v3319_v19 = vmul.f32 %v3280_v10, %v3239_v6  ;;  %v9978_v29 = vadd.f32 %v3386_v58, %v3322_v48 }
 0xde4   :  { %v3290_v51 = vpop.permute.xlu0 %3289  ;;  %v3389_v58 = vmul.f32 %v9854_v8, %v11521_v61  ;;  %v3449_v18 = vunpack.c.l.b16 %v3417_v7  ;;  %v3238_v6 = vsub.f32 1.0, %v9858_v31  ;;  %v11522_v10 = vrot.slane %v9688_v41, 7 }
 0xde5   :  { %v3461_v42 = vsel %vm907_vm5, %v3460_v20, %v3459_v47  ;;  %v3444_v45 = vunpack.c.l.b16 %v3412_v39  ;;  %v9981_v25 = vadd.f32 %v3383_v33, %v3319_v19  ;;  %v3418_v30 = vpack.c.bf16 %v9978_v29, %v9978_v29 }
 0xde6   :  { %v3462_v60 = vsel %vm910_vm6, %v3443_v26, %v3461_v42  ;;  %v3288_v32 = vpop.permute.xlu1 %3287  ;;  %v3324_v0 = vmul.f32 %v3290_v51, %v3244_v56  ;;  %v3382_v40 = vmul.f32 %v9858_v31, %v11522_v10  ;;  %v3472_v35 = vrot.slane %v3449_v18, 2 }
 0xde7   :  { %v3463_v24 = vrot.slane %v3444_v45, 7  ;;  %v3415_v44 = vpack.c.bf16 %v9981_v25, %v9981_v25  ;;  %v3323_v1 = vmul.f32 %v3288_v32, %v3243_v21  ;;  %v3450_v52 = vunpack.c.l.b16 %v3418_v30 }
 0xde8   :  { %v9997_v33 = vadd.f32 %v3388_v43, %v3324_v0  ;;  %v3292_v62 = vpop.permute.xlu0 %3291  ;;  %v3470_v21 = vrot.slane %v3448_v17, 3  ;;  %v3358_v43 = vrot.slane %v9702_v37, 7  ;;  %v3246_v37 = vsub.f32 1.0, %v9864_v9 }
 0xde9   :  { %v3464_v47 = vsel %vm913_vm7, %v3463_v24, %v3462_v60  ;;  %v3447_v4 = vunpack.c.l.b16 %v3415_v44  ;;  %v9999_v48 = vadd.f32 %v3387_v54, %v3323_v1  ;;  %v3325_v8 = vmul.f32 %v3292_v62, %v3245_v23 }
 0xdea   :  { %v3278_v56 = vpop.permute.xlu1 %3277  ;;  %v3466_v20 = vsel %vm916_vm8, %v3465_v13, %v3464_v47  ;;  %v3420_v19 = vpack.c.bf16 %v9997_v33, %v9997_v33  ;;  %v3474_v41 = vrot.slane %v3450_v52, 1  ;;  %v3390_v24 = vmul.f32 %v9864_v9, %v3358_v43 }
 0xdeb   :  { %v3469_v39 = vrot.slane %v3447_v4, 4  ;;  %v3318_v26 = vmul.f32 %v3278_v56, %v3238_v6  ;;  %v3419_v7 = vpack.c.bf16 %v9999_v48, %v9999_v48  ;;  %v10010_v42 = vadd.f32 %v3389_v58, %v3325_v8  ;;  %v8258_v56 = vld [vmem:[%s11496_s22] sm:$0xff]  }
 0xdec   :  { %v3452_v45 = vunpack.c.l.b16 %v3420_v19  ;;  %v3294_v27 = vpop.permute.xlu0 %3293 }
 0xded   :  { %v3471_v31 = vsel %vm901_vm3, %v3470_v21, %v3469_v39  ;;  %v10013_v51 = vadd.f32 %v3382_v40, %v3318_v26  ;;  %v3451_v60 = vunpack.c.l.b16 %v3419_v7  ;;  %v3421_v30 = vpack.c.bf16 %v10010_v42, %v10010_v42 }
 0xdee   :  { %v3473_v54 = vsel %vm904_vm4, %v3472_v35, %v3471_v31  ;;  %v3477_v32 = vrot.slane %v3452_v45, 7  ;;  %v3326_v44 = vmul.f32 %v3294_v27, %v3246_v37 }
 0xdef   :  { %v3475_v23 = vsel %vm907_vm5, %v3474_v41, %v3473_v54  ;;  %v3414_v61 = vpack.c.bf16 %v10013_v51, %v10013_v51  ;;  %v3453_v17 = vunpack.c.l.b16 %v3421_v30 }
 0xdf0   :  { %v3476_v58 = vsel %vm910_vm6, %v3451_v60, %v3475_v23  ;;  %v10025_v1 = vadd.f32 %v3390_v24, %v3326_v44 }
 0xdf1   :  { %v3446_v0 = vunpack.c.l.b16 %v3414_v61  ;;  %v3478_v13 = vsel %vm913_vm7, %v3477_v32, %v3476_v58  ;;  %v3479_v18 = vrot.slane %v3453_v17, 6 }
 0xdf2   :  { %v3422_v47 = vpack.c.bf16 %v10025_v1, %v10025_v1 }
 0xdf3   :  { %v3467_v6 = vrot.slane %v3446_v0, 5  ;;  %v3480_v52 = vsel %vm916_vm8, %v3479_v18, %v3478_v13 }
 0xdf4   :  { %v3454_v62 = vunpack.c.l.b16 %v3422_v47 }
 0xdf5   :  { %v3468_v4 = vsel %vm919_vm9, %v3467_v6, %v3466_v20  ;;  %v8259_v20 = vld [vmem:[%s11496_s22 + $0x8] sm:$0xff]  }
 0xdf6   :  { %v3481_v8 = vrot.slane %v3454_v62, 5 }
 0xdf8   :  { %v3482_v10 = vsel %vm919_vm9, %v3481_v8, %v3480_v52 }
 0xdf9   :  { %v3483_v9 = vpack.c.b16 %v3482_v10, %v3468_v4 }
 0xdfb   :  { %3484 = vrot.lane.b32.xlu1 %v3483_v9, %s8272_s4 }
 0xe6d   :  { %v3485_v40 = vpop.permute.xlu1 %3484 }
 0xe6e   :  { %7317 = vmatmul.mubr.msk.bf16.vlgmr.msra.gmra.mrb[16].mxu1 %vm146_vm1, %v3485_v40 }
 0xe6f   :  { %7329 = vmatpush3.bf16.msra.mxu1 %v8258_v56  ;;  %7332 = vmatprep.mubr.msk.bf16.mxu1 %vm8269_vm0, %v11502_v5 }
 0xe70   :  { %7330 = vmatprep.subr.bf16.mxu1 %v11502_v5 }
 0xe73   :  { %7331 = vmatpush3.bf16.msra.mxu1 %v8259_v20 }
 0xe74   :  { %7356 = vmatprep.subr.bf16.mxu1 %v11502_v5 }
 0xf41   :  { %v10044_v21 = vpop.f32.mrb[16].mxu1 }
 0xf42   :  { %v7318_v39 = vpop.f32.mrb[17].mxu1  ;;  %v3674_v43 = vadd.f32 %v10044_v21, %v8436_v15  ;;  %v3533_v24 = vrot.slane %v10044_v21, 4  ;;  %v3532_v44 = vrot.slane %v10044_v21, 3  ;;  %v3534_v0 = vrot.slane %v10044_v21, 5 }
 0xf43   :  { %v10046_v19 = vpop.f32.mrb[18].mxu1  ;;  %v3538_v18 = vrot.slane %v10044_v21, 2  ;;  %v3535_v47 = vrot.slane %v10044_v21, 6  ;;  %v3536_v9 = vrot.slane %v10044_v21, 7 }
 0xf44   :  { %v7319_v26 = vpop.f32.mrb[19].mxu1  ;;  %v3679_v35 = vrot.slane %v3674_v43, 4  ;;  %v3678_v7 = vrot.slane %v3674_v43, 3  ;;  %v3675_v41 = vadd.f32 %v10046_v19, %v8436_v15  ;;  %v3684_v31 = vrot.slane %v3674_v43, 2 }
 0xf45   :  { %v3680_v45 = vrot.slane %v3674_v43, 5  ;;  %v3681_v27 = vrot.slane %v3674_v43, 6  ;;  %v3682_v60 = vrot.slane %v3674_v43, 7  ;;  %v3683_v37 = vrot.slane %v3674_v43, 1 }
 0xf46   :  { %3694 = vrot.lane.b32.xlu1 %v3679_v35, %s8271_s0  ;;  %3692 = vrot.lane.b32.xlu0 %v3678_v7, %s8271_s0  ;;  %v3686_v54 = vrot.slane %v3675_v41, 4  ;;  %v3687_v30 = vrot.slane %v3675_v41, 5  ;;  %v3688_v32 = vrot.slane %v3675_v41, 6  ;;  %v3689_v23 = vrot.slane %v3675_v41, 7 }
 0xf47   :  { %v3685_v61 = vrot.slane %v3675_v41, 3  ;;  %v3690_v58 = vrot.slane %v3675_v41, 1  ;;  %v3691_v17 = vrot.slane %v3675_v41, 2  ;;  %v3563_v13 = vadd.f32 %v3533_v24, %v9746_v46 }
 0xf48   :  { %v3562_v6 = vadd.f32 %v3532_v44, %v9748_v36  ;;  %v3564_v52 = vadd.f32 %v3534_v0, %v9756_v3  ;;  %v3569_v62 = vadd.f32 %v3538_v18, %v9794_v22  ;;  %v3540_v10 = vrot.slane %v10046_v19, 4 }
 0xf49   :  { %v7100_v4 = vmul.f32 -1.442695, %v3563_v13  ;;  %v3565_v40 = vadd.f32 %v3535_v47, %v9760_v63  ;;  %v3541_v39 = vrot.slane %v10046_v19, 5  ;;  %v3566_v35 = vadd.f32 %v3536_v9, %v9740_v59 }
 0xf4a   :  { %3706 = vrot.lane.b32.xlu1 %v3684_v31, %s8271_s0  ;;  %3696 = vrot.lane.b32.xlu0 %v3680_v45, %s8271_s0  ;;  %v7099_v8 = vmul.f32 -1.442695, %v3562_v6  ;;  %v7101_v56 = vmul.f32 -1.442695, %v3564_v52  ;;  %v7106_v20 = vmul.f32 -1.442695, %v3569_v62  ;;  %v3571_v26 = vadd.f32 %v3540_v10, %v9765_v34 }
 0xf4b   :  { %7930 = vpow2.f32 %v7100_v4  ;;  %v7102_v7 = vmul.f32 -1.442695, %v3565_v40  ;;  %v3572_v31 = vadd.f32 %v3541_v39, %v9770_v55  ;;  %v3544_v24 = vrot.slane %v10046_v19, 1  ;;  %v11523_v52 = vld [vmem:[#allocation4_spill] sm:$0xff]  ;;  %v11524_v10 = vld [vmem:[#allocation6_spill] sm:$0xff] }
 0xf4c   :  { %7932 = vpow2.f32 %v7099_v8  ;;  %v7108_v45 = vmul.f32 -1.442695, %v3571_v26  ;;  %v3567_v4 = vadd.f32 %v10044_v21, %v11523_v52  ;;  %v3545_v8 = vrot.slane %v10046_v19, 2 }
 0xf4d   :  { %7934 = vpow2.f32 %v7101_v56  ;;  %v3576_v9 = vadd.f32 %v3544_v24, %v11524_v10 }
 0xf4e   :  { %3698 = vrot.lane.b32.xlu0 %v3681_v27, %s8271_s0  ;;  %3710 = vrot.lane.b32.xlu1 %v3686_v54, %s8271_s0  ;;  %7936 = vpow2.f32 %v7106_v20  ;;  %v3539_v54 = vrot.slane %v10046_v19, 3 }
 0xf4f   :  { %7938 = vpow2.f32 %v7102_v7 }
 0xf50   :  { %7940 = vpow2.f32 %v7108_v45 }
 0xf52   :  { %3700 = vrot.lane.b32.xlu0 %v3682_v60, %s8271_s0  ;;  %3712 = vrot.lane.b32.xlu1 %v3687_v30, %s8271_s0  ;;  %v7103_v60 = vmul.f32 -1.442695, %v3566_v35  ;;  %v3543_v30 = vrot.slane %v10046_v19, 7  ;;  %v11525_v35 = vld [vmem:[#allocation5_spill] sm:$0xff] }
 0xf53   :  { %v3575_v7 = vadd.f32 %v10046_v19, %v11525_v35 }
 0xf54   :  { %7942 = vpow2.f32 %v7103_v60  ;;  %v3574_v44 = vadd.f32 %v3543_v30, %v9785_v16 }
 0xf55   :  { %v7112_v30 = vmul.f32 -1.442695, %v3575_v7 }
 0xf56   :  { %3704 = vrot.lane.b32.xlu0 %v3683_v37, %s8271_s0  ;;  %3714 = vrot.lane.b32.xlu1 %v3688_v32, %s8271_s0  ;;  %v7109_v32 = vmul.f32 -1.442695, %v3572_v31  ;;  %v7111_v40 = vmul.f32 -1.442695, %v3574_v44  ;;  %v7113_v31 = vmul.f32 -1.442695, %v3576_v9 }
 0xf58   :  { %7944 = vpow2.f32 %v7109_v32 }
 0xf5a   :  { %3716 = vrot.lane.b32.xlu1 %v3689_v23, %s8271_s0  ;;  %3708 = vrot.lane.b32.xlu0 %v3685_v61, %s8271_s0  ;;  %v7931_v23 = vpop.eup %7930 }
 0xf5b   :  { %v7933_v61 = vpop.eup %7932  ;;  %v3627_v13 = vadd.f32 1.0, %v7931_v23 }
 0xf5c   :  { %v7935_v18 = vpop.eup %7934  ;;  %v3626_v6 = vadd.f32 1.0, %v7933_v61 }
 0xf5d   :  { %v7937_v47 = vpop.eup %7936  ;;  %v3628_v56 = vadd.f32 1.0, %v7935_v18 }
 0xf5e   :  { %3720 = vrot.lane.b32.xlu1 %v3690_v58, %s8271_s0  ;;  %3702 = vrot.lane.b32.xlu0 %v3674_v43, %s8271_s0  ;;  %v3537_v43 = vrot.slane %v10044_v21, 1  ;;  %v7939_v20 = vpop.eup %7938  ;;  %v3633_v39 = vadd.f32 1.0, %v7937_v47  ;;  %v11526_v21 = vld [vmem:[#allocation7_spill] sm:$0xff] }
 0xf5f   :  { %v7941_v26 = vpop.eup %7940  ;;  %v3629_v45 = vadd.f32 1.0, %v7939_v20 }
 0xf60   :  { %v3568_v27 = vadd.f32 %v3537_v43, %v9754_v2  ;;  %v7104_v43 = vmul.f32 -1.442695, %v3567_v4 }
 0xf62   :  { %3722 = vrot.lane.b32.xlu1 %v3691_v17, %s8271_s0  ;;  %3718 = vrot.lane.b32.xlu0 %v3675_v41, %s8271_s0  ;;  %v3542_v41 = vrot.slane %v10046_v19, 6  ;;  %v7105_v58 = vmul.f32 -1.442695, %v3568_v27  ;;  %v3570_v17 = vadd.f32 %v3539_v54, %v9778_v57  ;;  %v7943_v27 = vpop.eup %7942  ;;  %v3635_v54 = vadd.f32 1.0, %v7941_v26 }
 0xf63   :  { %v7945_v60 = vpop.eup %7944  ;;  %v3630_v23 = vadd.f32 1.0, %v7943_v27 }
 0xf64   :  { %v3573_v37 = vadd.f32 %v3542_v41, %v9780_v50  ;;  %7946 = vpow2.f32 %v7105_v58  ;;  %v7107_v62 = vmul.f32 -1.442695, %v3570_v17  ;;  %v3577_v41 = vadd.f32 %v3545_v8, %v11526_v21 }
 0xf65   :  { %v3636_v19 = vadd.f32 1.0, %v7945_v60 }
 0xf66   :  { %v7110_v0 = vmul.f32 -1.442695, %v3573_v37  ;;  %v7114_v37 = vmul.f32 -1.442695, %v3577_v41 }
 0xf68   :  { %7948 = vpow2.f32 %v7110_v0 }
 0xf69   :  { %7950 = vrcp.f32 %v3627_v13 }
 0xf6a   :  { %7952 = vrcp.f32 %v3626_v6 }
 0xf6b   :  { %7954 = vpow2.f32 %v7107_v62 }
 0xf6c   :  { %7956 = vpow2.f32 %v7111_v40 }
 0xf6d   :  { %7958 = vrcp.f32 %v3628_v56 }
 0xf6e   :  { %7960 = vrcp.f32 %v3633_v39  ;;  %v7947_v32 = vpop.eup %7946 }
 0xf6f   :  { %7962 = vpow2.f32 %v7104_v43  ;;  %v3632_v6 = vadd.f32 1.0, %v7947_v32 }
 0xf70   :  { %7964 = vpow2.f32 %v7113_v31 }
 0xf71   :  { %7966 = vrcp.f32 %v3629_v45 }
 0xf72   :  { %v7949_v61 = vpop.eup %7948  ;;  %7968 = vrcp.f32 %v3635_v54 }
 0xf73   :  { %v10100_v58 = vpop.eup %7950  ;;  %7970 = vpow2.f32 %v7112_v30  ;;  %v3637_v4 = vadd.f32 1.0, %v7949_v61 }
 0xf74   :  { %v10102_v17 = vpop.eup %7952  ;;  %7972 = vpow2.f32 %v7114_v37 }
 0xf75   :  { %v7955_v0 = vpop.eup %7954  ;;  %7974 = vrcp.f32 %v3630_v23 }
 0xf76   :  { %v7957_v47 = vpop.eup %7956  ;;  %7976 = vrcp.f32 %v3636_v19  ;;  %v3634_v7 = vadd.f32 1.0, %v7955_v0 }
 0xf77   :  { %v10106_v62 = vpop.eup %7958  ;;  %7978 = vrcp.f32 %v3632_v6  ;;  %v3638_v26 = vadd.f32 1.0, %v7957_v47 }
 0xf78   :  { %v10110_v8 = vpop.eup %7960  ;;  %7980 = vrcp.f32 %v3637_v4 }
 0xf79   :  { %v7963_v56 = vpop.eup %7962  ;;  %7982 = vrcp.f32 %v3638_v26 }
 0xf7a   :  { %v7965_v43 = vpop.eup %7964  ;;  %7984 = vrcp.f32 %v3634_v7  ;;  %v3631_v23 = vadd.f32 1.0, %v7963_v56 }
 0xf7b   :  { %v10114_v41 = vpop.eup %7966  ;;  %v3640_v37 = vadd.f32 1.0, %v7965_v43 }
 0xf7c   :  { %v10118_v31 = vpop.eup %7968 }
 0xf7d   :  { %v7971_v54 = vpop.eup %7970  ;;  %7986 = vrcp.f32 %v3640_v37 }
 0xf7e   :  { %v7973_v32 = vpop.eup %7972  ;;  %7988 = vrcp.f32 %v3631_v23  ;;  %v3639_v6 = vadd.f32 1.0, %v7971_v54 }
 0xf7f   :  { %v10122_v61 = vpop.eup %7974 }
 0xf80   :  { %v10126_v19 = vpop.eup %7976 }
 0xf81   :  { %v10130_v47 = vpop.eup %7978 }
 0xf82   :  { %v10134_v4 = vpop.eup %7980 }
 0xfb8   :  { %v3695_v24 = vpop.permute.xlu1 %3694  ;;  %v3693_v44 = vpop.permute.xlu0 %3692 }
 0xfb9   :  { %v3741_v13 = vmul.f32 %v10100_v58, %v3695_v24  ;;  %v3740_v18 = vmul.f32 %v10102_v17, %v3693_v44 }
 0xfbb   :  { %3774 = vrot.lane.b32.xlu1 %v3741_v13, %s8271_s0  ;;  %3772 = vrot.lane.b32.xlu0 %v3740_v18, %s8271_s0  ;;  %v3641_v18 = vadd.f32 1.0, %v7973_v32 }
 0xfbc   :  { %v3707_v9 = vpop.permute.xlu1 %3706  ;;  %v3697_v40 = vpop.permute.xlu0 %3696 }
 0xfbd   :  { %v3747_v20 = vmul.f32 %v10110_v8, %v3707_v9  ;;  %v3742_v39 = vmul.f32 %v10106_v62, %v3697_v40  ;;  %7990 = vrcp.f32 %v3641_v18 }
 0xfbe   :  { %7992 = vrcp.f32 %v3639_v6 }
 0xfbf   :  { %3786 = vrot.lane.b32.xlu1 %v3747_v20, %s8271_s0  ;;  %3776 = vrot.lane.b32.xlu0 %v3742_v39, %s8271_s0  ;;  %v10138_v39 = vpop.eup %7982 }
 0xfc0   :  { %v3699_v45 = vpop.permute.xlu0 %3698  ;;  %v3711_v27 = vpop.permute.xlu1 %3710 }
 0xfc1   :  { %v3743_v60 = vmul.f32 %v10114_v41, %v3699_v45  ;;  %v3749_v30 = vmul.f32 %v10118_v31, %v3711_v27  ;;  %v10142_v26 = vpop.eup %7984 }
 0xfc2   :  { %v10146_v54 = vpop.eup %7986 }
 0xfc3   :  { %3778 = vrot.lane.b32.xlu0 %v3743_v60, %s8271_s0  ;;  %3790 = vrot.lane.b32.xlu1 %v3749_v30, %s8271_s0  ;;  %v10150_v60 = vpop.eup %7988 }
 0xfc4   :  { %v3701_v24 = vpop.permute.xlu0 %3700  ;;  %v3713_v44 = vpop.permute.xlu1 %3712 }
 0xfc5   :  { %v3744_v0 = vmul.f32 %v10122_v61, %v3701_v24  ;;  %v3750_v13 = vmul.f32 %v10126_v19, %v3713_v44 }
 0xfc7   :  { %3780 = vrot.lane.b32.xlu0 %v3744_v0, %s8271_s0  ;;  %3792 = vrot.lane.b32.xlu1 %v3750_v13, %s8271_s0  ;;  %v10154_v24 = vpop.eup %7990 }
 0xfc8   :  { %v3705_v9 = vpop.permute.xlu0 %3704  ;;  %v3715_v40 = vpop.permute.xlu1 %3714 }
 0xfc9   :  { %v3746_v56 = vmul.f32 %v10130_v47, %v3705_v9  ;;  %v3751_v20 = vmul.f32 %v10134_v4, %v3715_v40  ;;  %v10158_v44 = vpop.eup %7992 }
 0xfcb   :  { %3784 = vrot.lane.b32.xlu0 %v3746_v56, %s8271_s0  ;;  %3794 = vrot.lane.b32.xlu1 %v3751_v20, %s8271_s0 }
 0xfcc   :  { %v3717_v43 = vpop.permute.xlu1 %3716  ;;  %v3709_v7 = vpop.permute.xlu0 %3708 }
 0xfcd   :  { %v3752_v45 = vmul.f32 %v10138_v39, %v3717_v43  ;;  %v3748_v27 = vmul.f32 %v10142_v26, %v3709_v7 }
 0xfcf   :  { %3796 = vrot.lane.b32.xlu1 %v3752_v45, %s8271_s0  ;;  %3788 = vrot.lane.b32.xlu0 %v3748_v27, %s8271_s0 }
 0xfd0   :  { %v3721_v30 = vpop.permute.xlu1 %3720  ;;  %v3703_v37 = vpop.permute.xlu0 %3702 }
 0xfd1   :  { %v3754_v32 = vmul.f32 %v10146_v54, %v3721_v30  ;;  %v3745_v23 = vmul.f32 %v10150_v60, %v3703_v37 }
 0xfd3   :  { %3800 = vrot.lane.b32.xlu1 %v3754_v32, %s8271_s0  ;;  %3782 = vrot.lane.b32.xlu0 %v3745_v23, %s8271_s0 }
 0xfd4   :  { %v3723_v0 = vpop.permute.xlu1 %3722  ;;  %v3719_v13 = vpop.permute.xlu0 %3718 }
 0xfd5   :  { %v3755_v18 = vmul.f32 %v10154_v24, %v3723_v0  ;;  %v3753_v6 = vmul.f32 %v10158_v44, %v3719_v13 }
 0xfd7   :  { %3802 = vrot.lane.b32.xlu1 %v3755_v18, %s8271_s0  ;;  %3798 = vrot.lane.b32.xlu0 %v3753_v6, %s8271_s0 }
0x102d   :  { %v3775_v9 = vpop.permute.xlu1 %3774  ;;  %v3773_v40 = vpop.permute.xlu0 %3772 }
0x102e   :  { %v3821_v56 = vadd.f32 %v3775_v9, %v9746_v46  ;;  %v3820_v20 = vadd.f32 %v3773_v40, %v9748_v36 }
0x1030   :  { %7994 = vtanh.f32 %v3821_v56 }
0x1031   :  { %7996 = vtanh.f32 %v3820_v20  ;;  %v3787_v43 = vpop.permute.xlu1 %3786  ;;  %v3777_v7 = vpop.permute.xlu0 %3776 }
0x1032   :  { %v3827_v45 = vadd.f32 %v3787_v43, %v9794_v22  ;;  %v3822_v27 = vadd.f32 %v3777_v7, %v9756_v3 }
0x1034   :  { %7998 = vtanh.f32 %v3827_v45 }
0x1035   :  { %8000 = vtanh.f32 %v3822_v27  ;;  %v3779_v30 = vpop.permute.xlu0 %3778  ;;  %v3791_v37 = vpop.permute.xlu1 %3790 }
0x1036   :  { %v3823_v32 = vadd.f32 %v3779_v30, %v9760_v63  ;;  %v3829_v23 = vadd.f32 %v3791_v37, %v9765_v34 }
0x1038   :  { %8002 = vtanh.f32 %v3823_v32 }
0x1039   :  { %8004 = vtanh.f32 %v3829_v23  ;;  %v3781_v46 = vpop.permute.xlu0 %3780  ;;  %v3793_v36 = vpop.permute.xlu1 %3792 }
0x103a   :  { %v7995_v0 = vpop.eup %7994  ;;  %v3824_v13 = vadd.f32 %v3781_v46, %v9740_v59  ;;  %v3830_v18 = vadd.f32 %v3793_v36, %v9770_v55 }
0x103b   :  { %v7997_v22 = vpop.eup %7996  ;;  %3886 = vrot.lane.b32.xlu1 %v7995_v0, %s8272_s4 }
0x103c   :  { %8006 = vtanh.f32 %v3824_v13  ;;  %3884 = vrot.lane.b32.xlu0 %v7997_v22, %s8272_s4 }
0x103d   :  { %8008 = vtanh.f32 %v3830_v18  ;;  %v3785_v3 = vpop.permute.xlu0 %3784  ;;  %v3795_v63 = vpop.permute.xlu1 %3794  ;;  %v11527_v18 = vld [vmem:[#allocation8_spill] sm:$0xff] }
0x103e   :  { %v7999_v6 = vpop.eup %7998  ;;  %v3826_v34 = vadd.f32 %v3785_v3, %v9754_v2  ;;  %v3831_v9 = vadd.f32 %v3795_v63, %v9780_v50  ;;  %v3965_v22 = vrot.slane %v11527_v18, 7  ;;  %v3853_v3 = vsub.f32 1.0, %v10100_v58  ;;  %v11528_v63 = vld [vmem:[#allocation9_spill] sm:$0xff] }
0x103f   :  { %v8001_v40 = vpop.eup %8000  ;;  %3898 = vrot.lane.b32.xlu1 %v7999_v6, %s8272_s4  ;;  %v3964_v6 = vrot.slane %v11528_v63, 7  ;;  %v3976_v18 = vrot.slane %v9999_v48, 7  ;;  %v3971_v63 = vrot.slane %v10013_v51, 7  ;;  %v3862_v51 = vsub.f32 1.0, %v10126_v19 }
0x1040   :  { %8010 = vtanh.f32 %v3826_v34  ;;  %3888 = vrot.lane.b32.xlu0 %v8001_v40, %s8272_s4  ;;  %v3997_v40 = vmul.f32 %v10100_v58, %v3965_v22 }
0x1041   :  { %8012 = vtanh.f32 %v3831_v9  ;;  %v3797_v59 = vpop.permute.xlu1 %3796  ;;  %v3789_v55 = vpop.permute.xlu0 %3788  ;;  %v3852_v9 = vsub.f32 1.0, %v10102_v17 }
0x1042   :  { %v8003_v56 = vpop.eup %8002  ;;  %v3832_v20 = vadd.f32 %v3797_v59, %v9785_v16  ;;  %v3828_v43 = vadd.f32 %v3789_v55, %v9778_v57 }
0x1043   :  { %v8005_v7 = vpop.eup %8004 }
0x1044   :  { %8014 = vtanh.f32 %v3832_v20  ;;  %3902 = vrot.lane.b32.xlu1 %v8005_v7, %s8272_s4  ;;  %3890 = vrot.lane.b32.xlu0 %v8003_v56, %s8272_s4  ;;  %v3996_v56 = vmul.f32 %v10102_v17, %v3964_v6  ;;  %v3966_v7 = vrot.slane %v9932_v53, 7 }
0x1045   :  { %8016 = vtanh.f32 %v3828_v43  ;;  %v3801_v2 = vpop.permute.xlu1 %3800  ;;  %v3783_v50 = vpop.permute.xlu0 %3782 }
0x1046   :  { %v8007_v45 = vpop.eup %8006  ;;  %v3834_v27 = vadd.f32 %v3801_v2, %v11524_v10  ;;  %v3825_v30 = vadd.f32 %v3783_v50, %v11523_v52 }
0x1047   :  { %v8009_v37 = vpop.eup %8008 }
0x1048   :  { %8018 = vtanh.f32 %v3834_v27  ;;  %3904 = vrot.lane.b32.xlu1 %v8009_v37, %s8272_s4  ;;  %3892 = vrot.lane.b32.xlu0 %v8007_v45, %s8272_s4  ;;  %v3854_v45 = vsub.f32 1.0, %v10106_v62  ;;  %v3998_v37 = vmul.f32 %v10106_v62, %v3966_v7  ;;  %v3855_v62 = vsub.f32 1.0, %v10114_v41 }
0x1049   :  { %8020 = vtanh.f32 %v3825_v30  ;;  %v3803_v57 = vpop.permute.xlu1 %3802  ;;  %v3799_v16 = vpop.permute.xlu0 %3798 }
0x104a   :  { %v8011_v32 = vpop.eup %8010  ;;  %v3835_v23 = vadd.f32 %v3803_v57, %v11526_v21  ;;  %v3833_v46 = vadd.f32 %v3799_v16, %v11525_v35  ;;  %v3968_v57 = vrot.slane %v9941_v49, 7  ;;  %v3970_v16 = vrot.slane %v9943_v12, 7 }
0x104b   :  { %v8013_v36 = vpop.eup %8012  ;;  %v3975_v49 = vrot.slane %v9978_v29, 7  ;;  %v3972_v12 = vrot.slane %v9981_v25, 7  ;;  %v3979_v25 = vrot.slane %v10025_v1, 7 }
0x104c   :  { %8022 = vtanh.f32 %v3835_v23  ;;  %3906 = vrot.lane.b32.xlu1 %v8013_v36, %s8272_s4  ;;  %3896 = vrot.lane.b32.xlu0 %v8011_v32, %s8272_s4  ;;  %v3973_v32 = vrot.slane %v9954_v28, 7  ;;  %v3967_v23 = vrot.slane %v9948_v11, 7  ;;  %v3977_v28 = vrot.slane %v9997_v33, 7 }
0x104d   :  { %8024 = vtanh.f32 %v3833_v46  ;;  %v4000_v7 = vmul.f32 %v10122_v61, %v3968_v57 }
0x104e   :  { %v8015_v52 = vpop.eup %8014 }
0x104f   :  { %v8017_v10 = vpop.eup %8016 }
0x1050   :  { %3908 = vrot.lane.b32.xlu1 %v8015_v52, %s8272_s4  ;;  %3900 = vrot.lane.b32.xlu0 %v8017_v10, %s8272_s4  ;;  %v3974_v52 = vrot.slane %v9962_v14, 7  ;;  %v3969_v10 = vrot.slane %v9966_v38, 7  ;;  %v3999_v14 = vmul.f32 %v10114_v41, %v3967_v23  ;;  %v3859_v41 = vsub.f32 1.0, %v10110_v8 }
0x1051   :  { %v4011_v38 = vmul.f32 %v10154_v24, %v3979_v25 }
0x1052   :  { %v8019_v0 = vpop.eup %8018 }
0x1053   :  { %v8021_v13 = vpop.eup %8020 }
0x1054   :  { %3912 = vrot.lane.b32.xlu1 %v8019_v0, %s8272_s4  ;;  %3894 = vrot.lane.b32.xlu0 %v8021_v13, %s8272_s4 }
0x1056   :  { %v8023_v35 = vpop.eup %8022 }
0x1057   :  { %v8025_v21 = vpop.eup %8024 }
0x1058   :  { %3914 = vrot.lane.b32.xlu1 %v8023_v35, %s8272_s4  ;;  %3910 = vrot.lane.b32.xlu0 %v8025_v21, %s8272_s4 }
0x10ad   :  { %v3887_v34 = vpop.permute.xlu1 %3886 }
0x10ae   :  { %v3933_v59 = vmul.f32 %v3887_v34, %v3853_v3  ;;  %v3885_v55 = vpop.permute.xlu0 %3884  ;;  %v3978_v3 = vrot.slane %v10010_v42, 7  ;;  %v3861_v34 = vsub.f32 1.0, %v10118_v31 }
0x10af   :  { %v3932_v20 = vmul.f32 %v3885_v55, %v3852_v9  ;;  %v4003_v55 = vmul.f32 %v10110_v8, %v3971_v63  ;;  %v4006_v8 = vmul.f32 %v10126_v19, %v3974_v52 }
0x10b0   :  { %v10202_v43 = vadd.f32 %v3997_v40, %v3933_v59  ;;  %v3856_v59 = vsub.f32 1.0, %v10122_v61  ;;  %v4007_v61 = vmul.f32 %v10134_v4, %v3975_v49 }
0x10b1   :  { %v10205_v2 = vadd.f32 %v3996_v56, %v3932_v20  ;;  %v3899_v50 = vpop.permute.xlu1 %3898 }
0x10b2   :  { %v4029_v27 = vpack.c.bf16 %v10202_v43, %v10202_v43  ;;  %v3889_v30 = vpop.permute.xlu0 %3888 }
0x10b3   :  { %v4028_v58 = vpack.c.bf16 %v10205_v2, %v10205_v2  ;;  %v3934_v17 = vmul.f32 %v3889_v30, %v3854_v45  ;;  %v4005_v30 = vmul.f32 %v10118_v31, %v3973_v32 }
0x10b4   :  { %v4061_v53 = vunpack.c.l.b16 %v4029_v27 }
0x10b5   :  { %v4060_v46 = vunpack.c.l.b16 %v4028_v58  ;;  %v10217_v36 = vadd.f32 %v3998_v37, %v3934_v17  ;;  %v3863_v37 = vsub.f32 1.0, %v10134_v4 }
0x10b6   :  { %v4077_v0 = vrot.slane %v4061_v53, 4  ;;  %v3903_v13 = vpop.permute.xlu1 %3902  ;;  %v3891_v35 = vpop.permute.xlu0 %3890 }
0x10b7   :  { %v4076_v21 = vrot.slane %v4060_v46, 5  ;;  %v4030_v11 = vpack.c.bf16 %v10217_v36, %v10217_v36  ;;  %v3935_v22 = vmul.f32 %v3891_v35, %v3855_v62  ;;  %v3941_v56 = vmul.f32 %v3903_v13, %v3861_v34 }
0x10b8   :  { %v3858_v46 = vsub.f32 1.0, %v10130_v47  ;;  %v3939_v13 = vmul.f32 %v3899_v50, %v3859_v41  ;;  %v4002_v62 = vmul.f32 %v10130_v47, %v3970_v16  ;;  %v4008_v50 = vmul.f32 %v10138_v39, %v3976_v18 }
0x10b9   :  { %v4078_v6 = vsel %vm901_vm3, %v4077_v0, %v4076_v21  ;;  %v4062_v29 = vunpack.c.l.b16 %v4030_v11  ;;  %v10234_v9 = vadd.f32 %v3999_v14, %v3935_v22  ;;  %v10252_v35 = vadd.f32 %v4005_v30, %v3941_v56 }
0x10ba   :  { %v3905_v40 = vpop.permute.xlu1 %3904  ;;  %v3893_v48 = vpop.permute.xlu0 %3892  ;;  %v3864_v11 = vsub.f32 1.0, %v10138_v39  ;;  %v3860_v16 = vsub.f32 1.0, %v10142_v26  ;;  %v10266_v63 = vadd.f32 %v4003_v55, %v3939_v13  ;;  %v3866_v34 = vsub.f32 1.0, %v10146_v54 }
0x10bb   :  { %v4079_v42 = vrot.slane %v4062_v29, 3  ;;  %v4031_v20 = vpack.c.bf16 %v10234_v9, %v10234_v9  ;;  %v3936_v45 = vmul.f32 %v3893_v48, %v3856_v59  ;;  %v3942_v58 = vmul.f32 %v3905_v40, %v3862_v51 }
0x10bc   :  { %v4004_v29 = vmul.f32 %v10142_v26, %v3972_v12  ;;  %v4037_v40 = vpack.c.bf16 %v10252_v35, %v10252_v35  ;;  %v4010_v59 = vmul.f32 %v10146_v54, %v3978_v3  ;;  %v4001_v54 = vmul.f32 %v10150_v60, %v3969_v10 }
0x10bd   :  { %v4080_v27 = vsel %vm904_vm4, %v4079_v42, %v4078_v6  ;;  %v4063_v17 = vunpack.c.l.b16 %v4031_v20  ;;  %v10247_v53 = vadd.f32 %v4000_v7, %v3936_v45  ;;  %v10256_v19 = vadd.f32 %v4006_v8, %v3942_v58 }
0x10be   :  { %v3907_v23 = vpop.permute.xlu1 %3906  ;;  %v3897_v0 = vpop.permute.xlu0 %3896  ;;  %v3857_v42 = vsub.f32 1.0, %v10150_v60  ;;  %v4035_v20 = vpack.c.bf16 %v10266_v63, %v10266_v63  ;;  %v4069_v30 = vunpack.c.l.b16 %v4037_v40  ;;  %v3865_v8 = vsub.f32 1.0, %v10158_v44 }
0x10bf   :  { %v3943_v57 = vmul.f32 %v3907_v23, %v3863_v37  ;;  %v4081_v31 = vrot.slane %v4063_v17, 2  ;;  %v4032_v32 = vpack.c.bf16 %v10247_v53, %v10247_v53  ;;  %v3938_v21 = vmul.f32 %v3897_v0, %v3858_v46 }
0x10c0   :  { %v4038_v48 = vpack.c.bf16 %v10256_v19, %v10256_v19 }
0x10c1   :  { %v10258_v52 = vadd.f32 %v4007_v61, %v3943_v57  ;;  %v4082_v4 = vsel %vm907_vm5, %v4081_v31, %v4080_v27  ;;  %v4064_v49 = vunpack.c.l.b16 %v4032_v32  ;;  %v10263_v14 = vadd.f32 %v4002_v62, %v3938_v21 }
0x10c2   :  { %v3909_v47 = vpop.permute.xlu1 %3908  ;;  %v3901_v22 = vpop.permute.xlu0 %3900  ;;  %v3867_v27 = vsub.f32 1.0, %v10154_v24  ;;  %v4070_v60 = vunpack.c.l.b16 %v4038_v48  ;;  %v4009_v61 = vmul.f32 %v10158_v44, %v3977_v28  ;;  %v4067_v62 = vunpack.c.l.b16 %v4035_v20 }
0x10c3   :  { %v3944_v6 = vmul.f32 %v3909_v47, %v3864_v11  ;;  %v4083_v39 = vrot.slane %v4064_v49, 1  ;;  %v3940_v18 = vmul.f32 %v3901_v22, %v3860_v16  ;;  %v4039_v41 = vpack.c.bf16 %v10258_v52, %v10258_v52 }
0x10c4   :  { %v4034_v12 = vpack.c.bf16 %v10263_v14, %v10263_v14  ;;  %v4091_v31 = vrot.slane %v4069_v30, 4 }
0x10c5   :  { %v10277_v55 = vadd.f32 %v4008_v50, %v3944_v6  ;;  %v4084_v26 = vsel %vm910_vm6, %v4083_v39, %v4082_v4  ;;  %v10283_v51 = vadd.f32 %v4004_v29, %v3940_v18  ;;  %v4071_v10 = vunpack.c.l.b16 %v4039_v41 }
0x10c6   :  { %v3913_v56 = vpop.permute.xlu1 %3912  ;;  %v3895_v3 = vpop.permute.xlu0 %3894  ;;  %v4066_v23 = vunpack.c.l.b16 %v4034_v12  ;;  %v4093_v50 = vrot.slane %v4070_v60, 3 }
0x10c7   :  { %v4040_v7 = vpack.c.bf16 %v10277_v55, %v10277_v55  ;;  %v3946_v45 = vmul.f32 %v3913_v56, %v3866_v34  ;;  %v4036_v58 = vpack.c.bf16 %v10283_v51, %v10283_v51  ;;  %v3937_v37 = vmul.f32 %v3895_v3, %v3857_v42 }
0x10c8   :  { %v4095_v4 = vrot.slane %v4071_v10, 2  ;;  %v4086_v33 = vrot.slane %v4066_v23, 7  ;;  %v4088_v34 = vrot.slane %v4067_v62, 6 }
0x10c9   :  { %v10298_v17 = vadd.f32 %v4010_v59, %v3946_v45  ;;  %v4068_v46 = vunpack.c.l.b16 %v4036_v58  ;;  %v10301_v0 = vadd.f32 %v4001_v54, %v3937_v37  ;;  %v4072_v1 = vunpack.c.l.b16 %v4040_v7 }
0x10ca   :  { %v3915_v13 = vpop.permute.xlu1 %3914  ;;  %v3911_v57 = vpop.permute.xlu0 %3910 }
0x10cb   :  { %v4042_v24 = vpack.c.bf16 %v10298_v17, %v10298_v17  ;;  %v3947_v25 = vmul.f32 %v3915_v13, %v3867_v27  ;;  %v4090_v32 = vrot.slane %v4068_v46, 5  ;;  %v4033_v21 = vpack.c.bf16 %v10301_v0, %v10301_v0 }
0x10cc   :  { %v3945_v11 = vmul.f32 %v3911_v57, %v3865_v8  ;;  %v4097_v16 = vrot.slane %v4072_v1, 1 }
0x10cd   :  { %v10310_v49 = vadd.f32 %v4011_v38, %v3947_v25  ;;  %v4092_v44 = vsel %vm901_vm3, %v4091_v31, %v4090_v32  ;;  %v4065_v28 = vunpack.c.l.b16 %v4033_v21  ;;  %v4074_v6 = vunpack.c.l.b16 %v4042_v24 }
0x10ce   :  { %v10313_v47 = vadd.f32 %v4009_v61, %v3945_v11  ;;  %v4094_v22 = vsel %vm904_vm4, %v4093_v50, %v4092_v44  ;;  %v4152_v11 = vld [vmem:[#allocation2 + $0x4] sm:$0x8]  ;;  %v4151_v50 = vld [vmem:[#allocation2] sm:$0x8] }
0x10cf   :  { %v4043_v29 = vpack.c.bf16 %v10310_v49, %v10310_v49  ;;  %v4085_v40 = vsel %vm913_vm7, %v4065_v28, %v4084_v26  ;;  %v4096_v39 = vsel %vm907_vm5, %v4095_v4, %v4094_v22  ;;  %v4100_v56 = vrot.slane %v4074_v6, 7  ;;  %v4153_v28 = vld [vmem:[#allocation2 + $0x8] sm:$0x8] }
0x10d0   :  { %v4041_v18 = vpack.c.bf16 %v10313_v47, %v10313_v47  ;;  %v4098_v48 = vsel %vm910_vm6, %v4097_v16, %v4096_v39  ;;  %v4087_v41 = vsel %vm916_vm8, %v4086_v33, %v4085_v40  ;;  %v10356_v44 = vunpack.c.l.bf16 %v4152_v11 }
0x10d1   :  { %v4075_v59 = vunpack.c.l.b16 %v4043_v29  ;;  %v4089_v12 = vsel %vm919_vm9, %v4088_v34, %v4087_v41  ;;  %v10358_v16 = vunpack.c.l.bf16 %v4151_v50  ;;  %v4160_v29 = vld [vmem:[#allocation2 + $0x24] sm:$0x8]  ;;  %v10364_v39 = vunpack.c.l.bf16 %v4153_v28 }
0x10d2   :  { %v4073_v42 = vunpack.c.l.b16 %v4041_v18  ;;  %v4154_v18 = vld [vmem:[#allocation2 + $0xc] sm:$0x8] }
0x10d3   :  { %v4102_v54 = vrot.slane %v4075_v59, 6  ;;  %v10366_v59 = vunpack.c.l.bf16 %v4160_v29 }
0x10d4   :  { %v4099_v3 = vsel %vm913_vm7, %v4073_v42, %v4098_v48 }
0x10d5   :  { %v4101_v20 = vsel %vm916_vm8, %v4100_v56, %v4099_v3 }
0x10d6   :  { %v4103_v26 = vsel %vm919_vm9, %v4102_v54, %v4101_v20  ;;  %v10372_v20 = vunpack.c.l.bf16 %v4154_v18  ;;  %v4158_v18 = vld [vmem:[#allocation2 + $0x1c] sm:$0x8] }
0x10d7   :  { %v4104_v7 = vpack.c.b16 %v4103_v26, %v4089_v12  ;;  %v4161_v12 = vld [vmem:[#allocation2 + $0x28] sm:$0x8]  ;;  %v4155_v26 = vld [vmem:[#allocation2 + $0x10] sm:$0x8] }
0x10d9   :  { %4105 = vrot.lane.b32.xlu0 %v4104_v7, %s8272_s4  ;;  %v10374_v7 = vunpack.c.l.bf16 %v4161_v12 }
0x114b   :  { %v4106_v45 = vpop.permute.xlu0 %4105 }
0x114c   :  { %7325 = vmatmul.mubr.msk.bf16.vlgmr.msra.gmra.mrb[20].mxu0 %vm146_vm1, %v4106_v45 }
0x121f   :  { %v10330_v27 = vpop.f32.mrb[20].mxu0 }
0x1220   :  { %v7326_v30 = vpop.f32.mrb[21].mxu0  ;;  %v4327_v38 = vadd.f32 %v10330_v27, %v8436_v15  ;;  %v4186_v4 = vrot.slane %v10330_v27, 3  ;;  %v4185_v33 = vrot.slane %v10330_v27, 2  ;;  %v4187_v22 = vrot.slane %v10330_v27, 4 }
0x1221   :  { %v10332_v58 = vpop.f32.mrb[22].mxu0  ;;  %v4188_v48 = vrot.slane %v10330_v27, 5  ;;  %v4189_v45 = vrot.slane %v10330_v27, 6 }
0x1222   :  { %v7327_v37 = vpop.f32.mrb[23].mxu0  ;;  %v4328_v60 = vadd.f32 %v10332_v58, %v8436_v15  ;;  %v4332_v10 = vrot.slane %v4327_v38, 3  ;;  %v4331_v8 = vrot.slane %v4327_v38, 2  ;;  %v4333_v23 = vrot.slane %v4327_v38, 4 }
0x1223   :  { %v4334_v13 = vrot.slane %v4327_v38, 5  ;;  %v4335_v57 = vrot.slane %v4327_v38, 6  ;;  %v4336_v1 = vrot.slane %v4327_v38, 7  ;;  %v4337_v21 = vrot.slane %v4327_v38, 1 }
0x1224   :  { %4347 = vrot.lane.b32.xlu0 %v4332_v10, %s8271_s0  ;;  %4345 = vrot.lane.b32.xlu1 %v4331_v8, %s8271_s0  ;;  %v4339_v46 = vrot.slane %v4328_v60, 3  ;;  %v4340_v61 = vrot.slane %v4328_v60, 4  ;;  %v4341_v62 = vrot.slane %v4328_v60, 5  ;;  %v4342_v24 = vrot.slane %v4328_v60, 6 }
0x1225   :  { %v4343_v25 = vrot.slane %v4328_v60, 7  ;;  %v4338_v31 = vrot.slane %v4328_v60, 2  ;;  %v4344_v32 = vrot.slane %v4328_v60, 1  ;;  %v4216_v6 = vadd.f32 %v4186_v4, %v10356_v44  ;;  %v4164_v4 = vld [vmem:[#allocation2 + $0x34] sm:$0x8] }
0x1226   :  { %v4215_v34 = vadd.f32 %v4185_v33, %v10358_v16  ;;  %v4193_v40 = vrot.slane %v10332_v58, 3  ;;  %v4217_v41 = vadd.f32 %v4187_v22, %v10364_v39  ;;  %v4194_v54 = vrot.slane %v10332_v58, 4 }
0x1227   :  { %v7117_v42 = vmul.f32 -1.442695, %v4216_v6  ;;  %v4218_v30 = vadd.f32 %v4188_v48, %v10372_v20  ;;  %v4192_v33 = vrot.slane %v10332_v58, 2  ;;  %v4197_v22 = vrot.slane %v10332_v58, 7 }
0x1228   :  { %4349 = vrot.lane.b32.xlu1 %v4333_v23, %s8271_s0  ;;  %4363 = vrot.lane.b32.xlu0 %v4339_v46, %s8271_s0  ;;  %v7116_v56 = vmul.f32 -1.442695, %v4215_v34  ;;  %v4224_v3 = vadd.f32 %v4193_v40, %v10366_v59  ;;  %v7118_v37 = vmul.f32 -1.442695, %v4217_v41  ;;  %v4225_v10 = vadd.f32 %v4194_v54, %v10374_v7  ;;  %v4156_v23 = vld [vmem:[#allocation2 + $0x14] sm:$0x8] }
0x1229   :  { %8026 = vpow2.f32 %v7117_v42  ;;  %v10380_v46 = vunpack.c.l.bf16 %v4155_v26  ;;  %v10398_v48 = vunpack.c.l.bf16 %v4164_v4  ;;  %v4191_v42 = vrot.slane %v10330_v27, 1 }
0x122a   :  { %8028 = vpow2.f32 %v7116_v56  ;;  %v7125_v8 = vmul.f32 -1.442695, %v4224_v3  ;;  %v4166_v56 = vld [vmem:[#allocation2 + $0x3c] sm:$0x8]  ;;  %v4198_v3 = vrot.slane %v10332_v58, 1 }
0x122b   :  { %8030 = vpow2.f32 %v7118_v37  ;;  %v4228_v26 = vadd.f32 %v4197_v22, %v10398_v48 }
0x122c   :  { %4351 = vrot.lane.b32.xlu1 %v4334_v13, %s8271_s0  ;;  %4365 = vrot.lane.b32.xlu0 %v4340_v61, %s8271_s0  ;;  %v4190_v13 = vrot.slane %v10330_v27, 7  ;;  %v4163_v61 = vld [vmem:[#allocation2 + $0x30] sm:$0x8]  ;;  %8032 = vpow2.f32 %v7125_v8 }
0x122d   :  { %v10390_v11 = vunpack.c.l.bf16 %v4163_v61  ;;  %v4165_v61 = vld [vmem:[#allocation2 + $0x38] sm:$0x8] }
0x1230   :  { %4353 = vrot.lane.b32.xlu1 %v4335_v57, %s8271_s0  ;;  %4367 = vrot.lane.b32.xlu0 %v4341_v62, %s8271_s0  ;;  %v4219_v62 = vadd.f32 %v4189_v45, %v10380_v46 }
0x1232   :  { %v7120_v28 = vmul.f32 -1.442695, %v4219_v62 }
0x1233   :  { %v8027_v40 = vpop.eup %8026 }
0x1234   :  { %4355 = vrot.lane.b32.xlu1 %v4336_v1, %s8271_s0  ;;  %4369 = vrot.lane.b32.xlu0 %v4342_v24, %s8271_s0  ;;  %v7119_v1 = vmul.f32 -1.442695, %v4218_v30  ;;  %v4196_v24 = vrot.slane %v10332_v58, 6  ;;  %v8029_v41 = vpop.eup %8028  ;;  %v10404_v30 = vunpack.c.l.bf16 %v4158_v18  ;;  %v4280_v37 = vadd.f32 1.0, %v8027_v40 }
0x1235   :  { %v4279_v8 = vadd.f32 1.0, %v8029_v41 }
0x1236   :  { %8034 = vpow2.f32 %v7119_v1  ;;  %v4227_v6 = vadd.f32 %v4196_v24, %v10390_v11  ;;  %v7129_v24 = vmul.f32 -1.442695, %v4228_v26 }
0x1238   :  { %4371 = vrot.lane.b32.xlu0 %v4343_v25, %s8271_s0  ;;  %4361 = vrot.lane.b32.xlu1 %v4338_v31, %s8271_s0  ;;  %v10387_v25 = vunpack.c.l.bf16 %v4156_v23  ;;  %v7128_v45 = vmul.f32 -1.442695, %v4227_v6 }
0x123a   :  { %v4220_v50 = vadd.f32 %v4190_v13, %v10387_v25  ;;  %v4222_v13 = vadd.f32 %v4191_v42, %v10404_v30 }
0x123c   :  { %4375 = vrot.lane.b32.xlu0 %v4344_v32, %s8271_s0  ;;  %4359 = vrot.lane.b32.xlu1 %v4337_v21, %s8271_s0  ;;  %v7126_v32 = vmul.f32 -1.442695, %v4225_v10  ;;  %v4159_v21 = vld [vmem:[#allocation2 + $0x20] sm:$0x8]  ;;  %v7121_v12 = vmul.f32 -1.442695, %v4220_v50  ;;  %v10406_v10 = vunpack.c.l.bf16 %v4166_v56  ;;  %v10412_v50 = vunpack.c.l.bf16 %v4165_v61 }
0x123d   :  { %v10396_v29 = vunpack.c.l.bf16 %v4159_v21  ;;  %v7123_v22 = vmul.f32 -1.442695, %v4222_v13 }
0x123e   :  { %8036 = vpow2.f32 %v7126_v32  ;;  %v4230_v1 = vadd.f32 %v4198_v3, %v10406_v10  ;;  %v4229_v6 = vadd.f32 %v10412_v50, %v10332_v58 }
0x123f   :  { %v4223_v54 = vadd.f32 %v4192_v33, %v10396_v29  ;;  %8038 = vpow2.f32 %v7120_v28 }
0x1240   :  { %4373 = vrot.lane.b32.xlu0 %v4328_v60, %s8271_s0  ;;  %4357 = vrot.lane.b32.xlu1 %v4327_v38, %s8271_s0  ;;  %v4162_v38 = vld [vmem:[#allocation2 + $0x2c] sm:$0x8]  ;;  %v4195_v60 = vrot.slane %v10332_v58, 5  ;;  %v7130_v56 = vmul.f32 -1.442695, %v4229_v6 }
0x1241   :  { %v10383_v57 = vunpack.c.l.bf16 %v4162_v38  ;;  %v8031_v38 = vpop.eup %8030  ;;  %v7124_v62 = vmul.f32 -1.442695, %v4223_v54 }
0x1242   :  { %v8033_v23 = vpop.eup %8032  ;;  %v4281_v32 = vadd.f32 1.0, %v8031_v38 }
0x1243   :  { %v4226_v31 = vadd.f32 %v4195_v60, %v10383_v57  ;;  %v4157_v60 = vld [vmem:[#allocation2 + $0x18] sm:$0x8]  ;;  %v8035_v21 = vpop.eup %8034  ;;  %v4288_v4 = vadd.f32 1.0, %v8033_v23 }
0x1244   :  { %v4282_v40 = vadd.f32 1.0, %v8035_v21 }
0x1245   :  { %v7127_v34 = vmul.f32 -1.442695, %v4226_v31  ;;  %v10410_v31 = vunpack.c.l.bf16 %v4157_v60 }
0x1247   :  { %8040 = vpow2.f32 %v7127_v34  ;;  %v4221_v28 = vadd.f32 %v10410_v31, %v10330_v27  ;;  %v7131_v34 = vmul.f32 -1.442695, %v4230_v1 }
0x1248   :  { %8042 = vpow2.f32 %v7121_v12  ;;  %v8037_v33 = vpop.eup %8036 }
0x1249   :  { %8044 = vpow2.f32 %v7128_v45  ;;  %v8039_v18 = vpop.eup %8038  ;;  %v4289_v41 = vadd.f32 1.0, %v8037_v33  ;;  %v7122_v12 = vmul.f32 -1.442695, %v4221_v28 }
0x124a   :  { %8046 = vrcp.f32 %v4280_v37  ;;  %v4283_v27 = vadd.f32 1.0, %v8039_v18 }
0x124b   :  { %8048 = vrcp.f32 %v4279_v8 }
0x124c   :  { %8050 = vpow2.f32 %v7124_v62 }
0x124d   :  { %8052 = vpow2.f32 %v7129_v24 }
0x124e   :  { %8054 = vrcp.f32 %v4281_v32 }
0x124f   :  { %8056 = vrcp.f32 %v4288_v4 }
0x1250   :  { %8058 = vpow2.f32 %v7123_v22 }
0x1251   :  { %v8041_v42 = vpop.eup %8040  ;;  %8060 = vpow2.f32 %v7131_v34 }
0x1252   :  { %v8043_v54 = vpop.eup %8042  ;;  %8062 = vrcp.f32 %v4282_v40  ;;  %v4290_v26 = vadd.f32 1.0, %v8041_v42 }
0x1253   :  { %v8045_v3 = vpop.eup %8044  ;;  %8064 = vrcp.f32 %v4289_v41  ;;  %v4284_v13 = vadd.f32 1.0, %v8043_v54 }
0x1254   :  { %v10418_v45 = vpop.eup %8046  ;;  %8066 = vpow2.f32 %v7122_v12  ;;  %v4291_v62 = vadd.f32 1.0, %v8045_v3 }
0x1255   :  { %v10420_v58 = vpop.eup %8048  ;;  %8068 = vpow2.f32 %v7130_v56 }
0x1256   :  { %v8051_v60 = vpop.eup %8050  ;;  %8070 = vrcp.f32 %v4283_v27 }
0x1257   :  { %v8053_v61 = vpop.eup %8052  ;;  %8072 = vrcp.f32 %v4290_v26  ;;  %v4287_v34 = vadd.f32 1.0, %v8051_v60 }
0x1258   :  { %v10424_v1 = vpop.eup %8054  ;;  %8074 = vrcp.f32 %v4284_v13  ;;  %v4292_v22 = vadd.f32 1.0, %v8053_v61 }
0x1259   :  { %v10428_v24 = vpop.eup %8056  ;;  %8076 = vrcp.f32 %v4291_v62 }
0x125a   :  { %v8059_v4 = vpop.eup %8058  ;;  %8078 = vrcp.f32 %v4292_v22 }
0x125b   :  { %v8061_v6 = vpop.eup %8060  ;;  %8080 = vrcp.f32 %v4287_v34  ;;  %v4286_v26 = vadd.f32 1.0, %v8059_v4 }
0x125c   :  { %v10432_v40 = vpop.eup %8062  ;;  %v4294_v27 = vadd.f32 1.0, %v8061_v6 }
0x125d   :  { %v10436_v18 = vpop.eup %8064 }
0x125e   :  { %v8067_v12 = vpop.eup %8066  ;;  %8082 = vrcp.f32 %v4294_v27 }
0x125f   :  { %v8069_v3 = vpop.eup %8068  ;;  %8084 = vrcp.f32 %v4286_v26  ;;  %v4285_v62 = vadd.f32 1.0, %v8067_v12 }
0x1260   :  { %v4293_v61 = vadd.f32 1.0, %v8069_v3 }
0x1262   :  { %8086 = vrcp.f32 %v4293_v61 }
0x1263   :  { %8088 = vrcp.f32 %v4285_v62 }
0x1296   :  { %v4348_v37 = vpop.permute.xlu0 %4347  ;;  %v4346_v38 = vpop.permute.xlu1 %4345 }
0x1297   :  { %v4394_v8 = vmul.f32 %v10418_v45, %v4348_v37  ;;  %v4393_v23 = vmul.f32 %v10420_v58, %v4346_v38  ;;  %v10440_v37 = vpop.eup %8070 }
0x1298   :  { %v10444_v38 = vpop.eup %8072 }
0x1299   :  { %4427 = vrot.lane.b32.xlu0 %v4394_v8, %s8271_s0  ;;  %4425 = vrot.lane.b32.xlu1 %v4393_v23, %s8271_s0 }
0x129a   :  { %v4350_v32 = vpop.permute.xlu1 %4349  ;;  %v4364_v21 = vpop.permute.xlu0 %4363 }
0x129b   :  { %v4395_v33 = vmul.f32 %v10424_v1, %v4350_v32  ;;  %v4402_v28 = vmul.f32 %v10428_v24, %v4364_v21  ;;  %v10448_v32 = vpop.eup %8074 }
0x129c   :  { %v10452_v21 = vpop.eup %8076 }
0x129d   :  { %4429 = vrot.lane.b32.xlu1 %v4395_v33, %s8271_s0  ;;  %4443 = vrot.lane.b32.xlu0 %v4402_v28, %s8271_s0  ;;  %v10456_v6 = vpop.eup %8078 }
0x129e   :  { %v4352_v41 = vpop.permute.xlu1 %4351  ;;  %v4366_v42 = vpop.permute.xlu0 %4365 }
0x129f   :  { %v4396_v56 = vmul.f32 %v10432_v40, %v4352_v41  ;;  %v4403_v54 = vmul.f32 %v10436_v18, %v4366_v42  ;;  %v10460_v34 = vpop.eup %8080 }
0x12a1   :  { %4431 = vrot.lane.b32.xlu1 %v4396_v56, %s8271_s0  ;;  %4445 = vrot.lane.b32.xlu0 %v4403_v54, %s8271_s0  ;;  %v10464_v54 = vpop.eup %8082 }
0x12a2   :  { %v4354_v60 = vpop.permute.xlu1 %4353  ;;  %v4368_v8 = vpop.permute.xlu0 %4367 }
0x12a3   :  { %v4397_v23 = vmul.f32 %v10440_v37, %v4354_v60  ;;  %v4404_v13 = vmul.f32 %v10444_v38, %v4368_v8  ;;  %v10468_v27 = vpop.eup %8084 }
0x12a5   :  { %4433 = vrot.lane.b32.xlu1 %v4397_v23, %s8271_s0  ;;  %4447 = vrot.lane.b32.xlu0 %v4404_v13, %s8271_s0  ;;  %v10472_v23 = vpop.eup %8086 }
0x12a6   :  { %v4356_v4 = vpop.permute.xlu1 %4355  ;;  %v4370_v33 = vpop.permute.xlu0 %4369 }
0x12a7   :  { %v4398_v28 = vmul.f32 %v10448_v32, %v4356_v4  ;;  %v4405_v22 = vmul.f32 %v10452_v21, %v4370_v33  ;;  %v10476_v13 = vpop.eup %8088 }
0x12a9   :  { %4435 = vrot.lane.b32.xlu1 %v4398_v28, %s8271_s0  ;;  %4449 = vrot.lane.b32.xlu0 %v4405_v22, %s8271_s0 }
0x12aa   :  { %v4372_v41 = vpop.permute.xlu0 %4371  ;;  %v4362_v42 = vpop.permute.xlu1 %4361 }
0x12ab   :  { %v4406_v12 = vmul.f32 %v10456_v6, %v4372_v41  ;;  %v4401_v56 = vmul.f32 %v10460_v34, %v4362_v42 }
0x12ad   :  { %4451 = vrot.lane.b32.xlu0 %v4406_v12, %s8271_s0  ;;  %4441 = vrot.lane.b32.xlu1 %v4401_v56, %s8271_s0 }
0x12ae   :  { %v4376_v3 = vpop.permute.xlu0 %4375  ;;  %v4360_v26 = vpop.permute.xlu1 %4359 }
0x12af   :  { %v4408_v60 = vmul.f32 %v10464_v54, %v4376_v3  ;;  %v4400_v8 = vmul.f32 %v10468_v27, %v4360_v26 }
0x12b1   :  { %4455 = vrot.lane.b32.xlu0 %v4408_v60, %s8271_s0  ;;  %4439 = vrot.lane.b32.xlu1 %v4400_v8, %s8271_s0 }
0x12b2   :  { %v4374_v61 = vpop.permute.xlu0 %4373  ;;  %v4358_v62 = vpop.permute.xlu1 %4357 }
0x12b3   :  { %v4407_v4 = vmul.f32 %v10472_v23, %v4374_v61  ;;  %v4399_v33 = vmul.f32 %v10476_v13, %v4358_v62 }
0x12b5   :  { %4453 = vrot.lane.b32.xlu0 %v4407_v4, %s8271_s0  ;;  %4437 = vrot.lane.b32.xlu1 %v4399_v33, %s8271_s0 }
0x130b   :  { %v4428_v28 = vpop.permute.xlu0 %4427  ;;  %v4426_v22 = vpop.permute.xlu1 %4425 }
0x130c   :  { %v4474_v41 = vadd.f32 %v4428_v28, %v10356_v44  ;;  %v4473_v42 = vadd.f32 %v4426_v22, %v10358_v16 }
0x130e   :  { %8090 = vtanh.f32 %v4474_v41 }
0x130f   :  { %8092 = vtanh.f32 %v4473_v42  ;;  %v4430_v12 = vpop.permute.xlu1 %4429  ;;  %v4444_v56 = vpop.permute.xlu0 %4443 }
0x1310   :  { %v4475_v3 = vadd.f32 %v4430_v12, %v10364_v39  ;;  %v4482_v26 = vadd.f32 %v4444_v56, %v10366_v59 }
0x1312   :  { %8094 = vtanh.f32 %v4475_v3 }
0x1313   :  { %8096 = vtanh.f32 %v4482_v26  ;;  %v4432_v60 = vpop.permute.xlu1 %4431  ;;  %v4446_v8 = vpop.permute.xlu0 %4445 }
0x1314   :  { %v4476_v61 = vadd.f32 %v4432_v60, %v10372_v20  ;;  %v4483_v62 = vadd.f32 %v4446_v8, %v10374_v7 }
0x1316   :  { %8098 = vtanh.f32 %v4476_v61 }
0x1317   :  { %8100 = vtanh.f32 %v4483_v62  ;;  %v4434_v4 = vpop.permute.xlu1 %4433  ;;  %v4448_v33 = vpop.permute.xlu0 %4447 }
0x1318   :  { %v8091_v28 = vpop.eup %8090  ;;  %v4477_v22 = vadd.f32 %v4434_v4, %v10380_v46  ;;  %v4484_v41 = vadd.f32 %v4448_v33, %v10383_v57 }
0x1319   :  { %v8093_v42 = vpop.eup %8092  ;;  %4539 = vrot.lane.b32.xlu0 %v8091_v28, %s8272_s4 }
0x131a   :  { %8102 = vtanh.f32 %v4477_v22  ;;  %4537 = vrot.lane.b32.xlu1 %v8093_v42, %s8272_s4 }
0x131b   :  { %8104 = vtanh.f32 %v4484_v41  ;;  %v4436_v12 = vpop.permute.xlu1 %4435  ;;  %v4450_v56 = vpop.permute.xlu0 %4449 }
0x131c   :  { %v8095_v3 = vpop.eup %8094  ;;  %v4478_v26 = vadd.f32 %v4436_v12, %v10387_v25  ;;  %v4485_v60 = vadd.f32 %v4450_v56, %v10390_v11 }
0x131d   :  { %v8097_v8 = vpop.eup %8096 }
0x131e   :  { %8106 = vtanh.f32 %v4478_v26  ;;  %4555 = vrot.lane.b32.xlu0 %v8097_v8, %s8272_s4  ;;  %4541 = vrot.lane.b32.xlu1 %v8095_v3, %s8272_s4 }
0x131f   :  { %8108 = vtanh.f32 %v4485_v60  ;;  %v4452_v61 = vpop.permute.xlu0 %4451  ;;  %v4442_v62 = vpop.permute.xlu1 %4441 }
0x1320   :  { %v8099_v4 = vpop.eup %8098  ;;  %v4486_v33 = vadd.f32 %v4452_v61, %v10398_v48  ;;  %v4481_v28 = vadd.f32 %v4442_v62, %v10396_v29 }
0x1321   :  { %v8101_v22 = vpop.eup %8100 }
0x1322   :  { %8110 = vtanh.f32 %v4486_v33  ;;  %4557 = vrot.lane.b32.xlu0 %v8101_v22, %s8272_s4  ;;  %4543 = vrot.lane.b32.xlu1 %v8099_v4, %s8272_s4 }
0x1323   :  { %8112 = vtanh.f32 %v4481_v28  ;;  %v4456_v41 = vpop.permute.xlu0 %4455  ;;  %v4440_v42 = vpop.permute.xlu1 %4439 }
0x1324   :  { %v8103_v12 = vpop.eup %8102  ;;  %v4488_v56 = vadd.f32 %v4456_v41, %v10406_v10  ;;  %v4480_v3 = vadd.f32 %v4440_v42, %v10404_v30 }
0x1325   :  { %v8105_v26 = vpop.eup %8104 }
0x1326   :  { %8114 = vtanh.f32 %v4488_v56  ;;  %4559 = vrot.lane.b32.xlu0 %v8105_v26, %s8272_s4  ;;  %4545 = vrot.lane.b32.xlu1 %v8103_v12, %s8272_s4  ;;  %v4506_v26 = vsub.f32 1.0, %v10418_v45 }
0x1327   :  { %8116 = vtanh.f32 %v4480_v3  ;;  %v4454_v60 = vpop.permute.xlu0 %4453  ;;  %v4438_v8 = vpop.permute.xlu1 %4437  ;;  %v4618_v3 = vrot.slane %v10202_v43, 7  ;;  %v4507_v43 = vsub.f32 1.0, %v10424_v1 }
0x1328   :  { %v8107_v61 = vpop.eup %8106  ;;  %v4487_v62 = vadd.f32 %v4454_v60, %v10412_v50  ;;  %v4479_v4 = vadd.f32 %v4438_v8, %v10410_v31  ;;  %v4617_v60 = vrot.slane %v10205_v2, 7 }
0x1329   :  { %v8109_v33 = vpop.eup %8108 }
0x132a   :  { %8118 = vtanh.f32 %v4487_v62  ;;  %4561 = vrot.lane.b32.xlu0 %v8109_v33, %s8272_s4  ;;  %4547 = vrot.lane.b32.xlu1 %v8107_v61, %s8272_s4  ;;  %v4505_v61 = vsub.f32 1.0, %v10420_v58  ;;  %v4650_v62 = vmul.f32 %v10418_v45, %v4618_v3 }
0x132b   :  { %8120 = vtanh.f32 %v4479_v4 }
0x132c   :  { %v8111_v28 = vpop.eup %8110 }
0x132d   :  { %v8113_v22 = vpop.eup %8112 }
0x132e   :  { %4563 = vrot.lane.b32.xlu0 %v8111_v28, %s8272_s4  ;;  %4553 = vrot.lane.b32.xlu1 %v8113_v22, %s8272_s4  ;;  %v4649_v28 = vmul.f32 %v10420_v58, %v4617_v60  ;;  %v4620_v58 = vrot.slane %v10234_v9, 7  ;;  %v4629_v9 = vrot.slane %v10277_v55, 7 }
0x1330   :  { %v8115_v41 = vpop.eup %8114  ;;  %v4652_v55 = vmul.f32 %v10432_v40, %v4620_v58  ;;  %v4516_v58 = vsub.f32 1.0, %v10444_v38 }
0x1331   :  { %v8117_v42 = vpop.eup %8116 }
0x1332   :  { %4567 = vrot.lane.b32.xlu0 %v8115_v41, %s8272_s4  ;;  %4551 = vrot.lane.b32.xlu1 %v8117_v42, %s8272_s4  ;;  %v4619_v42 = vrot.slane %v10217_v36, 7 }
0x1334   :  { %v8119_v12 = vpop.eup %8118  ;;  %v4651_v36 = vmul.f32 %v10424_v1, %v4619_v42 }
0x1335   :  { %v8121_v56 = vpop.eup %8120 }
0x1336   :  { %4565 = vrot.lane.b32.xlu0 %v8119_v12, %s8272_s4  ;;  %4549 = vrot.lane.b32.xlu1 %v8121_v56, %s8272_s4  ;;  %v4626_v56 = vrot.slane %v10252_v35, 7 }
0x138b   :  { %v4540_v8 = vpop.permute.xlu0 %4539 }
0x138c   :  { %v4586_v4 = vmul.f32 %v4540_v8, %v4506_v26  ;;  %v4538_v33 = vpop.permute.xlu1 %4537 }
0x138d   :  { %v4585_v22 = vmul.f32 %v4538_v33, %v4505_v61  ;;  %v4627_v61 = vrot.slane %v10256_v19, 7  ;;  %v4508_v19 = vsub.f32 1.0, %v10432_v40 }
0x138e   :  { %v10520_v41 = vadd.f32 %v4650_v62, %v4586_v4  ;;  %v4621_v62 = vrot.slane %v10247_v53, 7  ;;  %v4628_v4 = vrot.slane %v10258_v52, 7 }
0x138f   :  { %v10523_v12 = vadd.f32 %v4649_v28, %v4585_v22  ;;  %v4514_v22 = vsub.f32 1.0, %v10428_v24 }
0x1390   :  { %11529 = vst [vmem:[#allocation4_spill] sm:$0xff] %v10520_v41  ;;  %v4682_v45 = vpack.c.bf16 %v10520_v41, %v10520_v41  ;;  %v4556_v3 = vpop.permute.xlu0 %4555  ;;  %v4542_v26 = vpop.permute.xlu1 %4541  ;;  %v4509_v41 = vsub.f32 1.0, %v10440_v37 }
0x1391   :  { %11530 = vst [vmem:[#allocation6_spill] sm:$0xff] %v10523_v12  ;;  %v4681_v60 = vpack.c.bf16 %v10523_v12, %v10523_v12  ;;  %v4587_v8 = vmul.f32 %v4542_v26, %v4507_v43  ;;  %v4625_v12 = vrot.slane %v10283_v51, 7 }
0x1392   :  { %v4714_v35 = vunpack.c.l.b16 %v4682_v45  ;;  %v4594_v45 = vmul.f32 %v4556_v3, %v4514_v22  ;;  %v4515_v3 = vsub.f32 1.0, %v10436_v18 }
0x1393   :  { %v4713_v28 = vunpack.c.l.b16 %v4681_v60  ;;  %v10539_v2 = vadd.f32 %v4651_v36, %v4587_v8  ;;  %v4622_v60 = vrot.slane %v10301_v0, 7  ;;  %v4632_v36 = vrot.slane %v10310_v49, 7 }
0x1394   :  { %v4730_v1 = vrot.slane %v4714_v35, 5  ;;  %v4558_v42 = vpop.permute.xlu0 %4557  ;;  %v4544_v43 = vpop.permute.xlu1 %4543  ;;  %v4658_v35 = vmul.f32 %v10428_v24, %v4626_v56  ;;  %v4653_v0 = vmul.f32 %v10440_v37, %v4621_v62 }
0x1395   :  { %11531 = vst [vmem:[#allocation5_spill] sm:$0xff] %v10539_v2  ;;  %v4729_v52 = vrot.slane %v4713_v28, 6  ;;  %v4683_v26 = vpack.c.bf16 %v10539_v2, %v10539_v2  ;;  %v4588_v8 = vmul.f32 %v4544_v43, %v4508_v19  ;;  %v4630_v28 = vrot.slane %v10313_v47, 7 }
0x1396   :  { %v10558_v2 = vadd.f32 %v4658_v35, %v4594_v45  ;;  %v4595_v24 = vmul.f32 %v4558_v42, %v4515_v3  ;;  %v4510_v47 = vsub.f32 1.0, %v10448_v32  ;;  %v4654_v19 = vmul.f32 %v10448_v32, %v4622_v60 }
0x1397   :  { %v4731_v51 = vsel %vm901_vm3, %v4730_v1, %v4729_v52  ;;  %v4715_v33 = vunpack.c.l.b16 %v4683_v26  ;;  %v10555_v22 = vadd.f32 %v4652_v55, %v4588_v8  ;;  %v4659_v52 = vmul.f32 %v10436_v18, %v4627_v61 }
0x1398   :  { %v4560_v53 = vpop.permute.xlu0 %4559  ;;  %v4546_v49 = vpop.permute.xlu1 %4545  ;;  %v4661_v42 = vmul.f32 %v10452_v21, %v4629_v9  ;;  %v4690_v8 = vpack.c.bf16 %v10558_v2, %v10558_v2  ;;  %v4518_v18 = vsub.f32 1.0, %v10456_v6  ;;  %v4662_v61 = vmul.f32 %v10456_v6, %v4630_v28 }
0x1399   :  { %v4732_v40 = vrot.slane %v4715_v33, 4  ;;  %v4589_v1 = vmul.f32 %v4546_v49, %v4509_v41  ;;  %v4684_v56 = vpack.c.bf16 %v10555_v22, %v10555_v22  ;;  %v4596_v37 = vmul.f32 %v4560_v53, %v4516_v58 }
0x139a   :  { %v4660_v33 = vmul.f32 %v10444_v38, %v4628_v4  ;;  %v4517_v41 = vsub.f32 1.0, %v10452_v21  ;;  %v10578_v53 = vadd.f32 %v4659_v52, %v4595_v24  ;;  %v4513_v9 = vsub.f32 1.0, %v10460_v34 }
0x139b   :  { %v4733_v43 = vsel %vm904_vm4, %v4732_v40, %v4731_v51  ;;  %v10567_v62 = vadd.f32 %v4653_v0, %v4589_v1  ;;  %v4716_v45 = vunpack.c.l.b16 %v4684_v56  ;;  %v4657_v35 = vmul.f32 %v10460_v34, %v4625_v12 }
0x139c   :  { %v4562_v26 = vpop.permute.xlu0 %4561  ;;  %v4548_v55 = vpop.permute.xlu1 %4547  ;;  %v10580_v51 = vadd.f32 %v4660_v33, %v4596_v37  ;;  %v4520_v28 = vsub.f32 1.0, %v10464_v54  ;;  %v4664_v56 = vmul.f32 %v10464_v54, %v4632_v36  ;;  %v4691_v52 = vpack.c.bf16 %v10578_v53, %v10578_v53 }
0x139d   :  { %v4685_v32 = vpack.c.bf16 %v10567_v62, %v10567_v62  ;;  %v4734_v60 = vrot.slane %v4716_v45, 3  ;;  %v4597_v38 = vmul.f32 %v4562_v26, %v4517_v41  ;;  %v4590_v4 = vmul.f32 %v4548_v55, %v4510_v47 }
0x139e   :  { %v4722_v47 = vunpack.c.l.b16 %v4690_v8  ;;  %v4512_v12 = vsub.f32 1.0, %v10468_v27  ;;  %v11532_v41 = vrot.slane %v10266_v63, 7  ;;  %v4519_v55 = vsub.f32 1.0, %v10472_v23 }
0x139f   :  { %v4717_v21 = vunpack.c.l.b16 %v4685_v32  ;;  %v4735_v3 = vsel %vm907_vm5, %v4734_v60, %v4733_v43  ;;  %v10585_v0 = vadd.f32 %v4661_v42, %v4597_v38  ;;  %v10587_v49 = vadd.f32 %v4654_v19, %v4590_v4 }
0x13a0   :  { %v4564_v40 = vpop.permute.xlu0 %4563  ;;  %v4554_v6 = vpop.permute.xlu1 %4553  ;;  %v4692_v19 = vpack.c.bf16 %v10580_v51, %v10580_v51  ;;  %v4656_v42 = vmul.f32 %v10468_v27, %v11532_v41  ;;  %v4511_v60 = vsub.f32 1.0, %v10476_v13  ;;  %v4723_v38 = vunpack.c.l.b16 %v4691_v52 }
0x13a1   :  { %v4736_v58 = vrot.slane %v4717_v21, 2  ;;  %v4598_v1 = vmul.f32 %v4564_v40, %v4518_v18  ;;  %v4593_v24 = vmul.f32 %v4554_v6, %v4513_v9  ;;  %v4686_v34 = vpack.c.bf16 %v10587_v49, %v10587_v49 }
0x13a2   :  { %v4693_v54 = vpack.c.bf16 %v10585_v0, %v10585_v0  ;;  %v11533_v18 = vrot.slane %v10298_v17, 7  ;;  %v4744_v27 = vrot.slane %v4722_v47, 5  ;;  %v4724_v9 = vunpack.c.l.b16 %v4692_v19 }
0x13a3   :  { %v4737_v43 = vsel %vm910_vm6, %v4736_v58, %v4735_v3  ;;  %v10599_v37 = vadd.f32 %v4662_v61, %v4598_v1  ;;  %v10601_v45 = vadd.f32 %v4657_v35, %v4593_v24  ;;  %v4718_v36 = vunpack.c.l.b16 %v4686_v34 }
0x13a4   :  { %v4568_v33 = vpop.permute.xlu0 %4567  ;;  %v4552_v26 = vpop.permute.xlu1 %4551  ;;  %v4663_v61 = vmul.f32 %v10472_v23, %v11533_v18  ;;  %v11534_v3 = vrot.slane %v10263_v14, 7  ;;  %v4725_v6 = vunpack.c.l.b16 %v4693_v54  ;;  %v4746_v47 = vrot.slane %v4723_v38, 4 }
0x13a5   :  { %v4694_v8 = vpack.c.bf16 %v10599_v37, %v10599_v37  ;;  %v4689_v32 = vpack.c.bf16 %v10601_v45, %v10601_v45  ;;  %v4738_v4 = vrot.slane %v4718_v36, 1  ;;  %v4600_v63 = vmul.f32 %v4568_v33, %v4520_v28 }
0x13a6   :  { %v4592_v21 = vmul.f32 %v4552_v26, %v4512_v12  ;;  %v4655_v40 = vmul.f32 %v10476_v13, %v11534_v3  ;;  %v4748_v13 = vrot.slane %v4724_v9, 3  ;;  %v4750_v36 = vrot.slane %v4725_v6, 2 }
0x13a7   :  { %v4721_v35 = vunpack.c.l.b16 %v4689_v32  ;;  %v4739_v58 = vsel %vm913_vm7, %v4738_v4, %v4737_v43  ;;  %v10621_v1 = vadd.f32 %v4664_v56, %v4600_v63  ;;  %v4726_v52 = vunpack.c.l.b16 %v4694_v8 }
0x13a8   :  { %v10623_v17 = vadd.f32 %v4656_v42, %v4592_v21  ;;  %v4566_v23 = vpop.permute.xlu0 %4565  ;;  %v4550_v24 = vpop.permute.xlu1 %4549 }
0x13a9   :  { %v4743_v34 = vrot.slane %v4721_v35, 6  ;;  %v4599_v28 = vmul.f32 %v4566_v23, %v4519_v55  ;;  %v4591_v12 = vmul.f32 %v4550_v24, %v4511_v60  ;;  %v4696_v19 = vpack.c.bf16 %v10621_v1, %v10621_v1 }
0x13aa   :  { %v4688_v14 = vpack.c.bf16 %v10623_v17, %v10623_v17  ;;  %v4752_v26 = vrot.slane %v4726_v52, 1 }
0x13ab   :  { %v4745_v43 = vsel %vm901_vm3, %v4744_v27, %v4743_v34  ;;  %v10630_v56 = vadd.f32 %v4663_v61, %v4599_v28  ;;  %v10632_v54 = vadd.f32 %v4655_v40, %v4591_v12  ;;  %v4728_v41 = vunpack.c.l.b16 %v4696_v19 }
0x13ac   :  { %v4747_v33 = vsel %vm904_vm4, %v4746_v47, %v4745_v43  ;;  %v4720_v42 = vunpack.c.l.b16 %v4688_v14 }
0x13ad   :  { %v4749_v55 = vsel %vm907_vm5, %v4748_v13, %v4747_v33  ;;  %v4695_v8 = vpack.c.bf16 %v10630_v56, %v10630_v56  ;;  %v4687_v32 = vpack.c.bf16 %v10632_v54, %v10632_v54  ;;  %v4755_v4 = vrot.slane %v4728_v41, 7 }
0x13ae   :  { %v4751_v18 = vsel %vm910_vm6, %v4750_v36, %v4749_v55  ;;  %v4741_v63 = vrot.slane %v4720_v42, 7 }
0x13af   :  { %v4727_v61 = vunpack.c.l.b16 %v4695_v8  ;;  %v4753_v60 = vsel %vm913_vm7, %v4752_v26, %v4751_v18  ;;  %v4719_v38 = vunpack.c.l.b16 %v4687_v32 }
0x13b1   :  { %v4754_v21 = vsel %vm916_vm8, %v4727_v61, %v4753_v60  ;;  %v4740_v27 = vsel %vm916_vm8, %v4719_v38, %v4739_v58 }
0x13b2   :  { %v4742_v9 = vsel %vm919_vm9, %v4741_v63, %v4740_v27  ;;  %v4756_v35 = vsel %vm919_vm9, %v4755_v4, %v4754_v21 }
0x13b3   :  { %v4757_v3 = vpack.c.b16 %v4756_v35, %v4742_v9 }
0x13b5   :  { %4758 = vrot.lane.b32.xlu1 %v4757_v3, %s8272_s4 }
0x1427   :  { %v4759_v40 = vpop.permute.xlu1 %4758 }
0x1428   :  { %7333 = vmatmul.mubr.msk.bf16.vlgmr.msra.gmra.mrb[20].mxu1 %vm146_vm1, %v4759_v40 }
0x1429   :  { %7360 = vmatprep.mubr.msk.bf16.mxu1 %vm8269_vm0, %v11502_v5 }
0x14fb   :  { %v10650_v6 = vpop.f32.mrb[20].mxu1 }
0x14fc   :  { %v7334_v23 = vpop.f32.mrb[21].mxu1  ;;  %v4948_v58 = vadd.f32 %v10650_v6, %v8436_v15  ;;  %v4807_v8 = vrot.slane %v10650_v6, 2  ;;  %v4806_v32 = vrot.slane %v10650_v6, 1  ;;  %v4808_v18 = vrot.slane %v10650_v6, 3 }
0x14fd   :  { %v10652_v24 = vpop.f32.mrb[22].mxu1  ;;  %v4809_v4 = vrot.slane %v10650_v6, 4  ;;  %v4810_v3 = vrot.slane %v10650_v6, 5 }
0x14fe   :  { %v7335_v52 = vpop.f32.mrb[23].mxu1  ;;  %v4949_v34 = vadd.f32 %v10652_v24, %v8436_v15  ;;  %v4953_v28 = vrot.slane %v4948_v58, 2  ;;  %v4952_v12 = vrot.slane %v4948_v58, 1  ;;  %v4954_v47 = vrot.slane %v4948_v58, 3 }
0x14ff   :  { %v4955_v14 = vrot.slane %v4948_v58, 4  ;;  %v4956_v43 = vrot.slane %v4948_v58, 5  ;;  %v4957_v36 = vrot.slane %v4948_v58, 6  ;;  %v4958_v55 = vrot.slane %v4948_v58, 7 }
0x1500   :  { %4968 = vrot.lane.b32.xlu1 %v4953_v28, %s8271_s0  ;;  %4966 = vrot.lane.b32.xlu0 %v4952_v12, %s8271_s0  ;;  %v4960_v19 = vrot.slane %v4949_v34, 2  ;;  %v4961_v13 = vrot.slane %v4949_v34, 3  ;;  %v4962_v15 = vrot.slane %v4949_v34, 4  ;;  %v4963_v33 = vrot.slane %v4949_v34, 5 }
0x1501   :  { %v4964_v41 = vrot.slane %v4949_v34, 6  ;;  %v4959_v42 = vrot.slane %v4949_v34, 1  ;;  %v4965_v26 = vrot.slane %v4949_v34, 7  ;;  %v4837_v61 = vadd.f32 %v4807_v8, %v10356_v44 }
0x1502   :  { %v4836_v60 = vadd.f32 %v4806_v32, %v10358_v16  ;;  %v4814_v38 = vrot.slane %v10652_v24, 2  ;;  %v4838_v63 = vadd.f32 %v4808_v18, %v10364_v39  ;;  %v4815_v9 = vrot.slane %v10652_v24, 3 }
0x1503   :  { %v7134_v21 = vmul.f32 -1.442695, %v4837_v61  ;;  %v4839_v40 = vadd.f32 %v4809_v4, %v10372_v20  ;;  %v4816_v52 = vrot.slane %v10652_v24, 4  ;;  %v4811_v28 = vrot.slane %v10650_v6, 6 }
0x1504   :  { %4970 = vrot.lane.b32.xlu0 %v4954_v47, %s8271_s0  ;;  %4984 = vrot.lane.b32.xlu1 %v4960_v19, %s8271_s0  ;;  %v7133_v27 = vmul.f32 -1.442695, %v4836_v60  ;;  %v4845_v35 = vadd.f32 %v4814_v38, %v10366_v59  ;;  %v7135_v23 = vmul.f32 -1.442695, %v4838_v63  ;;  %v4840_v12 = vadd.f32 %v4810_v3, %v10380_v46 }
0x1505   :  { %8122 = vpow2.f32 %v7134_v21  ;;  %v7136_v47 = vmul.f32 -1.442695, %v4839_v40  ;;  %v4817_v19 = vrot.slane %v10652_v24, 5  ;;  %v4812_v8 = vrot.slane %v10650_v6, 7 }
0x1506   :  { %8124 = vpow2.f32 %v7133_v27  ;;  %v4819_v61 = vrot.slane %v10652_v24, 7 }
0x1507   :  { %8126 = vpow2.f32 %v7135_v23 }
0x1508   :  { %4972 = vrot.lane.b32.xlu0 %v4955_v14, %s8271_s0  ;;  %4986 = vrot.lane.b32.xlu1 %v4961_v13, %s8271_s0  ;;  %v4847_v14 = vadd.f32 %v4816_v52, %v10383_v57  ;;  %v4850_v3 = vadd.f32 %v4819_v61, %v10412_v50 }
0x150c   :  { %4974 = vrot.lane.b32.xlu0 %v4956_v43, %s8271_s0  ;;  %4988 = vrot.lane.b32.xlu1 %v4962_v15, %s8271_s0  ;;  %v4841_v43 = vadd.f32 %v4811_v28, %v10387_v25  ;;  %v4813_v15 = vrot.slane %v10652_v24, 1  ;;  %v4843_v28 = vadd.f32 %v10650_v6, %v10404_v30 }
0x150e   :  { %v7138_v32 = vmul.f32 -1.442695, %v4841_v43  ;;  %v4844_v18 = vadd.f32 %v4813_v15, %v10396_v29 }
0x1510   :  { %4976 = vrot.lane.b32.xlu0 %v4957_v36, %s8271_s0  ;;  %4990 = vrot.lane.b32.xlu1 %v4963_v33, %s8271_s0  ;;  %v7137_v36 = vmul.f32 -1.442695, %v4840_v12  ;;  %v4818_v33 = vrot.slane %v10652_v24, 6 }
0x1512   :  { %v4849_v60 = vadd.f32 %v4818_v33, %v10398_v48 }
0x1514   :  { %4992 = vrot.lane.b32.xlu1 %v4964_v41, %s8271_s0  ;;  %4982 = vrot.lane.b32.xlu0 %v4959_v42, %s8271_s0  ;;  %v4848_v41 = vadd.f32 %v4817_v19, %v10390_v11  ;;  %v7144_v42 = vmul.f32 -1.442695, %v4847_v14  ;;  %v7146_v40 = vmul.f32 -1.442695, %v4849_v60  ;;  %v7147_v19 = vmul.f32 -1.442695, %v4850_v3 }
0x1516   :  { %v7145_v38 = vmul.f32 -1.442695, %v4848_v41 }
0x1518   :  { %4994 = vrot.lane.b32.xlu1 %v4965_v26, %s8271_s0  ;;  %4978 = vrot.lane.b32.xlu0 %v4958_v55, %s8271_s0  ;;  %v8123_v26 = vpop.eup %8122 }
0x1519   :  { %v8125_v55 = vpop.eup %8124  ;;  %v4901_v4 = vadd.f32 1.0, %v8123_v26 }
0x151a   :  { %v8127_v63 = vpop.eup %8126  ;;  %v4900_v21 = vadd.f32 1.0, %v8125_v55 }
0x151b   :  { %v4902_v23 = vadd.f32 1.0, %v8127_v63 }
0x151c   :  { %4996 = vrot.lane.b32.xlu1 %v4949_v34, %s8271_s0  ;;  %4980 = vrot.lane.b32.xlu0 %v4948_v58, %s8271_s0  ;;  %v4846_v58 = vadd.f32 %v4815_v9, %v10374_v7  ;;  %v7142_v34 = vmul.f32 -1.442695, %v4845_v35  ;;  %v4842_v9 = vadd.f32 %v4812_v8, %v10410_v31  ;;  %v7141_v35 = vmul.f32 -1.442695, %v4844_v18 }
0x151e   :  { %8128 = vpow2.f32 %v7142_v34  ;;  %v7143_v13 = vmul.f32 -1.442695, %v4846_v58  ;;  %v7139_v12 = vmul.f32 -1.442695, %v4842_v9 }
0x151f   :  { %8130 = vpow2.f32 %v7136_v47  ;;  %v4851_v47 = vadd.f32 %v10652_v24, %v10406_v10 }
0x1520   :  { %8132 = vpow2.f32 %v7143_v13 }
0x1521   :  { %8134 = vpow2.f32 %v7137_v36  ;;  %v7140_v36 = vmul.f32 -1.442695, %v4843_v28  ;;  %v7148_v33 = vmul.f32 -1.442695, %v4851_v47 }
0x1522   :  { %8136 = vpow2.f32 %v7144_v42 }
0x1523   :  { %8138 = vpow2.f32 %v7138_v32 }
0x1524   :  { %8140 = vpow2.f32 %v7145_v38 }
0x1525   :  { %8142 = vrcp.f32 %v4901_v4 }
0x1526   :  { %8144 = vrcp.f32 %v4900_v21 }
0x1527   :  { %8146 = vpow2.f32 %v7141_v35 }
0x1528   :  { %v8129_v27 = vpop.eup %8128  ;;  %8148 = vpow2.f32 %v7146_v40 }
0x1529   :  { %v8131_v52 = vpop.eup %8130  ;;  %v4909_v58 = vadd.f32 1.0, %v8129_v27  ;;  %8150 = vrcp.f32 %v4902_v23 }
0x152a   :  { %v8133_v34 = vpop.eup %8132  ;;  %v4903_v14 = vadd.f32 1.0, %v8131_v52 }
0x152b   :  { %v8135_v13 = vpop.eup %8134  ;;  %8152 = vrcp.f32 %v4909_v58  ;;  %v4910_v43 = vadd.f32 1.0, %v8133_v34 }
0x152c   :  { %v8137_v15 = vpop.eup %8136  ;;  %8154 = vpow2.f32 %v7139_v12  ;;  %v4904_v6 = vadd.f32 1.0, %v8135_v13 }
0x152d   :  { %8156 = vpow2.f32 %v7147_v19  ;;  %v8139_v41 = vpop.eup %8138  ;;  %v4911_v26 = vadd.f32 1.0, %v8137_v15 }
0x152e   :  { %8158 = vrcp.f32 %v4903_v14  ;;  %v8141_v42 = vpop.eup %8140  ;;  %v4905_v38 = vadd.f32 1.0, %v8139_v41 }
0x152f   :  { %8160 = vrcp.f32 %v4910_v43  ;;  %v10706_v55 = vpop.eup %8142  ;;  %v4912_v63 = vadd.f32 1.0, %v8141_v42 }
0x1530   :  { %8162 = vpow2.f32 %v7140_v36  ;;  %v10708_v24 = vpop.eup %8144 }
0x1531   :  { %8164 = vpow2.f32 %v7148_v33  ;;  %v8147_v18 = vpop.eup %8146 }
0x1532   :  { %8166 = vrcp.f32 %v4904_v6  ;;  %v8149_v4 = vpop.eup %8148  ;;  %v4908_v34 = vadd.f32 1.0, %v8147_v18 }
0x1533   :  { %8168 = vrcp.f32 %v4911_v26  ;;  %v10712_v21 = vpop.eup %8150  ;;  %v4913_v52 = vadd.f32 1.0, %v8149_v4 }
0x1534   :  { %8170 = vrcp.f32 %v4905_v38 }
0x1535   :  { %v10716_v27 = vpop.eup %8152  ;;  %8172 = vrcp.f32 %v4912_v63 }
0x1536   :  { %v8155_v3 = vpop.eup %8154  ;;  %8174 = vrcp.f32 %v4913_v52 }
0x1537   :  { %v8157_v58 = vpop.eup %8156  ;;  %8176 = vrcp.f32 %v4908_v34  ;;  %v4906_v33 = vadd.f32 1.0, %v8155_v3 }
0x1538   :  { %v10720_v28 = vpop.eup %8158  ;;  %v4914_v15 = vadd.f32 1.0, %v8157_v58 }
0x1539   :  { %v10724_v12 = vpop.eup %8160 }
0x153a   :  { %v8163_v14 = vpop.eup %8162  ;;  %8178 = vrcp.f32 %v4914_v15 }
0x153b   :  { %v8165_v36 = vpop.eup %8164  ;;  %8180 = vrcp.f32 %v4906_v33 }
0x153c   :  { %v10728_v41 = vpop.eup %8166  ;;  %v4915_v18 = vadd.f32 1.0, %v8165_v36 }
0x153d   :  { %v10732_v6 = vpop.eup %8168 }
0x153e   :  { %8182 = vrcp.f32 %v4915_v18 }
0x1572   :  { %v4969_v8 = vpop.permute.xlu1 %4968  ;;  %v4967_v32 = vpop.permute.xlu0 %4966 }
0x1573   :  { %v5015_v61 = vmul.f32 %v10706_v55, %v4969_v8  ;;  %v5014_v60 = vmul.f32 %v10708_v24, %v4967_v32 }
0x1575   :  { %5048 = vrot.lane.b32.xlu1 %v5015_v61, %s8271_s0  ;;  %5046 = vrot.lane.b32.xlu0 %v5014_v60, %s8271_s0  ;;  %v4907_v61 = vadd.f32 1.0, %v8163_v14  ;;  %v10736_v60 = vpop.eup %8170 }
0x1576   :  { %v4971_v9 = vpop.permute.xlu0 %4970  ;;  %v4985_v35 = vpop.permute.xlu1 %4984 }
0x1577   :  { %v5016_v40 = vmul.f32 %v10712_v21, %v4971_v9  ;;  %v5023_v23 = vmul.f32 %v10716_v27, %v4985_v35  ;;  %v10740_v38 = vpop.eup %8172  ;;  %8184 = vrcp.f32 %v4907_v61 }
0x1578   :  { %v10744_v3 = vpop.eup %8174 }
0x1579   :  { %5050 = vrot.lane.b32.xlu0 %v5016_v40, %s8271_s0  ;;  %5064 = vrot.lane.b32.xlu1 %v5023_v23, %s8271_s0  ;;  %v10748_v40 = vpop.eup %8176 }
0x157a   :  { %v4973_v47 = vpop.permute.xlu0 %4972  ;;  %v4987_v19 = vpop.permute.xlu1 %4986 }
0x157b   :  { %v5017_v13 = vmul.f32 %v10720_v28, %v4973_v47  ;;  %v5024_v43 = vmul.f32 %v10724_v12, %v4987_v19  ;;  %v10752_v47 = vpop.eup %8178 }
0x157c   :  { %v10756_v19 = vpop.eup %8180 }
0x157d   :  { %5052 = vrot.lane.b32.xlu0 %v5017_v13, %s8271_s0  ;;  %5066 = vrot.lane.b32.xlu1 %v5024_v43, %s8271_s0  ;;  %v10760_v36 = vpop.eup %8182 }
0x157e   :  { %v4975_v42 = vpop.permute.xlu0 %4974  ;;  %v4989_v26 = vpop.permute.xlu1 %4988 }
0x157f   :  { %v5018_v8 = vmul.f32 %v10728_v41, %v4975_v42  ;;  %v5025_v32 = vmul.f32 %v10732_v6, %v4989_v26 }
0x1581   :  { %5054 = vrot.lane.b32.xlu0 %v5018_v8, %s8271_s0  ;;  %5068 = vrot.lane.b32.xlu1 %v5025_v32, %s8271_s0  ;;  %v10764_v33 = vpop.eup %8184 }
0x1582   :  { %v4977_v4 = vpop.permute.xlu0 %4976  ;;  %v4991_v63 = vpop.permute.xlu1 %4990 }
0x1583   :  { %v5019_v9 = vmul.f32 %v10736_v60, %v4977_v4  ;;  %v5026_v35 = vmul.f32 %v10740_v38, %v4991_v63 }
0x1585   :  { %5056 = vrot.lane.b32.xlu0 %v5019_v9, %s8271_s0  ;;  %5070 = vrot.lane.b32.xlu1 %v5026_v35, %s8271_s0 }
0x1586   :  { %v4993_v23 = vpop.permute.xlu1 %4992  ;;  %v4983_v52 = vpop.permute.xlu0 %4982 }
0x1587   :  { %v5027_v58 = vmul.f32 %v10744_v3, %v4993_v23  ;;  %v5022_v34 = vmul.f32 %v10748_v40, %v4983_v52 }
0x1589   :  { %5072 = vrot.lane.b32.xlu1 %v5027_v58, %s8271_s0  ;;  %5062 = vrot.lane.b32.xlu0 %v5022_v34, %s8271_s0 }
0x158a   :  { %v4995_v14 = vpop.permute.xlu1 %4994  ;;  %v4979_v13 = vpop.permute.xlu0 %4978 }
0x158b   :  { %v5028_v43 = vmul.f32 %v10752_v47, %v4995_v14  ;;  %v5020_v15 = vmul.f32 %v10756_v19, %v4979_v13 }
0x158d   :  { %5074 = vrot.lane.b32.xlu1 %v5028_v43, %s8271_s0  ;;  %5058 = vrot.lane.b32.xlu0 %v5020_v15, %s8271_s0 }
0x158e   :  { %v4997_v42 = vpop.permute.xlu1 %4996  ;;  %v4981_v26 = vpop.permute.xlu0 %4980 }
0x158f   :  { %v5029_v8 = vmul.f32 %v10760_v36, %v4997_v42  ;;  %v5021_v32 = vmul.f32 %v10764_v33, %v4981_v26 }
0x1591   :  { %5076 = vrot.lane.b32.xlu1 %v5029_v8, %s8271_s0  ;;  %5060 = vrot.lane.b32.xlu0 %v5021_v32, %s8271_s0 }
0x15e7   :  { %v5049_v18 = vpop.permute.xlu1 %5048  ;;  %v5047_v61 = vpop.permute.xlu0 %5046 }
0x15e8   :  { %v5095_v4 = vadd.f32 %v5049_v18, %v10356_v44  ;;  %v5094_v63 = vadd.f32 %v5047_v61, %v10358_v16 }
0x15ea   :  { %8186 = vtanh.f32 %v5095_v4 }
0x15eb   :  { %8188 = vtanh.f32 %v5094_v63  ;;  %v5051_v9 = vpop.permute.xlu0 %5050  ;;  %v5065_v35 = vpop.permute.xlu1 %5064 }
0x15ec   :  { %v5096_v23 = vadd.f32 %v5051_v9, %v10364_v39  ;;  %v5103_v52 = vadd.f32 %v5065_v35, %v10366_v59 }
0x15ee   :  { %8190 = vtanh.f32 %v5096_v23 }
0x15ef   :  { %8192 = vtanh.f32 %v5103_v52  ;;  %v5053_v58 = vpop.permute.xlu0 %5052  ;;  %v5067_v34 = vpop.permute.xlu1 %5066 }
0x15f0   :  { %v5097_v14 = vadd.f32 %v5053_v58, %v10372_v20  ;;  %v5104_v13 = vadd.f32 %v5067_v34, %v10374_v7 }
0x15f2   :  { %8194 = vtanh.f32 %v5097_v14 }
0x15f3   :  { %8196 = vtanh.f32 %v5104_v13  ;;  %v5055_v44 = vpop.permute.xlu0 %5054  ;;  %v5069_v16 = vpop.permute.xlu1 %5068 }
0x15f4   :  { %v8187_v43 = vpop.eup %8186  ;;  %v5098_v15 = vadd.f32 %v5055_v44, %v10380_v46  ;;  %v5105_v42 = vadd.f32 %v5069_v16, %v10383_v57 }
0x15f5   :  { %v8189_v39 = vpop.eup %8188  ;;  %5160 = vrot.lane.b32.xlu1 %v8187_v43, %s8272_s4  ;;  %v7420_v43 = vld [vmem:[%s11447_s6] sm:$0xff]  }
0x15f6   :  { %8198 = vtanh.f32 %v5098_v15  ;;  %5158 = vrot.lane.b32.xlu0 %v8189_v39, %s8272_s4  ;;  %v7421_v15 = vld [vmem:[%s11447_s6 + $0x8] sm:$0xff]   ;;  %7336 = vmatprep.subr.bf16.mxu0 %v7420_v43  ;;  %v7424_v39 = vld [vmem:[%s11449_s8] sm:$0xff]  }
0x15f7   :  { %8200 = vtanh.f32 %v5105_v42  ;;  %v5057_v59 = vpop.permute.xlu0 %5056  ;;  %v5071_v20 = vpop.permute.xlu1 %5070  ;;  %v5318_v42 = vld [vmem:[%s11448_s1] sm:$0xff]   ;;  %7337 = vmatpush3.bf16.msra.mxu0 %v7420_v43  ;;  %7357 = vmatpush3.bf16.msra.mxu1 %v7424_v39  ;;  %v5250_v43 = vrot.slane %v10585_v0, 7  ;;  %v5252_v0 = vrot.slane %v10630_v56, 7  ;;  %v5137_v56 = vsub.f32 1.0, %v10732_v6 }
0x15f8   :  { %v8191_v26 = vpop.eup %8190  ;;  %v5099_v7 = vadd.f32 %v5057_v59, %v10387_v25  ;;  %v5106_v8 = vadd.f32 %v5071_v20, %v10390_v11  ;;  %v5320_v59 = vld [vmem:[%s11448_s1 + $0x8] sm:$0xff]   ;;  %7338 = vmatprep.subr.bf16.mxu0 %v7421_v15  ;;  %7340 = vmatprep.mubr.msk.bf16.mxu0 %vm146_vm1, %v5318_v42  ;;  %v5322_v20 = vld [vmem:[%s11448_s1 + $0x10] sm:$0xff]  }
0x15f9   :  { %v8193_v32 = vpop.eup %8192  ;;  %7358 = vmatprep.subr.bf16.mxu1 %v11502_v5 }
0x15fa   :  { %8202 = vtanh.f32 %v5099_v7  ;;  %5176 = vrot.lane.b32.xlu1 %v8193_v32, %s8272_s4  ;;  %5162 = vrot.lane.b32.xlu0 %v8191_v26, %s8272_s4  ;;  %v7427_v26 = vld [vmem:[%s11449_s8 + $0x8] sm:$0xff]   ;;  %v5324_v7 = vld [vmem:[%s11448_s1 + $0x18] sm:$0xff]  }
0x15fb   :  { %8204 = vtanh.f32 %v5106_v8  ;;  %v5073_v46 = vpop.permute.xlu1 %5072  ;;  %v5063_v57 = vpop.permute.xlu0 %5062  ;;  %7339 = vmatpush3.bf16.msra.mxu0 %v7421_v15  ;;  %7359 = vmatpush3.bf16.msra.mxu1 %v7427_v26  ;;  %v11535_v8 = vld [vmem:[#allocation4_spill] sm:$0xff]  ;;  %v5129_v26 = vsub.f32 1.0, %v10720_v28 }
0x15fc   :  { %v8195_v18 = vpop.eup %8194  ;;  %v5107_v61 = vadd.f32 %v5073_v46, %v10398_v48  ;;  %v5102_v4 = vadd.f32 %v5063_v57, %v10396_v29  ;;  %7388 = vmatprep.subr.bf16.mxu0 %v11502_v5  ;;  %7364 = vmatprep.subr.bf16.mxu1 %v11502_v5  ;;  %v5239_v32 = vrot.slane %v11535_v8, 7  ;;  %v5127_v46 = vsub.f32 1.0, %v10706_v55  ;;  %v11536_v57 = vld [vmem:[#allocation6_spill] sm:$0xff] }
0x15fd   :  { %v8197_v63 = vpop.eup %8196 }
0x15fe   :  { %8206 = vtanh.f32 %v5107_v61  ;;  %5178 = vrot.lane.b32.xlu1 %v8197_v63, %s8272_s4  ;;  %5164 = vrot.lane.b32.xlu0 %v8195_v18, %s8272_s4  ;;  %v5238_v18 = vrot.slane %v11536_v57, 7  ;;  %v5271_v63 = vmul.f32 %v10706_v55, %v5239_v32  ;;  %v5241_v55 = vrot.slane %v10555_v22, 7 }
0x15ff   :  { %8208 = vtanh.f32 %v5102_v4  ;;  %v5075_v25 = vpop.permute.xlu1 %5074  ;;  %v5059_v11 = vpop.permute.xlu0 %5058  ;;  %7341 = vmatmul.mubr.msk.bf16.vlgmr.msra.gmra.mrb[24].mxu0 %vm146_vm1, %v5320_v59  ;;  %v5126_v4 = vsub.f32 1.0, %v10708_v24  ;;  %v5246_v59 = vrot.slane %v10601_v45, 7  ;;  %v5253_v22 = vrot.slane %v10621_v1, 7 }
0x1600   :  { %v8199_v9 = vpop.eup %8198  ;;  %v5108_v35 = vadd.f32 %v5075_v25, %v10412_v50  ;;  %v5100_v23 = vadd.f32 %v5059_v11, %v10410_v31  ;;  %7344 = vmatprep.mubr.msk.bf16.mxu0 %vm146_vm1, %v5322_v20  ;;  %v5273_v32 = vmul.f32 %v10720_v28, %v5241_v55  ;;  %v5131_v28 = vsub.f32 1.0, %v10736_v60 }
0x1601   :  { %v8201_v52 = vpop.eup %8200 }
0x1602   :  { %8210 = vtanh.f32 %v5108_v35  ;;  %5180 = vrot.lane.b32.xlu1 %v8201_v52, %s8272_s4  ;;  %5166 = vrot.lane.b32.xlu0 %v8199_v9, %s8272_s4  ;;  %v5270_v9 = vmul.f32 %v10708_v24, %v5238_v18  ;;  %v11537_v52 = vld [vmem:[#allocation5_spill] sm:$0xff]  ;;  %v5136_v18 = vsub.f32 1.0, %v10724_v12 }
0x1603   :  { %8212 = vtanh.f32 %v5100_v23  ;;  %v5077_v29 = vpop.permute.xlu1 %5076  ;;  %v5061_v48 = vpop.permute.xlu0 %5060 }
0x1604   :  { %v8203_v58 = vpop.eup %8202  ;;  %v5109_v34 = vadd.f32 %v5077_v29, %v10406_v10  ;;  %v5101_v14 = vadd.f32 %v5061_v48, %v10404_v30  ;;  %v5240_v29 = vrot.slane %v11537_v52, 7 }
0x1605   :  { %v8205_v13 = vpop.eup %8204 }
0x1606   :  { %8214 = vtanh.f32 %v5109_v34  ;;  %5182 = vrot.lane.b32.xlu1 %v8205_v13, %s8272_s4  ;;  %5168 = vrot.lane.b32.xlu0 %v8203_v58, %s8272_s4  ;;  %v5128_v58 = vsub.f32 1.0, %v10712_v21  ;;  %v5247_v34 = vrot.slane %v10558_v2, 7  ;;  %v5243_v2 = vrot.slane %v10587_v49, 7 }
0x1607   :  { %8216 = vtanh.f32 %v5101_v14  ;;  %7345 = vmatmul.mubr.msk.bf16.gmra.mrb[28].mxu0 %vm146_vm1, %v5324_v7  ;;  %v5248_v14 = vrot.slane %v10578_v53, 7  ;;  %v5251_v53 = vrot.slane %v10599_v37, 7  ;;  %v5244_v49 = vrot.slane %v10632_v54, 7 }
0x1608   :  { %v8207_v31 = vpop.eup %8206  ;;  %v5135_v37 = vsub.f32 1.0, %v10716_v27  ;;  %v5279_v52 = vmul.f32 %v10716_v27, %v5247_v34 }
0x1609   :  { %v8209_v50 = vpop.eup %8208 }
0x160a   :  { %5184 = vrot.lane.b32.xlu1 %v8207_v31, %s8272_s4  ;;  %5174 = vrot.lane.b32.xlu0 %v8209_v50, %s8272_s4 }
0x160c   :  { %v8211_v44 = vpop.eup %8210 }
0x160d   :  { %v8213_v16 = vpop.eup %8212 }
0x160e   :  { %5186 = vrot.lane.b32.xlu1 %v8211_v44, %s8272_s4  ;;  %5170 = vrot.lane.b32.xlu0 %v8213_v16, %s8272_s4  ;;  %v5272_v16 = vmul.f32 %v10712_v21, %v5240_v29 }
0x1610   :  { %v8215_v30 = vpop.eup %8214 }
0x1611   :  { %v8217_v10 = vpop.eup %8216 }
0x1612   :  { %5188 = vrot.lane.b32.xlu1 %v8215_v30, %s8272_s4  ;;  %5172 = vrot.lane.b32.xlu0 %v8217_v10, %s8272_s4  ;;  %v5249_v30 = vrot.slane %v10580_v51, 7  ;;  %v5242_v10 = vrot.slane %v10567_v62, 7  ;;  %v5245_v62 = vrot.slane %v10623_v17, 7  ;;  %v10893_v17 = vld [vmem:[%s11448_s1 + $0x20] sm:$0xff]  }
0x1613   :  { %7348 = vmatprep.mubr.msk.bf16.mxu0 %vm146_vm1, %v10893_v17 }
0x1667   :  { %v5161_v61 = vpop.permute.xlu1 %5160 }
0x1668   :  { %v5207_v25 = vmul.f32 %v5161_v61, %v5127_v46  ;;  %v5159_v11 = vpop.permute.xlu0 %5158  ;;  %v5130_v61 = vsub.f32 1.0, %v10728_v41 }
0x1669   :  { %v5206_v35 = vmul.f32 %v5159_v11, %v5126_v4  ;;  %v5274_v11 = vmul.f32 %v10728_v41, %v5242_v10  ;;  %v5138_v41 = vsub.f32 1.0, %v10740_v38 }
0x166a   :  { %v5287_v23 = vadd.f32 %v5271_v63, %v5207_v25 }
0x166b   :  { %v5286_v48 = vadd.f32 %v5270_v9, %v5206_v35 }
0x166c   :  { %v5303_v13 = vpack.c.bf16 %v5287_v23, %v5287_v23  ;;  %v5177_v31 = vpop.permute.xlu1 %5176  ;;  %v5163_v50 = vpop.permute.xlu0 %5162  ;;  %v5275_v23 = vmul.f32 %v10736_v60, %v5243_v2  ;;  %v5139_v2 = vsub.f32 1.0, %v10744_v3 }
0x166d   :  { %v5302_v44 = vpack.c.bf16 %v5286_v48, %v5286_v48  ;;  %v5208_v24 = vmul.f32 %v5163_v50, %v5128_v58  ;;  %v5215_v4 = vmul.f32 %v5177_v31, %v5135_v37  ;;  %v5280_v31 = vmul.f32 %v10724_v12, %v5248_v14 }
0x166e   :  { %v5562_v15 = vunpack.c.l.b16 %v5303_v13  ;;  %v5281_v50 = vmul.f32 %v10732_v6, %v5249_v30  ;;  %v5283_v12 = vmul.f32 %v10744_v3, %v5251_v53  ;;  %v5134_v14 = vsub.f32 1.0, %v10748_v40 }
0x166f   :  { %v5561_v42 = vunpack.c.l.b16 %v5302_v44  ;;  %v5288_v39 = vadd.f32 %v5272_v16, %v5208_v24  ;;  %v5295_v55 = vadd.f32 %v5279_v52, %v5215_v4  ;;  %v5282_v24 = vmul.f32 %v10740_v38, %v5250_v43 }
0x1670   :  { %v5578_v20 = vrot.slane %v5562_v15, 6  ;;  %v5179_v21 = vpop.permute.xlu1 %5178  ;;  %v5165_v51 = vpop.permute.xlu0 %5164  ;;  %v5278_v30 = vmul.f32 %v10748_v40, %v5246_v59  ;;  %v5141_v4 = vsub.f32 1.0, %v10760_v36 }
0x1671   :  { %v5577_v7 = vrot.slane %v5561_v42, 7  ;;  %v5304_v8 = vpack.c.bf16 %v5288_v39, %v5288_v39  ;;  %v5209_v45 = vmul.f32 %v5165_v51, %v5129_v26  ;;  %v5216_v35 = vmul.f32 %v5179_v21, %v5136_v18 }
0x1672   :  { %v5140_v21 = vsub.f32 1.0, %v10752_v47  ;;  %v5311_v38 = vpack.c.bf16 %v5295_v55, %v5295_v55  ;;  %v5132_v18 = vsub.f32 1.0, %v10756_v19 }
0x1673   :  { %v5579_v46 = vsel %vm901_vm3, %v5578_v20, %v5577_v7  ;;  %v5563_v57 = vunpack.c.l.b16 %v5304_v8  ;;  %v5289_v63 = vadd.f32 %v5273_v32, %v5209_v45  ;;  %v5296_v15 = vadd.f32 %v5280_v31, %v5216_v35 }
0x1674   :  { %v5181_v25 = vpop.permute.xlu1 %5180  ;;  %v5167_v54 = vpop.permute.xlu0 %5166 }
0x1675   :  { %v5580_v9 = vrot.slane %v5563_v57, 5  ;;  %v5305_v29 = vpack.c.bf16 %v5289_v63, %v5289_v63  ;;  %v5217_v48 = vmul.f32 %v5181_v25, %v5137_v56  ;;  %v5210_v58 = vmul.f32 %v5167_v54, %v5130_v61 }
0x1676   :  { %v5312_v37 = vpack.c.bf16 %v5296_v15, %v5296_v15  ;;  %v5276_v61 = vmul.f32 %v10756_v19, %v5244_v49  ;;  %v5570_v63 = vunpack.c.l.b16 %v5311_v38 }
0x1677   :  { %v5581_v13 = vsel %vm904_vm4, %v5580_v9, %v5579_v46  ;;  %v5564_v44 = vunpack.c.l.b16 %v5305_v29  ;;  %v5290_v16 = vadd.f32 %v5274_v11, %v5210_v58  ;;  %v5297_v39 = vadd.f32 %v5281_v50, %v5217_v48 }
0x1678   :  { %v5183_v10 = vpop.permute.xlu1 %5182  ;;  %v5169_v60 = vpop.permute.xlu0 %5168  ;;  %v5284_v46 = vmul.f32 %v10752_v47, %v5252_v0  ;;  %v5571_v35 = vunpack.c.l.b16 %v5312_v37  ;;  %v5133_v58 = vsub.f32 1.0, %v10764_v33  ;;  %v5592_v31 = vrot.slane %v5570_v63, 6 }
0x1679   :  { %v5218_v27 = vmul.f32 %v5183_v10, %v5138_v41  ;;  %v5211_v34 = vmul.f32 %v5169_v60, %v5131_v28  ;;  %v5582_v42 = vrot.slane %v5564_v44, 4  ;;  %v5306_v20 = vpack.c.bf16 %v5290_v16, %v5290_v16 }
0x167a   :  { %v5313_v3 = vpack.c.bf16 %v5297_v39, %v5297_v39  ;;  %v5285_v28 = vmul.f32 %v10760_v36, %v5253_v22  ;;  %v5594_v36 = vrot.slane %v5571_v35, 5 }
0x167b   :  { %v5291_v6 = vadd.f32 %v5275_v23, %v5211_v34  ;;  %v5583_v43 = vsel %vm907_vm5, %v5582_v42, %v5581_v13  ;;  %v5565_v26 = vunpack.c.l.b16 %v5306_v20  ;;  %v5298_v51 = vadd.f32 %v5282_v24, %v5218_v27 }
0x167c   :  { %v5185_v7 = vpop.permute.xlu1 %5184  ;;  %v5175_v8 = vpop.permute.xlu0 %5174  ;;  %v5572_v23 = vunpack.c.l.b16 %v5313_v3  ;;  %v5277_v13 = vmul.f32 %v10764_v33, %v5245_v62  ;;  %v10898_v33 = vld [vmem:[%s11448_s1 + $0x28] sm:$0xff]  }
0x167d   :  { %v5307_v32 = vpack.c.bf16 %v5291_v6, %v5291_v6  ;;  %v5219_v45 = vmul.f32 %v5185_v7, %v5139_v2  ;;  %v5584_v53 = vrot.slane %v5565_v26, 3  ;;  %v5214_v57 = vmul.f32 %v5175_v8, %v5134_v14  ;;  %7349 = vmatmul.mubr.msk.bf16.gmra.mrb[32].mxu0 %vm146_vm1, %v10898_v33 }
0x167e   :  { %v5314_v25 = vpack.c.bf16 %v5298_v51, %v5298_v51  ;;  %v5596_v10 = vrot.slane %v5572_v23, 4 }
0x167f   :  { %v5566_v40 = vunpack.c.l.b16 %v5307_v32  ;;  %v5299_v59 = vadd.f32 %v5283_v12, %v5219_v45  ;;  %v5585_v56 = vsel %vm910_vm6, %v5584_v53, %v5583_v43  ;;  %v5294_v11 = vadd.f32 %v5278_v30, %v5214_v57  ;;  %v5330_v32 = vld [vmem:[%s11448_s1 + $0x30] sm:$0xff]   ;;  %v5332_v45 = vld [vmem:[%s11448_s1 + $0x38] sm:$0xff]  }
0x1680   :  { %v5187_v54 = vpop.permute.xlu1 %5186  ;;  %v5171_v9 = vpop.permute.xlu0 %5170  ;;  %v5573_v50 = vunpack.c.l.b16 %v5314_v25  ;;  %7352 = vmatprep.mubr.msk.bf16.mxu0 %vm146_vm1, %v5330_v32 }
0x1681   :  { %v5586_v47 = vrot.slane %v5566_v40, 2  ;;  %v5220_v0 = vmul.f32 %v5187_v54, %v5140_v21  ;;  %v5315_v52 = vpack.c.bf16 %v5299_v59, %v5299_v59  ;;  %v5310_v29 = vpack.c.bf16 %v5294_v11, %v5294_v11 }
0x1682   :  { %v5212_v19 = vmul.f32 %v5171_v9, %v5132_v18  ;;  %v5598_v42 = vrot.slane %v5573_v50, 3  ;;  %v7168_v50 = vld [vmem:[%s11452_s9] ss:$0 sm:$0xff] }
0x1683   :  { %v5587_v49 = vsel %vm913_vm7, %v5586_v47, %v5585_v56  ;;  %v5300_v48 = vadd.f32 %v5284_v46, %v5220_v0  ;;  %v5569_v41 = vunpack.c.l.b16 %v5310_v29  ;;  %v5574_v60 = vunpack.c.l.b16 %v5315_v52  ;;  %v7431_v56 = vld [vmem:[%s11450_s11 + $0x8] sm:$0xff]  }
0x1684   :  { %v5292_v55 = vadd.f32 %v5276_v61, %v5212_v19  ;;  %v5189_v1 = vpop.permute.xlu1 %5188  ;;  %v5173_v44 = vpop.permute.xlu0 %5172 }
0x1685   :  { %v5316_v22 = vpack.c.bf16 %v5300_v48, %v5300_v48  ;;  %v5221_v16 = vmul.f32 %v5189_v1, %v5141_v4  ;;  %v5213_v24 = vmul.f32 %v5173_v44, %v5133_v58  ;;  %v5591_v15 = vrot.slane %v5569_v41, 7  ;;  %7353 = vmatmul.mubr.msk.bf16.gmra.mrb[36].mxu0 %vm146_vm1, %v5332_v45  ;;  %v7428_v4 = vld [vmem:[%s11450_s11] sm:$0xff]  }
0x1686   :  { %v5308_v27 = vpack.c.bf16 %v5292_v55, %v5292_v55  ;;  %v5600_v21 = vrot.slane %v5574_v60, 2  ;;  %7396 = vmatprep.mubr.msk.bf16.mxu0 %vm8269_vm0, %v11502_v5  ;;  %v8273_v48 = vmov 1966171168   ;;  %v7172_v60 = vld [vmem:[%s11453_s10] ss:$0 sm:$0xff] }
0x1687   :  { %v5575_v62 = vunpack.c.l.b16 %v5316_v22  ;;  %v5301_v34 = vadd.f32 %v5285_v28, %v5221_v16  ;;  %v5293_v2 = vadd.f32 %v5277_v13, %v5213_v24  ;;  %v5593_v39 = vsel %vm901_vm3, %v5592_v31, %v5591_v15 }
0x1688   :  { %v5567_v20 = vunpack.c.l.b16 %v5308_v27  ;;  %v5595_v12 = vsel %vm904_vm4, %v5594_v36, %v5593_v39  ;;  %v5679_v58 = vunpack.c.l.s4 %v8273_v48  ;;  %v5681_v13 = vlaneseq }
0x1689   :  { %v5602_v6 = vrot.slane %v5575_v62, 1  ;;  %v5317_v14 = vpack.c.bf16 %v5301_v34, %v5301_v34  ;;  %v5309_v30 = vpack.c.bf16 %v5293_v2, %v5293_v2  ;;  %v5597_v38 = vsel %vm907_vm5, %v5596_v10, %v5595_v12 }
0x168a   :  { %v5588_v43 = vrot.slane %v5567_v20, 1  ;;  %v5599_v26 = vsel %vm910_vm6, %v5598_v42, %v5597_v38  ;;  %v5680_v41 = vunpack.c.0.s8 %v5679_v58  ;;  %v10954_v55 = vshrl.u32 %v5681_v13, 7 }
0x168b   :  { %v5576_v51 = vunpack.c.l.b16 %v5317_v14  ;;  %v5568_v7 = vunpack.c.l.b16 %v5309_v30  ;;  %v5601_v8 = vsel %vm913_vm7, %v5600_v21, %v5599_v26 }
0x168c   :  { %v5589_v37 = vsel %vm916_vm8, %v5588_v43, %v5587_v49  ;;  %v5603_v46 = vsel %vm916_vm8, %v5602_v6, %v5601_v8  ;;  %v10945_v49 = vld [vmem:[%s11451_s7] ss:$0 sm:$0xff]  ;;  %v10971_v34 = vsub.s32 %v5680_v41, %v10954_v55  ;;  %v10974_v2 = vsub.s32 0, %v10954_v55 }
0x168d   :  { %v5590_v3 = vsel %vm919_vm9, %v5568_v7, %v5589_v37  ;;  %v5604_v53 = vsel %vm919_vm9, %v5576_v51, %v5603_v46 }
0x168e   :  { %v5605_v57 = vpack.c.b16 %v5604_v53, %v5590_v3 }
0x1690   :  { %5606 = vrot.lane.b32.xlu0 %v5605_v57, %s8272_s4 }
0x16d2   :  { %v10924_v18 = vpop.f32.mrb[24].mxu0 }
0x16d3   :  { %v5455_v40 = vpop.f32.mrb[25].mxu0 }
0x16d4   :  { %v10926_v59 = vpop.f32.mrb[26].mxu0  ;;  %v10948_v31 = vadd.f32 %v10945_v49, %v5455_v40 }
0x16d5   :  { %v5458_v61 = vpop.f32.mrb[27].mxu0 }
0x16d6   :  { %v5518_v24 = vmax.f32 %v10948_v31, 0.0  ;;  %v10962_v10 = vadd.f32 %v10945_v49, %v5458_v61 }
0x16da   :  { %v7346_v25 = vpop.f32.mrb[28].mxu0 }
0x16db   :  { %v5471_v11 = vpop.f32.mrb[29].mxu0  ;;  %v10957_v44 = vadd.f32 %v7346_v25, %v10945_v49 }
0x16dc   :  { %v7347_v54 = vpop.f32.mrb[30].mxu0  ;;  %v5472_v16 = vadd.f32 %v10945_v49, %v5471_v11 }
0x16dd   :  { %v5474_v9 = vpop.f32.mrb[31].mxu0  ;;  %v10968_v27 = vadd.f32 %v7347_v54, %v10945_v49  ;;  %v5524_v20 = vmax.f32 %v10957_v44, 0.0 }
0x16de   :  { %v5475_v12 = vadd.f32 %v10945_v49, %v5474_v9  ;;  %v5522_v38 = vmax.f32 %v5472_v16, 0.0 }
0x16df   :  { %v5525_v26 = vmax.f32 %v10968_v27, 0.0 }
0x16e0   :  { %v5523_v3 = vmax.f32 %v5475_v12, 0.0 }
0x1702   :  { %v5607_v63 = vpop.permute.xlu0 %5606 }
0x1703   :  { %7361 = vmatmul.mubr.msk.bf16.vlgmr.msra.gmra.mrb[24].mxu1 %vm146_vm1, %v5607_v63 }
0x1704   :  { %7365 = vmatpush3.bf16.msra.mxu1 %v7428_v4  ;;  %7368 = vmatprep.mubr.msk.bf16.mxu1 %vm8269_vm0, %v11502_v5 }
0x1705   :  { %7366 = vmatprep.subr.bf16.mxu1 %v11502_v5 }
0x1708   :  { %7367 = vmatpush3.bf16.msra.mxu1 %v7431_v56 }
0x1709   :  { %7372 = vmatprep.subr.bf16.mxu1 %v11502_v5 }
0x170b   :  { %7369 = vmatmul.mubr.msk.bf16.vlgmr.msra.gmra.mrb[28].mxu1 %vm146_vm1, %v5607_v63 }
0x170c   :  { %7376 = vmatprep.mubr.msk.bf16.mxu1 %vm8269_vm0, %v11502_v5 }
0x1750   :  { %v7350_v35 = vpop.f32.mrb[32].mxu0 }
0x1751   :  { %v5487_v47 = vpop.f32.mrb[33].mxu0  ;;  %v5496_v6 = vadd.f32 %v7350_v35, %v10945_v49 }
0x1752   :  { %v7351_v0 = vpop.f32.mrb[34].mxu0  ;;  %v5488_v14 = vadd.f32 %v10945_v49, %v5487_v47 }
0x1753   :  { %v5490_v28 = vpop.f32.mrb[35].mxu0  ;;  %v5499_v51 = vadd.f32 %v7351_v0, %v10945_v49  ;;  %v5528_v53 = vmax.f32 %v5496_v6, 0.0 }
0x1754   :  { %v5491_v43 = vadd.f32 %v10945_v49, %v5490_v28  ;;  %v5526_v57 = vmax.f32 %v5488_v14, 0.0 }
0x1755   :  { %v5529_v9 = vmax.f32 %v5499_v51, 0.0 }
0x1756   :  { %v5527_v11 = vmax.f32 %v5491_v43, 0.0 }
0x1758   :  { %v7354_v23 = vpop.f32.mrb[36].mxu0 }
0x1759   :  { %v5503_v52 = vpop.f32.mrb[37].mxu0  ;;  %v10984_v7 = vadd.f32 %v7354_v23, %v10945_v49 }
0x175a   :  { %v7355_v29 = vpop.f32.mrb[38].mxu0  ;;  %v10987_v8 = vadd.f32 %v10945_v49, %v5503_v52 }
0x175b   :  { %v5506_v19 = vpop.f32.mrb[39].mxu0  ;;  %v10996_v61 = vadd.f32 %v7355_v29, %v10945_v49  ;;  %v5532_v47 = vmax.f32 %v10984_v7, 0.0 }
0x175c   :  { %v10991_v46 = vadd.f32 %v10945_v49, %v5506_v19  ;;  %v5530_v0 = vmax.f32 %v10987_v8, 0.0 }
0x175d   :  { %v5533_v41 = vmax.f32 %v10996_v61, 0.0 }
0x175e   :  { %v5531_v19 = vmax.f32 %v10991_v46, 0.0 }
0x17d6   :  { %v5657_v1 = vpop.f32.mrb[24].mxu1 }
0x17d7   :  { %v5658_v36 = vadd.f32 %v7168_v50, %v5657_v1  ;;  %v7362_v22 = vpop.f32.mrb[25].mxu1 }
0x17d8   :  { %v5660_v15 = vpop.f32.mrb[26].mxu1 }
0x17d9   :  { %v5664_v62 = vmax.f32 %v5658_v36, 0.0  ;;  %v5661_v42 = vadd.f32 %v7168_v50, %v5660_v15  ;;  %v7363_v39 = vpop.f32.mrb[27].mxu1 }
0x17db   :  { %v5673_v30 = vmul.f32 %v7172_v60, %v5664_v62  ;;  %v5665_v21 = vmax.f32 %v5661_v42, 0.0 }
0x17dd   :  { %v5677_v37 = vcombine.high %v5673_v30, %v5673_v30  ;;  %v5684_v32 = vrot.slane %v5673_v30, %v10971_v34  ;;  %v5674_v45 = vmul.f32 %v7172_v60, %v5665_v21 }
0x17de   :  { %v10993_v40 = vpop.f32.mrb[28].mxu1 }
0x17df   :  { %v5691_v4 = vrot.slane %v5677_v37, %v10971_v34  ;;  %v11000_v63 = vrot.slane %v5684_v32, %v10971_v34  ;;  %v5726_v56 = vcombine.high %v5674_v45, %v5674_v45  ;;  %v7370_v25 = vpop.f32.mrb[29].mxu1  ;;  %v5733_v54 = vrot.slane %v5674_v45, %v10971_v34 }
0x17e0   :  { %v11003_v35 = vpop.f32.mrb[30].mxu1  ;;  %v5692_v48 = vcombine.high %v5684_v32, %v5684_v32 }
0x17e1   :  { %v5693_v28 = vcombine.high %v5691_v4, %v5691_v4  ;;  %v5707_v23 = vrot.slane %v5691_v4, %v10971_v34  ;;  %v5740_v52 = vrot.slane %v5726_v56, %v10971_v34  ;;  %v7371_v29 = vpop.f32.mrb[31].mxu1  ;;  %v5741_v58 = vcombine.high %v5733_v54, %v5733_v54 }
0x17e2   :  { %v5749_v50 = vrot.slane %v5733_v54, %v10971_v34  ;;  %v5778_v22 = vrot.slane %v11000_v63, %v10974_v2 }
0x17e3   :  { %v5723_v1 = vcombine.high %v5707_v23, %v5707_v23  ;;  %v5794_v44 = vrot.slane %v5707_v23, %v10974_v2  ;;  %v5721_v36 = vrot.slane %v5693_v28, %v10971_v34  ;;  %v5742_v16 = vcombine.high %v5740_v52, %v5740_v52 }
0x17e4   :  { %v5771_v60 = vcombine.high %v5749_v50, %v5749_v50  ;;  %v5810_v15 = vrot.slane %v5749_v50, %v10974_v2  ;;  %v5763_v27 = vrot.slane %v5741_v58, %v10971_v34  ;;  %v5756_v8 = vrot.slane %v5740_v52, %v10971_v34 }
0x17e5   :  { %v5802_v62 = vrot.slane %v5723_v1, %v10974_v2  ;;  %v5859_v42 = vmul.f32 %v5794_v44, %v5522_v38  ;;  %v5725_v39 = vcombine.high %v5721_v36, %v5721_v36  ;;  %v5798_v12 = vrot.slane %v5721_v36, %v10974_v2 }
0x17e6   :  { %v5818_v6 = vrot.slane %v5771_v60, %v10974_v2  ;;  %v5863_v14 = vmul.f32 %v5810_v15, %v5526_v57  ;;  %v5773_v30 = vcombine.high %v5763_v27, %v5763_v27  ;;  %v5814_v21 = vrot.slane %v5763_v27, %v10974_v2 }
0x17e7   :  { %v5861_v43 = vmul.f32 %v5802_v62, %v5524_v20  ;;  %v5806_v51 = vrot.slane %v5725_v39, %v10974_v2  ;;  %v5860_v7 = vmul.f32 %v5798_v12, %v5523_v3  ;;  %v5770_v38 = vrot.slane %v5742_v16, %v10971_v34 }
0x17e8   :  { %v5865_v37 = vmul.f32 %v5818_v6, %v5528_v53  ;;  %v5822_v32 = vrot.slane %v5773_v30, %v10974_v2  ;;  %v5864_v45 = vmul.f32 %v5814_v21, %v5527_v11  ;;  %v5772_v61 = vcombine.high %v5756_v8, %v5756_v8 }
0x17e9   :  { %v5862_v46 = vmul.f32 %v5806_v51, %v5525_v26  ;;  %v5826_v4 = vrot.slane %v5756_v8, %v10974_v2  ;;  %v5855_v57 = vmul.f32 %v5778_v22, %v5518_v24  ;;  %v5774_v20 = vcombine.high %v5770_v38, %v5770_v38 }
0x17ea   :  { %v5866_v56 = vmul.f32 %v5822_v32, %v5529_v9  ;;  %v5830_v25 = vrot.slane %v5770_v38, %v10974_v2  ;;  %v5714_v3 = vrot.slane %v5692_v48, %v10971_v34  ;;  %v5464_v53 = vadd.f32 %v10924_v18, %v10945_v49 }
0x17eb   :  { %v5834_v11 = vrot.slane %v5772_v61, %v10974_v2  ;;  %v5867_v54 = vmul.f32 %v5826_v4, %v5530_v0  ;;  %v5871_v26 = vsel %vm146_vm1, %v5855_v57, 0.0  ;;  %v5519_v28 = vmax.f32 %v10962_v10, 0.0 }
0x17ec   :  { %v5838_v23 = vrot.slane %v5774_v20, %v10974_v2  ;;  %v5868_v31 = vmul.f32 %v5830_v25, %v5531_v19  ;;  %5872 = vadd.xlane.f32.xlu1 %v5871_v26  ;;  %v5782_v24 = vrot.slane %v5714_v3, %v10974_v2  ;;  %v5467_v9 = vadd.f32 %v10926_v59, %v10945_v49 }
0x17ed   :  { %v5869_v34 = vmul.f32 %v5834_v11, %v5532_v47  ;;  %v5898_v52 = vsel %vm146_vm1, %v5864_v45, 0.0  ;;  %v5722_v18 = vcombine.high %v11000_v63, %v11000_v63  ;;  %v5520_v48 = vmax.f32 %v5464_v53, 0.0 }
0x17ee   :  { %v5870_v0 = vmul.f32 %v5838_v23, %v5533_v41  ;;  %v5856_v29 = vmul.f32 %v5782_v24, %v5519_v28  ;;  %v5724_v58 = vcombine.high %v5714_v3, %v5714_v3  ;;  %v5521_v50 = vmax.f32 %v5467_v9, 0.0 }
0x17ef   :  { %v5786_v10 = vrot.slane %v5722_v18, %v10974_v2  ;;  %v5901_v49 = vsel %vm146_vm1, %v5865_v37, 0.0  ;;  %v5895_v44 = vsel %vm146_vm1, %v5863_v14, 0.0  ;;  %v5907_v63 = vsel %vm146_vm1, %v5867_v54, 0.0 }
0x17f0   :  { %v5874_v19 = vsel %vm146_vm1, %v5856_v29, 0.0  ;;  %5899 = vadd.xlane.f32.xlu1 %v5898_v52  ;;  %v5790_v59 = vrot.slane %v5724_v58, %v10974_v2  ;;  %v5904_v36 = vsel %vm146_vm1, %v5866_v56, 0.0  ;;  %v5883_v22 = vsel %vm146_vm1, %v5859_v42, 0.0 }
0x17f1   :  { %5875 = vadd.xlane.f32.xlu0 %v5874_v19  ;;  %v5857_v1 = vmul.f32 %v5786_v10, %v5520_v48  ;;  %v5910_v16 = vsel %vm146_vm1, %v5868_v31, 0.0  ;;  %v5913_v15 = vsel %vm146_vm1, %v5869_v34, 0.0  ;;  %v5886_v27 = vsel %vm146_vm1, %v5860_v7, 0.0 }
0x17f2   :  { %v5858_v47 = vmul.f32 %v5790_v59, %v5521_v50  ;;  %v5916_v62 = vsel %vm146_vm1, %v5870_v0, 0.0  ;;  %v5889_v39 = vsel %vm146_vm1, %v5861_v43, 0.0  ;;  %v5892_v42 = vsel %vm146_vm1, %v5862_v46, 0.0 }
0x17f3   :  { %v5877_v41 = vsel %vm146_vm1, %v5857_v1, 0.0  ;;  %v5936_v51 = vand.u32 127, %v5681_v13 }
0x17f4   :  { %5902 = vadd.xlane.f32.xlu1 %v5901_v49  ;;  %v5880_v60 = vsel %vm146_vm1, %v5858_v47, 0.0 }
0x17f5   :  { %5896 = vadd.xlane.f32.xlu0 %v5895_v44  ;;  %v11073_v43 = vsub.s32 %v5936_v51, %v10954_v55 }
0x17f8   :  { %5908 = vadd.xlane.f32.xlu1 %v5907_v63 }
0x17f9   :  { %5878 = vadd.xlane.f32.xlu0 %v5877_v41 }
0x17fc   :  { %5905 = vadd.xlane.f32.xlu1 %v5904_v36 }
0x17fd   :  { %5884 = vadd.xlane.f32.xlu0 %v5883_v22 }
0x1800   :  { %5911 = vadd.xlane.f32.xlu1 %v5910_v16  ;;  %v11132_v16 = vsub.s32 4, %v10954_v55 }
0x1801   :  { %5881 = vadd.xlane.f32.xlu0 %v5880_v60 }
0x1804   :  { %5914 = vadd.xlane.f32.xlu1 %v5913_v15  ;;  %v11137_v15 = vsub.s32 1, %v10954_v55 }
0x1805   :  { %5887 = vadd.xlane.f32.xlu0 %v5886_v27 }
0x1808   :  { %5917 = vadd.xlane.f32.xlu1 %v5916_v62  ;;  %v11142_v62 = vsub.s32 2, %v10954_v55 }
0x1809   :  { %5890 = vadd.xlane.f32.xlu0 %v5889_v39 }
0x180d   :  { %5893 = vadd.xlane.f32.xlu0 %v5892_v42  ;;  %v11147_v42 = vsub.s32 5, %v10954_v55 }
0x1879   :  { %v11059_v12 = vpop.xlane.xlu1 %5872 }
0x187a   :  { %v5940_v26 = vrot.slane %v11059_v12, %v11073_v43 }
0x187d   :  { %v11061_v6 = vpop.xlane.xlu1 %5899 }
0x187e   :  { %v11063_v14 = vpop.xlane.xlu0 %5875  ;;  %v5976_v38 = vrot.slane %v11061_v6, %v11073_v43 }
0x187f   :  { %v5944_v56 = vrot.slane %v11063_v14, %v11073_v43 }
0x1881   :  { %v11065_v30 = vpop.xlane.xlu1 %5902  ;;  %v6001_v24 = vsel %vm901_vm3, %v5944_v56, %v5940_v26  ;;  %v11161_v56 = vsub.s32 6, %v10954_v55 }
0x1882   :  { %v11067_v21 = vpop.xlane.xlu0 %5896  ;;  %v5980_v46 = vrot.slane %v11065_v30, %v11073_v43 }
0x1883   :  { %v5972_v32 = vrot.slane %v11067_v21, %v11073_v43 }
0x1885   :  { %v5909_v7 = vpop.xlane.xlu1 %5908  ;;  %v6008_v61 = vsel %vm901_vm3, %v5976_v38, %v5972_v32 }
0x1886   :  { %v11070_v8 = vpop.xlane.xlu0 %5878  ;;  %v6009_v20 = vsel %vm904_vm4, %v5980_v46, %v6008_v61  ;;  %v5988_v28 = vrot.slane %v5909_v7, %v11073_v43  ;;  %v11156_v46 = vsub.s32 3, %v10954_v55 }
0x1887   :  { %v5948_v3 = vrot.slane %v11070_v8, %v11073_v43 }
0x1889   :  { %v11075_v37 = vpop.xlane.xlu1 %5905  ;;  %v6002_v52 = vsel %vm904_vm4, %v5948_v3, %v6001_v24 }
0x188a   :  { %v11079_v45 = vpop.xlane.xlu0 %5884  ;;  %v5984_v4 = vrot.slane %v11075_v37, %v11073_v43 }
0x188b   :  { %v5956_v19 = vrot.slane %v11079_v45, %v11073_v43 }
0x188c   :  { %v6010_v53 = vsel %vm907_vm5, %v5984_v4, %v6009_v20 }
0x188d   :  { %v5912_v13 = vpop.xlane.xlu1 %5911  ;;  %v6011_v9 = vsel %vm910_vm6, %v5988_v28, %v6010_v53 }
0x188e   :  { %v5882_v57 = vpop.xlane.xlu0 %5881  ;;  %v5992_v11 = vrot.slane %v5912_v13, %v11073_v43 }
0x188f   :  { %v5952_v23 = vrot.slane %v5882_v57, %v11073_v43 }
0x1890   :  { %v6012_v18 = vsel %vm913_vm7, %v5992_v11, %v6011_v9 }
0x1891   :  { %v11091_v25 = vpop.xlane.xlu1 %5914  ;;  %v6003_v48 = vsel %vm907_vm5, %v5952_v23, %v6002_v52  ;;  %v11169_v23 = vsub.s32 7, %v10954_v55 }
0x1892   :  { %v11097_v54 = vpop.xlane.xlu0 %5887  ;;  %v5996_v31 = vrot.slane %v11091_v25, %v11073_v43  ;;  %v6004_v49 = vsel %vm910_vm6, %v5956_v19, %v6003_v48 }
0x1893   :  { %v5960_v10 = vrot.slane %v11097_v54, %v11073_v43 }
0x1894   :  { %v6013_v58 = vsel %vm916_vm8, %v5996_v31, %v6012_v18 }
0x1895   :  { %v5918_v34 = vpop.xlane.xlu1 %5917  ;;  %v6005_v44 = vsel %vm913_vm7, %v5960_v10, %v6004_v49 }
0x1896   :  { %v11109_v0 = vpop.xlane.xlu0 %5890  ;;  %v6000_v29 = vrot.slane %v5918_v34, %v11073_v43 }
0x1897   :  { %v5964_v50 = vrot.slane %v11109_v0, %v11073_v43 }
0x1898   :  { %v6014_v1 = vsel %vm919_vm9, %v6000_v29, %v6013_v58 }
0x1899   :  { %v6021_v59 = vsel %vm6017_vm10, %v6014_v1, -inf  ;;  %v6006_v41 = vsel %vm916_vm8, %v5964_v50, %v6005_v44 }
0x189a   :  { %v11123_v47 = vpop.xlane.xlu0 %5893  ;;  %6022 = vmax.xlane.f32.xlu1 %v6021_v59 }
0x189b   :  { %v5968_v63 = vrot.slane %v11123_v47, %v11073_v43 }
0x189d   :  { %v6007_v36 = vsel %vm919_vm9, %v5968_v63, %v6006_v41 }
0x189e   :  { %v6018_v22 = vsel %vm6017_vm10, %v6007_v36, -inf }
0x189f   :  { %6019 = vmax.xlane.f32.xlu0 %v6018_v22 }
0x1927   :  { %v11134_v60 = vpop.xlane.xlu1 %6022 }
0x1928   :  { %v6077_v51 = vrot.slane %v11134_v60, %v11132_v16  ;;  %v6081_v20 = vrot.slane %v11134_v60, %v11147_v42  ;;  %v6065_v44 = vrot.slane %v11134_v60, %v11137_v15  ;;  %v6069_v22 = vrot.slane %v11134_v60, %v11142_v62 }
0x192a   :  { %v6118_v3 = vsub.f32 %v5909_v7, %v6077_v51 }
0x192c   :  { %v11139_v27 = vpop.xlane.xlu0 %6019  ;;  %v6146_v31 = vmul.f32 1.442695, %v6118_v3 }
0x192d   :  { %v6029_v39 = vrot.slane %v11139_v27, %v10974_v2  ;;  %v6033_v32 = vrot.slane %v11139_v27, %v11137_v15  ;;  %v6037_v38 = vrot.slane %v11139_v27, %v11142_v62  ;;  %v6041_v53 = vrot.slane %v11139_v27, %v11156_v46 }
0x192e   :  { %v6045_v24 = vrot.slane %v11139_v27, %v11132_v16  ;;  %v6049_v18 = vrot.slane %v11139_v27, %v11147_v42 }
0x192f   :  { %v6106_v61 = vsub.f32 %v11059_v12, %v6029_v39  ;;  %v6107_v4 = vsub.f32 %v11063_v14, %v6033_v32  ;;  %v6108_v11 = vsub.f32 %v11070_v8, %v6037_v38  ;;  %v6085_v12 = vrot.slane %v11134_v60, %v11161_v56 }
0x1930   :  { %v6119_v14 = vsub.f32 %v5912_v13, %v6081_v20  ;;  %v6109_v7 = vsub.f32 %v5882_v57, %v6041_v53  ;;  %v6089_v8 = vrot.slane %v11134_v60, %v11169_v23  ;;  %v6110_v13 = vsub.f32 %v11079_v45, %v6045_v24 }
0x1931   :  { %v6122_v26 = vmul.f32 1.442695, %v6106_v61  ;;  %v6124_v28 = vmul.f32 1.442695, %v6107_v4  ;;  %v6126_v9 = vmul.f32 1.442695, %v6108_v11  ;;  %v6120_v52 = vsub.f32 %v11091_v25, %v6085_v12 }
0x1932   :  { %v6148_v55 = vmul.f32 1.442695, %v6119_v14  ;;  %v6128_v29 = vmul.f32 1.442695, %v6109_v7  ;;  %v6121_v48 = vsub.f32 %v5918_v34, %v6089_v8  ;;  %v6053_v57 = vrot.slane %v11139_v27, %v11161_v56 }
0x1933   :  { %8218 = vpow2.f32 %v6122_v26  ;;  %v6150_v10 = vmul.f32 1.442695, %v6120_v52  ;;  %v6111_v58 = vsub.f32 %v11097_v54, %v6049_v18  ;;  %v6130_v19 = vmul.f32 1.442695, %v6110_v13 }
0x1934   :  { %8220 = vpow2.f32 %v6124_v28  ;;  %v6152_v45 = vmul.f32 1.442695, %v6121_v48  ;;  %v6061_v34 = vrot.slane %v11134_v60, %v10974_v2  ;;  %v6112_v1 = vsub.f32 %v11109_v0, %v6053_v57 }
0x1935   :  { %8222 = vpow2.f32 %v6146_v31  ;;  %v6132_v59 = vmul.f32 1.442695, %v6111_v58  ;;  %v6115_v39 = vsub.f32 %v11061_v6, %v6065_v44  ;;  %v6073_v38 = vrot.slane %v11134_v60, %v11156_v46 }
0x1936   :  { %8224 = vpow2.f32 %v6126_v9  ;;  %v6114_v63 = vsub.f32 %v11067_v21, %v6061_v34  ;;  %v6134_v41 = vmul.f32 1.442695, %v6112_v1  ;;  %v6116_v61 = vsub.f32 %v11065_v30, %v6069_v22 }
0x1937   :  { %8226 = vpow2.f32 %v6148_v55  ;;  %v6140_v4 = vmul.f32 1.442695, %v6115_v39  ;;  %v6117_v3 = vsub.f32 %v11075_v37, %v6073_v38  ;;  %v6057_v11 = vrot.slane %v11139_v27, %v11169_v23 }
0x1938   :  { %8228 = vpow2.f32 %v6128_v29  ;;  %v6138_v51 = vmul.f32 1.442695, %v6114_v63  ;;  %v6142_v53 = vmul.f32 1.442695, %v6116_v61 }
0x1939   :  { %8230 = vpow2.f32 %v6150_v10  ;;  %v6144_v30 = vmul.f32 1.442695, %v6117_v3  ;;  %v6113_v26 = vsub.f32 %v11123_v47, %v6057_v11 }
0x193a   :  { %8232 = vpow2.f32 %v6130_v19 }
0x193b   :  { %8234 = vpow2.f32 %v6152_v45  ;;  %v6136_v12 = vmul.f32 1.442695, %v6113_v26 }
0x193c   :  { %8236 = vpow2.f32 %v6132_v59 }
0x193d   :  { %v11184_v25 = vpop.eup %8218  ;;  %8238 = vpow2.f32 %v6134_v41 }
0x193e   :  { %v11186_v50 = vpop.eup %8220  ;;  %6171 = vperm.xlu0 %7406, %v11184_v25   ;;  %8240 = vpow2.f32 %v6138_v51 }
0x193f   :  { %6174 = vperm.xlu1 %7407, %v11186_v50   ;;  %v11193_v54 = vpop.eup %8222  ;;  %8242 = vpow2.f32 %v6140_v4 }
0x1940   :  { %v11195_v49 = vpop.eup %8224  ;;  %8244 = vpow2.f32 %v6142_v53 }
0x1941   :  { %v11202_v36 = vpop.eup %8226  ;;  %8246 = vpow2.f32 %v6144_v30 }
0x1942   :  { %6207 = vperm.xlu0 %7406, %v11193_v54   ;;  %v11204_v0 = vpop.eup %8228  ;;  %8248 = vpow2.f32 %v6136_v12 }
0x1943   :  { %6177 = vperm.xlu1 %7407, %v11195_v49   ;;  %v11211_v32 = vpop.eup %8230 }
0x1944   :  { %v11213_v21 = vpop.eup %8232 }
0x1945   :  { %v11220_v20 = vpop.eup %8234 }
0x1946   :  { %6210 = vperm.xlu0 %7406, %v11202_v36   ;;  %v11222_v6 = vpop.eup %8236 }
0x1947   :  { %6180 = vperm.xlu1 %7407, %v11204_v0   ;;  %v11229_v60 = vpop.eup %8238 }
0x1948   :  { %v11233_v28 = vpop.eup %8240 }
0x1949   :  { %v11236_v37 = vpop.eup %8242 }
0x194a   :  { %6213 = vperm.xlu0 %7406, %v11211_v32   ;;  %v11239_v27 = vpop.eup %8244 }
0x194b   :  { %6183 = vperm.xlu1 %7407, %v11213_v21   ;;  %v11242_v14 = vpop.eup %8246 }
0x194c   :  { %v11245_v47 = vpop.eup %8248 }
0x194e   :  { %6216 = vperm.xlu0 %7406, %v11220_v20  }
0x194f   :  { %6186 = vperm.xlu1 %7407, %v11222_v6  }
0x1953   :  { %6189 = vperm.xlu1 %7407, %v11229_v60  }
0x1957   :  { %6195 = vperm.xlu1 %7407, %v11233_v28  }
0x195b   :  { %6198 = vperm.xlu1 %7407, %v11236_v37  }
0x195f   :  { %6201 = vperm.xlu1 %7407, %v11239_v27  }
0x1963   :  { %6204 = vperm.xlu1 %7407, %v11242_v14  }
0x1967   :  { %6192 = vperm.xlu1 %7407, %v11245_v47  }
0x19bd   :  { %v6172_v8 = vpop.permute.xlu0 %6171 }
0x19be   :  { %v6175_v31 = vpop.permute.xlu1 %6174  ;;  %v6221_v58 = vrot.slane %v6172_v8, %v11073_v43 }
0x19bf   :  { %v6225_v19 = vrot.slane %v6175_v31, %v11073_v43 }
0x19c1   :  { %v6208_v55 = vpop.permute.xlu0 %6207  ;;  %v6282_v22 = vsel %vm901_vm3, %v6225_v19, %v6221_v58 }
0x19c2   :  { %v6178_v24 = vpop.permute.xlu1 %6177  ;;  %v6269_v61 = vrot.slane %v6208_v55, %v11073_v43 }
0x19c3   :  { %v6229_v34 = vrot.slane %v6178_v24, %v11073_v43 }
0x19c5   :  { %v6211_v29 = vpop.permute.xlu0 %6210  ;;  %v6283_v4 = vsel %vm904_vm4, %v6229_v34, %v6282_v22 }
0x19c6   :  { %v6181_v7 = vpop.permute.xlu1 %6180  ;;  %v6273_v30 = vrot.slane %v6211_v29, %v11073_v43 }
0x19c7   :  { %v6233_v59 = vrot.slane %v6181_v7, %v11073_v43 }
0x19c9   :  { %v6214_v10 = vpop.permute.xlu0 %6213  ;;  %v6284_v26 = vsel %vm907_vm5, %v6233_v59, %v6283_v4 }
0x19ca   :  { %v6184_v9 = vpop.permute.xlu1 %6183  ;;  %v6277_v31 = vrot.slane %v6214_v10, %v11073_v43 }
0x19cb   :  { %v6237_v63 = vrot.slane %v6184_v9, %v11073_v43 }
0x19cd   :  { %v6217_v3 = vpop.permute.xlu0 %6216  ;;  %v6285_v24 = vsel %vm910_vm6, %v6237_v63, %v6284_v26 }
0x19ce   :  { %v6187_v52 = vpop.permute.xlu1 %6186  ;;  %v6281_v8 = vrot.slane %v6217_v3, %v11073_v43 }
0x19cf   :  { %v6241_v39 = vrot.slane %v6187_v52, %v11073_v43 }
0x19d1   :  { %v6286_v52 = vsel %vm913_vm7, %v6241_v39, %v6285_v24 }
0x19d2   :  { %v6190_v18 = vpop.permute.xlu1 %6189 }
0x19d3   :  { %v6245_v53 = vrot.slane %v6190_v18, %v11073_v43 }
0x19d5   :  { %v6287_v29 = vsel %vm916_vm8, %v6245_v53, %v6286_v52 }
0x19d6   :  { %v6196_v13 = vpop.permute.xlu1 %6195 }
0x19d7   :  { %v6253_v44 = vrot.slane %v6196_v13, %v11073_v43 }
0x19da   :  { %v6199_v48 = vpop.permute.xlu1 %6198 }
0x19db   :  { %v6257_v45 = vrot.slane %v6199_v48, %v11073_v43 }
0x19dd   :  { %v6289_v51 = vsel %vm901_vm3, %v6257_v45, %v6253_v44 }
0x19de   :  { %v6202_v57 = vpop.permute.xlu1 %6201 }
0x19df   :  { %v6261_v1 = vrot.slane %v6202_v57, %v11073_v43 }
0x19e1   :  { %v6290_v11 = vsel %vm904_vm4, %v6261_v1, %v6289_v51 }
0x19e2   :  { %v6205_v41 = vpop.permute.xlu1 %6204 }
0x19e3   :  { %v6265_v38 = vrot.slane %v6205_v41, %v11073_v43 }
0x19e5   :  { %v6291_v12 = vsel %vm907_vm5, %v6265_v38, %v6290_v11 }
0x19e6   :  { %v6292_v7 = vsel %vm910_vm6, %v6269_v61, %v6291_v12  ;;  %v6193_v9 = vpop.permute.xlu1 %6192 }
0x19e7   :  { %v6249_v55 = vrot.slane %v6193_v9, %v11073_v43  ;;  %v6293_v18 = vsel %vm913_vm7, %v6273_v30, %v6292_v7  ;;  %v6413_v7 = vunpack.c.h.bf16 %v10893_v17 }
0x19e8   :  { %v6294_v13 = vsel %vm916_vm8, %v6277_v31, %v6293_v18  ;;  %v8261_v31 = vld [vmem:[%s11448_s1 + $0x8] sm:$0xff]  }
0x19e9   :  { %v6295_v48 = vsel %vm919_vm9, %v6281_v8, %v6294_v13  ;;  %v6288_v10 = vsel %vm919_vm9, %v6249_v55, %v6287_v29  ;;  %v6406_v24 = vunpack.c.l.bf16 %v8261_v31 }
0x19ea   :  { %v6301_v57 = vsel %vm6017_vm10, %v6295_v48, 0.0  ;;  %v6298_v58 = vsel %vm6017_vm10, %v6288_v10, 0.0  ;;  %v6407_v10 = vunpack.c.h.bf16 %v8261_v31 }
0x19eb   :  { %6302 = vadd.xlane.f32.xlu0 %v6301_v57  ;;  %6299 = vadd.xlane.f32.xlu1 %v6298_v58  ;;  %v6414_v57 = vunpack.c.l.bf16 %v10898_v33  ;;  %v8263_v33 = vld [vmem:[%s11448_s1 + $0x28] sm:$0xff]  }
0x1a78   :  { %v6303_v19 = vpop.xlane.xlu0 %6302  ;;  %v6300_v45 = vpop.xlane.xlu1 %6299 }
0x1a79   :  { %8250 = vrcp.f32 %v6303_v19 }
0x1a7a   :  { %8252 = vrcp.f32 %v6300_v45 }
0x1a83   :  { %v8251_v43 = vpop.eup %8250 }
0x1a84   :  { %v8253_v34 = vpop.eup %8252  ;;  %v6347_v22 = vrot.slane %v8251_v43, %v11137_v15  ;;  %v6351_v61 = vrot.slane %v8251_v43, %v11142_v62  ;;  %v6343_v53 = vrot.slane %v8251_v43, %v10974_v2 }
0x1a85   :  { %v6315_v1 = vrot.slane %v8253_v34, %v11137_v15  ;;  %v6311_v59 = vrot.slane %v8253_v34, %v10974_v2  ;;  %v6319_v41 = vrot.slane %v8253_v34, %v11142_v62  ;;  %v6323_v38 = vrot.slane %v8253_v34, %v11156_v46 }
0x1a86   :  { %v6397_v51 = vmul.f32 %v11236_v37, %v6347_v22  ;;  %v6327_v4 = vrot.slane %v8253_v34, %v11132_v16  ;;  %v6355_v15 = vrot.slane %v8251_v43, %v11156_v46  ;;  %v6331_v3 = vrot.slane %v8253_v34, %v11147_v42 }
0x1a87   :  { %v6389_v44 = vmul.f32 %v11186_v50, %v6315_v1  ;;  %v6388_v63 = vmul.f32 %v11184_v25, %v6311_v59  ;;  %v6390_v39 = vmul.f32 %v11195_v49, %v6319_v41  ;;  %v6391_v50 = vmul.f32 %v11204_v0, %v6323_v38 }
0x1a88   :  { %v6398_v25 = vmul.f32 %v11239_v27, %v6351_v61  ;;  %v6392_v49 = vmul.f32 %v11213_v21, %v6327_v4  ;;  %v6399_v37 = vmul.f32 %v11242_v14, %v6355_v15  ;;  %v6359_v62 = vrot.slane %v8251_v43, %v11132_v16 }
0x1a89   :  { %6427 = vperm.xlu1 %7407, %v6389_v44   ;;  %6422 = vperm.xlu0 %7406, %v6388_v63   ;;  %v6393_v0 = vmul.f32 %v11222_v6, %v6331_v3  ;;  %v6363_v46 = vrot.slane %v8251_v43, %v11147_v42  ;;  %v6396_v21 = vmul.f32 %v11233_v28, %v6343_v53  ;;  %v6415_v38 = vunpack.c.h.bf16 %v8263_v33 }
0x1a8a   :  { %v6400_v27 = vmul.f32 %v11193_v54, %v6359_v62  ;;  %v6335_v11 = vrot.slane %v8253_v34, %v11161_v56  ;;  %v6367_v16 = vrot.slane %v8251_v43, %v11161_v56  ;;  %v6339_v2 = vrot.slane %v8253_v34, %v11169_v23  ;;  %v7434_v56 = vld [vmem:[%s11454_s13] sm:$0xff]  }
0x1a8b   :  { %v6401_v14 = vmul.f32 %v11202_v36, %v6363_v46  ;;  %v6371_v42 = vrot.slane %v8251_v43, %v11169_v23  ;;  %7373 = vmatpush3.bf16.msra.mxu1 %v7434_v56  ;;  %v8260_v23 = vld [vmem:[%s11448_s1] sm:$0xff]  }
0x1a8c   :  { %v6394_v6 = vmul.f32 %v11229_v60, %v6335_v11  ;;  %v6402_v54 = vmul.f32 %v11211_v32, %v6367_v16  ;;  %v6395_v28 = vmul.f32 %v11245_v47, %v6339_v2  ;;  %7374 = vmatprep.subr.bf16.mxu1 %v11502_v5  ;;  %v7435_v32 = vld [vmem:[%s11454_s13 + $0x8] sm:$0xff]   ;;  %v6404_v60 = vunpack.c.l.bf16 %v8260_v23 }
0x1a8d   :  { %6432 = vperm.xlu1 %7407, %v6390_v39   ;;  %6467 = vperm.xlu0 %7406, %v6397_v51   ;;  %v6403_v36 = vmul.f32 %v11220_v20, %v6371_v42  ;;  %v6405_v20 = vunpack.c.h.bf16 %v8260_v23  ;;  %v8262_v39 = vld [vmem:[%s11448_s1 + $0x10] sm:$0xff]  }
0x1a8e   :  { %v6408_v51 = vunpack.c.l.bf16 %v8262_v39  ;;  %v6409_v56 = vunpack.c.h.bf16 %v8262_v39 }
0x1a8f   :  { %7375 = vmatpush3.bf16.msra.mxu1 %v7435_v32 }
0x1a90   :  { %7380 = vmatprep.subr.bf16.mxu1 %v11502_v5 }
0x1a91   :  { %6437 = vperm.xlu1 %7407, %v6391_v50   ;;  %6472 = vperm.xlu0 %7406, %v6398_v25  }
0x1a95   :  { %6442 = vperm.xlu1 %7407, %v6392_v49   ;;  %6477 = vperm.xlu0 %7406, %v6399_v37  }
0x1a99   :  { %6447 = vperm.xlu1 %7407, %v6393_v0   ;;  %6482 = vperm.xlu0 %7406, %v6400_v27  }
0x1a9d   :  { %6462 = vperm.xlu1 %7407, %v6396_v21   ;;  %6487 = vperm.xlu0 %7406, %v6401_v14  }
0x1aa1   :  { %6452 = vperm.xlu1 %7407, %v6394_v6   ;;  %6492 = vperm.xlu0 %7406, %v6402_v54  }
0x1aa5   :  { %6457 = vperm.xlu1 %7407, %v6395_v28   ;;  %6497 = vperm.xlu0 %7406, %v6403_v36  }
0x1b08   :  { %v6428_v47 = vpop.permute.xlu1 %6427  ;;  %v6423_v30 = vpop.permute.xlu0 %6422 }
0x1b09   :  { %v6501_v26 = vmul.f32 %v6428_v47, %v6405_v20  ;;  %v6500_v12 = vmul.f32 %v6423_v30, %v6404_v60 }
0x1b0b   :  { %v6523_v9 = vsel %vm146_vm1, %v6501_v26, 0.0  ;;  %v6516_v8 = vsel %vm146_vm1, %v6500_v12, 0.0  ;;  %v8264_v26 = vld [vmem:[%s11448_s1 + $0x30] sm:$0xff]  }
0x1b0c   :  { %v6524_v52 = vrot.slane %v6523_v9, 4  ;;  %v6517_v55 = vrot.slane %v6516_v8, 4  ;;  %v6433_v18 = vpop.permute.xlu1 %6432  ;;  %v6468_v13 = vpop.permute.xlu0 %6467  ;;  %v6416_v12 = vunpack.c.l.bf16 %v8264_v26 }
0x1b0d   :  { %v6502_v29 = vmul.f32 %v6433_v18, %v6406_v24  ;;  %v6509_v48 = vmul.f32 %v6468_v13, %v6413_v7  ;;  %v6417_v13 = vunpack.c.h.bf16 %v8264_v26 }
0x1b0e   :  { %v6525_v58 = vadd.f32 %v6524_v52, %v6523_v9  ;;  %v6518_v19 = vadd.f32 %v6517_v55, %v6516_v8  ;;  %v8265_v52 = vld [vmem:[%s11448_s1 + $0x20] sm:$0xff]  }
0x1b0f   :  { %v6530_v45 = vsel %vm146_vm1, %v6502_v29, 0.0  ;;  %v6579_v43 = vsel %vm146_vm1, %v6509_v48, 0.0  ;;  %v6412_v55 = vunpack.c.l.bf16 %v8265_v52  ;;  %v11351_v48 = vld [vmem:[%s11448_s1 + $0x18] sm:$0xff]  }
0x1b10   :  { %v6526_v17 = vrot.slane %v6525_v58, 2  ;;  %v6519_v34 = vrot.slane %v6518_v19, 2  ;;  %v6531_v1 = vrot.slane %v6530_v45, 4  ;;  %v6580_v59 = vrot.slane %v6579_v43, 4  ;;  %v6438_v44 = vpop.permute.xlu1 %6437  ;;  %v6473_v63 = vpop.permute.xlu0 %6472 }
0x1b11   :  { %v6503_v41 = vmul.f32 %v6438_v44, %v6407_v10  ;;  %v6510_v22 = vmul.f32 %v6473_v63, %v6414_v57  ;;  %v6410_v10 = vunpack.c.l.bf16 %v11351_v48 }
0x1b12   :  { %v6527_v61 = vadd.f32 %v6526_v17, %v6525_v58  ;;  %v6520_v50 = vadd.f32 %v6519_v34, %v6518_v19  ;;  %v6532_v25 = vadd.f32 %v6531_v1, %v6530_v45  ;;  %v6581_v4 = vadd.f32 %v6580_v59, %v6579_v43  ;;  %v8267_v34 = vld [vmem:[%s11448_s1 + $0x38] sm:$0xff]  }
0x1b13   :  { %v6537_v15 = vsel %vm146_vm1, %v6503_v41, 0.0  ;;  %v6586_v49 = vsel %vm146_vm1, %v6510_v22, 0.0  ;;  %v6418_v1 = vunpack.c.l.bf16 %v8267_v34  ;;  %v6411_v59 = vunpack.c.h.bf16 %v11351_v48 }
0x1b14   :  { %v6533_v37 = vrot.slane %v6532_v25, 2  ;;  %v6582_v3 = vrot.slane %v6581_v4, 2  ;;  %v6443_v62 = vpop.permute.xlu1 %6442  ;;  %v6478_v0 = vpop.permute.xlu0 %6477  ;;  %v6538_v27 = vrot.slane %v6537_v15, 4  ;;  %v6587_v53 = vrot.slane %v6586_v49, 4 }
0x1b15   :  { %v6504_v46 = vmul.f32 %v6443_v62, %v6408_v51  ;;  %v6511_v21 = vmul.f32 %v6478_v0, %v6415_v38  ;;  %v6528_v14 = vrot.slane %v6527_v61, 1  ;;  %v6521_v11 = vrot.slane %v6520_v50, 1 }
0x1b16   :  { %v6534_v16 = vadd.f32 %v6533_v37, %v6532_v25  ;;  %v6583_v6 = vadd.f32 %v6582_v3, %v6581_v4  ;;  %v6539_v54 = vadd.f32 %v6538_v27, %v6537_v15  ;;  %v6588_v2 = vadd.f32 %v6587_v53, %v6586_v49 }
0x1b17   :  { %v6544_v42 = vsel %vm146_vm1, %v6504_v46, 0.0  ;;  %v6593_v28 = vsel %vm146_vm1, %v6511_v21, 0.0  ;;  %v6529_v31 = vadd.f32 %v6528_v14, %v6527_v61  ;;  %v6522_v24 = vadd.f32 %v6521_v11, %v6520_v50 }
0x1b18   :  { %v6535_v36 = vrot.slane %v6534_v16, 1  ;;  %v6448_v32 = vpop.permute.xlu1 %6447  ;;  %v6483_v23 = vpop.permute.xlu0 %6482  ;;  %v6584_v20 = vrot.slane %v6583_v6, 1  ;;  %v6540_v60 = vrot.slane %v6539_v54, 2  ;;  %v6545_v47 = vrot.slane %v6544_v42, 4 }
0x1b19   :  { %v6594_v30 = vrot.slane %v6593_v28, 4  ;;  %v6589_v7 = vrot.slane %v6588_v2, 2  ;;  %v6505_v8 = vmul.f32 %v6448_v32, %v6409_v56  ;;  %v6512_v17 = vmul.f32 %v6483_v23, %v6416_v12 }
0x1b1a   :  { %v6536_v57 = vadd.f32 %v6535_v36, %v6534_v16  ;;  %v6585_v58 = vadd.f32 %v6584_v20, %v6583_v6  ;;  %v6541_v19 = vadd.f32 %v6540_v60, %v6539_v54  ;;  %v6546_v45 = vadd.f32 %v6545_v47, %v6544_v42 }
0x1b1b   :  { %v6595_v9 = vadd.f32 %v6594_v30, %v6593_v28  ;;  %v6551_v43 = vsel %vm146_vm1, %v6505_v8, 0.0  ;;  %v6695_v44 = vpack.c.bf16 %v6529_v31, %v6529_v31  ;;  %v6694_v63 = vpack.c.bf16 %v6522_v24, %v6522_v24 }
0x1b1c   :  { %v6463_v18 = vpop.permute.xlu1 %6462  ;;  %v6488_v29 = vpop.permute.xlu0 %6487  ;;  %v6590_v41 = vadd.f32 %v6589_v7, %v6588_v2  ;;  %v6552_v39 = vrot.slane %v6551_v43, 4  ;;  %v6600_v51 = vsel %vm146_vm1, %v6512_v17, 0.0  ;;  %v6419_v38 = vunpack.c.h.bf16 %v8267_v34 }
0x1b1d   :  { %v6596_v22 = vrot.slane %v6595_v9, 2  ;;  %v6508_v33 = vmul.f32 %v6463_v18, %v6412_v55  ;;  %v6696_v61 = vpack.c.bf16 %v6536_v57, %v6536_v57  ;;  %v6703_v50 = vpack.c.bf16 %v6585_v58, %v6585_v58 }
0x1b1e   :  { %v6542_v25 = vrot.slane %v6541_v19, 1  ;;  %v6547_v4 = vrot.slane %v6546_v45, 2  ;;  %v6553_v15 = vadd.f32 %v6552_v39, %v6551_v43  ;;  %v6601_v49 = vrot.slane %v6600_v51, 4 }
0x1b1f   :  { %v6572_v37 = vsel %vm146_vm1, %v6508_v33, 0.0  ;;  %v6513_v3 = vmul.f32 %v6488_v29, %v6417_v13  ;;  %v11361_v27 = vunpack.c.l.b16 %v6695_v44  ;;  %v11363_v53 = vunpack.c.l.b16 %v6694_v63 }
0x1b20   :  { %v6453_v62 = vpop.permute.xlu1 %6452  ;;  %v6493_v0 = vpop.permute.xlu0 %6492  ;;  %v6591_v46 = vrot.slane %v6590_v41, 1  ;;  %v6597_v21 = vadd.f32 %v6596_v22, %v6595_v9  ;;  %v6554_v14 = vrot.slane %v6553_v15, 2  ;;  %v6602_v11 = vadd.f32 %v6601_v49, %v6600_v51 }
0x1b21   :  { %v6573_v16 = vrot.slane %v6572_v37, 4  ;;  %v6607_v6 = vsel %vm146_vm1, %v6513_v3, 0.0  ;;  %v11366_v54 = vunpack.c.l.b16 %v6696_v61  ;;  %v11368_v2 = vunpack.c.l.b16 %v6703_v50 }
0x1b22   :  { %v11370_v42 = vadd.f32 %v6542_v25, %v6541_v19  ;;  %v6608_v28 = vrot.slane %v6607_v6, 4  ;;  %v6548_v36 = vadd.f32 %v6547_v4, %v6546_v45  ;;  %v6603_v56 = vrot.slane %v6602_v11, 2 }
0x1b23   :  { %v6574_v32 = vadd.f32 %v6573_v16, %v6572_v37  ;;  %v6506_v23 = vmul.f32 %v6453_v62, %v6410_v10  ;;  %v6592_v20 = vadd.f32 %v6591_v46, %v6590_v41  ;;  %v6598_v60 = vrot.slane %v6597_v21, 1 }
0x1b24   :  { %v6609_v47 = vadd.f32 %v6608_v28, %v6607_v6  ;;  %v6514_v30 = vmul.f32 %v6493_v0, %v6418_v1  ;;  %v6555_v26 = vadd.f32 %v6554_v14, %v6553_v15  ;;  %v6604_v12 = vadd.f32 %v6603_v56, %v6602_v11  ;;  %v6458_v7 = vpop.permute.xlu1 %6457  ;;  %v6498_v9 = vpop.permute.xlu0 %6497 }
0x1b25   :  { %v6575_v31 = vrot.slane %v6574_v32, 2  ;;  %v6558_v24 = vsel %vm146_vm1, %v6506_v23, 0.0  ;;  %v6697_v8 = vpack.c.bf16 %v11370_v42, %v11370_v42  ;;  %v6549_v13 = vrot.slane %v6548_v36, 1 }
0x1b26   :  { %v6610_v52 = vrot.slane %v6609_v47, 2  ;;  %v6559_v55 = vrot.slane %v6558_v24, 4  ;;  %v6614_v18 = vsel %vm146_vm1, %v6514_v30, 0.0  ;;  %v6605_v29 = vrot.slane %v6604_v12, 1 }
0x1b27   :  { %v6576_v48 = vadd.f32 %v6575_v31, %v6574_v32  ;;  %v6615_v10 = vrot.slane %v6614_v18, 4  ;;  %v6507_v19 = vmul.f32 %v6458_v7, %v6411_v59  ;;  %v6515_v45 = vmul.f32 %v6498_v9, %v6419_v38 }
0x1b28   :  { %v6611_v57 = vadd.f32 %v6610_v52, %v6609_v47  ;;  %v6560_v58 = vadd.f32 %v6559_v55, %v6558_v24  ;;  %v6599_v43 = vadd.f32 %v6598_v60, %v6597_v21  ;;  %v6556_v17 = vrot.slane %v6555_v26, 1 }
0x1b29   :  { %v6577_v34 = vrot.slane %v6576_v48, 1  ;;  %v6616_v1 = vadd.f32 %v6615_v10, %v6614_v18  ;;  %v6565_v41 = vsel %vm146_vm1, %v6507_v19, 0.0  ;;  %v6621_v22 = vsel %vm146_vm1, %v6515_v45, 0.0 }
0x1b2a   :  { %v6612_v44 = vrot.slane %v6611_v57, 1  ;;  %v6561_v63 = vrot.slane %v6560_v58, 2  ;;  %v6704_v39 = vpack.c.bf16 %v6592_v20, %v6592_v20  ;;  %v6606_v51 = vadd.f32 %v6605_v29, %v6604_v12 }
0x1b2b   :  { %v6578_v33 = vadd.f32 %v6577_v34, %v6576_v48  ;;  %v6617_v61 = vrot.slane %v6616_v1, 2  ;;  %v6550_v50 = vadd.f32 %v6549_v13, %v6548_v36  ;;  %v6566_v4 = vrot.slane %v6565_v41, 4 }
0x1b2c   :  { %v6562_v25 = vadd.f32 %v6561_v63, %v6560_v58  ;;  %v6622_v15 = vrot.slane %v6621_v22, 4  ;;  %v6705_v59 = vpack.c.bf16 %v6599_v43, %v6599_v43  ;;  %v6557_v38 = vadd.f32 %v6556_v17, %v6555_v26 }
0x1b2d   :  { %v6702_v49 = vpack.c.bf16 %v6578_v33, %v6578_v33  ;;  %v6618_v37 = vadd.f32 %v6617_v61, %v6616_v1  ;;  %v6613_v3 = vadd.f32 %v6612_v44, %v6611_v57  ;;  %v6567_v0 = vadd.f32 %v6566_v4, %v6565_v41  ;;  %v7437_v33 = vld [vmem:[%s11455_s15 + $0x8] sm:$0xff]   ;;  %v7438_v61 = vld [vmem:[%s11456_s17] sm:$0xff]  }
0x1b2e   :  { %v6563_v62 = vrot.slane %v6562_v25, 1  ;;  %v6623_v46 = vadd.f32 %v6622_v15, %v6621_v22  ;;  %v6747_v21 = vunpack.c.l.b16 %v6704_v39  ;;  %v6706_v14 = vpack.c.bf16 %v6606_v51, %v6606_v51  ;;  %v7436_v51 = vld [vmem:[%s11455_s15] sm:$0xff]   ;;  %7389 = vmatpush3.bf16.msra.mxu0 %v7438_v61 }
0x1b2f   :  { %v6745_v11 = vunpack.c.l.b16 %v6702_v49  ;;  %v6619_v16 = vrot.slane %v6618_v37, 1  ;;  %v6698_v6 = vpack.c.bf16 %v6550_v50, %v6550_v50  ;;  %v6568_v28 = vrot.slane %v6567_v0, 2  ;;  %v7439_v50 = vld [vmem:[%s11456_s17 + $0x8] sm:$0xff]   ;;  %7390 = vmatprep.subr.bf16.mxu0 %v11502_v5  ;;  %v7177_v4 = vld [vmem:[%s11458_s14] ss:$0 sm:$0xff] }
0x1b30   :  { %v6564_v42 = vadd.f32 %v6563_v62, %v6562_v25  ;;  %v6624_v56 = vrot.slane %v6623_v46, 2  ;;  %v6748_v36 = vunpack.c.l.b16 %v6705_v59  ;;  %v6699_v32 = vpack.c.bf16 %v6557_v38, %v6557_v38  ;;  %v7173_v25 = vld [vmem:[%s11457_s12] ss:$0 sm:$0xff] }
0x1b31   :  { %v6760_v23 = vsel %vm901_vm3, %v11368_v2, %v6745_v11  ;;  %v6620_v20 = vadd.f32 %v6619_v16, %v6618_v37  ;;  %v6707_v47 = vpack.c.bf16 %v6613_v3, %v6613_v3  ;;  %v6569_v30 = vadd.f32 %v6568_v28, %v6567_v0  ;;  %v7181_v28 = vld [vmem:[%s11459_s16] ss:$0 sm:$0xff] }
0x1b32   :  { %v6761_v60 = vsel %vm904_vm4, %v6747_v21, %v6760_v23  ;;  %v6625_v26 = vadd.f32 %v6624_v56, %v6623_v46  ;;  %v6749_v12 = vunpack.c.l.b16 %v6706_v14  ;;  %v6700_v24 = vpack.c.bf16 %v6564_v42, %v6564_v42  ;;  %7391 = vmatpush3.bf16.msra.mxu0 %v7439_v50 }
0x1b33   :  { %v6762_v31 = vsel %vm907_vm5, %v6748_v36, %v6761_v60  ;;  %v6708_v7 = vpack.c.bf16 %v6620_v20, %v6620_v20  ;;  %v6740_v9 = vunpack.c.l.b16 %v6697_v8  ;;  %v6570_v52 = vrot.slane %v6569_v30, 1  ;;  %7392 = vmatprep.subr.bf16.mxu0 %v11502_v5 }
0x1b34   :  { %v6626_v55 = vrot.slane %v6625_v26, 1  ;;  %v6753_v18 = vsel %vm901_vm3, %v11361_v27, %v11363_v53  ;;  %v6741_v13 = vunpack.c.l.b16 %v6698_v6  ;;  %v6763_v2 = vsel %vm910_vm6, %v6749_v12, %v6762_v31  ;;  %v7185_v12 = vld [vmem:[%s11460_s18] ss:$0 sm:$0xff] }
0x1b35   :  { %v6742_v29 = vunpack.c.l.b16 %v6699_v32  ;;  %v6750_v48 = vunpack.c.l.b16 %v6707_v47  ;;  %v6571_v10 = vadd.f32 %v6570_v52, %v6569_v30  ;;  %v6754_v58 = vsel %vm904_vm4, %v11366_v54, %v6753_v18 }
0x1b36   :  { %v6627_v57 = vadd.f32 %v6626_v55, %v6625_v26  ;;  %v6743_v19 = vunpack.c.l.b16 %v6700_v24  ;;  %v6751_v45 = vunpack.c.l.b16 %v6708_v7  ;;  %v6755_v8 = vsel %vm907_vm5, %v6740_v9, %v6754_v58 }
0x1b37   :  { %v6764_v43 = vsel %vm913_vm7, %v6750_v48, %v6763_v2  ;;  %v6701_v17 = vpack.c.bf16 %v6571_v10, %v6571_v10  ;;  %v6756_v27 = vsel %vm910_vm6, %v6741_v13, %v6755_v8  ;;  %v6686_v15 = vadd.f32 %v7173_v25, %v10993_v40  ;;  %v7440_v40 = vld [vmem:[%s11456_s17 + $0x10] sm:$0xff]  }
0x1b38   :  { %v6709_v34 = vpack.c.bf16 %v6627_v57, %v6627_v57  ;;  %v6757_v53 = vsel %vm913_vm7, %v6742_v29, %v6756_v27  ;;  %v6765_v41 = vsel %vm916_vm8, %v6751_v45, %v6764_v43  ;;  %v6689_v38 = vadd.f32 %v7173_v25, %v11003_v35  ;;  %7393 = vmatpush3.bf16.msra.mxu0 %v7440_v40  ;;  %v7441_v35 = vld [vmem:[%s11456_s17 + $0x18] sm:$0xff]  }
0x1b39   :  { %v6744_v1 = vunpack.c.l.b16 %v6701_v17  ;;  %v6758_v63 = vsel %vm916_vm8, %v6743_v19, %v6757_v53  ;;  %v6692_v62 = vmax.f32 %v6686_v15, 0.0  ;;  %7394 = vmatprep.subr.bf16.mxu0 %v11502_v5 }
0x1b3a   :  { %v6752_v44 = vunpack.c.l.b16 %v6709_v34  ;;  %v6693_v14 = vmax.f32 %v6689_v38, 0.0 }
0x1b3b   :  { %v6759_v54 = vsel %vm919_vm9, %v6744_v1, %v6758_v63 }
0x1b3c   :  { %v6766_v22 = vsel %vm919_vm9, %v6752_v44, %v6765_v41  ;;  %7395 = vmatpush3.bf16.msra.mxu0 %v7441_v35 }
0x1b3d   :  { %v6767_v39 = vpack.c.b16 %v6766_v22, %v6759_v54 }
0x1b3f   :  { %7377 = vmatmul.mubr.msk.bf16.vlgmr.msra.gmra.mrb[32].mxu1 %vm146_vm1, %v6767_v39 }
0x1b40   :  { %7384 = vmatprep.mubr.msk.bf16.mxu1 %vm8269_vm0, %v11502_v5  ;;  %7381 = vmatpush3.bf16.msra.mxu1 %v7436_v51 }
0x1b41   :  { %7382 = vmatprep.subr.bf16.mxu1 %v11502_v5 }
0x1b44   :  { %7383 = vmatpush3.bf16.msra.mxu1 %v7437_v33 }
0x1c12   :  { %v6817_v59 = vpop.f32.mrb[32].mxu1 }
0x1c13   :  { %v6818_v49 = vadd.f32 %v7177_v4, %v6817_v59  ;;  %v7378_v37 = vpop.f32.mrb[33].mxu1 }
0x1c14   :  { %v6820_v3 = vpop.f32.mrb[34].mxu1 }
0x1c15   :  { %v6824_v0 = vmax.f32 %v6818_v49, 0.0  ;;  %v6821_v46 = vadd.f32 %v7177_v4, %v6820_v3  ;;  %v7379_v21 = vpop.f32.mrb[35].mxu1 }
0x1c17   :  { %v6826_v11 = vmul.f32 %v6824_v0, %v6692_v62  ;;  %v6825_v16 = vmax.f32 %v6821_v46, 0.0 }
0x1c19   :  { %v6827_v6 = vmul.f32 %v6825_v16, %v6693_v14 }
0x1c1b   :  { %v6828_v42 = vpack.c.bf16 %v6827_v6, %v6826_v11 }
0x1c1d   :  { %7385 = vmatmul.mubr.msk.bf16.vlgmr.msra.gmra.mrb[36].mxu1 %vm146_vm1, %v6828_v42 }
0x1cf0   :  { %v6889_v56 = vpop.f32.mrb[36].mxu1 }
0x1cf1   :  { %v6890_v36 = vadd.f32 %v7181_v28, %v6889_v56  ;;  %v7386_v32 = vpop.f32.mrb[37].mxu1 }
0x1cf2   :  { %v6892_v23 = vpop.f32.mrb[38].mxu1 }
0x1cf3   :  { %v6893_v20 = vadd.f32 %v7181_v28, %v6892_v23  ;;  %v7387_v60 = vpop.f32.mrb[39].mxu1  ;;  %v6896_v47 = vmax.f32 %v6890_v36, 0.0 }
0x1cf5   :  { %v6897_v30 = vmax.f32 %v6893_v20, 0.0 }
0x1cf7   :  { %v6898_v26 = vpack.c.bf16 %v6897_v30, %v6896_v47 }
0x1cf9   :  { %6900 = vst.msk [vmem:[#allocation3] sm:$0xff] %vm6899_vm11, %v6898_v26 }
0x1d00   :  { %v6901_v5 = vld [vmem:[#allocation3] sm:$0xff] }
0x1d01   :  { %7397 = vmatmul.mubr.msk.bf16.vlgmr.msra.gmra.mrb[40].mxu0 %vm6899_vm11, %v6901_v5 }
0x1dd4   :  { %v6979_v31 = vpop.f32.mrb[40].mxu0 }
0x1dd5   :  { %v6980_v24 = vadd.f32 %v7185_v12, %v6979_v31  ;;  %v7398_v7 = vpop.f32.mrb[41].mxu0 }
0x1dd6   :  { %v6982_v9 = vpop.f32.mrb[42].mxu0 }
0x1dd7   :  { %6986 = vst [vmem:[%s11461_s19] sm:$0xff] %v6980_v24  ;;  %v6983_v52 = vadd.f32 %v7185_v12, %v6982_v9  ;;  %v7399_v55 = vpop.f32.mrb[43].mxu0 }
0x1dd9   :  { %6987 = vst [vmem:[%s11461_s19 + $0x8] sm:$0xff] %v6983_v52 }

</bundles_post_ra>
